<compile_context>
chip_gen: v7x
topology: tpu7x:2x2x1
jax: 0.10.0
libtpu: 0.0.40
codegen_flags: <defaults>
</compile_context>

<pallas_src>
import functools

import jax
import jax.numpy as jnp
from jax.experimental import pallas as pl
from jax.experimental.pallas import tpu as pltpu

# ----------------------------- CONFIG (synthetic, small) -----------------------------
IN_CH = 4
N_STAGES = 3
FEATURES = (8, 16, 32)
KERNELS = (3, 3, 3)
STRIDES = (1, 2, 2)
NUM_CLASSES = 3
EPS = 1e-5            # InstanceNorm eps (nnUNet default)
NEG_SLOPE = 0.01      # LeakyReLU default negative slope
# conv_bias=True, norm_op=InstanceNorm2d(affine=True), nonlin=LeakyReLU,
# dropout_op=None, deep_supervision=False, block=BasicBlockD, n_blocks/stage=1

LANE = 128            # TPU lane width (last-dim alignment)
SUBLANE = 8           # TPU sublane granularity
TM_BASE = 256         # M tile for plain GEMMs
VMEM_LIMIT = 32 * 1024 * 1024   # safe on v5e/v6e (128 MiB) and v7x (64 MiB physical)


def _round_up(x, m):
    return (x + m - 1) // m * m


# =============== Fused Conv(GEMM) + InstanceNorm (+residual) (+LeakyReLU) kernel ===============
def _conv_in_kernel(*refs, n_pairs, has_residual, apply_act, eps, neg_slope, inv_hw, hw,
                    need_row_mask):
    """refs = (x1, w1[, x2, w2, ...], bias, gamma, beta[, residual], out).

    One grid step = one batch element:
        y   = sum_i x_i @ w_i + bias                    (MXU, f32 accumulation)
        y   = InstanceNorm(y) * gamma + beta            (stats over spatial rows, per channel)
        y  += residual                                  (optional, BasicBlockD tail)
        y   = LeakyReLU(y)                              (optional)
    """
    o_ref = refs[-1]
    base = 2 * n_pairs
    b_ref, g_ref, bt_ref = refs[base], refs[base + 1], refs[base + 2]
    r_ref = refs[base + 3] if has_residual else None

    acc = jnp.dot(refs[0][0], refs[1][...], preferred_element_type=jnp.float32)
    for i in range(1, n_pairs):
        acc = acc + jnp.dot(refs[2 * i][0], refs[2 * i + 1][...],
                            preferred_element_type=jnp.float32)
    y = acc + b_ref[...]

    # single-pass biased variance: E[x^2] - mean^2, scaled by precomputed 1/(H*W)
    if need_row_mask:
        rows = jax.lax.broadcasted_iota(jnp.int32, y.shape, 0)
        ym = jnp.where(rows < hw, y, 0.0)
    else:
        ym = y
    s = jnp.sum(ym, axis=0, keepdims=True)
    ss = jnp.sum(ym * ym, axis=0, keepdims=True)
    mean = s * inv_hw
    var = jnp.maximum(ss * inv_hw - mean * mean, 0.0)
    y = (y - mean) * jax.lax.rsqrt(var + eps) * g_ref[...] + bt_ref[...]

    if has_residual:
        y = y + r_ref[0]
    if apply_act:
        y = jnp.where(y >= 0, y, neg_slope * y)
    o_ref[0] = y


def conv_instnorm(pairs, bias, gamma, beta, apply_act, residual=None):
    """Fused conv-as-GEMM + InstanceNorm + optional residual + optional LeakyReLU.

    pairs: list of (patches (B, HW, K), weights (K, N)) summed K-chunks (concat never built).
    residual: (B, HW, N) float32 or None.  Returns (B, HW, N) float32.

    K and N are zero-padded to multiples of 128 (dense vst, full MXU lanes); operands cast to
    bf16 (f32 accumulation); grid over batch with 'parallel' semantics.
    """
    B, HW, _ = pairs[0][0].shape
    N = pairs[0][1].shape[1]
    Np = _round_up(N, LANE)
    HWp = _round_up(HW, SUBLANE)
    need_row_mask = HWp != HW

    ins, in_specs = [], []
    flops = 0
    bytes_accessed = B * HWp * Np * 4
    for (x, w) in pairs:
        K = x.shape[-1]
        Kp = _round_up(K, LANE)
        xp = jnp.pad(x.astype(jnp.bfloat16), ((0, 0), (0, HWp - HW), (0, Kp - K)))
        wp = jnp.pad(w.astype(jnp.bfloat16), ((0, Kp - K), (0, Np - N)))
        ins += [xp, wp]
        in_specs += [
            pl.BlockSpec((1, HWp, Kp), lambda b: (b, 0, 0)),
            pl.BlockSpec((Kp, Np), lambda b: (0, 0)),
        ]
        flops += 2 * B * HWp * Kp * Np
        bytes_accessed += xp.size * 2 + wp.size * 2

    bp = jnp.pad(bias.astype(jnp.float32), (0, Np - N)).reshape(1, Np)
    gp = jnp.pad(gamma.astype(jnp.float32), (0, Np - N)).reshape(1, Np)
    btp = jnp.pad(beta.astype(jnp.float32), (0, Np - N)).reshape(1, Np)
    ins += [bp, gp, btp]
    vec_spec = pl.BlockSpec((1, Np), lambda b: (0, 0))
    in_specs += [vec_spec] * 3
    bytes_accessed += 3 * Np * 4

    has_residual = residual is not None
    if has_residual:
        rp = jnp.pad(residual.astype(jnp.float32), ((0, 0), (0, HWp - HW), (0, Np - N)))
        ins.append(rp)
        in_specs.append(pl.BlockSpec((1, HWp, Np), lambda b: (b, 0, 0)))
        bytes_accessed += rp.size * 4

    # TODO(synk): for realistic nnUNet sizes (per-sample HW*Np*4 approaching the 32 MiB scoped
    # VMEM) switch to an M-tiled two-sweep variant with sum/sum-sq accumulators in VMEM scratch.
    out = pl.pallas_call(
        functools.partial(_conv_in_kernel, n_pairs=len(pairs), has_residual=has_residual,
                          apply_act=apply_act, eps=EPS, neg_slope=NEG_SLOPE,
                          inv_hw=1.0 / HW, hw=HW, need_row_mask=need_row_mask),
        out_shape=jax.ShapeDtypeStruct((B, HWp, Np), jnp.float32),
        grid=(B,),
        in_specs=in_specs,
        out_specs=pl.BlockSpec((1, HWp, Np), lambda b: (b, 0, 0)),
        compiler_params=pltpu.CompilerParams(
            dimension_semantics=("parallel",), vmem_limit_bytes=VMEM_LIMIT),
        cost_estimate=pl.CostEstimate(flops=flops + 10 * B * HWp * Np,
                                      transcendentals=B * Np,
                                      bytes_accessed=bytes_accessed),
    )(*ins)
    return out[:, :HW, :N]


# ----------------------------- Plain Pallas GEMM (+bias) kernel -----------------------------
def _gemm_bias_kernel(x_ref, w_ref, b_ref, o_ref):
    o_ref[...] = jnp.dot(x_ref[...], w_ref[...],
                         preferred_element_type=jnp.float32) + b_ref[...]


def matmul_bias(x, w, b):
    """x @ w + b with lane-dense, M-tiled, bf16 MXU GEMM (f32 accumulation + f32 bias)."""
    M, K = x.shape
    N = w.shape[1]
    Np = _round_up(N, LANE)
    Kp = _round_up(K, LANE)
    Mp = _round_up(M, SUBLANE)
    if Mp <= TM_BASE:
        TM = Mp
    else:
        TM = TM_BASE
        Mp = _round_up(M, TM)

    xp = jnp.pad(x.astype(jnp.bfloat16), ((0, Mp - M), (0, Kp - K)))
    wp = jnp.pad(w.astype(jnp.bfloat16), ((0, Kp - K), (0, Np - N)))
    bp = jnp.pad(b.astype(jnp.float32), (0, Np - N)).reshape(1, Np)

    out = pl.pallas_call(
        _gemm_bias_kernel,
        out_shape=jax.ShapeDtypeStruct((Mp, Np), jnp.float32),
        grid=(Mp // TM,),
        in_specs=[pl.BlockSpec((TM, Kp), lambda i: (i, 0)),
                  pl.BlockSpec((Kp, Np), lambda i: (0, 0)),
                  pl.BlockSpec((1, Np), lambda i: (0, 0))],
        out_specs=pl.BlockSpec((TM, Np), lambda i: (i, 0)),
        compiler_params=pltpu.CompilerParams(dimension_semantics=("parallel",),
                                             vmem_limit_bytes=VMEM_LIMIT),
        cost_estimate=pl.CostEstimate(
            flops=2 * Mp * Kp * Np, transcendentals=0,
            bytes_accessed=xp.size * 2 + wp.size * 2 + bp.size * 4 + Mp * Np * 4),
    )(xp, wp, bp)
    return out[:M, :N]


# ----------------------------- Pallas average pool (identity-channel skip fallback) ------------
def _avgpool_kernel(*refs, inv_num):
    o_ref = refs[-1]
    acc = refs[0][...]
    for r in refs[1:-1]:
        acc = acc + r[...]
    o_ref[...] = acc * inv_num


def avg_pool(x, s):
    # non-overlapping s x s average pool; only needed when the BasicBlockD skip has a stride but
    # no channel change (the channel-change case is fused into conv_instnorm, see skip path).
    B, H, W, C = x.shape
    Ho, Wo = H // s, W // s
    M = B * Ho * Wo
    views = [x[:, di::s, dj::s, :].reshape(M, C) for di in range(s) for dj in range(s)]
    spec = pl.BlockSpec((M, C), lambda i: (0, 0))
    out = pl.pallas_call(
        functools.partial(_avgpool_kernel, inv_num=1.0 / (s * s)),
        out_shape=jax.ShapeDtypeStruct((M, C), jnp.float32),
        grid=(1,),
        in_specs=[spec] * (s * s),
        out_specs=spec,
        compiler_params=pltpu.CompilerParams(vmem_limit_bytes=VMEM_LIMIT),
        cost_estimate=pl.CostEstimate(flops=s * s * M * C, transcendentals=0,
                                      bytes_accessed=(s * s + 1) * M * C * 4),
    )(*views)
    return out.reshape(B, Ho, Wo, C)


# ----------------------------- Conv helpers (im2col glue + fused Pallas kernels) ---------------
def _im2col(x, k, stride, pad):
    # Patches are built in bf16 (halves the k*k im2col blow-up in HBM); the GEMM accumulates f32.
    # TODO(synk): replace with a direct-conv Pallas kernel (halo'd tile + k*k shifted MXU dots) to
    # avoid materializing the k*k patch matrix entirely.
    B, H, W, C = x.shape
    xp = jnp.pad(x.astype(jnp.bfloat16), ((0, 0), (pad, pad), (pad, pad), (0, 0)))
    Ho = (H + 2 * pad - k) // stride + 1
    Wo = (W + 2 * pad - k) // stride + 1
    cols = []
    for di in range(k):
        for dj in range(k):
            cols.append(xp[:, di:di + stride * Ho:stride, dj:dj + stride * Wo:stride, :])
    patches = jnp.stack(cols, axis=3)            # (B, Ho, Wo, k*k, C)
    return patches.reshape(B, Ho * Wo, k * k * C), Ho, Wo


def conv_norm_act(x, p, stride, k, act, residual=None):
    """ConvDropoutNormReLU (dropout_op=None) as one fused Pallas call; optionally fuses the
    BasicBlockD tail (`+ residual` then LeakyReLU) into the same kernel."""
    cout, cin = p["w"].shape[0], p["w"].shape[1]
    B = x.shape[0]
    if k == 1 and stride == 1:
        _, H, W, _ = x.shape
        patches, Ho, Wo = x.reshape(B, H * W, cin), H, W
    else:
        patches, Ho, Wo = _im2col(x, k, stride, (k - 1) // 2)
    wm = jnp.transpose(p["w"], (2, 3, 1, 0)).reshape(k * k * cin, cout)
    r = residual.reshape(B, Ho * Wo, cout) if residual is not None else None
    y = conv_instnorm([(patches, wm)], p["b"], p["gamma"], p["beta"], act, residual=r)
    return y.reshape(B, Ho, Wo, cout)


def conv_norm_act_dual(x_a, x_b, p, k, act):
    """conv(concat([x_a, x_b], channel)) -> IN -> LReLU without materializing the concat: the
    weight is split on input channels and the two GEMMs are summed inside one fused kernel."""
    w = p["w"]
    cout = w.shape[0]
    ca = x_a.shape[-1]
    pad = (k - 1) // 2
    wa = jnp.transpose(w[:, :ca], (2, 3, 1, 0)).reshape(k * k * ca, cout)
    wb = jnp.transpose(w[:, ca:], (2, 3, 1, 0)).reshape(-1, cout)
    pa, Ho, Wo = _im2col(x_a, k, 1, pad)
    pb, _, _ = _im2col(x_b, k, 1, pad)
    B = x_a.shape[0]
    y = conv_instnorm([(pa, wa), (pb, wb)], p["b"], p["gamma"], p["beta"], act)
    return y.reshape(B, Ho, Wo, cout)


def skip_pool_conv_norm(x, p, stride):
    """BasicBlockD skip branch: AvgPool(s) -> Conv1x1 -> InstanceNorm fused into ONE Pallas call.
    The pool is folded into the GEMM weights: pooled @ W == concat(s*s shifted views) @ tile(W)/s^2,
    so no pooled tensor is ever written to HBM."""
    B, H, W, cin = x.shape
    cout = p["w"].shape[0]
    w1 = p["w"].reshape(cout, cin).T               # (cin, cout)
    if stride == 1:
        patches, Ho, Wo = x.reshape(B, H * W, cin), H, W
        wm = w1
    else:
        s = stride
        Ho, Wo = H // s, W // s
        views = [x[:, di::s, dj::s, :] for di in range(s) for dj in range(s)]
        patches = jnp.concatenate(views, axis=-1).reshape(B, Ho * Wo, s * s * cin)
        wm = jnp.tile(w1, (s * s, 1)) * (1.0 / (s * s))
    y = conv_instnorm([(patches, wm)], p["b"], p["gamma"], p["beta"], False)
    return y.reshape(B, Ho, Wo, cout)


def conv2d(x, w, b, stride, pad):
    # plain conv (no norm), used for the 1x1 segmentation head.  w: PyTorch layout (Cout,Cin,k,k).
    cout, cin, k, _ = w.shape
    B = x.shape[0]
    if k == 1 and stride == 1 and pad == 0:
        _, H, W, C = x.shape
        patches, Ho, Wo = x.reshape(B * H * W, C), H, W
    else:
        patches, Ho, Wo = _im2col(x, k, stride, pad)
        patches = patches.reshape(B * Ho * Wo, k * k * cin)
    wm = jnp.transpose(w, (2, 3, 1, 0)).reshape(k * k * cin, cout)
    return matmul_bias(patches, wm, b).reshape(B, Ho, Wo, cout)


def transp_conv(x, w, b, s):
    # ConvTranspose2d(kernel=s, stride=s): each input pixel -> disjoint s x s output block.
    # w: PyTorch layout (Cin, Cout, s, s)
    B, H, W, Cin = x.shape
    Cout = w.shape[1]
    wm = w.reshape(Cin, Cout * s * s)
    bexp = jnp.repeat(b, s * s)
    out = matmul_bias(x.reshape(B * H * W, Cin), wm, bexp)
    # TODO(synk): the s x s interleave below is an XLA transpose; could be folded into the GEMM
    # output BlockSpec, but it is a small tensor per decoder stage.
    out = (out.reshape(B, H, W, Cout, s, s)
              .transpose(0, 1, 4, 2, 5, 3)
              .reshape(B, H * s, W * s, Cout))
    return out


# ----------------------------- Parameters (deterministic synthetic init) -----------------------------
def _conv_norm_params(key, cin, cout, k):
    k1, k2, k3, k4 = jax.random.split(key, 4)
    fan_in = cin * k * k
    return {
        "w": jax.random.normal(k1, (cout, cin, k, k), jnp.float32) / jnp.sqrt(float(fan_in)),
        "b": 0.01 * jax.random.normal(k2, (cout,), jnp.float32),
        "gamma": 1.0 + 0.05 * jax.random.normal(k3, (cout,), jnp.float32),
        "beta": 0.05 * jax.random.normal(k4, (cout,), jnp.float32),
    }


def init_params(key):
    it = iter(jax.random.split(key, 64))
    params = {}
    stem_ch = FEATURES[0]
    params["stem"] = _conv_norm_params(next(it), IN_CH, stem_ch, KERNELS[0])

    stages = []
    cin = stem_ch
    for s in range(N_STAGES):
        cout = FEATURES[s]
        stage = {
            "conv1": _conv_norm_params(next(it), cin, cout, KERNELS[s]),
            "conv2": _conv_norm_params(next(it), cout, cout, KERNELS[s]),
        }
        if cin != cout:
            stage["skip"] = _conv_norm_params(next(it), cin, cout, 1)
        stages.append(stage)
        cin = cout
    params["stages"] = stages

    dec = []
    for s in range(1, N_STAGES):
        c_below = FEATURES[-s]
        c_skip = FEATURES[-(s + 1)]
        stride = STRIDES[-s]
        k1, k2 = jax.random.split(next(it))
        dec.append(
            {
                "tw": jax.random.normal(k1, (c_below, c_skip, stride, stride), jnp.float32)
                / jnp.sqrt(float(c_below)),
                "tb": 0.01 * jax.random.normal(k2, (c_skip,), jnp.float32),
                "stage": _conv_norm_params(next(it), 2 * c_skip, c_skip, KERNELS[-(s + 1)]),
            }
        )
    params["decoder"] = dec

    ks1, ks2 = jax.random.split(next(it))
    params["seg"] = {
        "w": jax.random.normal(ks1, (NUM_CLASSES, FEATURES[0], 1, 1), jnp.float32)
        / jnp.sqrt(float(FEATURES[0])),
        "b": 0.01 * jax.random.normal(ks2, (NUM_CLASSES,), jnp.float32),
    }
    return params


# ----------------------------- Forward pass -----------------------------
def residual_encoder_unet_forward(params, x_nchw):
    # layout: input NCHW -> internal NHWC -> output NCHW
    x = jnp.transpose(x_nchw, (0, 2, 3, 1)).astype(jnp.float32)

    # ---- ResidualEncoder ----
    x = conv_norm_act(x, params["stem"], 1, KERNELS[0], True)          # stem
    skips = []
    for s in range(N_STAGES):
        p = params["stages"][s]
        stride = STRIDES[s]
        cin = x.shape[-1]
        cout = FEATURES[s]
        # BasicBlockD main path: conv1-IN-LReLU (one fused call)
        y = conv_norm_act(x, p["conv1"], stride, KERNELS[s], True)
        # BasicBlockD skip path
        if stride != 1 or cin != cout:
            if cin != cout:
                r = skip_pool_conv_norm(x, p["skip"], stride)   # pool folded into conv-IN kernel
            else:
                r = avg_pool(x, stride)                          # identity channels: plain pool
        else:
            r = x
        # conv2 + IN + residual-add + LeakyReLU, all fused into one Pallas call
        x = conv_norm_act(y, p["conv2"], 1, KERNELS[s], True, residual=r)
        skips.append(x)

    # ---- UNetDecoder (deep_supervision=False) ----
    lres = skips[-1]
    for s in range(N_STAGES - 1):
        p = params["decoder"][s]
        stride = STRIDES[-(s + 1)]
        up = transp_conv(lres, p["tw"], p["tb"], stride)
        # torch.cat((up, skip), 1) + conv-IN-LReLU, concat folded into a dual-K fused kernel
        lres = conv_norm_act_dual(up, skips[-(s + 2)], p["stage"], KERNELS[-(s + 2)], True)
    seg = conv2d(lres, params["seg"]["w"], params["seg"]["b"], 1, 0)    # 1x1 seg head

    return jnp.transpose(seg, (0, 3, 1, 2))  # back to NCHW


# ----------------------------- Main -----------------------------
if __name__ == "__main__":
    key = jax.random.PRNGKey(0)
    pkey, xkey = jax.random.split(key)
    params = init_params(pkey)
    x = jax.random.normal(xkey, (2, IN_CH, 16, 16), jnp.float32)

    fwd = jax.jit(residual_encoder_unet_forward)
    out = jax.block_until_ready(fwd(params, x))

    assert out.shape == (2, NUM_CLASSES, 16, 16), out.shape
    assert bool(jnp.all(jnp.isfinite(out)))
    print("KERNEL_OK")
</pallas_src>

<mosaic_0001>
module attributes {stable_mosaic.version = 11 : i64} {
  func.func @_conv_in_kernel(%arg0: i32, %arg1: memref<1x256x128xbf16, #tpu.memory_space<vmem>>, %arg2: memref<128x128xbf16, #tpu.memory_space<vmem>>, %arg3: memref<1x128xf32, #tpu.memory_space<vmem>>, %arg4: memref<1x128xf32, #tpu.memory_space<vmem>>, %arg5: memref<1x128xf32, #tpu.memory_space<vmem>>, %arg6: memref<1x256x128xf32, #tpu.memory_space<vmem>>) attributes {dimension_semantics = [#tpu.dimension_semantics<parallel>], iteration_bounds = array<i64: 2>, scalar_prefetch = 0 : i64, scratch_operands = 0 : i64, tpu.core_type = #tpu.core_type<tc>, window_params = [{transform_indices = @transform_0, window_bounds = array<i64: 1, 256, 128>}, {pipeline_mode = #tpu.pipeline_mode<synchronous>, transform_indices = @transform_1, window_bounds = array<i64: 128, 128>}, {pipeline_mode = #tpu.pipeline_mode<synchronous>, transform_indices = @transform_2, window_bounds = array<i64: 1, 128>}, {pipeline_mode = #tpu.pipeline_mode<synchronous>, transform_indices = @transform_3, window_bounds = array<i64: 1, 128>}, {pipeline_mode = #tpu.pipeline_mode<synchronous>, transform_indices = @transform_4, window_bounds = array<i64: 1, 128>}, {transform_indices = @transform_5, window_bounds = array<i64: 1, 256, 128>}]} {
    %c0 = arith.constant 0 : index
    %c0_0 = arith.constant 0 : index
    %c0_1 = arith.constant 0 : index
    %0 = vector.load %arg1[%c0, %c0_0, %c0_1] : memref<1x256x128xbf16, #tpu.memory_space<vmem>>, vector<1x256x128xbf16>
    %1 = vector.shape_cast %0 : vector<1x256x128xbf16> to vector<256x128xbf16>
    %c0_2 = arith.constant 0 : index
    %c0_3 = arith.constant 0 : index
    %2 = vector.load %arg2[%c0_2, %c0_3] : memref<128x128xbf16, #tpu.memory_space<vmem>>, vector<128x128xbf16>
    %cst = arith.constant dense<0.000000e+00> : vector<256x128xf32>
    %3 = tpu.matmul %1, %2, %cst {dimension_numbers = #tpu.dot_dimension_numbers<[1], [0], [0], [1], [0, 0, 1, 1], [], []>} : vector<256x128xbf16>, vector<128x128xbf16>, vector<256x128xf32> -> vector<256x128xf32>
    %c0_4 = arith.constant 0 : index
    %c0_5 = arith.constant 0 : index
    %4 = vector.load %arg3[%c0_4, %c0_5] : memref<1x128xf32, #tpu.memory_space<vmem>>, vector<1x128xf32>
    %5 = vector.broadcast %4 : vector<1x128xf32> to vector<256x128xf32>
    %6 = arith.addf %3, %5 : vector<256x128xf32>
    %cst_6 = arith.constant dense<0.000000e+00> : vector<128xf32>
    %7 = vector.multi_reduction <add>, %6, %cst_6 [0] : vector<256x128xf32> to vector<128xf32>
    %8 = vector.shape_cast %7 : vector<128xf32> to vector<1x128xf32>
    %9 = arith.mulf %6, %6 : vector<256x128xf32>
    %cst_7 = arith.constant dense<0.000000e+00> : vector<128xf32>
    %10 = vector.multi_reduction <add>, %9, %cst_7 [0] : vector<256x128xf32> to vector<128xf32>
    %11 = vector.shape_cast %10 : vector<128xf32> to vector<1x128xf32>
    %cst_8 = arith.constant 3.906250e-03 : f32
    %12 = vector.broadcast %cst_8 : f32 to vector<1x128xf32>
    %13 = arith.mulf %8, %12 : vector<1x128xf32>
    %cst_9 = arith.constant 3.906250e-03 : f32
    %14 = vector.broadcast %cst_9 : f32 to vector<1x128xf32>
    %15 = arith.mulf %11, %14 : vector<1x128xf32>
    %16 = arith.mulf %13, %13 : vector<1x128xf32>
    %17 = arith.subf %15, %16 : vector<1x128xf32>
    %cst_10 = arith.constant 0.000000e+00 : f32
    %18 = vector.broadcast %cst_10 : f32 to vector<1x128xf32>
    %19 = arith.maximumf %17, %18 : vector<1x128xf32>
    %20 = vector.broadcast %13 : vector<1x128xf32> to vector<256x128xf32>
    %21 = arith.subf %6, %20 : vector<256x128xf32>
    %cst_11 = arith.constant 9.99999974E-6 : f32
    %22 = vector.broadcast %cst_11 : f32 to vector<1x128xf32>
    %23 = arith.addf %19, %22 : vector<1x128xf32>
    %24 = math.rsqrt %23 : vector<1x128xf32>
    %25 = vector.broadcast %24 : vector<1x128xf32> to vector<256x128xf32>
    %26 = arith.mulf %21, %25 : vector<256x128xf32>
    %c0_12 = arith.constant 0 : index
    %c0_13 = arith.constant 0 : index
    %27 = vector.load %arg4[%c0_12, %c0_13] : memref<1x128xf32, #tpu.memory_space<vmem>>, vector<1x128xf32>
    %28 = vector.broadcast %27 : vector<1x128xf32> to vector<256x128xf32>
    %29 = arith.mulf %26, %28 : vector<256x128xf32>
    %c0_14 = arith.constant 0 : index
    %c0_15 = arith.constant 0 : index
    %30 = vector.load %arg5[%c0_14, %c0_15] : memref<1x128xf32, #tpu.memory_space<vmem>>, vector<1x128xf32>
    %31 = vector.broadcast %30 : vector<1x128xf32> to vector<256x128xf32>
    %32 = arith.addf %29, %31 : vector<256x128xf32>
    %cst_16 = arith.constant 0.000000e+00 : f32
    %33 = vector.broadcast %cst_16 : f32 to vector<256x128xf32>
    %34 = arith.cmpf oge, %32, %33 : vector<256x128xf32>
    %cst_17 = arith.constant 0.00999999977 : f32
    %35 = vector.broadcast %cst_17 : f32 to vector<256x128xf32>
    %36 = arith.mulf %35, %32 : vector<256x128xf32>
    %37 = arith.select %34, %32, %36 : vector<256x128xi1>, vector<256x128xf32>
    %c0_18 = arith.constant 0 : index
    %c0_19 = arith.constant 0 : index
    %c0_20 = arith.constant 0 : index
    %38 = vector.load %arg6[%c0_18, %c0_19, %c0_20] : memref<1x256x128xf32, #tpu.memory_space<vmem>>, vector<1x256x128xf32>
    %39 = vector.shape_cast %38 : vector<1x256x128xf32> to vector<256x128xf32>
    %40 = vector.shape_cast %37 : vector<256x128xf32> to vector<1x256x128xf32>
    tpu.vector_store %arg6[%c0_18, %c0_19, %c0_20], %40 {strides = array<i32>} : memref<1x256x128xf32, #tpu.memory_space<vmem>>, vector<1x256x128xf32>,
    return
  }
  func.func @transform_0(%arg0: i32) -> (i32, i32, i32) {
    %c0_i32 = arith.constant 0 : i32
    %c0_i32_0 = arith.constant 0 : i32
    %c0_i32_1 = arith.constant 0 : i32
    return %arg0, %c0_i32, %c0_i32_0 : i32, i32, i32
  }
  func.func @transform_1(%arg0: i32) -> (i32, i32) {
    %c0_i32 = arith.constant 0 : i32
    %c0_i32_0 = arith.constant 0 : i32
    %c0_i32_1 = arith.constant 0 : i32
    return %c0_i32, %c0_i32_0 : i32, i32
  }
  func.func @transform_2(%arg0: i32) -> (i32, i32) {
    %c0_i32 = arith.constant 0 : i32
    %c0_i32_0 = arith.constant 0 : i32
    %c0_i32_1 = arith.constant 0 : i32
    return %c0_i32, %c0_i32_0 : i32, i32
  }
  func.func @transform_3(%arg0: i32) -> (i32, i32) {
    %c0_i32 = arith.constant 0 : i32
    %c0_i32_0 = arith.constant 0 : i32
    %c0_i32_1 = arith.constant 0 : i32
    return %c0_i32, %c0_i32_0 : i32, i32
  }
  func.func @transform_4(%arg0: i32) -> (i32, i32) {
    %c0_i32 = arith.constant 0 : i32
    %c0_i32_0 = arith.constant 0 : i32
    %c0_i32_1 = arith.constant 0 : i32
    return %c0_i32, %c0_i32_0 : i32, i32
  }
  func.func @transform_5(%arg0: i32) -> (i32, i32, i32) {
    %c0_i32 = arith.constant 0 : i32
    %c0_i32_0 = arith.constant 0 : i32
    %c0_i32_1 = arith.constant 0 : i32
    return %arg0, %c0_i32, %c0_i32_0 : i32, i32, i32
  }
}

module attributes {stable_mosaic.version = 11 : i64} {
  func.func @_conv_in_kernel(%arg0: i32, %arg1: memref<1x256x128xbf16, #tpu.memory_space<vmem>>, %arg2: memref<128x128xbf16, #tpu.memory_space<vmem>>, %arg3: memref<1x128xf32, #tpu.memory_space<vmem>>, %arg4: memref<1x128xf32, #tpu.memory_space<vmem>>, %arg5: memref<1x128xf32, #tpu.memory_space<vmem>>, %arg6: memref<1x256x128xf32, #tpu.memory_space<vmem>>, %arg7: memref<1x256x128xf32, #tpu.memory_space<vmem>>) attributes {dimension_semantics = [#tpu.dimension_semantics<parallel>], iteration_bounds = array<i64: 2>, scalar_prefetch = 0 : i64, scratch_operands = 0 : i64, tpu.core_type = #tpu.core_type<tc>, window_params = [{transform_indices = @transform_0, window_bounds = array<i64: 1, 256, 128>}, {pipeline_mode = #tpu.pipeline_mode<synchronous>, transform_indices = @transform_1, window_bounds = array<i64: 128, 128>}, {pipeline_mode = #tpu.pipeline_mode<synchronous>, transform_indices = @transform_2, window_bounds = array<i64: 1, 128>}, {pipeline_mode = #tpu.pipeline_mode<synchronous>, transform_indices = @transform_3, window_bounds = array<i64: 1, 128>}, {pipeline_mode = #tpu.pipeline_mode<synchronous>, transform_indices = @transform_4, window_bounds = array<i64: 1, 128>}, {transform_indices = @transform_5, window_bounds = array<i64: 1, 256, 128>}, {transform_indices = @transform_6, window_bounds = array<i64: 1, 256, 128>}]} {
    %c0 = arith.constant 0 : index
    %c0_0 = arith.constant 0 : index
    %c0_1 = arith.constant 0 : index
    %0 = vector.load %arg1[%c0, %c0_0, %c0_1] : memref<1x256x128xbf16, #tpu.memory_space<vmem>>, vector<1x256x128xbf16>
    %1 = vector.shape_cast %0 : vector<1x256x128xbf16> to vector<256x128xbf16>
    %c0_2 = arith.constant 0 : index
    %c0_3 = arith.constant 0 : index
    %2 = vector.load %arg2[%c0_2, %c0_3] : memref<128x128xbf16, #tpu.memory_space<vmem>>, vector<128x128xbf16>
    %cst = arith.constant dense<0.000000e+00> : vector<256x128xf32>
    %3 = tpu.matmul %1, %2, %cst {dimension_numbers = #tpu.dot_dimension_numbers<[1], [0], [0], [1], [0, 0, 1, 1], [], []>} : vector<256x128xbf16>, vector<128x128xbf16>, vector<256x128xf32> -> vector<256x128xf32>
    %c0_4 = arith.constant 0 : index
    %c0_5 = arith.constant 0 : index
    %4 = vector.load %arg3[%c0_4, %c0_5] : memref<1x128xf32, #tpu.memory_space<vmem>>, vector<1x128xf32>
    %5 = vector.broadcast %4 : vector<1x128xf32> to vector<256x128xf32>
    %6 = arith.addf %3, %5 : vector<256x128xf32>
    %cst_6 = arith.constant dense<0.000000e+00> : vector<128xf32>
    %7 = vector.multi_reduction <add>, %6, %cst_6 [0] : vector<256x128xf32> to vector<128xf32>
    %8 = vector.shape_cast %7 : vector<128xf32> to vector<1x128xf32>
    %9 = arith.mulf %6, %6 : vector<256x128xf32>
    %cst_7 = arith.constant dense<0.000000e+00> : vector<128xf32>
    %10 = vector.multi_reduction <add>, %9, %cst_7 [0] : vector<256x128xf32> to vector<128xf32>
    %11 = vector.shape_cast %10 : vector<128xf32> to vector<1x128xf32>
    %cst_8 = arith.constant 3.906250e-03 : f32
    %12 = vector.broadcast %cst_8 : f32 to vector<1x128xf32>
    %13 = arith.mulf %8, %12 : vector<1x128xf32>
    %cst_9 = arith.constant 3.906250e-03 : f32
    %14 = vector.broadcast %cst_9 : f32 to vector<1x128xf32>
    %15 = arith.mulf %11, %14 : vector<1x128xf32>
    %16 = arith.mulf %13, %13 : vector<1x128xf32>
    %17 = arith.subf %15, %16 : vector<1x128xf32>
    %cst_10 = arith.constant 0.000000e+00 : f32
    %18 = vector.broadcast %cst_10 : f32 to vector<1x128xf32>
    %19 = arith.maximumf %17, %18 : vector<1x128xf32>
    %20 = vector.broadcast %13 : vector<1x128xf32> to vector<256x128xf32>
    %21 = arith.subf %6, %20 : vector<256x128xf32>
    %cst_11 = arith.constant 9.99999974E-6 : f32
    %22 = vector.broadcast %cst_11 : f32 to vector<1x128xf32>
    %23 = arith.addf %19, %22 : vector<1x128xf32>
    %24 = math.rsqrt %23 : vector<1x128xf32>
    %25 = vector.broadcast %24 : vector<1x128xf32> to vector<256x128xf32>
    %26 = arith.mulf %21, %25 : vector<256x128xf32>
    %c0_12 = arith.constant 0 : index
    %c0_13 = arith.constant 0 : index
    %27 = vector.load %arg4[%c0_12, %c0_13] : memref<1x128xf32, #tpu.memory_space<vmem>>, vector<1x128xf32>
    %28 = vector.broadcast %27 : vector<1x128xf32> to vector<256x128xf32>
    %29 = arith.mulf %26, %28 : vector<256x128xf32>
    %c0_14 = arith.constant 0 : index
    %c0_15 = arith.constant 0 : index
    %30 = vector.load %arg5[%c0_14, %c0_15] : memref<1x128xf32, #tpu.memory_space<vmem>>, vector<1x128xf32>
    %31 = vector.broadcast %30 : vector<1x128xf32> to vector<256x128xf32>
    %32 = arith.addf %29, %31 : vector<256x128xf32>
    %c0_16 = arith.constant 0 : index
    %c0_17 = arith.constant 0 : index
    %c0_18 = arith.constant 0 : index
    %33 = vector.load %arg6[%c0_16, %c0_17, %c0_18] : memref<1x256x128xf32, #tpu.memory_space<vmem>>, vector<1x256x128xf32>
    %34 = vector.shape_cast %33 : vector<1x256x128xf32> to vector<256x128xf32>
    %35 = arith.addf %32, %34 : vector<256x128xf32>
    %cst_19 = arith.constant 0.000000e+00 : f32
    %36 = vector.broadcast %cst_19 : f32 to vector<256x128xf32>
    %37 = arith.cmpf oge, %35, %36 : vector<256x128xf32>
    %cst_20 = arith.constant 0.00999999977 : f32
    %38 = vector.broadcast %cst_20 : f32 to vector<256x128xf32>
    %39 = arith.mulf %38, %35 : vector<256x128xf32>
    %40 = arith.select %37, %35, %39 : vector<256x128xi1>, vector<256x128xf32>
    %c0_21 = arith.constant 0 : index
    %c0_22 = arith.constant 0 : index
    %c0_23 = arith.constant 0 : index
    %41 = vector.load %arg7[%c0_21, %c0_22, %c0_23] : memref<1x256x128xf32, #tpu.memory_space<vmem>>, vector<1x256x128xf32>
    %42 = vector.shape_cast %41 : vector<1x256x128xf32> to vector<256x128xf32>
    %43 = vector.shape_cast %40 : vector<256x128xf32> to vector<1x256x128xf32>
    tpu.vector_store %arg7[%c0_21, %c0_22, %c0_23], %43 {strides = array<i32>} : memref<1x256x128xf32, #tpu.memory_space<vmem>>, vector<1x256x128xf32>,
    return
  }
  func.func @transform_0(%arg0: i32) -> (i32, i32, i32) {
    %c0_i32 = arith.constant 0 : i32
    %c0_i32_0 = arith.constant 0 : i32
    %c0_i32_1 = arith.constant 0 : i32
    return %arg0, %c0_i32, %c0_i32_0 : i32, i32, i32
  }
  func.func @transform_1(%arg0: i32) -> (i32, i32) {
    %c0_i32 = arith.constant 0 : i32
    %c0_i32_0 = arith.constant 0 : i32
    %c0_i32_1 = arith.constant 0 : i32
    return %c0_i32, %c0_i32_0 : i32, i32
  }
  func.func @transform_2(%arg0: i32) -> (i32, i32) {
    %c0_i32 = arith.constant 0 : i32
    %c0_i32_0 = arith.constant 0 : i32
    %c0_i32_1 = arith.constant 0 : i32
    return %c0_i32, %c0_i32_0 : i32, i32
  }
  func.func @transform_3(%arg0: i32) -> (i32, i32) {
    %c0_i32 = arith.constant 0 : i32
    %c0_i32_0 = arith.constant 0 : i32
    %c0_i32_1 = arith.constant 0 : i32
    return %c0_i32, %c0_i32_0 : i32, i32
  }
  func.func @transform_4(%arg0: i32) -> (i32, i32) {
    %c0_i32 = arith.constant 0 : i32
    %c0_i32_0 = arith.constant 0 : i32
    %c0_i32_1 = arith.constant 0 : i32
    return %c0_i32, %c0_i32_0 : i32, i32
  }
  func.func @transform_5(%arg0: i32) -> (i32, i32, i32) {
    %c0_i32 = arith.constant 0 : i32
    %c0_i32_0 = arith.constant 0 : i32
    %c0_i32_1 = arith.constant 0 : i32
    return %arg0, %c0_i32, %c0_i32_0 : i32, i32, i32
  }
  func.func @transform_6(%arg0: i32) -> (i32, i32, i32) {
    %c0_i32 = arith.constant 0 : i32
    %c0_i32_0 = arith.constant 0 : i32
    %c0_i32_1 = arith.constant 0 : i32
    return %arg0, %c0_i32, %c0_i32_0 : i32, i32, i32
  }
}

module attributes {stable_mosaic.version = 11 : i64} {
  func.func @_conv_in_kernel(%arg0: i32, %arg1: memref<1x64x128xbf16, #tpu.memory_space<vmem>>, %arg2: memref<128x128xbf16, #tpu.memory_space<vmem>>, %arg3: memref<1x128xf32, #tpu.memory_space<vmem>>, %arg4: memref<1x128xf32, #tpu.memory_space<vmem>>, %arg5: memref<1x128xf32, #tpu.memory_space<vmem>>, %arg6: memref<1x64x128xf32, #tpu.memory_space<vmem>>) attributes {dimension_semantics = [#tpu.dimension_semantics<parallel>], iteration_bounds = array<i64: 2>, scalar_prefetch = 0 : i64, scratch_operands = 0 : i64, tpu.core_type = #tpu.core_type<tc>, window_params = [{transform_indices = @transform_0, window_bounds = array<i64: 1, 64, 128>}, {pipeline_mode = #tpu.pipeline_mode<synchronous>, transform_indices = @transform_1, window_bounds = array<i64: 128, 128>}, {pipeline_mode = #tpu.pipeline_mode<synchronous>, transform_indices = @transform_2, window_bounds = array<i64: 1, 128>}, {pipeline_mode = #tpu.pipeline_mode<synchronous>, transform_indices = @transform_3, window_bounds = array<i64: 1, 128>}, {pipeline_mode = #tpu.pipeline_mode<synchronous>, transform_indices = @transform_4, window_bounds = array<i64: 1, 128>}, {transform_indices = @transform_5, window_bounds = array<i64: 1, 64, 128>}]} {
    %c0 = arith.constant 0 : index
    %c0_0 = arith.constant 0 : index
    %c0_1 = arith.constant 0 : index
    %0 = vector.load %arg1[%c0, %c0_0, %c0_1] : memref<1x64x128xbf16, #tpu.memory_space<vmem>>, vector<1x64x128xbf16>
    %1 = vector.shape_cast %0 : vector<1x64x128xbf16> to vector<64x128xbf16>
    %c0_2 = arith.constant 0 : index
    %c0_3 = arith.constant 0 : index
    %2 = vector.load %arg2[%c0_2, %c0_3] : memref<128x128xbf16, #tpu.memory_space<vmem>>, vector<128x128xbf16>
    %cst = arith.constant dense<0.000000e+00> : vector<64x128xf32>
    %3 = tpu.matmul %1, %2, %cst {dimension_numbers = #tpu.dot_dimension_numbers<[1], [0], [0], [1], [0, 0, 1, 1], [], []>} : vector<64x128xbf16>, vector<128x128xbf16>, vector<64x128xf32> -> vector<64x128xf32>
    %c0_4 = arith.constant 0 : index
    %c0_5 = arith.constant 0 : index
    %4 = vector.load %arg3[%c0_4, %c0_5] : memref<1x128xf32, #tpu.memory_space<vmem>>, vector<1x128xf32>
    %5 = vector.broadcast %4 : vector<1x128xf32> to vector<64x128xf32>
    %6 = arith.addf %3, %5 : vector<64x128xf32>
    %cst_6 = arith.constant dense<0.000000e+00> : vector<128xf32>
    %7 = vector.multi_reduction <add>, %6, %cst_6 [0] : vector<64x128xf32> to vector<128xf32>
    %8 = vector.shape_cast %7 : vector<128xf32> to vector<1x128xf32>
    %9 = arith.mulf %6, %6 : vector<64x128xf32>
    %cst_7 = arith.constant dense<0.000000e+00> : vector<128xf32>
    %10 = vector.multi_reduction <add>, %9, %cst_7 [0] : vector<64x128xf32> to vector<128xf32>
    %11 = vector.shape_cast %10 : vector<128xf32> to vector<1x128xf32>
    %cst_8 = arith.constant 1.562500e-02 : f32
    %12 = vector.broadcast %cst_8 : f32 to vector<1x128xf32>
    %13 = arith.mulf %8, %12 : vector<1x128xf32>
    %cst_9 = arith.constant 1.562500e-02 : f32
    %14 = vector.broadcast %cst_9 : f32 to vector<1x128xf32>
    %15 = arith.mulf %11, %14 : vector<1x128xf32>
    %16 = arith.mulf %13, %13 : vector<1x128xf32>
    %17 = arith.subf %15, %16 : vector<1x128xf32>
    %cst_10 = arith.constant 0.000000e+00 : f32
    %18 = vector.broadcast %cst_10 : f32 to vector<1x128xf32>
    %19 = arith.maximumf %17, %18 : vector<1x128xf32>
    %20 = vector.broadcast %13 : vector<1x128xf32> to vector<64x128xf32>
    %21 = arith.subf %6, %20 : vector<64x128xf32>
    %cst_11 = arith.constant 9.99999974E-6 : f32
    %22 = vector.broadcast %cst_11 : f32 to vector<1x128xf32>
    %23 = arith.addf %19, %22 : vector<1x128xf32>
    %24 = math.rsqrt %23 : vector<1x128xf32>
    %25 = vector.broadcast %24 : vector<1x128xf32> to vector<64x128xf32>
    %26 = arith.mulf %21, %25 : vector<64x128xf32>
    %c0_12 = arith.constant 0 : index
    %c0_13 = arith.constant 0 : index
    %27 = vector.load %arg4[%c0_12, %c0_13] : memref<1x128xf32, #tpu.memory_space<vmem>>, vector<1x128xf32>
    %28 = vector.broadcast %27 : vector<1x128xf32> to vector<64x128xf32>
    %29 = arith.mulf %26, %28 : vector<64x128xf32>
    %c0_14 = arith.constant 0 : index
    %c0_15 = arith.constant 0 : index
    %30 = vector.load %arg5[%c0_14, %c0_15] : memref<1x128xf32, #tpu.memory_space<vmem>>, vector<1x128xf32>
    %31 = vector.broadcast %30 : vector<1x128xf32> to vector<64x128xf32>
    %32 = arith.addf %29, %31 : vector<64x128xf32>
    %c0_16 = arith.constant 0 : index
    %c0_17 = arith.constant 0 : index
    %c0_18 = arith.constant 0 : index
    %33 = vector.load %arg6[%c0_16, %c0_17, %c0_18] : memref<1x64x128xf32, #tpu.memory_space<vmem>>, vector<1x64x128xf32>
    %34 = vector.shape_cast %33 : vector<1x64x128xf32> to vector<64x128xf32>
    %35 = vector.shape_cast %32 : vector<64x128xf32> to vector<1x64x128xf32>
    tpu.vector_store %arg6[%c0_16, %c0_17, %c0_18], %35 {strides = array<i32>} : memref<1x64x128xf32, #tpu.memory_space<vmem>>, vector<1x64x128xf32>,
    return
  }
  func.func @transform_0(%arg0: i32) -> (i32, i32, i32) {
    %c0_i32 = arith.constant 0 : i32
    %c0_i32_0 = arith.constant 0 : i32
    %c0_i32_1 = arith.constant 0 : i32
    return %arg0, %c0_i32, %c0_i32_0 : i32, i32, i32
  }
  func.func @transform_1(%arg0: i32) -> (i32, i32) {
    %c0_i32 = arith.constant 0 : i32
    %c0_i32_0 = arith.constant 0 : i32
    %c0_i32_1 = arith.constant 0 : i32
    return %c0_i32, %c0_i32_0 : i32, i32
  }
  func.func @transform_2(%arg0: i32) -> (i32, i32) {
    %c0_i32 = arith.constant 0 : i32
    %c0_i32_0 = arith.constant 0 : i32
    %c0_i32_1 = arith.constant 0 : i32
    return %c0_i32, %c0_i32_0 : i32, i32
  }
  func.func @transform_3(%arg0: i32) -> (i32, i32) {
    %c0_i32 = arith.constant 0 : i32
    %c0_i32_0 = arith.constant 0 : i32
    %c0_i32_1 = arith.constant 0 : i32
    return %c0_i32, %c0_i32_0 : i32, i32
  }
  func.func @transform_4(%arg0: i32) -> (i32, i32) {
    %c0_i32 = arith.constant 0 : i32
    %c0_i32_0 = arith.constant 0 : i32
    %c0_i32_1 = arith.constant 0 : i32
    return %c0_i32, %c0_i32_0 : i32, i32
  }
  func.func @transform_5(%arg0: i32) -> (i32, i32, i32) {
    %c0_i32 = arith.constant 0 : i32
    %c0_i32_0 = arith.constant 0 : i32
    %c0_i32_1 = arith.constant 0 : i32
    return %arg0, %c0_i32, %c0_i32_0 : i32, i32, i32
  }
}

module attributes {stable_mosaic.version = 11 : i64} {
  func.func @_conv_in_kernel(%arg0: i32, %arg1: memref<1x64x128xbf16, #tpu.memory_space<vmem>>, %arg2: memref<128x128xbf16, #tpu.memory_space<vmem>>, %arg3: memref<1x128xf32, #tpu.memory_space<vmem>>, %arg4: memref<1x128xf32, #tpu.memory_space<vmem>>, %arg5: memref<1x128xf32, #tpu.memory_space<vmem>>, %arg6: memref<1x64x128xf32, #tpu.memory_space<vmem>>) attributes {dimension_semantics = [#tpu.dimension_semantics<parallel>], iteration_bounds = array<i64: 2>, scalar_prefetch = 0 : i64, scratch_operands = 0 : i64, tpu.core_type = #tpu.core_type<tc>, window_params = [{transform_indices = @transform_0, window_bounds = array<i64: 1, 64, 128>}, {pipeline_mode = #tpu.pipeline_mode<synchronous>, transform_indices = @transform_1, window_bounds = array<i64: 128, 128>}, {pipeline_mode = #tpu.pipeline_mode<synchronous>, transform_indices = @transform_2, window_bounds = array<i64: 1, 128>}, {pipeline_mode = #tpu.pipeline_mode<synchronous>, transform_indices = @transform_3, window_bounds = array<i64: 1, 128>}, {pipeline_mode = #tpu.pipeline_mode<synchronous>, transform_indices = @transform_4, window_bounds = array<i64: 1, 128>}, {transform_indices = @transform_5, window_bounds = array<i64: 1, 64, 128>}]} {
    %c0 = arith.constant 0 : index
    %c0_0 = arith.constant 0 : index
    %c0_1 = arith.constant 0 : index
    %0 = vector.load %arg1[%c0, %c0_0, %c0_1] : memref<1x64x128xbf16, #tpu.memory_space<vmem>>, vector<1x64x128xbf16>
    %1 = vector.shape_cast %0 : vector<1x64x128xbf16> to vector<64x128xbf16>
    %c0_2 = arith.constant 0 : index
    %c0_3 = arith.constant 0 : index
    %2 = vector.load %arg2[%c0_2, %c0_3] : memref<128x128xbf16, #tpu.memory_space<vmem>>, vector<128x128xbf16>
    %cst = arith.constant dense<0.000000e+00> : vector<64x128xf32>
    %3 = tpu.matmul %1, %2, %cst {dimension_numbers = #tpu.dot_dimension_numbers<[1], [0], [0], [1], [0, 0, 1, 1], [], []>} : vector<64x128xbf16>, vector<128x128xbf16>, vector<64x128xf32> -> vector<64x128xf32>
    %c0_4 = arith.constant 0 : index
    %c0_5 = arith.constant 0 : index
    %4 = vector.load %arg3[%c0_4, %c0_5] : memref<1x128xf32, #tpu.memory_space<vmem>>, vector<1x128xf32>
    %5 = vector.broadcast %4 : vector<1x128xf32> to vector<64x128xf32>
    %6 = arith.addf %3, %5 : vector<64x128xf32>
    %cst_6 = arith.constant dense<0.000000e+00> : vector<128xf32>
    %7 = vector.multi_reduction <add>, %6, %cst_6 [0] : vector<64x128xf32> to vector<128xf32>
    %8 = vector.shape_cast %7 : vector<128xf32> to vector<1x128xf32>
    %9 = arith.mulf %6, %6 : vector<64x128xf32>
    %cst_7 = arith.constant dense<0.000000e+00> : vector<128xf32>
    %10 = vector.multi_reduction <add>, %9, %cst_7 [0] : vector<64x128xf32> to vector<128xf32>
    %11 = vector.shape_cast %10 : vector<128xf32> to vector<1x128xf32>
    %cst_8 = arith.constant 1.562500e-02 : f32
    %12 = vector.broadcast %cst_8 : f32 to vector<1x128xf32>
    %13 = arith.mulf %8, %12 : vector<1x128xf32>
    %cst_9 = arith.constant 1.562500e-02 : f32
    %14 = vector.broadcast %cst_9 : f32 to vector<1x128xf32>
    %15 = arith.mulf %11, %14 : vector<1x128xf32>
    %16 = arith.mulf %13, %13 : vector<1x128xf32>
    %17 = arith.subf %15, %16 : vector<1x128xf32>
    %cst_10 = arith.constant 0.000000e+00 : f32
    %18 = vector.broadcast %cst_10 : f32 to vector<1x128xf32>
    %19 = arith.maximumf %17, %18 : vector<1x128xf32>
    %20 = vector.broadcast %13 : vector<1x128xf32> to vector<64x128xf32>
    %21 = arith.subf %6, %20 : vector<64x128xf32>
    %cst_11 = arith.constant 9.99999974E-6 : f32
    %22 = vector.broadcast %cst_11 : f32 to vector<1x128xf32>
    %23 = arith.addf %19, %22 : vector<1x128xf32>
    %24 = math.rsqrt %23 : vector<1x128xf32>
    %25 = vector.broadcast %24 : vector<1x128xf32> to vector<64x128xf32>
    %26 = arith.mulf %21, %25 : vector<64x128xf32>
    %c0_12 = arith.constant 0 : index
    %c0_13 = arith.constant 0 : index
    %27 = vector.load %arg4[%c0_12, %c0_13] : memref<1x128xf32, #tpu.memory_space<vmem>>, vector<1x128xf32>
    %28 = vector.broadcast %27 : vector<1x128xf32> to vector<64x128xf32>
    %29 = arith.mulf %26, %28 : vector<64x128xf32>
    %c0_14 = arith.constant 0 : index
    %c0_15 = arith.constant 0 : index
    %30 = vector.load %arg5[%c0_14, %c0_15] : memref<1x128xf32, #tpu.memory_space<vmem>>, vector<1x128xf32>
    %31 = vector.broadcast %30 : vector<1x128xf32> to vector<64x128xf32>
    %32 = arith.addf %29, %31 : vector<64x128xf32>
    %cst_16 = arith.constant 0.000000e+00 : f32
    %33 = vector.broadcast %cst_16 : f32 to vector<64x128xf32>
    %34 = arith.cmpf oge, %32, %33 : vector<64x128xf32>
    %cst_17 = arith.constant 0.00999999977 : f32
    %35 = vector.broadcast %cst_17 : f32 to vector<64x128xf32>
    %36 = arith.mulf %35, %32 : vector<64x128xf32>
    %37 = arith.select %34, %32, %36 : vector<64x128xi1>, vector<64x128xf32>
    %c0_18 = arith.constant 0 : index
    %c0_19 = arith.constant 0 : index
    %c0_20 = arith.constant 0 : index
    %38 = vector.load %arg6[%c0_18, %c0_19, %c0_20] : memref<1x64x128xf32, #tpu.memory_space<vmem>>, vector<1x64x128xf32>
    %39 = vector.shape_cast %38 : vector<1x64x128xf32> to vector<64x128xf32>
    %40 = vector.shape_cast %37 : vector<64x128xf32> to vector<1x64x128xf32>
    tpu.vector_store %arg6[%c0_18, %c0_19, %c0_20], %40 {strides = array<i32>} : memref<1x64x128xf32, #tpu.memory_space<vmem>>, vector<1x64x128xf32>,
    return
  }
  func.func @transform_0(%arg0: i32) -> (i32, i32, i32) {
    %c0_i32 = arith.constant 0 : i32
    %c0_i32_0 = arith.constant 0 : i32
    %c0_i32_1 = arith.constant 0 : i32
    return %arg0, %c0_i32, %c0_i32_0 : i32, i32, i32
  }
  func.func @transform_1(%arg0: i32) -> (i32, i32) {
    %c0_i32 = arith.constant 0 : i32
    %c0_i32_0 = arith.constant 0 : i32
    %c0_i32_1 = arith.constant 0 : i32
    return %c0_i32, %c0_i32_0 : i32, i32
  }
  func.func @transform_2(%arg0: i32) -> (i32, i32) {
    %c0_i32 = arith.constant 0 : i32
    %c0_i32_0 = arith.constant 0 : i32
    %c0_i32_1 = arith.constant 0 : i32
    return %c0_i32, %c0_i32_0 : i32, i32
  }
  func.func @transform_3(%arg0: i32) -> (i32, i32) {
    %c0_i32 = arith.constant 0 : i32
    %c0_i32_0 = arith.constant 0 : i32
    %c0_i32_1 = arith.constant 0 : i32
    return %c0_i32, %c0_i32_0 : i32, i32
  }
  func.func @transform_4(%arg0: i32) -> (i32, i32) {
    %c0_i32 = arith.constant 0 : i32
    %c0_i32_0 = arith.constant 0 : i32
    %c0_i32_1 = arith.constant 0 : i32
    return %c0_i32, %c0_i32_0 : i32, i32
  }
  func.func @transform_5(%arg0: i32) -> (i32, i32, i32) {
    %c0_i32 = arith.constant 0 : i32
    %c0_i32_0 = arith.constant 0 : i32
    %c0_i32_1 = arith.constant 0 : i32
    return %arg0, %c0_i32, %c0_i32_0 : i32, i32, i32
  }
}

module attributes {stable_mosaic.version = 11 : i64} {
  func.func @_conv_in_kernel(%arg0: i32, %arg1: memref<1x64x256xbf16, #tpu.memory_space<vmem>>, %arg2: memref<256x128xbf16, #tpu.memory_space<vmem>>, %arg3: memref<1x128xf32, #tpu.memory_space<vmem>>, %arg4: memref<1x128xf32, #tpu.memory_space<vmem>>, %arg5: memref<1x128xf32, #tpu.memory_space<vmem>>, %arg6: memref<1x64x128xf32, #tpu.memory_space<vmem>>, %arg7: memref<1x64x128xf32, #tpu.memory_space<vmem>>) attributes {dimension_semantics = [#tpu.dimension_semantics<parallel>], iteration_bounds = array<i64: 2>, scalar_prefetch = 0 : i64, scratch_operands = 0 : i64, tpu.core_type = #tpu.core_type<tc>, window_params = [{transform_indices = @transform_0, window_bounds = array<i64: 1, 64, 256>}, {pipeline_mode = #tpu.pipeline_mode<synchronous>, transform_indices = @transform_1, window_bounds = array<i64: 256, 128>}, {pipeline_mode = #tpu.pipeline_mode<synchronous>, transform_indices = @transform_2, window_bounds = array<i64: 1, 128>}, {pipeline_mode = #tpu.pipeline_mode<synchronous>, transform_indices = @transform_3, window_bounds = array<i64: 1, 128>}, {pipeline_mode = #tpu.pipeline_mode<synchronous>, transform_indices = @transform_4, window_bounds = array<i64: 1, 128>}, {transform_indices = @transform_5, window_bounds = array<i64: 1, 64, 128>}, {transform_indices = @transform_6, window_bounds = array<i64: 1, 64, 128>}]} {
    %c0 = arith.constant 0 : index
    %c0_0 = arith.constant 0 : index
    %c0_1 = arith.constant 0 : index
    %0 = vector.load %arg1[%c0, %c0_0, %c0_1] : memref<1x64x256xbf16, #tpu.memory_space<vmem>>, vector<1x64x256xbf16>
    %1 = vector.shape_cast %0 : vector<1x64x256xbf16> to vector<64x256xbf16>
    %c0_2 = arith.constant 0 : index
    %c0_3 = arith.constant 0 : index
    %2 = vector.load %arg2[%c0_2, %c0_3] : memref<256x128xbf16, #tpu.memory_space<vmem>>, vector<256x128xbf16>
    %cst = arith.constant dense<0.000000e+00> : vector<64x128xf32>
    %3 = tpu.matmul %1, %2, %cst {dimension_numbers = #tpu.dot_dimension_numbers<[1], [0], [0], [1], [0, 0, 1, 1], [], []>} : vector<64x256xbf16>, vector<256x128xbf16>, vector<64x128xf32> -> vector<64x128xf32>
    %c0_4 = arith.constant 0 : index
    %c0_5 = arith.constant 0 : index
    %4 = vector.load %arg3[%c0_4, %c0_5] : memref<1x128xf32, #tpu.memory_space<vmem>>, vector<1x128xf32>
    %5 = vector.broadcast %4 : vector<1x128xf32> to vector<64x128xf32>
    %6 = arith.addf %3, %5 : vector<64x128xf32>
    %cst_6 = arith.constant dense<0.000000e+00> : vector<128xf32>
    %7 = vector.multi_reduction <add>, %6, %cst_6 [0] : vector<64x128xf32> to vector<128xf32>
    %8 = vector.shape_cast %7 : vector<128xf32> to vector<1x128xf32>
    %9 = arith.mulf %6, %6 : vector<64x128xf32>
    %cst_7 = arith.constant dense<0.000000e+00> : vector<128xf32>
    %10 = vector.multi_reduction <add>, %9, %cst_7 [0] : vector<64x128xf32> to vector<128xf32>
    %11 = vector.shape_cast %10 : vector<128xf32> to vector<1x128xf32>
    %cst_8 = arith.constant 1.562500e-02 : f32
    %12 = vector.broadcast %cst_8 : f32 to vector<1x128xf32>
    %13 = arith.mulf %8, %12 : vector<1x128xf32>
    %cst_9 = arith.constant 1.562500e-02 : f32
    %14 = vector.broadcast %cst_9 : f32 to vector<1x128xf32>
    %15 = arith.mulf %11, %14 : vector<1x128xf32>
    %16 = arith.mulf %13, %13 : vector<1x128xf32>
    %17 = arith.subf %15, %16 : vector<1x128xf32>
    %cst_10 = arith.constant 0.000000e+00 : f32
    %18 = vector.broadcast %cst_10 : f32 to vector<1x128xf32>
    %19 = arith.maximumf %17, %18 : vector<1x128xf32>
    %20 = vector.broadcast %13 : vector<1x128xf32> to vector<64x128xf32>
    %21 = arith.subf %6, %20 : vector<64x128xf32>
    %cst_11 = arith.constant 9.99999974E-6 : f32
    %22 = vector.broadcast %cst_11 : f32 to vector<1x128xf32>
    %23 = arith.addf %19, %22 : vector<1x128xf32>
    %24 = math.rsqrt %23 : vector<1x128xf32>
    %25 = vector.broadcast %24 : vector<1x128xf32> to vector<64x128xf32>
    %26 = arith.mulf %21, %25 : vector<64x128xf32>
    %c0_12 = arith.constant 0 : index
    %c0_13 = arith.constant 0 : index
    %27 = vector.load %arg4[%c0_12, %c0_13] : memref<1x128xf32, #tpu.memory_space<vmem>>, vector<1x128xf32>
    %28 = vector.broadcast %27 : vector<1x128xf32> to vector<64x128xf32>
    %29 = arith.mulf %26, %28 : vector<64x128xf32>
    %c0_14 = arith.constant 0 : index
    %c0_15 = arith.constant 0 : index
    %30 = vector.load %arg5[%c0_14, %c0_15] : memref<1x128xf32, #tpu.memory_space<vmem>>, vector<1x128xf32>
    %31 = vector.broadcast %30 : vector<1x128xf32> to vector<64x128xf32>
    %32 = arith.addf %29, %31 : vector<64x128xf32>
    %c0_16 = arith.constant 0 : index
    %c0_17 = arith.constant 0 : index
    %c0_18 = arith.constant 0 : index
    %33 = vector.load %arg6[%c0_16, %c0_17, %c0_18] : memref<1x64x128xf32, #tpu.memory_space<vmem>>, vector<1x64x128xf32>
    %34 = vector.shape_cast %33 : vector<1x64x128xf32> to vector<64x128xf32>
    %35 = arith.addf %32, %34 : vector<64x128xf32>
    %cst_19 = arith.constant 0.000000e+00 : f32
    %36 = vector.broadcast %cst_19 : f32 to vector<64x128xf32>
    %37 = arith.cmpf oge, %35, %36 : vector<64x128xf32>
    %cst_20 = arith.constant 0.00999999977 : f32
    %38 = vector.broadcast %cst_20 : f32 to vector<64x128xf32>
    %39 = arith.mulf %38, %35 : vector<64x128xf32>
    %40 = arith.select %37, %35, %39 : vector<64x128xi1>, vector<64x128xf32>
    %c0_21 = arith.constant 0 : index
    %c0_22 = arith.constant 0 : index
    %c0_23 = arith.constant 0 : index
    %41 = vector.load %arg7[%c0_21, %c0_22, %c0_23] : memref<1x64x128xf32, #tpu.memory_space<vmem>>, vector<1x64x128xf32>
    %42 = vector.shape_cast %41 : vector<1x64x128xf32> to vector<64x128xf32>
    %43 = vector.shape_cast %40 : vector<64x128xf32> to vector<1x64x128xf32>
    tpu.vector_store %arg7[%c0_21, %c0_22, %c0_23], %43 {strides = array<i32>} : memref<1x64x128xf32, #tpu.memory_space<vmem>>, vector<1x64x128xf32>,
    return
  }
  func.func @transform_0(%arg0: i32) -> (i32, i32, i32) {
    %c0_i32 = arith.constant 0 : i32
    %c0_i32_0 = arith.constant 0 : i32
    %c0_i32_1 = arith.constant 0 : i32
    return %arg0, %c0_i32, %c0_i32_0 : i32, i32, i32
  }
  func.func @transform_1(%arg0: i32) -> (i32, i32) {
    %c0_i32 = arith.constant 0 : i32
    %c0_i32_0 = arith.constant 0 : i32
    %c0_i32_1 = arith.constant 0 : i32
    return %c0_i32, %c0_i32_0 : i32, i32
  }
  func.func @transform_2(%arg0: i32) -> (i32, i32) {
    %c0_i32 = arith.constant 0 : i32
    %c0_i32_0 = arith.constant 0 : i32
    %c0_i32_1 = arith.constant 0 : i32
    return %c0_i32, %c0_i32_0 : i32, i32
  }
  func.func @transform_3(%arg0: i32) -> (i32, i32) {
    %c0_i32 = arith.constant 0 : i32
    %c0_i32_0 = arith.constant 0 : i32
    %c0_i32_1 = arith.constant 0 : i32
    return %c0_i32, %c0_i32_0 : i32, i32
  }
  func.func @transform_4(%arg0: i32) -> (i32, i32) {
    %c0_i32 = arith.constant 0 : i32
    %c0_i32_0 = arith.constant 0 : i32
    %c0_i32_1 = arith.constant 0 : i32
    return %c0_i32, %c0_i32_0 : i32, i32
  }
  func.func @transform_5(%arg0: i32) -> (i32, i32, i32) {
    %c0_i32 = arith.constant 0 : i32
    %c0_i32_0 = arith.constant 0 : i32
    %c0_i32_1 = arith.constant 0 : i32
    return %arg0, %c0_i32, %c0_i32_0 : i32, i32, i32
  }
  func.func @transform_6(%arg0: i32) -> (i32, i32, i32) {
    %c0_i32 = arith.constant 0 : i32
    %c0_i32_0 = arith.constant 0 : i32
    %c0_i32_1 = arith.constant 0 : i32
    return %arg0, %c0_i32, %c0_i32_0 : i32, i32, i32
  }
}

module attributes {stable_mosaic.version = 11 : i64} {
  func.func @_conv_in_kernel(%arg0: i32, %arg1: memref<1x16x128xbf16, #tpu.memory_space<vmem>>, %arg2: memref<128x128xbf16, #tpu.memory_space<vmem>>, %arg3: memref<1x128xf32, #tpu.memory_space<vmem>>, %arg4: memref<1x128xf32, #tpu.memory_space<vmem>>, %arg5: memref<1x128xf32, #tpu.memory_space<vmem>>, %arg6: memref<1x16x128xf32, #tpu.memory_space<vmem>>) attributes {dimension_semantics = [#tpu.dimension_semantics<parallel>], iteration_bounds = array<i64: 2>, scalar_prefetch = 0 : i64, scratch_operands = 0 : i64, tpu.core_type = #tpu.core_type<tc>, window_params = [{transform_indices = @transform_0, window_bounds = array<i64: 1, 16, 128>}, {pipeline_mode = #tpu.pipeline_mode<synchronous>, transform_indices = @transform_1, window_bounds = array<i64: 128, 128>}, {pipeline_mode = #tpu.pipeline_mode<synchronous>, transform_indices = @transform_2, window_bounds = array<i64: 1, 128>}, {pipeline_mode = #tpu.pipeline_mode<synchronous>, transform_indices = @transform_3, window_bounds = array<i64: 1, 128>}, {pipeline_mode = #tpu.pipeline_mode<synchronous>, transform_indices = @transform_4, window_bounds = array<i64: 1, 128>}, {transform_indices = @transform_5, window_bounds = array<i64: 1, 16, 128>}]} {
    %c0 = arith.constant 0 : index
    %c0_0 = arith.constant 0 : index
    %c0_1 = arith.constant 0 : index
    %0 = vector.load %arg1[%c0, %c0_0, %c0_1] : memref<1x16x128xbf16, #tpu.memory_space<vmem>>, vector<1x16x128xbf16>
    %1 = vector.shape_cast %0 : vector<1x16x128xbf16> to vector<16x128xbf16>
    %c0_2 = arith.constant 0 : index
    %c0_3 = arith.constant 0 : index
    %2 = vector.load %arg2[%c0_2, %c0_3] : memref<128x128xbf16, #tpu.memory_space<vmem>>, vector<128x128xbf16>
    %cst = arith.constant dense<0.000000e+00> : vector<16x128xf32>
    %3 = tpu.matmul %1, %2, %cst {dimension_numbers = #tpu.dot_dimension_numbers<[1], [0], [0], [1], [0, 0, 1, 1], [], []>} : vector<16x128xbf16>, vector<128x128xbf16>, vector<16x128xf32> -> vector<16x128xf32>
    %c0_4 = arith.constant 0 : index
    %c0_5 = arith.constant 0 : index
    %4 = vector.load %arg3[%c0_4, %c0_5] : memref<1x128xf32, #tpu.memory_space<vmem>>, vector<1x128xf32>
    %5 = vector.broadcast %4 : vector<1x128xf32> to vector<16x128xf32>
    %6 = arith.addf %3, %5 : vector<16x128xf32>
    %cst_6 = arith.constant dense<0.000000e+00> : vector<128xf32>
    %7 = vector.multi_reduction <add>, %6, %cst_6 [0] : vector<16x128xf32> to vector<128xf32>
    %8 = vector.shape_cast %7 : vector<128xf32> to vector<1x128xf32>
    %9 = arith.mulf %6, %6 : vector<16x128xf32>
    %cst_7 = arith.constant dense<0.000000e+00> : vector<128xf32>
    %10 = vector.multi_reduction <add>, %9, %cst_7 [0] : vector<16x128xf32> to vector<128xf32>
    %11 = vector.shape_cast %10 : vector<128xf32> to vector<1x128xf32>
    %cst_8 = arith.constant 6.250000e-02 : f32
    %12 = vector.broadcast %cst_8 : f32 to vector<1x128xf32>
    %13 = arith.mulf %8, %12 : vector<1x128xf32>
    %cst_9 = arith.constant 6.250000e-02 : f32
    %14 = vector.broadcast %cst_9 : f32 to vector<1x128xf32>
    %15 = arith.mulf %11, %14 : vector<1x128xf32>
    %16 = arith.mulf %13, %13 : vector<1x128xf32>
    %17 = arith.subf %15, %16 : vector<1x128xf32>
    %cst_10 = arith.constant 0.000000e+00 : f32
    %18 = vector.broadcast %cst_10 : f32 to vector<1x128xf32>
    %19 = arith.maximumf %17, %18 : vector<1x128xf32>
    %20 = vector.broadcast %13 : vector<1x128xf32> to vector<16x128xf32>
    %21 = arith.subf %6, %20 : vector<16x128xf32>
    %cst_11 = arith.constant 9.99999974E-6 : f32
    %22 = vector.broadcast %cst_11 : f32 to vector<1x128xf32>
    %23 = arith.addf %19, %22 : vector<1x128xf32>
    %24 = math.rsqrt %23 : vector<1x128xf32>
    %25 = vector.broadcast %24 : vector<1x128xf32> to vector<16x128xf32>
    %26 = arith.mulf %21, %25 : vector<16x128xf32>
    %c0_12 = arith.constant 0 : index
    %c0_13 = arith.constant 0 : index
    %27 = vector.load %arg4[%c0_12, %c0_13] : memref<1x128xf32, #tpu.memory_space<vmem>>, vector<1x128xf32>
    %28 = vector.broadcast %27 : vector<1x128xf32> to vector<16x128xf32>
    %29 = arith.mulf %26, %28 : vector<16x128xf32>
    %c0_14 = arith.constant 0 : index
    %c0_15 = arith.constant 0 : index
    %30 = vector.load %arg5[%c0_14, %c0_15] : memref<1x128xf32, #tpu.memory_space<vmem>>, vector<1x128xf32>
    %31 = vector.broadcast %30 : vector<1x128xf32> to vector<16x128xf32>
    %32 = arith.addf %29, %31 : vector<16x128xf32>
    %c0_16 = arith.constant 0 : index
    %c0_17 = arith.constant 0 : index
    %c0_18 = arith.constant 0 : index
    %33 = vector.load %arg6[%c0_16, %c0_17, %c0_18] : memref<1x16x128xf32, #tpu.memory_space<vmem>>, vector<1x16x128xf32>
    %34 = vector.shape_cast %33 : vector<1x16x128xf32> to vector<16x128xf32>
    %35 = vector.shape_cast %32 : vector<16x128xf32> to vector<1x16x128xf32>
    tpu.vector_store %arg6[%c0_16, %c0_17, %c0_18], %35 {strides = array<i32>} : memref<1x16x128xf32, #tpu.memory_space<vmem>>, vector<1x16x128xf32>,
    return
  }
  func.func @transform_0(%arg0: i32) -> (i32, i32, i32) {
    %c0_i32 = arith.constant 0 : i32
    %c0_i32_0 = arith.constant 0 : i32
    %c0_i32_1 = arith.constant 0 : i32
    return %arg0, %c0_i32, %c0_i32_0 : i32, i32, i32
  }
  func.func @transform_1(%arg0: i32) -> (i32, i32) {
    %c0_i32 = arith.constant 0 : i32
    %c0_i32_0 = arith.constant 0 : i32
    %c0_i32_1 = arith.constant 0 : i32
    return %c0_i32, %c0_i32_0 : i32, i32
  }
  func.func @transform_2(%arg0: i32) -> (i32, i32) {
    %c0_i32 = arith.constant 0 : i32
    %c0_i32_0 = arith.constant 0 : i32
    %c0_i32_1 = arith.constant 0 : i32
    return %c0_i32, %c0_i32_0 : i32, i32
  }
  func.func @transform_3(%arg0: i32) -> (i32, i32) {
    %c0_i32 = arith.constant 0 : i32
    %c0_i32_0 = arith.constant 0 : i32
    %c0_i32_1 = arith.constant 0 : i32
    return %c0_i32, %c0_i32_0 : i32, i32
  }
  func.func @transform_4(%arg0: i32) -> (i32, i32) {
    %c0_i32 = arith.constant 0 : i32
    %c0_i32_0 = arith.constant 0 : i32
    %c0_i32_1 = arith.constant 0 : i32
    return %c0_i32, %c0_i32_0 : i32, i32
  }
  func.func @transform_5(%arg0: i32) -> (i32, i32, i32) {
    %c0_i32 = arith.constant 0 : i32
    %c0_i32_0 = arith.constant 0 : i32
    %c0_i32_1 = arith.constant 0 : i32
    return %arg0, %c0_i32, %c0_i32_0 : i32, i32, i32
  }
}

module attributes {stable_mosaic.version = 11 : i64} {
  func.func @_conv_in_kernel(%arg0: i32, %arg1: memref<1x16x256xbf16, #tpu.memory_space<vmem>>, %arg2: memref<256x128xbf16, #tpu.memory_space<vmem>>, %arg3: memref<1x128xf32, #tpu.memory_space<vmem>>, %arg4: memref<1x128xf32, #tpu.memory_space<vmem>>, %arg5: memref<1x128xf32, #tpu.memory_space<vmem>>, %arg6: memref<1x16x128xf32, #tpu.memory_space<vmem>>) attributes {dimension_semantics = [#tpu.dimension_semantics<parallel>], iteration_bounds = array<i64: 2>, scalar_prefetch = 0 : i64, scratch_operands = 0 : i64, tpu.core_type = #tpu.core_type<tc>, window_params = [{transform_indices = @transform_0, window_bounds = array<i64: 1, 16, 256>}, {pipeline_mode = #tpu.pipeline_mode<synchronous>, transform_indices = @transform_1, window_bounds = array<i64: 256, 128>}, {pipeline_mode = #tpu.pipeline_mode<synchronous>, transform_indices = @transform_2, window_bounds = array<i64: 1, 128>}, {pipeline_mode = #tpu.pipeline_mode<synchronous>, transform_indices = @transform_3, window_bounds = array<i64: 1, 128>}, {pipeline_mode = #tpu.pipeline_mode<synchronous>, transform_indices = @transform_4, window_bounds = array<i64: 1, 128>}, {transform_indices = @transform_5, window_bounds = array<i64: 1, 16, 128>}]} {
    %c0 = arith.constant 0 : index
    %c0_0 = arith.constant 0 : index
    %c0_1 = arith.constant 0 : index
    %0 = vector.load %arg1[%c0, %c0_0, %c0_1] : memref<1x16x256xbf16, #tpu.memory_space<vmem>>, vector<1x16x256xbf16>
    %1 = vector.shape_cast %0 : vector<1x16x256xbf16> to vector<16x256xbf16>
    %c0_2 = arith.constant 0 : index
    %c0_3 = arith.constant 0 : index
    %2 = vector.load %arg2[%c0_2, %c0_3] : memref<256x128xbf16, #tpu.memory_space<vmem>>, vector<256x128xbf16>
    %cst = arith.constant dense<0.000000e+00> : vector<16x128xf32>
    %3 = tpu.matmul %1, %2, %cst {dimension_numbers = #tpu.dot_dimension_numbers<[1], [0], [0], [1], [0, 0, 1, 1], [], []>} : vector<16x256xbf16>, vector<256x128xbf16>, vector<16x128xf32> -> vector<16x128xf32>
    %c0_4 = arith.constant 0 : index
    %c0_5 = arith.constant 0 : index
    %4 = vector.load %arg3[%c0_4, %c0_5] : memref<1x128xf32, #tpu.memory_space<vmem>>, vector<1x128xf32>
    %5 = vector.broadcast %4 : vector<1x128xf32> to vector<16x128xf32>
    %6 = arith.addf %3, %5 : vector<16x128xf32>
    %cst_6 = arith.constant dense<0.000000e+00> : vector<128xf32>
    %7 = vector.multi_reduction <add>, %6, %cst_6 [0] : vector<16x128xf32> to vector<128xf32>
    %8 = vector.shape_cast %7 : vector<128xf32> to vector<1x128xf32>
    %9 = arith.mulf %6, %6 : vector<16x128xf32>
    %cst_7 = arith.constant dense<0.000000e+00> : vector<128xf32>
    %10 = vector.multi_reduction <add>, %9, %cst_7 [0] : vector<16x128xf32> to vector<128xf32>
    %11 = vector.shape_cast %10 : vector<128xf32> to vector<1x128xf32>
    %cst_8 = arith.constant 6.250000e-02 : f32
    %12 = vector.broadcast %cst_8 : f32 to vector<1x128xf32>
    %13 = arith.mulf %8, %12 : vector<1x128xf32>
    %cst_9 = arith.constant 6.250000e-02 : f32
    %14 = vector.broadcast %cst_9 : f32 to vector<1x128xf32>
    %15 = arith.mulf %11, %14 : vector<1x128xf32>
    %16 = arith.mulf %13, %13 : vector<1x128xf32>
    %17 = arith.subf %15, %16 : vector<1x128xf32>
    %cst_10 = arith.constant 0.000000e+00 : f32
    %18 = vector.broadcast %cst_10 : f32 to vector<1x128xf32>
    %19 = arith.maximumf %17, %18 : vector<1x128xf32>
    %20 = vector.broadcast %13 : vector<1x128xf32> to vector<16x128xf32>
    %21 = arith.subf %6, %20 : vector<16x128xf32>
    %cst_11 = arith.constant 9.99999974E-6 : f32
    %22 = vector.broadcast %cst_11 : f32 to vector<1x128xf32>
    %23 = arith.addf %19, %22 : vector<1x128xf32>
    %24 = math.rsqrt %23 : vector<1x128xf32>
    %25 = vector.broadcast %24 : vector<1x128xf32> to vector<16x128xf32>
    %26 = arith.mulf %21, %25 : vector<16x128xf32>
    %c0_12 = arith.constant 0 : index
    %c0_13 = arith.constant 0 : index
    %27 = vector.load %arg4[%c0_12, %c0_13] : memref<1x128xf32, #tpu.memory_space<vmem>>, vector<1x128xf32>
    %28 = vector.broadcast %27 : vector<1x128xf32> to vector<16x128xf32>
    %29 = arith.mulf %26, %28 : vector<16x128xf32>
    %c0_14 = arith.constant 0 : index
    %c0_15 = arith.constant 0 : index
    %30 = vector.load %arg5[%c0_14, %c0_15] : memref<1x128xf32, #tpu.memory_space<vmem>>, vector<1x128xf32>
    %31 = vector.broadcast %30 : vector<1x128xf32> to vector<16x128xf32>
    %32 = arith.addf %29, %31 : vector<16x128xf32>
    %cst_16 = arith.constant 0.000000e+00 : f32
    %33 = vector.broadcast %cst_16 : f32 to vector<16x128xf32>
    %34 = arith.cmpf oge, %32, %33 : vector<16x128xf32>
    %cst_17 = arith.constant 0.00999999977 : f32
    %35 = vector.broadcast %cst_17 : f32 to vector<16x128xf32>
    %36 = arith.mulf %35, %32 : vector<16x128xf32>
    %37 = arith.select %34, %32, %36 : vector<16x128xi1>, vector<16x128xf32>
    %c0_18 = arith.constant 0 : index
    %c0_19 = arith.constant 0 : index
    %c0_20 = arith.constant 0 : index
    %38 = vector.load %arg6[%c0_18, %c0_19, %c0_20] : memref<1x16x128xf32, #tpu.memory_space<vmem>>, vector<1x16x128xf32>
    %39 = vector.shape_cast %38 : vector<1x16x128xf32> to vector<16x128xf32>
    %40 = vector.shape_cast %37 : vector<16x128xf32> to vector<1x16x128xf32>
    tpu.vector_store %arg6[%c0_18, %c0_19, %c0_20], %40 {strides = array<i32>} : memref<1x16x128xf32, #tpu.memory_space<vmem>>, vector<1x16x128xf32>,
    return
  }
  func.func @transform_0(%arg0: i32) -> (i32, i32, i32) {
    %c0_i32 = arith.constant 0 : i32
    %c0_i32_0 = arith.constant 0 : i32
    %c0_i32_1 = arith.constant 0 : i32
    return %arg0, %c0_i32, %c0_i32_0 : i32, i32, i32
  }
  func.func @transform_1(%arg0: i32) -> (i32, i32) {
    %c0_i32 = arith.constant 0 : i32
    %c0_i32_0 = arith.constant 0 : i32
    %c0_i32_1 = arith.constant 0 : i32
    return %c0_i32, %c0_i32_0 : i32, i32
  }
  func.func @transform_2(%arg0: i32) -> (i32, i32) {
    %c0_i32 = arith.constant 0 : i32
    %c0_i32_0 = arith.constant 0 : i32
    %c0_i32_1 = arith.constant 0 : i32
    return %c0_i32, %c0_i32_0 : i32, i32
  }
  func.func @transform_3(%arg0: i32) -> (i32, i32) {
    %c0_i32 = arith.constant 0 : i32
    %c0_i32_0 = arith.constant 0 : i32
    %c0_i32_1 = arith.constant 0 : i32
    return %c0_i32, %c0_i32_0 : i32, i32
  }
  func.func @transform_4(%arg0: i32) -> (i32, i32) {
    %c0_i32 = arith.constant 0 : i32
    %c0_i32_0 = arith.constant 0 : i32
    %c0_i32_1 = arith.constant 0 : i32
    return %c0_i32, %c0_i32_0 : i32, i32
  }
  func.func @transform_5(%arg0: i32) -> (i32, i32, i32) {
    %c0_i32 = arith.constant 0 : i32
    %c0_i32_0 = arith.constant 0 : i32
    %c0_i32_1 = arith.constant 0 : i32
    return %arg0, %c0_i32, %c0_i32_0 : i32, i32, i32
  }
}

module attributes {stable_mosaic.version = 11 : i64} {
  func.func @_conv_in_kernel(%arg0: i32, %arg1: memref<1x16x384xbf16, #tpu.memory_space<vmem>>, %arg2: memref<384x128xbf16, #tpu.memory_space<vmem>>, %arg3: memref<1x128xf32, #tpu.memory_space<vmem>>, %arg4: memref<1x128xf32, #tpu.memory_space<vmem>>, %arg5: memref<1x128xf32, #tpu.memory_space<vmem>>, %arg6: memref<1x16x128xf32, #tpu.memory_space<vmem>>, %arg7: memref<1x16x128xf32, #tpu.memory_space<vmem>>) attributes {dimension_semantics = [#tpu.dimension_semantics<parallel>], iteration_bounds = array<i64: 2>, scalar_prefetch = 0 : i64, scratch_operands = 0 : i64, tpu.core_type = #tpu.core_type<tc>, window_params = [{transform_indices = @transform_0, window_bounds = array<i64: 1, 16, 384>}, {pipeline_mode = #tpu.pipeline_mode<synchronous>, transform_indices = @transform_1, window_bounds = array<i64: 384, 128>}, {pipeline_mode = #tpu.pipeline_mode<synchronous>, transform_indices = @transform_2, window_bounds = array<i64: 1, 128>}, {pipeline_mode = #tpu.pipeline_mode<synchronous>, transform_indices = @transform_3, window_bounds = array<i64: 1, 128>}, {pipeline_mode = #tpu.pipeline_mode<synchronous>, transform_indices = @transform_4, window_bounds = array<i64: 1, 128>}, {transform_indices = @transform_5, window_bounds = array<i64: 1, 16, 128>}, {transform_indices = @transform_6, window_bounds = array<i64: 1, 16, 128>}]} {
    %c0 = arith.constant 0 : index
    %c0_0 = arith.constant 0 : index
    %c0_1 = arith.constant 0 : index
    %0 = vector.load %arg1[%c0, %c0_0, %c0_1] : memref<1x16x384xbf16, #tpu.memory_space<vmem>>, vector<1x16x384xbf16>
    %1 = vector.shape_cast %0 : vector<1x16x384xbf16> to vector<16x384xbf16>
    %c0_2 = arith.constant 0 : index
    %c0_3 = arith.constant 0 : index
    %2 = vector.load %arg2[%c0_2, %c0_3] : memref<384x128xbf16, #tpu.memory_space<vmem>>, vector<384x128xbf16>
    %cst = arith.constant dense<0.000000e+00> : vector<16x128xf32>
    %3 = tpu.matmul %1, %2, %cst {dimension_numbers = #tpu.dot_dimension_numbers<[1], [0], [0], [1], [0, 0, 1, 1], [], []>} : vector<16x384xbf16>, vector<384x128xbf16>, vector<16x128xf32> -> vector<16x128xf32>
    %c0_4 = arith.constant 0 : index
    %c0_5 = arith.constant 0 : index
    %4 = vector.load %arg3[%c0_4, %c0_5] : memref<1x128xf32, #tpu.memory_space<vmem>>, vector<1x128xf32>
    %5 = vector.broadcast %4 : vector<1x128xf32> to vector<16x128xf32>
    %6 = arith.addf %3, %5 : vector<16x128xf32>
    %cst_6 = arith.constant dense<0.000000e+00> : vector<128xf32>
    %7 = vector.multi_reduction <add>, %6, %cst_6 [0] : vector<16x128xf32> to vector<128xf32>
    %8 = vector.shape_cast %7 : vector<128xf32> to vector<1x128xf32>
    %9 = arith.mulf %6, %6 : vector<16x128xf32>
    %cst_7 = arith.constant dense<0.000000e+00> : vector<128xf32>
    %10 = vector.multi_reduction <add>, %9, %cst_7 [0] : vector<16x128xf32> to vector<128xf32>
    %11 = vector.shape_cast %10 : vector<128xf32> to vector<1x128xf32>
    %cst_8 = arith.constant 6.250000e-02 : f32
    %12 = vector.broadcast %cst_8 : f32 to vector<1x128xf32>
    %13 = arith.mulf %8, %12 : vector<1x128xf32>
    %cst_9 = arith.constant 6.250000e-02 : f32
    %14 = vector.broadcast %cst_9 : f32 to vector<1x128xf32>
    %15 = arith.mulf %11, %14 : vector<1x128xf32>
    %16 = arith.mulf %13, %13 : vector<1x128xf32>
    %17 = arith.subf %15, %16 : vector<1x128xf32>
    %cst_10 = arith.constant 0.000000e+00 : f32
    %18 = vector.broadcast %cst_10 : f32 to vector<1x128xf32>
    %19 = arith.maximumf %17, %18 : vector<1x128xf32>
    %20 = vector.broadcast %13 : vector<1x128xf32> to vector<16x128xf32>
    %21 = arith.subf %6, %20 : vector<16x128xf32>
    %cst_11 = arith.constant 9.99999974E-6 : f32
    %22 = vector.broadcast %cst_11 : f32 to vector<1x128xf32>
    %23 = arith.addf %19, %22 : vector<1x128xf32>
    %24 = math.rsqrt %23 : vector<1x128xf32>
    %25 = vector.broadcast %24 : vector<1x128xf32> to vector<16x128xf32>
    %26 = arith.mulf %21, %25 : vector<16x128xf32>
    %c0_12 = arith.constant 0 : index
    %c0_13 = arith.constant 0 : index
    %27 = vector.load %arg4[%c0_12, %c0_13] : memref<1x128xf32, #tpu.memory_space<vmem>>, vector<1x128xf32>
    %28 = vector.broadcast %27 : vector<1x128xf32> to vector<16x128xf32>
    %29 = arith.mulf %26, %28 : vector<16x128xf32>
    %c0_14 = arith.constant 0 : index
    %c0_15 = arith.constant 0 : index
    %30 = vector.load %arg5[%c0_14, %c0_15] : memref<1x128xf32, #tpu.memory_space<vmem>>, vector<1x128xf32>
    %31 = vector.broadcast %30 : vector<1x128xf32> to vector<16x128xf32>
    %32 = arith.addf %29, %31 : vector<16x128xf32>
    %c0_16 = arith.constant 0 : index
    %c0_17 = arith.constant 0 : index
    %c0_18 = arith.constant 0 : index
    %33 = vector.load %arg6[%c0_16, %c0_17, %c0_18] : memref<1x16x128xf32, #tpu.memory_space<vmem>>, vector<1x16x128xf32>
    %34 = vector.shape_cast %33 : vector<1x16x128xf32> to vector<16x128xf32>
    %35 = arith.addf %32, %34 : vector<16x128xf32>
    %cst_19 = arith.constant 0.000000e+00 : f32
    %36 = vector.broadcast %cst_19 : f32 to vector<16x128xf32>
    %37 = arith.cmpf oge, %35, %36 : vector<16x128xf32>
    %cst_20 = arith.constant 0.00999999977 : f32
    %38 = vector.broadcast %cst_20 : f32 to vector<16x128xf32>
    %39 = arith.mulf %38, %35 : vector<16x128xf32>
    %40 = arith.select %37, %35, %39 : vector<16x128xi1>, vector<16x128xf32>
    %c0_21 = arith.constant 0 : index
    %c0_22 = arith.constant 0 : index
    %c0_23 = arith.constant 0 : index
    %41 = vector.load %arg7[%c0_21, %c0_22, %c0_23] : memref<1x16x128xf32, #tpu.memory_space<vmem>>, vector<1x16x128xf32>
    %42 = vector.shape_cast %41 : vector<1x16x128xf32> to vector<16x128xf32>
    %43 = vector.shape_cast %40 : vector<16x128xf32> to vector<1x16x128xf32>
    tpu.vector_store %arg7[%c0_21, %c0_22, %c0_23], %43 {strides = array<i32>} : memref<1x16x128xf32, #tpu.memory_space<vmem>>, vector<1x16x128xf32>,
    return
  }
  func.func @transform_0(%arg0: i32) -> (i32, i32, i32) {
    %c0_i32 = arith.constant 0 : i32
    %c0_i32_0 = arith.constant 0 : i32
    %c0_i32_1 = arith.constant 0 : i32
    return %arg0, %c0_i32, %c0_i32_0 : i32, i32, i32
  }
  func.func @transform_1(%arg0: i32) -> (i32, i32) {
    %c0_i32 = arith.constant 0 : i32
    %c0_i32_0 = arith.constant 0 : i32
    %c0_i32_1 = arith.constant 0 : i32
    return %c0_i32, %c0_i32_0 : i32, i32
  }
  func.func @transform_2(%arg0: i32) -> (i32, i32) {
    %c0_i32 = arith.constant 0 : i32
    %c0_i32_0 = arith.constant 0 : i32
    %c0_i32_1 = arith.constant 0 : i32
    return %c0_i32, %c0_i32_0 : i32, i32
  }
  func.func @transform_3(%arg0: i32) -> (i32, i32) {
    %c0_i32 = arith.constant 0 : i32
    %c0_i32_0 = arith.constant 0 : i32
    %c0_i32_1 = arith.constant 0 : i32
    return %c0_i32, %c0_i32_0 : i32, i32
  }
  func.func @transform_4(%arg0: i32) -> (i32, i32) {
    %c0_i32 = arith.constant 0 : i32
    %c0_i32_0 = arith.constant 0 : i32
    %c0_i32_1 = arith.constant 0 : i32
    return %c0_i32, %c0_i32_0 : i32, i32
  }
  func.func @transform_5(%arg0: i32) -> (i32, i32, i32) {
    %c0_i32 = arith.constant 0 : i32
    %c0_i32_0 = arith.constant 0 : i32
    %c0_i32_1 = arith.constant 0 : i32
    return %arg0, %c0_i32, %c0_i32_0 : i32, i32, i32
  }
  func.func @transform_6(%arg0: i32) -> (i32, i32, i32) {
    %c0_i32 = arith.constant 0 : i32
    %c0_i32_0 = arith.constant 0 : i32
    %c0_i32_1 = arith.constant 0 : i32
    return %arg0, %c0_i32, %c0_i32_0 : i32, i32, i32
  }
}

module attributes {stable_mosaic.version = 11 : i64} {
  func.func @_gemm_bias_kernel(%arg0: i32, %arg1: memref<32x128xbf16, #tpu.memory_space<vmem>>, %arg2: memref<128x128xbf16, #tpu.memory_space<vmem>>, %arg3: memref<1x128xf32, #tpu.memory_space<vmem>>, %arg4: memref<32x128xf32, #tpu.memory_space<vmem>>) attributes {dimension_semantics = [#tpu.dimension_semantics<parallel>], iteration_bounds = array<i64: 1>, scalar_prefetch = 0 : i64, scratch_operands = 0 : i64, tpu.core_type = #tpu.core_type<tc>, window_params = [{transform_indices = @transform_0, window_bounds = array<i64: 32, 128>}, {pipeline_mode = #tpu.pipeline_mode<synchronous>, transform_indices = @transform_1, window_bounds = array<i64: 128, 128>}, {pipeline_mode = #tpu.pipeline_mode<synchronous>, transform_indices = @transform_2, window_bounds = array<i64: 1, 128>}, {transform_indices = @transform_3, window_bounds = array<i64: 32, 128>}]} {
    %c0 = arith.constant 0 : index
    %c0_0 = arith.constant 0 : index
    %0 = vector.load %arg1[%c0, %c0_0] : memref<32x128xbf16, #tpu.memory_space<vmem>>, vector<32x128xbf16>
    %c0_1 = arith.constant 0 : index
    %c0_2 = arith.constant 0 : index
    %1 = vector.load %arg2[%c0_1, %c0_2] : memref<128x128xbf16, #tpu.memory_space<vmem>>, vector<128x128xbf16>
    %cst = arith.constant dense<0.000000e+00> : vector<32x128xf32>
    %2 = tpu.matmul %0, %1, %cst {dimension_numbers = #tpu.dot_dimension_numbers<[1], [0], [0], [1], [0, 0, 1, 1], [], []>} : vector<32x128xbf16>, vector<128x128xbf16>, vector<32x128xf32> -> vector<32x128xf32>
    %c0_3 = arith.constant 0 : index
    %c0_4 = arith.constant 0 : index
    %3 = vector.load %arg3[%c0_3, %c0_4] : memref<1x128xf32, #tpu.memory_space<vmem>>, vector<1x128xf32>
    %4 = vector.broadcast %3 : vector<1x128xf32> to vector<32x128xf32>
    %5 = arith.addf %2, %4 : vector<32x128xf32>
    %c0_5 = arith.constant 0 : index
    %c0_6 = arith.constant 0 : index
    %6 = vector.load %arg4[%c0_5, %c0_6] : memref<32x128xf32, #tpu.memory_space<vmem>>, vector<32x128xf32>
    tpu.vector_store %arg4[%c0_5, %c0_6], %5 {strides = array<i32>} : memref<32x128xf32, #tpu.memory_space<vmem>>, vector<32x128xf32>,
    return
  }
  func.func @transform_0(%arg0: i32) -> (i32, i32) {
    %c0_i32 = arith.constant 0 : i32
    %c0_i32_0 = arith.constant 0 : i32
    return %arg0, %c0_i32 : i32, i32
  }
  func.func @transform_1(%arg0: i32) -> (i32, i32) {
    %c0_i32 = arith.constant 0 : i32
    %c0_i32_0 = arith.constant 0 : i32
    %c0_i32_1 = arith.constant 0 : i32
    return %c0_i32, %c0_i32_0 : i32, i32
  }
  func.func @transform_2(%arg0: i32) -> (i32, i32) {
    %c0_i32 = arith.constant 0 : i32
    %c0_i32_0 = arith.constant 0 : i32
    %c0_i32_1 = arith.constant 0 : i32
    return %c0_i32, %c0_i32_0 : i32, i32
  }
  func.func @transform_3(%arg0: i32) -> (i32, i32) {
    %c0_i32 = arith.constant 0 : i32
    %c0_i32_0 = arith.constant 0 : i32
    return %arg0, %c0_i32 : i32, i32
  }
}

module attributes {stable_mosaic.version = 11 : i64} {
  func.func @_conv_in_kernel(%arg0: i32, %arg1: memref<1x64x256xbf16, #tpu.memory_space<vmem>>, %arg2: memref<256x128xbf16, #tpu.memory_space<vmem>>, %arg3: memref<1x64x256xbf16, #tpu.memory_space<vmem>>, %arg4: memref<256x128xbf16, #tpu.memory_space<vmem>>, %arg5: memref<1x128xf32, #tpu.memory_space<vmem>>, %arg6: memref<1x128xf32, #tpu.memory_space<vmem>>, %arg7: memref<1x128xf32, #tpu.memory_space<vmem>>, %arg8: memref<1x64x128xf32, #tpu.memory_space<vmem>>) attributes {dimension_semantics = [#tpu.dimension_semantics<parallel>], iteration_bounds = array<i64: 2>, scalar_prefetch = 0 : i64, scratch_operands = 0 : i64, tpu.core_type = #tpu.core_type<tc>, window_params = [{transform_indices = @transform_0, window_bounds = array<i64: 1, 64, 256>}, {pipeline_mode = #tpu.pipeline_mode<synchronous>, transform_indices = @transform_1, window_bounds = array<i64: 256, 128>}, {transform_indices = @transform_2, window_bounds = array<i64: 1, 64, 256>}, {pipeline_mode = #tpu.pipeline_mode<synchronous>, transform_indices = @transform_3, window_bounds = array<i64: 256, 128>}, {pipeline_mode = #tpu.pipeline_mode<synchronous>, transform_indices = @transform_4, window_bounds = array<i64: 1, 128>}, {pipeline_mode = #tpu.pipeline_mode<synchronous>, transform_indices = @transform_5, window_bounds = array<i64: 1, 128>}, {pipeline_mode = #tpu.pipeline_mode<synchronous>, transform_indices = @transform_6, window_bounds = array<i64: 1, 128>}, {transform_indices = @transform_7, window_bounds = array<i64: 1, 64, 128>}]} {
    %c0 = arith.constant 0 : index
    %c0_0 = arith.constant 0 : index
    %c0_1 = arith.constant 0 : index
    %0 = vector.load %arg1[%c0, %c0_0, %c0_1] : memref<1x64x256xbf16, #tpu.memory_space<vmem>>, vector<1x64x256xbf16>
    %1 = vector.shape_cast %0 : vector<1x64x256xbf16> to vector<64x256xbf16>
    %c0_2 = arith.constant 0 : index
    %c0_3 = arith.constant 0 : index
    %2 = vector.load %arg2[%c0_2, %c0_3] : memref<256x128xbf16, #tpu.memory_space<vmem>>, vector<256x128xbf16>
    %cst = arith.constant dense<0.000000e+00> : vector<64x128xf32>
    %3 = tpu.matmul %1, %2, %cst {dimension_numbers = #tpu.dot_dimension_numbers<[1], [0], [0], [1], [0, 0, 1, 1], [], []>} : vector<64x256xbf16>, vector<256x128xbf16>, vector<64x128xf32> -> vector<64x128xf32>
    %c0_4 = arith.constant 0 : index
    %c0_5 = arith.constant 0 : index
    %c0_6 = arith.constant 0 : index
    %4 = vector.load %arg3[%c0_4, %c0_5, %c0_6] : memref<1x64x256xbf16, #tpu.memory_space<vmem>>, vector<1x64x256xbf16>
    %5 = vector.shape_cast %4 : vector<1x64x256xbf16> to vector<64x256xbf16>
    %c0_7 = arith.constant 0 : index
    %c0_8 = arith.constant 0 : index
    %6 = vector.load %arg4[%c0_7, %c0_8] : memref<256x128xbf16, #tpu.memory_space<vmem>>, vector<256x128xbf16>
    %cst_9 = arith.constant dense<0.000000e+00> : vector<64x128xf32>
    %7 = tpu.matmul %5, %6, %cst_9 {dimension_numbers = #tpu.dot_dimension_numbers<[1], [0], [0], [1], [0, 0, 1, 1], [], []>} : vector<64x256xbf16>, vector<256x128xbf16>, vector<64x128xf32> -> vector<64x128xf32>
    %8 = arith.addf %3, %7 : vector<64x128xf32>
    %c0_10 = arith.constant 0 : index
    %c0_11 = arith.constant 0 : index
    %9 = vector.load %arg5[%c0_10, %c0_11] : memref<1x128xf32, #tpu.memory_space<vmem>>, vector<1x128xf32>
    %10 = vector.broadcast %9 : vector<1x128xf32> to vector<64x128xf32>
    %11 = arith.addf %8, %10 : vector<64x128xf32>
    %cst_12 = arith.constant dense<0.000000e+00> : vector<128xf32>
    %12 = vector.multi_reduction <add>, %11, %cst_12 [0] : vector<64x128xf32> to vector<128xf32>
    %13 = vector.shape_cast %12 : vector<128xf32> to vector<1x128xf32>
    %14 = arith.mulf %11, %11 : vector<64x128xf32>
    %cst_13 = arith.constant dense<0.000000e+00> : vector<128xf32>
    %15 = vector.multi_reduction <add>, %14, %cst_13 [0] : vector<64x128xf32> to vector<128xf32>
    %16 = vector.shape_cast %15 : vector<128xf32> to vector<1x128xf32>
    %cst_14 = arith.constant 1.562500e-02 : f32
    %17 = vector.broadcast %cst_14 : f32 to vector<1x128xf32>
    %18 = arith.mulf %13, %17 : vector<1x128xf32>
    %cst_15 = arith.constant 1.562500e-02 : f32
    %19 = vector.broadcast %cst_15 : f32 to vector<1x128xf32>
    %20 = arith.mulf %16, %19 : vector<1x128xf32>
    %21 = arith.mulf %18, %18 : vector<1x128xf32>
    %22 = arith.subf %20, %21 : vector<1x128xf32>
    %cst_16 = arith.constant 0.000000e+00 : f32
    %23 = vector.broadcast %cst_16 : f32 to vector<1x128xf32>
    %24 = arith.maximumf %22, %23 : vector<1x128xf32>
    %25 = vector.broadcast %18 : vector<1x128xf32> to vector<64x128xf32>
    %26 = arith.subf %11, %25 : vector<64x128xf32>
    %cst_17 = arith.constant 9.99999974E-6 : f32
    %27 = vector.broadcast %cst_17 : f32 to vector<1x128xf32>
    %28 = arith.addf %24, %27 : vector<1x128xf32>
    %29 = math.rsqrt %28 : vector<1x128xf32>
    %30 = vector.broadcast %29 : vector<1x128xf32> to vector<64x128xf32>
    %31 = arith.mulf %26, %30 : vector<64x128xf32>
    %c0_18 = arith.constant 0 : index
    %c0_19 = arith.constant 0 : index
    %32 = vector.load %arg6[%c0_18, %c0_19] : memref<1x128xf32, #tpu.memory_space<vmem>>, vector<1x128xf32>
    %33 = vector.broadcast %32 : vector<1x128xf32> to vector<64x128xf32>
    %34 = arith.mulf %31, %33 : vector<64x128xf32>
    %c0_20 = arith.constant 0 : index
    %c0_21 = arith.constant 0 : index
    %35 = vector.load %arg7[%c0_20, %c0_21] : memref<1x128xf32, #tpu.memory_space<vmem>>, vector<1x128xf32>
    %36 = vector.broadcast %35 : vector<1x128xf32> to vector<64x128xf32>
    %37 = arith.addf %34, %36 : vector<64x128xf32>
    %cst_22 = arith.constant 0.000000e+00 : f32
    %38 = vector.broadcast %cst_22 : f32 to vector<64x128xf32>
    %39 = arith.cmpf oge, %37, %38 : vector<64x128xf32>
    %cst_23 = arith.constant 0.00999999977 : f32
    %40 = vector.broadcast %cst_23 : f32 to vector<64x128xf32>
    %41 = arith.mulf %40, %37 : vector<64x128xf32>
    %42 = arith.select %39, %37, %41 : vector<64x128xi1>, vector<64x128xf32>
    %c0_24 = arith.constant 0 : index
    %c0_25 = arith.constant 0 : index
    %c0_26 = arith.constant 0 : index
    %43 = vector.load %arg8[%c0_24, %c0_25, %c0_26] : memref<1x64x128xf32, #tpu.memory_space<vmem>>, vector<1x64x128xf32>
    %44 = vector.shape_cast %43 : vector<1x64x128xf32> to vector<64x128xf32>
    %45 = vector.shape_cast %42 : vector<64x128xf32> to vector<1x64x128xf32>
    tpu.vector_store %arg8[%c0_24, %c0_25, %c0_26], %45 {strides = array<i32>} : memref<1x64x128xf32, #tpu.memory_space<vmem>>, vector<1x64x128xf32>,
    return
  }
  func.func @transform_0(%arg0: i32) -> (i32, i32, i32) {
    %c0_i32 = arith.constant 0 : i32
    %c0_i32_0 = arith.constant 0 : i32
    %c0_i32_1 = arith.constant 0 : i32
    return %arg0, %c0_i32, %c0_i32_0 : i32, i32, i32
  }
  func.func @transform_1(%arg0: i32) -> (i32, i32) {
    %c0_i32 = arith.constant 0 : i32
    %c0_i32_0 = arith.constant 0 : i32
    %c0_i32_1 = arith.constant 0 : i32
    return %c0_i32, %c0_i32_0 : i32, i32
  }
  func.func @transform_2(%arg0: i32) -> (i32, i32, i32) {
    %c0_i32 = arith.constant 0 : i32
    %c0_i32_0 = arith.constant 0 : i32
    %c0_i32_1 = arith.constant 0 : i32
    return %arg0, %c0_i32, %c0_i32_0 : i32, i32, i32
  }
  func.func @transform_3(%arg0: i32) -> (i32, i32) {
    %c0_i32 = arith.constant 0 : i32
    %c0_i32_0 = arith.constant 0 : i32
    %c0_i32_1 = arith.constant 0 : i32
    return %c0_i32, %c0_i32_0 : i32, i32
  }
  func.func @transform_4(%arg0: i32) -> (i32, i32) {
    %c0_i32 = arith.constant 0 : i32
    %c0_i32_0 = arith.constant 0 : i32
    %c0_i32_1 = arith.constant 0 : i32
    return %c0_i32, %c0_i32_0 : i32, i32
  }
  func.func @transform_5(%arg0: i32) -> (i32, i32) {
    %c0_i32 = arith.constant 0 : i32
    %c0_i32_0 = arith.constant 0 : i32
    %c0_i32_1 = arith.constant 0 : i32
    return %c0_i32, %c0_i32_0 : i32, i32
  }
  func.func @transform_6(%arg0: i32) -> (i32, i32) {
    %c0_i32 = arith.constant 0 : i32
    %c0_i32_0 = arith.constant 0 : i32
    %c0_i32_1 = arith.constant 0 : i32
    return %c0_i32, %c0_i32_0 : i32, i32
  }
  func.func @transform_7(%arg0: i32) -> (i32, i32, i32) {
    %c0_i32 = arith.constant 0 : i32
    %c0_i32_0 = arith.constant 0 : i32
    %c0_i32_1 = arith.constant 0 : i32
    return %arg0, %c0_i32, %c0_i32_0 : i32, i32, i32
  }
}

module attributes {stable_mosaic.version = 11 : i64} {
  func.func @_gemm_bias_kernel(%arg0: i32, %arg1: memref<128x128xbf16, #tpu.memory_space<vmem>>, %arg2: memref<128x128xbf16, #tpu.memory_space<vmem>>, %arg3: memref<1x128xf32, #tpu.memory_space<vmem>>, %arg4: memref<128x128xf32, #tpu.memory_space<vmem>>) attributes {dimension_semantics = [#tpu.dimension_semantics<parallel>], iteration_bounds = array<i64: 1>, scalar_prefetch = 0 : i64, scratch_operands = 0 : i64, tpu.core_type = #tpu.core_type<tc>, window_params = [{transform_indices = @transform_0, window_bounds = array<i64: 128, 128>}, {pipeline_mode = #tpu.pipeline_mode<synchronous>, transform_indices = @transform_1, window_bounds = array<i64: 128, 128>}, {pipeline_mode = #tpu.pipeline_mode<synchronous>, transform_indices = @transform_2, window_bounds = array<i64: 1, 128>}, {transform_indices = @transform_3, window_bounds = array<i64: 128, 128>}]} {
    %c0 = arith.constant 0 : index
    %c0_0 = arith.constant 0 : index
    %0 = vector.load %arg1[%c0, %c0_0] : memref<128x128xbf16, #tpu.memory_space<vmem>>, vector<128x128xbf16>
    %c0_1 = arith.constant 0 : index
    %c0_2 = arith.constant 0 : index
    %1 = vector.load %arg2[%c0_1, %c0_2] : memref<128x128xbf16, #tpu.memory_space<vmem>>, vector<128x128xbf16>
    %cst = arith.constant dense<0.000000e+00> : vector<128x128xf32>
    %2 = tpu.matmul %0, %1, %cst {dimension_numbers = #tpu.dot_dimension_numbers<[1], [0], [0], [1], [0, 0, 1, 1], [], []>} : vector<128x128xbf16>, vector<128x128xbf16>, vector<128x128xf32> -> vector<128x128xf32>
    %c0_3 = arith.constant 0 : index
    %c0_4 = arith.constant 0 : index
    %3 = vector.load %arg3[%c0_3, %c0_4] : memref<1x128xf32, #tpu.memory_space<vmem>>, vector<1x128xf32>
    %4 = vector.broadcast %3 : vector<1x128xf32> to vector<128x128xf32>
    %5 = arith.addf %2, %4 : vector<128x128xf32>
    %c0_5 = arith.constant 0 : index
    %c0_6 = arith.constant 0 : index
    %6 = vector.load %arg4[%c0_5, %c0_6] : memref<128x128xf32, #tpu.memory_space<vmem>>, vector<128x128xf32>
    tpu.vector_store %arg4[%c0_5, %c0_6], %5 {strides = array<i32>} : memref<128x128xf32, #tpu.memory_space<vmem>>, vector<128x128xf32>,
    return
  }
  func.func @transform_0(%arg0: i32) -> (i32, i32) {
    %c0_i32 = arith.constant 0 : i32
    %c0_i32_0 = arith.constant 0 : i32
    return %arg0, %c0_i32 : i32, i32
  }
  func.func @transform_1(%arg0: i32) -> (i32, i32) {
    %c0_i32 = arith.constant 0 : i32
    %c0_i32_0 = arith.constant 0 : i32
    %c0_i32_1 = arith.constant 0 : i32
    return %c0_i32, %c0_i32_0 : i32, i32
  }
  func.func @transform_2(%arg0: i32) -> (i32, i32) {
    %c0_i32 = arith.constant 0 : i32
    %c0_i32_0 = arith.constant 0 : i32
    %c0_i32_1 = arith.constant 0 : i32
    return %c0_i32, %c0_i32_0 : i32, i32
  }
  func.func @transform_3(%arg0: i32) -> (i32, i32) {
    %c0_i32 = arith.constant 0 : i32
    %c0_i32_0 = arith.constant 0 : i32
    return %arg0, %c0_i32 : i32, i32
  }
}

module attributes {stable_mosaic.version = 11 : i64} {
  func.func @_conv_in_kernel(%arg0: i32, %arg1: memref<1x256x128xbf16, #tpu.memory_space<vmem>>, %arg2: memref<128x128xbf16, #tpu.memory_space<vmem>>, %arg3: memref<1x256x128xbf16, #tpu.memory_space<vmem>>, %arg4: memref<128x128xbf16, #tpu.memory_space<vmem>>, %arg5: memref<1x128xf32, #tpu.memory_space<vmem>>, %arg6: memref<1x128xf32, #tpu.memory_space<vmem>>, %arg7: memref<1x128xf32, #tpu.memory_space<vmem>>, %arg8: memref<1x256x128xf32, #tpu.memory_space<vmem>>) attributes {dimension_semantics = [#tpu.dimension_semantics<parallel>], iteration_bounds = array<i64: 2>, scalar_prefetch = 0 : i64, scratch_operands = 0 : i64, tpu.core_type = #tpu.core_type<tc>, window_params = [{transform_indices = @transform_0, window_bounds = array<i64: 1, 256, 128>}, {pipeline_mode = #tpu.pipeline_mode<synchronous>, transform_indices = @transform_1, window_bounds = array<i64: 128, 128>}, {transform_indices = @transform_2, window_bounds = array<i64: 1, 256, 128>}, {pipeline_mode = #tpu.pipeline_mode<synchronous>, transform_indices = @transform_3, window_bounds = array<i64: 128, 128>}, {pipeline_mode = #tpu.pipeline_mode<synchronous>, transform_indices = @transform_4, window_bounds = array<i64: 1, 128>}, {pipeline_mode = #tpu.pipeline_mode<synchronous>, transform_indices = @transform_5, window_bounds = array<i64: 1, 128>}, {pipeline_mode = #tpu.pipeline_mode<synchronous>, transform_indices = @transform_6, window_bounds = array<i64: 1, 128>}, {transform_indices = @transform_7, window_bounds = array<i64: 1, 256, 128>}]} {
    %c0 = arith.constant 0 : index
    %c0_0 = arith.constant 0 : index
    %c0_1 = arith.constant 0 : index
    %0 = vector.load %arg1[%c0, %c0_0, %c0_1] : memref<1x256x128xbf16, #tpu.memory_space<vmem>>, vector<1x256x128xbf16>
    %1 = vector.shape_cast %0 : vector<1x256x128xbf16> to vector<256x128xbf16>
    %c0_2 = arith.constant 0 : index
    %c0_3 = arith.constant 0 : index
    %2 = vector.load %arg2[%c0_2, %c0_3] : memref<128x128xbf16, #tpu.memory_space<vmem>>, vector<128x128xbf16>
    %cst = arith.constant dense<0.000000e+00> : vector<256x128xf32>
    %3 = tpu.matmul %1, %2, %cst {dimension_numbers = #tpu.dot_dimension_numbers<[1], [0], [0], [1], [0, 0, 1, 1], [], []>} : vector<256x128xbf16>, vector<128x128xbf16>, vector<256x128xf32> -> vector<256x128xf32>
    %c0_4 = arith.constant 0 : index
    %c0_5 = arith.constant 0 : index
    %c0_6 = arith.constant 0 : index
    %4 = vector.load %arg3[%c0_4, %c0_5, %c0_6] : memref<1x256x128xbf16, #tpu.memory_space<vmem>>, vector<1x256x128xbf16>
    %5 = vector.shape_cast %4 : vector<1x256x128xbf16> to vector<256x128xbf16>
    %c0_7 = arith.constant 0 : index
    %c0_8 = arith.constant 0 : index
    %6 = vector.load %arg4[%c0_7, %c0_8] : memref<128x128xbf16, #tpu.memory_space<vmem>>, vector<128x128xbf16>
    %cst_9 = arith.constant dense<0.000000e+00> : vector<256x128xf32>
    %7 = tpu.matmul %5, %6, %cst_9 {dimension_numbers = #tpu.dot_dimension_numbers<[1], [0], [0], [1], [0, 0, 1, 1], [], []>} : vector<256x128xbf16>, vector<128x128xbf16>, vector<256x128xf32> -> vector<256x128xf32>
    %8 = arith.addf %3, %7 : vector<256x128xf32>
    %c0_10 = arith.constant 0 : index
    %c0_11 = arith.constant 0 : index
    %9 = vector.load %arg5[%c0_10, %c0_11] : memref<1x128xf32, #tpu.memory_space<vmem>>, vector<1x128xf32>
    %10 = vector.broadcast %9 : vector<1x128xf32> to vector<256x128xf32>
    %11 = arith.addf %8, %10 : vector<256x128xf32>
    %cst_12 = arith.constant dense<0.000000e+00> : vector<128xf32>
    %12 = vector.multi_reduction <add>, %11, %cst_12 [0] : vector<256x128xf32> to vector<128xf32>
    %13 = vector.shape_cast %12 : vector<128xf32> to vector<1x128xf32>
    %14 = arith.mulf %11, %11 : vector<256x128xf32>
    %cst_13 = arith.constant dense<0.000000e+00> : vector<128xf32>
    %15 = vector.multi_reduction <add>, %14, %cst_13 [0] : vector<256x128xf32> to vector<128xf32>
    %16 = vector.shape_cast %15 : vector<128xf32> to vector<1x128xf32>
    %cst_14 = arith.constant 3.906250e-03 : f32
    %17 = vector.broadcast %cst_14 : f32 to vector<1x128xf32>
    %18 = arith.mulf %13, %17 : vector<1x128xf32>
    %cst_15 = arith.constant 3.906250e-03 : f32
    %19 = vector.broadcast %cst_15 : f32 to vector<1x128xf32>
    %20 = arith.mulf %16, %19 : vector<1x128xf32>
    %21 = arith.mulf %18, %18 : vector<1x128xf32>
    %22 = arith.subf %20, %21 : vector<1x128xf32>
    %cst_16 = arith.constant 0.000000e+00 : f32
    %23 = vector.broadcast %cst_16 : f32 to vector<1x128xf32>
    %24 = arith.maximumf %22, %23 : vector<1x128xf32>
    %25 = vector.broadcast %18 : vector<1x128xf32> to vector<256x128xf32>
    %26 = arith.subf %11, %25 : vector<256x128xf32>
    %cst_17 = arith.constant 9.99999974E-6 : f32
    %27 = vector.broadcast %cst_17 : f32 to vector<1x128xf32>
    %28 = arith.addf %24, %27 : vector<1x128xf32>
    %29 = math.rsqrt %28 : vector<1x128xf32>
    %30 = vector.broadcast %29 : vector<1x128xf32> to vector<256x128xf32>
    %31 = arith.mulf %26, %30 : vector<256x128xf32>
    %c0_18 = arith.constant 0 : index
    %c0_19 = arith.constant 0 : index
    %32 = vector.load %arg6[%c0_18, %c0_19] : memref<1x128xf32, #tpu.memory_space<vmem>>, vector<1x128xf32>
    %33 = vector.broadcast %32 : vector<1x128xf32> to vector<256x128xf32>
    %34 = arith.mulf %31, %33 : vector<256x128xf32>
    %c0_20 = arith.constant 0 : index
    %c0_21 = arith.constant 0 : index
    %35 = vector.load %arg7[%c0_20, %c0_21] : memref<1x128xf32, #tpu.memory_space<vmem>>, vector<1x128xf32>
    %36 = vector.broadcast %35 : vector<1x128xf32> to vector<256x128xf32>
    %37 = arith.addf %34, %36 : vector<256x128xf32>
    %cst_22 = arith.constant 0.000000e+00 : f32
    %38 = vector.broadcast %cst_22 : f32 to vector<256x128xf32>
    %39 = arith.cmpf oge, %37, %38 : vector<256x128xf32>
    %cst_23 = arith.constant 0.00999999977 : f32
    %40 = vector.broadcast %cst_23 : f32 to vector<256x128xf32>
    %41 = arith.mulf %40, %37 : vector<256x128xf32>
    %42 = arith.select %39, %37, %41 : vector<256x128xi1>, vector<256x128xf32>
    %c0_24 = arith.constant 0 : index
    %c0_25 = arith.constant 0 : index
    %c0_26 = arith.constant 0 : index
    %43 = vector.load %arg8[%c0_24, %c0_25, %c0_26] : memref<1x256x128xf32, #tpu.memory_space<vmem>>, vector<1x256x128xf32>
    %44 = vector.shape_cast %43 : vector<1x256x128xf32> to vector<256x128xf32>
    %45 = vector.shape_cast %42 : vector<256x128xf32> to vector<1x256x128xf32>
    tpu.vector_store %arg8[%c0_24, %c0_25, %c0_26], %45 {strides = array<i32>} : memref<1x256x128xf32, #tpu.memory_space<vmem>>, vector<1x256x128xf32>,
    return
  }
  func.func @transform_0(%arg0: i32) -> (i32, i32, i32) {
    %c0_i32 = arith.constant 0 : i32
    %c0_i32_0 = arith.constant 0 : i32
    %c0_i32_1 = arith.constant 0 : i32
    return %arg0, %c0_i32, %c0_i32_0 : i32, i32, i32
  }
  func.func @transform_1(%arg0: i32) -> (i32, i32) {
    %c0_i32 = arith.constant 0 : i32
    %c0_i32_0 = arith.constant 0 : i32
    %c0_i32_1 = arith.constant 0 : i32
    return %c0_i32, %c0_i32_0 : i32, i32
  }
  func.func @transform_2(%arg0: i32) -> (i32, i32, i32) {
    %c0_i32 = arith.constant 0 : i32
    %c0_i32_0 = arith.constant 0 : i32
    %c0_i32_1 = arith.constant 0 : i32
    return %arg0, %c0_i32, %c0_i32_0 : i32, i32, i32
  }
  func.func @transform_3(%arg0: i32) -> (i32, i32) {
    %c0_i32 = arith.constant 0 : i32
    %c0_i32_0 = arith.constant 0 : i32
    %c0_i32_1 = arith.constant 0 : i32
    return %c0_i32, %c0_i32_0 : i32, i32
  }
  func.func @transform_4(%arg0: i32) -> (i32, i32) {
    %c0_i32 = arith.constant 0 : i32
    %c0_i32_0 = arith.constant 0 : i32
    %c0_i32_1 = arith.constant 0 : i32
    return %c0_i32, %c0_i32_0 : i32, i32
  }
  func.func @transform_5(%arg0: i32) -> (i32, i32) {
    %c0_i32 = arith.constant 0 : i32
    %c0_i32_0 = arith.constant 0 : i32
    %c0_i32_1 = arith.constant 0 : i32
    return %c0_i32, %c0_i32_0 : i32, i32
  }
  func.func @transform_6(%arg0: i32) -> (i32, i32) {
    %c0_i32 = arith.constant 0 : i32
    %c0_i32_0 = arith.constant 0 : i32
    %c0_i32_1 = arith.constant 0 : i32
    return %c0_i32, %c0_i32_0 : i32, i32
  }
  func.func @transform_7(%arg0: i32) -> (i32, i32, i32) {
    %c0_i32 = arith.constant 0 : i32
    %c0_i32_0 = arith.constant 0 : i32
    %c0_i32_1 = arith.constant 0 : i32
    return %arg0, %c0_i32, %c0_i32_0 : i32, i32, i32
  }
}

module attributes {stable_mosaic.version = 11 : i64} {
  func.func @_gemm_bias_kernel(%arg0: i32, %arg1: memref<256x128xbf16, #tpu.memory_space<vmem>>, %arg2: memref<128x128xbf16, #tpu.memory_space<vmem>>, %arg3: memref<1x128xf32, #tpu.memory_space<vmem>>, %arg4: memref<256x128xf32, #tpu.memory_space<vmem>>) attributes {dimension_semantics = [#tpu.dimension_semantics<parallel>], iteration_bounds = array<i64: 2>, scalar_prefetch = 0 : i64, scratch_operands = 0 : i64, tpu.core_type = #tpu.core_type<tc>, window_params = [{transform_indices = @transform_0, window_bounds = array<i64: 256, 128>}, {pipeline_mode = #tpu.pipeline_mode<synchronous>, transform_indices = @transform_1, window_bounds = array<i64: 128, 128>}, {pipeline_mode = #tpu.pipeline_mode<synchronous>, transform_indices = @transform_2, window_bounds = array<i64: 1, 128>}, {transform_indices = @transform_3, window_bounds = array<i64: 256, 128>}]} {
    %c0 = arith.constant 0 : index
    %c0_0 = arith.constant 0 : index
    %0 = vector.load %arg1[%c0, %c0_0] : memref<256x128xbf16, #tpu.memory_space<vmem>>, vector<256x128xbf16>
    %c0_1 = arith.constant 0 : index
    %c0_2 = arith.constant 0 : index
    %1 = vector.load %arg2[%c0_1, %c0_2] : memref<128x128xbf16, #tpu.memory_space<vmem>>, vector<128x128xbf16>
    %cst = arith.constant dense<0.000000e+00> : vector<256x128xf32>
    %2 = tpu.matmul %0, %1, %cst {dimension_numbers = #tpu.dot_dimension_numbers<[1], [0], [0], [1], [0, 0, 1, 1], [], []>} : vector<256x128xbf16>, vector<128x128xbf16>, vector<256x128xf32> -> vector<256x128xf32>
    %c0_3 = arith.constant 0 : index
    %c0_4 = arith.constant 0 : index
    %3 = vector.load %arg3[%c0_3, %c0_4] : memref<1x128xf32, #tpu.memory_space<vmem>>, vector<1x128xf32>
    %4 = vector.broadcast %3 : vector<1x128xf32> to vector<256x128xf32>
    %5 = arith.addf %2, %4 : vector<256x128xf32>
    %c0_5 = arith.constant 0 : index
    %c0_6 = arith.constant 0 : index
    %6 = vector.load %arg4[%c0_5, %c0_6] : memref<256x128xf32, #tpu.memory_space<vmem>>, vector<256x128xf32>
    tpu.vector_store %arg4[%c0_5, %c0_6], %5 {strides = array<i32>} : memref<256x128xf32, #tpu.memory_space<vmem>>, vector<256x128xf32>,
    return
  }
  func.func @transform_0(%arg0: i32) -> (i32, i32) {
    %c0_i32 = arith.constant 0 : i32
    %c0_i32_0 = arith.constant 0 : i32
    return %arg0, %c0_i32 : i32, i32
  }
  func.func @transform_1(%arg0: i32) -> (i32, i32) {
    %c0_i32 = arith.constant 0 : i32
    %c0_i32_0 = arith.constant 0 : i32
    %c0_i32_1 = arith.constant 0 : i32
    return %c0_i32, %c0_i32_0 : i32, i32
  }
  func.func @transform_2(%arg0: i32) -> (i32, i32) {
    %c0_i32 = arith.constant 0 : i32
    %c0_i32_0 = arith.constant 0 : i32
    %c0_i32_1 = arith.constant 0 : i32
    return %c0_i32, %c0_i32_0 : i32, i32
  }
  func.func @transform_3(%arg0: i32) -> (i32, i32) {
    %c0_i32 = arith.constant 0 : i32
    %c0_i32_0 = arith.constant 0 : i32
    return %arg0, %c0_i32 : i32, i32
  }
}

</mosaic_0001>

<bundles_post_ra>
// kernel: residual_encoder_unet_forward.14
= control target key start
LH: loop header
LB: loop body
LE: loop exit
PB: predicated region body
PF: predicated region fallthrough
CT: control target
= control target key end

     0   :  { %s1224_s18 = smov 0   ;;  %s1864_s0 = inlined_call_operand.vmem [shape: bf16[2,256,128], index: 0, kind: input, shape index: {}]   ;;  %s1865_s1 = inlined_call_operand.vmem [shape: bf16[128,128], index: 1, kind: input, shape index: {}]   ;;  %s1866_s2 = inlined_call_operand.vmem [shape: f32[1,128], index: 2, kind: input, shape index: {}]   ;;  %s1867_s3 = inlined_call_operand.vmem [shape: f32[1,128], index: 3, kind: input, shape index: {}]   ;;  %s1868_s4 = inlined_call_operand.vmem [shape: f32[1,128], index: 4, kind: input, shape index: {}]   ;;  %s1869_s5 = inlined_call_operand.vmem [shape: f32[2,256,128], index: 5, kind: output, shape index: {}]  }
   0x1 LB: > { %s1024_s19 = sadd.s32 4294967295, %s1192_s18   ;;  %p1028_p0 = scmp.ge.s32.totalorder %s1192_s18, 1  ;;  %s1192_s18 = sphi %s1224_s18, %s15_s18  }
   0x2   : > { %p187_p1 = scmp.lt.s32.totalorder %s1192_s18, 3 }
   0x4   : > { %p188_p2 = pnand %p1028_p0, %p187_p1 }
   0x5   : > { %v1160_v0 = vld [vmem:[%s1865_s1] sm:$0xff] (!%p188_p2)   ;;  %p215_p3 = scmp.lt.s32.totalorder (!%p188_p2), %s1024_s19, 1  ;;  %v1161_v1 = vld [vmem:[%s1865_s1 + $0x8] sm:$0xff] (!%p188_p2)   ;;  %v1162_v2 = vld [vmem:[%s1865_s1 + $0x10] sm:$0xff] (!%p188_p2)  }
   0x6   : > { %191 = sbr.rel (%p188_p2) target bundleno = 403 (0x193), region = 40  ;;  %1088 = vmatprep.subr.bf16.mxu0 (!%p188_p2), %v1160_v0  ;;  %1136 = vmatprep.subr.bf16.mxu1 (!%p188_p2), %v1160_v0  ;;  %v1163_v3 = vld [vmem:[%s1865_s1 + $0x18] sm:$0xff] (!%p188_p2)   ;;  %v1164_v5 = vld [vmem:[%s1865_s1 + $0x20] sm:$0xff] (!%p188_p2)   ;;  %v1165_v6 = vld [vmem:[%s1865_s1 + $0x28] sm:$0xff] (!%p188_p2)  }
   0x7   : > { %1089 = vmatpush3.bf16.msra.mxu0 (!%p188_p2), %v1160_v0  ;;  %1144 = vmatpush3.bf16.msra.mxu1 (!%p188_p2), %v1160_v0  ;;  %v1166_v8 = vld [vmem:[%s1865_s1 + $0x30] sm:$0xff] (!%p188_p2)   ;;  %v1167_v9 = vld [vmem:[%s1865_s1 + $0x38] sm:$0xff] (!%p188_p2)   ;;  %v1283_v24 = vld [vmem:[%s1866_s2] ss:$0 sm:$0xff] (!%p188_p2) }
   0x8   : > { %1090 = vmatprep.subr.bf16.mxu0 (!%p188_p2), %v1161_v1  ;;  %1137 = vmatprep.subr.bf16.mxu1 (!%p188_p2), %v1161_v1 }
   0xb   : > { %1091 = vmatpush3.bf16.msra.mxu0 (!%p188_p2), %v1161_v1  ;;  %1145 = vmatpush3.bf16.msra.mxu1 (!%p188_p2), %v1161_v1 }
   0xc   : > { %1092 = vmatprep.subr.bf16.mxu0 (!%p188_p2), %v1162_v2  ;;  %1138 = vmatprep.subr.bf16.mxu1 (!%p188_p2), %v1162_v2 }
   0xd   : > { %s1885_s19 = smov (!%p215_p3, %s1024_s19), 1 }
   0xe   : > { %s1062_s26 = sshll.u32 %s1885_s19, 7  ;;  %s1063_s23 = sshll.u32 %s1885_s19, 8 }
   0xf   : > { %s1247_s29 = scalar_lea.vmem %s1864_s0, %s1062_s26  ;;  %1093 = vmatpush3.bf16.msra.mxu0 %v1162_v2  ;;  %1146 = vmatpush3.bf16.msra.mxu1 %v1162_v2  ;;  %s1673_s25 = scalar_lea.vmem %s1869_s5, %s1063_s23 }
  0x10   : > { %v1168_v4 = vld [vmem:[%s1247_s29] sm:$0xff]   ;;  %1094 = vmatprep.subr.bf16.mxu0 %v1163_v3  ;;  %1139 = vmatprep.subr.bf16.mxu1 %v1163_v3  ;;  %v1169_v10 = vld [vmem:[%s1247_s29 + $0x8] sm:$0xff]   ;;  %v1170_v12 = vld [vmem:[%s1247_s29 + $0x10] sm:$0xff]  }
  0x11   : > { %1104 = vmatprep.mubr.bf16.mxu0 %v1168_v4  ;;  %v1176_v7 = vld [vmem:[%s1247_s29 + $0x40] sm:$0xff]   ;;  %v1177_v11 = vld [vmem:[%s1247_s29 + $0x48] sm:$0xff]   ;;  %v1178_v13 = vld [vmem:[%s1247_s29 + $0x50] sm:$0xff]  }
  0x12   : > { %1120 = vmatprep.mubr.bf16.mxu1 %v1176_v7  ;;  %v1171_v14 = vld [vmem:[%s1247_s29 + $0x18] sm:$0xff]   ;;  %v1172_v16 = vld [vmem:[%s1247_s29 + $0x20] sm:$0xff]   ;;  %v1173_v18 = vld [vmem:[%s1247_s29 + $0x28] sm:$0xff]  }
  0x13   : > { %1095 = vmatpush3.bf16.msra.mxu0 %v1163_v3  ;;  %1147 = vmatpush3.bf16.msra.mxu1 %v1163_v3  ;;  %v1179_v15 = vld [vmem:[%s1247_s29 + $0x58] sm:$0xff]   ;;  %v1180_v17 = vld [vmem:[%s1247_s29 + $0x60] sm:$0xff]   ;;  %v1181_v19 = vld [vmem:[%s1247_s29 + $0x68] sm:$0xff]  }
  0x14   : > { %1096 = vmatprep.subr.bf16.mxu0 %v1164_v5  ;;  %1140 = vmatprep.subr.bf16.mxu1 %v1164_v5  ;;  %v1174_v20 = vld [vmem:[%s1247_s29 + $0x30] sm:$0xff]   ;;  %v1175_v22 = vld [vmem:[%s1247_s29 + $0x38] sm:$0xff]  }
  0x15   : > { %v1182_v21 = vld [vmem:[%s1247_s29 + $0x70] sm:$0xff]   ;;  %v1183_v23 = vld [vmem:[%s1247_s29 + $0x78] sm:$0xff]  }
  0x17   : > { %1097 = vmatpush3.bf16.msra.mxu0 %v1164_v5  ;;  %1148 = vmatpush3.bf16.msra.mxu1 %v1164_v5 }
  0x18   : > { %1098 = vmatprep.subr.bf16.mxu0 %v1165_v6  ;;  %1141 = vmatprep.subr.bf16.mxu1 %v1165_v6 }
  0x1b   : > { %1099 = vmatpush3.bf16.msra.mxu0 %v1165_v6  ;;  %1149 = vmatpush3.bf16.msra.mxu1 %v1165_v6 }
  0x1c   : > { %1100 = vmatprep.subr.bf16.mxu0 %v1166_v8  ;;  %1142 = vmatprep.subr.bf16.mxu1 %v1166_v8 }
  0x1f   : > { %1101 = vmatpush3.bf16.msra.mxu0 %v1166_v8  ;;  %1150 = vmatpush3.bf16.msra.mxu1 %v1166_v8 }
  0x20   : > { %1102 = vmatprep.subr.bf16.mxu0 %v1167_v9  ;;  %1143 = vmatprep.subr.bf16.mxu1 %v1167_v9 }
  0x23   : > { %1103 = vmatpush3.bf16.msra.mxu0 %v1167_v9  ;;  %1151 = vmatpush3.bf16.msra.mxu1 %v1167_v9 }
  0x26   : > { %1105 = vmatmul.mubr.bf16.vlgmr.msra.gmra.mrb[0].mxu0 %v1169_v10  ;;  %1121 = vmatmul.mubr.bf16.vlgmr.msra.gmra.mrb[0].mxu1 %v1177_v11 }
  0x27   : > { %1108 = vmatprep.mubr.bf16.mxu0 %v1170_v12  ;;  %1124 = vmatprep.mubr.bf16.mxu1 %v1178_v13 }
  0x2e   : > { %1109 = vmatmul.mubr.bf16.gmra.mrb[4].mxu0 %v1171_v14  ;;  %1125 = vmatmul.mubr.bf16.gmra.mrb[4].mxu1 %v1179_v15 }
  0x2f   : > { %1112 = vmatprep.mubr.bf16.mxu0 %v1172_v16  ;;  %1128 = vmatprep.mubr.bf16.mxu1 %v1180_v17 }
  0x36   : > { %1113 = vmatmul.mubr.bf16.gmra.mrb[8].mxu0 %v1173_v18  ;;  %1129 = vmatmul.mubr.bf16.gmra.mrb[8].mxu1 %v1181_v19 }
  0x37   : > { %1116 = vmatprep.mubr.bf16.mxu0 %v1174_v20  ;;  %1132 = vmatprep.mubr.bf16.mxu1 %v1182_v21 }
  0x3e   : > { %1117 = vmatmul.mubr.bf16.gmra.mrb[12].mxu0 %v1175_v22  ;;  %1133 = vmatmul.mubr.bf16.gmra.mrb[12].mxu1 %v1183_v23 }
  0xf9   : > { %v1106_v25 = vpop.f32.mrb[0].mxu0  ;;  %v1285_v26 = vpop.f32.mrb[0].mxu1 }
  0xfa   : > { %v459_v27 = vpop.f32.mrb[1].mxu0  ;;  %v1287_v28 = vpop.f32.mrb[1].mxu1  ;;  %v1297_v34 = vadd.f32 %v1106_v25, %v1283_v24 }
  0xfb   : > { %v1290_v29 = vadd.f32 %v1283_v24, %v459_v27  ;;  %v1107_v30 = vpop.f32.mrb[2].mxu0  ;;  %v1292_v31 = vpop.f32.mrb[2].mxu1 }
  0xfc   : > { %v462_v32 = vpop.f32.mrb[3].mxu0  ;;  %v1294_v33 = vpop.f32.mrb[3].mxu1  ;;  %v1305_v37 = vadd.f32 %v1107_v30, %v1283_v24  ;;  %v625_v40 = vmul.f32 %v1297_v34, %v1297_v34 }
  0xfd   : > { %v1300_v35 = vadd.f32 %v1283_v24, %v462_v32  ;;  %v623_v36 = vmul.f32 %v1290_v29, %v1290_v29 }
  0xfe   : > { %v626_v47 = vmul.f32 %v1305_v37, %v1305_v37 }
  0xff   : > { %v586_v38 = vadd.f32 %v1300_v35, %v1290_v29  ;;  %v624_v39 = vmul.f32 %v1300_v35, %v1300_v35 }
 0x101   : > { %v587_v41 = vadd.f32 %v586_v38, %v1297_v34  ;;  %v655_v42 = vadd.f32 %v624_v39, %v623_v36  ;;  %v1110_v43 = vpop.f32.mrb[4].mxu0  ;;  %v1314_v44 = vpop.f32.mrb[4].mxu1 }
 0x102   : > { %v475_v45 = vpop.f32.mrb[5].mxu0  ;;  %v1316_v46 = vpop.f32.mrb[5].mxu1  ;;  %v1327_v53 = vadd.f32 %v1110_v43, %v1283_v24 }
 0x103   : > { %v656_v48 = vadd.f32 %v655_v42, %v625_v40  ;;  %v1321_v49 = vadd.f32 %v1283_v24, %v475_v45  ;;  %v588_v50 = vadd.f32 %v587_v41, %v1305_v37  ;;  %v1111_v51 = vpop.f32.mrb[6].mxu0  ;;  %v1324_v52 = vpop.f32.mrb[6].mxu1 }
 0x104   : > { %v478_v54 = vpop.f32.mrb[7].mxu0  ;;  %v1329_v55 = vpop.f32.mrb[7].mxu1  ;;  %v1338_v61 = vadd.f32 %v1111_v51, %v1283_v24  ;;  %v629_v0 = vmul.f32 %v1327_v53, %v1327_v53 }
 0x105   : > { %v589_v56 = vadd.f32 %v588_v50, %v1321_v49  ;;  %v627_v57 = vmul.f32 %v1321_v49, %v1321_v49  ;;  %v657_v58 = vadd.f32 %v656_v48, %v626_v47  ;;  %v1335_v59 = vadd.f32 %v1283_v24, %v478_v54 }
 0x106   : > { %v630_v7 = vmul.f32 %v1338_v61, %v1338_v61 }
 0x107   : > { %v658_v60 = vadd.f32 %v657_v58, %v627_v57  ;;  %v590_v62 = vadd.f32 %v589_v56, %v1335_v59  ;;  %v628_v63 = vmul.f32 %v1335_v59, %v1335_v59 }
 0x109   : > { %v591_v1 = vadd.f32 %v590_v62, %v1327_v53  ;;  %v659_v2 = vadd.f32 %v658_v60, %v628_v63  ;;  %v1114_v3 = vpop.f32.mrb[8].mxu0  ;;  %v1346_v4 = vpop.f32.mrb[8].mxu1  ;;  %v1403_v60 = vadd.f32 %v1283_v24, %v1287_v28 }
 0x10a   : > { %v491_v5 = vpop.f32.mrb[9].mxu0  ;;  %v1348_v6 = vpop.f32.mrb[9].mxu1  ;;  %v1359_v13 = vadd.f32 %v1114_v3, %v1283_v24 }
 0x10b   : > { %v660_v8 = vadd.f32 %v659_v2, %v629_v0  ;;  %v1353_v9 = vadd.f32 %v1283_v24, %v491_v5  ;;  %v592_v10 = vadd.f32 %v591_v1, %v1338_v61  ;;  %v1115_v11 = vpop.f32.mrb[10].mxu0  ;;  %v1356_v12 = vpop.f32.mrb[10].mxu1 }
 0x10c   : > { %v494_v14 = vpop.f32.mrb[11].mxu0  ;;  %v1361_v15 = vpop.f32.mrb[11].mxu1  ;;  %v1370_v21 = vadd.f32 %v1115_v11, %v1283_v24  ;;  %v633_v25 = vmul.f32 %v1359_v13, %v1359_v13  ;;  %v1421_v11 = vadd.f32 %v1283_v24, %v1294_v33  ;;  %v1437_v33 = vadd.f32 %v1283_v24, %v1316_v46 }
 0x10d   : > { %v593_v16 = vadd.f32 %v592_v10, %v1353_v9  ;;  %v631_v17 = vmul.f32 %v1353_v9, %v1353_v9  ;;  %v661_v18 = vadd.f32 %v660_v8, %v630_v7  ;;  %v1367_v19 = vadd.f32 %v1283_v24, %v494_v14 }
 0x10e   : > { %v634_v40 = vmul.f32 %v1370_v21, %v1370_v21  ;;  %v639_v7 = vmul.f32 %v1403_v60, %v1403_v60  ;;  %v1425_v14 = vadd.f32 %v1285_v26, %v1283_v24  ;;  %v1453_v46 = vadd.f32 %v1314_v44, %v1283_v24 }
 0x10f   : > { %v662_v20 = vadd.f32 %v661_v18, %v631_v17  ;;  %v594_v22 = vadd.f32 %v593_v16, %v1367_v19  ;;  %v632_v23 = vmul.f32 %v1367_v19, %v1367_v19  ;;  %v1430_v18 = vadd.f32 %v1292_v31, %v1283_v24 }
 0x110   : > { %v641_v26 = vmul.f32 %v1425_v14, %v1425_v14  ;;  %v645_v44 = vmul.f32 %v1453_v46, %v1453_v46 }
 0x111   : > { %v595_v27 = vadd.f32 %v594_v22, %v1359_v13  ;;  %v663_v30 = vadd.f32 %v662_v20, %v632_v23  ;;  %v1118_v32 = vpop.f32.mrb[12].mxu0  ;;  %v1378_v36 = vpop.f32.mrb[12].mxu1  ;;  %v640_v23 = vmul.f32 %v1421_v11, %v1421_v11  ;;  %v642_v31 = vmul.f32 %v1430_v18, %v1430_v18 }
 0x112   : > { %v507_v38 = vpop.f32.mrb[13].mxu0  ;;  %v1380_v39 = vpop.f32.mrb[13].mxu1  ;;  %v1391_v48 = vadd.f32 %v1118_v32, %v1283_v24 }
 0x113   : > { %v664_v41 = vadd.f32 %v663_v30, %v633_v25  ;;  %v1385_v42 = vadd.f32 %v1283_v24, %v507_v38  ;;  %v596_v43 = vadd.f32 %v595_v27, %v1370_v21  ;;  %v1119_v45 = vpop.f32.mrb[14].mxu0  ;;  %v1388_v47 = vpop.f32.mrb[14].mxu1  ;;  %v643_v38 = vmul.f32 %v1437_v33, %v1437_v33 }
 0x114   : > { %v510_v50 = vpop.f32.mrb[15].mxu0  ;;  %v1393_v51 = vpop.f32.mrb[15].mxu1  ;;  %v1406_v63 = vadd.f32 %v1119_v45, %v1283_v24  ;;  %v637_v2 = vmul.f32 %v1391_v48, %v1391_v48  ;;  %v1458_v45 = vadd.f32 %v1324_v52, %v1283_v24 }
 0x115   : > { %v597_v54 = vadd.f32 %v596_v43, %v1385_v42  ;;  %v635_v56 = vmul.f32 %v1385_v42, %v1385_v42  ;;  %v665_v57 = vadd.f32 %v664_v41, %v634_v40  ;;  %v1399_v58 = vadd.f32 %v1283_v24, %v510_v50 }
 0x116   : > { %v638_v28 = vmul.f32 %v1406_v63, %v1406_v63  ;;  %v1449_v40 = vadd.f32 %v1283_v24, %v1329_v55  ;;  %v1465_v55 = vadd.f32 %v1283_v24, %v1348_v6  ;;  %v646_v52 = vmul.f32 %v1458_v45, %v1458_v45 }
 0x117   : > { %v666_v62 = vadd.f32 %v665_v57, %v635_v56  ;;  %v598_v0 = vadd.f32 %v597_v54, %v1399_v58  ;;  %v636_v1 = vmul.f32 %v1399_v58, %v1399_v58  ;;  %v1481_v6 = vadd.f32 %v1346_v4, %v1283_v24 }
 0x118   : > { %v644_v56 = vmul.f32 %v1449_v40, %v1449_v40 }
 0x119   : > { %v599_v3 = vadd.f32 %v598_v0, %v1391_v48  ;;  %v667_v5 = vadd.f32 %v666_v62, %v636_v1  ;;  %v649_v4 = vmul.f32 %v1481_v6, %v1481_v6 }
 0x11b   : > { %v668_v8 = vadd.f32 %v667_v5, %v637_v2  ;;  %v600_v10 = vadd.f32 %v599_v3, %v1406_v63  ;;  %v647_v2 = vmul.f32 %v1465_v55, %v1465_v55  ;;  %v1477_v3 = vadd.f32 %v1283_v24, %v1361_v15 }
 0x11c   : > { %v1493_v15 = vadd.f32 %v1283_v24, %v1380_v39  ;;  %v1509_v39 = vadd.f32 %v1378_v36, %v1283_v24 }
 0x11d   : > { %v601_v16 = vadd.f32 %v600_v10, %v1403_v60  ;;  %v669_v17 = vadd.f32 %v668_v8, %v638_v28  ;;  %v1486_v28 = vadd.f32 %v1356_v12, %v1283_v24 }
 0x11f   : > { %v670_v20 = vadd.f32 %v669_v17, %v639_v7  ;;  %v602_v22 = vadd.f32 %v601_v16, %v1421_v11  ;;  %v648_v16 = vmul.f32 %v1477_v3, %v1477_v3  ;;  %v650_v12 = vmul.f32 %v1486_v28, %v1486_v28 }
 0x121   : > { %v603_v25 = vadd.f32 %v602_v22, %v1425_v14  ;;  %v671_v27 = vadd.f32 %v670_v20, %v640_v23 }
 0x123   : > { %v672_v30 = vadd.f32 %v671_v27, %v641_v26  ;;  %v604_v32 = vadd.f32 %v603_v25, %v1430_v18  ;;  %v651_v26 = vmul.f32 %v1493_v15, %v1493_v15  ;;  %v1505_v25 = vadd.f32 %v1283_v24, %v1393_v51 }
 0x124   : > { %v653_v51 = vmul.f32 %v1509_v39, %v1509_v39 }
 0x125   : > { %v605_v41 = vadd.f32 %v604_v32, %v1437_v33  ;;  %v673_v43 = vadd.f32 %v672_v30, %v642_v31  ;;  %v1514_v32 = vadd.f32 %v1388_v47, %v1283_v24 }
 0x127   : > { %v674_v50 = vadd.f32 %v673_v43, %v643_v38  ;;  %v606_v54 = vadd.f32 %v605_v41, %v1449_v40  ;;  %v652_v41 = vmul.f32 %v1505_v25, %v1505_v25 }
 0x129   : > { %v607_v57 = vadd.f32 %v606_v54, %v1453_v46  ;;  %v675_v62 = vadd.f32 %v674_v50, %v644_v56  ;;  %v654_v50 = vmul.f32 %v1514_v32, %v1514_v32 }
 0x12b   : > { %v676_v0 = vadd.f32 %v675_v62, %v645_v44  ;;  %v608_v1 = vadd.f32 %v607_v57, %v1458_v45 }
 0x12d   : > { %v609_v5 = vadd.f32 %v608_v1, %v1465_v55  ;;  %v677_v7 = vadd.f32 %v676_v0, %v646_v52 }
 0x12f   : > { %v678_v8 = vadd.f32 %v677_v7, %v647_v2  ;;  %v610_v10 = vadd.f32 %v609_v5, %v1477_v3 }
 0x131   : > { %v611_v17 = vadd.f32 %v610_v10, %v1481_v6  ;;  %v679_v20 = vadd.f32 %v678_v8, %v648_v16 }
 0x133   : > { %v680_v22 = vadd.f32 %v679_v20, %v649_v4  ;;  %v612_v23 = vadd.f32 %v611_v17, %v1486_v28 }
 0x135   : > { %v613_v27 = vadd.f32 %v612_v23, %v1493_v15  ;;  %v681_v31 = vadd.f32 %v680_v22, %v650_v12 }
 0x137   : > { %v682_v30 = vadd.f32 %v681_v31, %v651_v26  ;;  %v614_v38 = vadd.f32 %v613_v27, %v1505_v25 }
 0x139   : > { %v615_v43 = vadd.f32 %v614_v38, %v1509_v39  ;;  %v683_v36 = vadd.f32 %v682_v30, %v652_v41 }
 0x13b   : > { %v616_v54 = vadd.f32 %v615_v43, %v1514_v32  ;;  %v684_v56 = vadd.f32 %v683_v36, %v653_v51 }
 0x13d   : > { %v617_v44 = vrot.slane %v616_v54, 4  ;;  %v685_v24 = vadd.f32 %v684_v56, %v654_v50 }
 0x13f   : > { %v618_v47 = vadd.f32 %v617_v44, %v616_v54  ;;  %v686_v57 = vrot.slane %v685_v24, 4 }
 0x141   : > { %v619_v62 = vrot.slane %v618_v47, 2  ;;  %v687_v52 = vadd.f32 %v686_v57, %v685_v24 }
 0x143   : > { %v620_v0 = vadd.f32 %v619_v62, %v618_v47  ;;  %v688_v1 = vrot.slane %v687_v52, 2 }
 0x145   : > { %v621_v2 = vrot.slane %v620_v0, 1  ;;  %v689_v5 = vadd.f32 %v688_v1, %v687_v52 }
 0x147   : > { %v622_v7 = vadd.f32 %v621_v2, %v620_v0  ;;  %v690_v8 = vrot.slane %v689_v5, 1 }
 0x149   : > { %v691_v10 = vadd.f32 %v690_v8, %v689_v5  ;;  %v1525_v16 = vmul.f32 0.00390625, %v622_v7 }
 0x14b   : > { %v693_v4 = vmul.f32 0.00390625, %v691_v10  ;;  %v694_v17 = vmul.f32 %v1525_v16, %v1525_v16  ;;  %v705_v12 = vsub.f32 %v1353_v9, %v1525_v16  ;;  %v706_v22 = vsub.f32 %v1367_v19, %v1525_v16 }
 0x14c   : > { %v708_v23 = vsub.f32 %v1370_v21, %v1525_v16  ;;  %v709_v26 = vsub.f32 %v1385_v42, %v1525_v16  ;;  %v710_v27 = vsub.f32 %v1399_v58, %v1525_v16  ;;  %v711_v31 = vsub.f32 %v1391_v48, %v1525_v16 }
 0x14d   : > { %v695_v20 = vsub.f32 %v693_v4, %v694_v17  ;;  %v712_v30 = vsub.f32 %v1406_v63, %v1525_v16  ;;  %v718_v9 = vsub.f32 %v1449_v40, %v1525_v16  ;;  %v719_v19 = vsub.f32 %v1453_v46, %v1525_v16 }
 0x14e   : > { %v720_v21 = vsub.f32 %v1458_v45, %v1525_v16  ;;  %v721_v42 = vsub.f32 %v1465_v55, %v1525_v16  ;;  %v722_v58 = vsub.f32 %v1477_v3, %v1525_v16  ;;  %v723_v48 = vsub.f32 %v1481_v6, %v1525_v16 }
 0x14f   : > { %v696_v38 = vmax.f32 %v695_v20, 0.0  ;;  %v724_v63 = vsub.f32 %v1486_v28, %v1525_v16  ;;  %v725_v40 = vsub.f32 %v1493_v15, %v1525_v16  ;;  %v726_v46 = vsub.f32 %v1505_v25, %v1525_v16 }
 0x150   : > { %v727_v45 = vsub.f32 %v1509_v39, %v1525_v16  ;;  %v728_v55 = vsub.f32 %v1514_v32, %v1525_v16  ;;  %v697_v3 = vsub.f32 %v1290_v29, %v1525_v16  ;;  %v698_v6 = vsub.f32 %v1300_v35, %v1525_v16 }
 0x151   : > { %v729_v41 = vadd.f32 1e-05, %v696_v38  ;;  %v699_v28 = vsub.f32 %v1297_v34, %v1525_v16  ;;  %v700_v15 = vsub.f32 %v1305_v37, %v1525_v16  ;;  %v701_v25 = vsub.f32 %v1321_v49, %v1525_v16 }
 0x152   : > { %v702_v39 = vsub.f32 %v1335_v59, %v1525_v16  ;;  %v703_v32 = vsub.f32 %v1327_v53, %v1525_v16  ;;  %v704_v29 = vsub.f32 %v1338_v61, %v1525_v16  ;;  %v707_v35 = vsub.f32 %v1359_v13, %v1525_v16 }
 0x153   : > { %1184 = vrsqrt.f32 %v729_v41  ;;  %v713_v34 = vsub.f32 %v1403_v60, %v1525_v16  ;;  %v714_v37 = vsub.f32 %v1421_v11, %v1525_v16  ;;  %v715_v49 = vsub.f32 %v1425_v14, %v1525_v16 }
 0x154   : > { %v716_v59 = vsub.f32 %v1430_v18, %v1525_v16  ;;  %v717_v53 = vsub.f32 %v1437_v33, %v1525_v16 }
 0x15d   : > { %v1185_v51 = vpop.eup %1184 }
 0x15e   : > { %v731_v61 = vmul.f32 %v1185_v51, %v697_v3  ;;  %v732_v43 = vmul.f32 %v1185_v51, %v698_v6  ;;  %v733_v36 = vmul.f32 %v1185_v51, %v699_v28  ;;  %v734_v13 = vmul.f32 %v1185_v51, %v700_v15 }
 0x15f   : > { %v735_v50 = vmul.f32 %v1185_v51, %v701_v25  ;;  %v736_v54 = vmul.f32 %v1185_v51, %v702_v39  ;;  %v737_v60 = vmul.f32 %v1185_v51, %v703_v32  ;;  %v738_v56 = vmul.f32 %v1185_v51, %v704_v29 }
 0x160   : > { %v739_v44 = vmul.f32 %v1185_v51, %v705_v12  ;;  %v740_v24 = vmul.f32 %v1185_v51, %v706_v22  ;;  %v741_v11 = vmul.f32 %v1185_v51, %v707_v35  ;;  %v742_v47 = vmul.f32 %v1185_v51, %v708_v23  ;;  %v1059_v35 = vld [vmem:[%s1868_s4] ss:$0 sm:$0xff] }
 0x161   : > { %v743_v57 = vmul.f32 %v1185_v51, %v709_v26  ;;  %v744_v14 = vmul.f32 %v1185_v51, %v710_v27  ;;  %v745_v62 = vmul.f32 %v1185_v51, %v711_v31  ;;  %v746_v52 = vmul.f32 %v1185_v51, %v712_v30  ;;  %v1058_v26 = vld [vmem:[%s1867_s3] ss:$0 sm:$0xff] }
 0x162   : > { %v747_v18 = vmul.f32 %v1185_v51, %v713_v34  ;;  %v748_v0 = vmul.f32 %v1185_v51, %v714_v37  ;;  %v749_v1 = vmul.f32 %v1185_v51, %v715_v49  ;;  %v750_v33 = vmul.f32 %v1185_v51, %v716_v59 }
 0x163   : > { %v751_v2 = vmul.f32 %v1185_v51, %v717_v53  ;;  %v752_v5 = vmul.f32 %v1185_v51, %v718_v9  ;;  %v753_v7 = vmul.f32 %v1185_v51, %v719_v19  ;;  %v754_v8 = vmul.f32 %v1185_v51, %v720_v21 }
 0x164   : > { %v755_v10 = vmul.f32 %v1185_v51, %v721_v42  ;;  %v756_v16 = vmul.f32 %v1185_v51, %v722_v58  ;;  %v757_v4 = vmul.f32 %v1185_v51, %v723_v48  ;;  %v758_v17 = vmul.f32 %v1185_v51, %v724_v63 }
 0x165   : > { %v759_v20 = vmul.f32 %v1185_v51, %v725_v40  ;;  %v760_v12 = vmul.f32 %v1185_v51, %v726_v46  ;;  %v761_v22 = vmul.f32 %v1185_v51, %v727_v45  ;;  %v762_v23 = vmul.f32 %v1185_v51, %v728_v55 }
 0x166   : > { %v770_v27 = vmul.f32 %v1058_v26, %v731_v61  ;;  %v771_v31 = vmul.f32 %v1058_v26, %v732_v43  ;;  %v772_v30 = vmul.f32 %v1058_v26, %v733_v36  ;;  %v773_v38 = vmul.f32 %v1058_v26, %v734_v13 }
 0x167   : > { %v774_v41 = vmul.f32 %v1058_v26, %v735_v50  ;;  %v775_v9 = vmul.f32 %v1058_v26, %v736_v54  ;;  %v776_v19 = vmul.f32 %v1058_v26, %v737_v60  ;;  %v777_v21 = vmul.f32 %v1058_v26, %v738_v56 }
 0x168   : > { %v778_v42 = vmul.f32 %v1058_v26, %v739_v44  ;;  %v779_v58 = vmul.f32 %v1058_v26, %v740_v24  ;;  %v780_v48 = vmul.f32 %v1058_v26, %v741_v11  ;;  %v781_v63 = vmul.f32 %v1058_v26, %v742_v47 }
 0x169   : > { %v782_v40 = vmul.f32 %v1058_v26, %v743_v57  ;;  %v783_v46 = vmul.f32 %v1058_v26, %v744_v14  ;;  %v784_v45 = vmul.f32 %v1058_v26, %v745_v62  ;;  %v785_v55 = vmul.f32 %v1058_v26, %v746_v52 }
 0x16a   : > { %v786_v3 = vmul.f32 %v1058_v26, %v747_v18  ;;  %v787_v6 = vmul.f32 %v1058_v26, %v748_v0  ;;  %v788_v28 = vmul.f32 %v1058_v26, %v749_v1  ;;  %v789_v15 = vmul.f32 %v1058_v26, %v750_v33 }
 0x16b   : > { %v790_v25 = vmul.f32 %v1058_v26, %v751_v2  ;;  %v791_v39 = vmul.f32 %v1058_v26, %v752_v5  ;;  %v792_v32 = vmul.f32 %v1058_v26, %v753_v7  ;;  %v793_v29 = vmul.f32 %v1058_v26, %v754_v8 }
 0x16c   : > { %v794_v34 = vmul.f32 %v1058_v26, %v755_v10  ;;  %v795_v51 = vmul.f32 %v1058_v26, %v756_v16  ;;  %v796_v37 = vmul.f32 %v1058_v26, %v757_v4  ;;  %v797_v49 = vmul.f32 %v1058_v26, %v758_v17 }
 0x16d   : > { %v798_v59 = vmul.f32 %v1058_v26, %v759_v20  ;;  %v799_v53 = vmul.f32 %v1058_v26, %v760_v12  ;;  %v800_v61 = vmul.f32 %v1058_v26, %v761_v22  ;;  %v801_v43 = vmul.f32 %v1058_v26, %v762_v23 }
 0x16e   : > { %v1599_v36 = vadd.f32 %v1059_v35, %v770_v27  ;;  %v1601_v13 = vadd.f32 %v1059_v35, %v771_v31  ;;  %v1603_v50 = vadd.f32 %v1059_v35, %v772_v30  ;;  %v1605_v54 = vadd.f32 %v1059_v35, %v773_v38 }
 0x16f   : > { %v1607_v60 = vadd.f32 %v1059_v35, %v774_v41  ;;  %v1609_v56 = vadd.f32 %v1059_v35, %v775_v9  ;;  %v1611_v44 = vadd.f32 %v1059_v35, %v776_v19  ;;  %v1613_v24 = vadd.f32 %v1059_v35, %v777_v21 }
 0x170   : > { %v1615_v11 = vadd.f32 %v1059_v35, %v778_v42  ;;  %v1617_v47 = vadd.f32 %v1059_v35, %v779_v58  ;;  %v1619_v57 = vadd.f32 %v1059_v35, %v780_v48  ;;  %v1621_v14 = vadd.f32 %v1059_v35, %v781_v63 }
 0x171   : > { %v1623_v62 = vadd.f32 %v1059_v35, %v782_v40  ;;  %v1625_v52 = vadd.f32 %v1059_v35, %v783_v46  ;;  %v1627_v18 = vadd.f32 %v1059_v35, %v784_v45  ;;  %v1629_v0 = vadd.f32 %v1059_v35, %v785_v55 }
 0x172   : > { %v1631_v1 = vadd.f32 %v1059_v35, %v786_v3  ;;  %v1633_v33 = vadd.f32 %v1059_v35, %v787_v6  ;;  %v1635_v2 = vadd.f32 %v1059_v35, %v788_v28  ;;  %v1637_v5 = vadd.f32 %v1059_v35, %v789_v15 }
 0x173   : > { %v1639_v7 = vadd.f32 %v1059_v35, %v790_v25  ;;  %v1641_v8 = vadd.f32 %v1059_v35, %v791_v39  ;;  %v1643_v10 = vadd.f32 %v1059_v35, %v792_v32  ;;  %v1645_v16 = vadd.f32 %v1059_v35, %v793_v29 }
 0x174   : > { %v1647_v4 = vadd.f32 %v1059_v35, %v794_v34  ;;  %v1649_v17 = vadd.f32 %v1059_v35, %v795_v51  ;;  %v1651_v20 = vadd.f32 %v1059_v35, %v796_v37  ;;  %v1653_v12 = vadd.f32 %v1059_v35, %v797_v49 }
 0x175   : > { %v1656_v22 = vadd.f32 %v1059_v35, %v798_v59  ;;  %v1658_v23 = vadd.f32 %v1059_v35, %v799_v53  ;;  %vm841_vm0 = vcmp.ge.f32.partialorder %v1599_v36, 0.0  ;;  %vm842_vm1 = vcmp.ge.f32.partialorder %v1601_v13, 0.0 }
 0x176   : > { %vm843_vm2 = vcmp.ge.f32.partialorder %v1603_v50, 0.0  ;;  %vm844_vm3 = vcmp.ge.f32.partialorder %v1605_v54, 0.0  ;;  %vm845_vm4 = vcmp.ge.f32.partialorder %v1607_v60, 0.0  ;;  %vm846_vm5 = vcmp.ge.f32.partialorder %v1609_v56, 0.0 }
 0x177   : > { %vm847_vm6 = vcmp.ge.f32.partialorder %v1611_v44, 0.0  ;;  %vm848_vm7 = vcmp.ge.f32.partialorder %v1613_v24, 0.0  ;;  %vm849_vm8 = vcmp.ge.f32.partialorder %v1615_v11, 0.0  ;;  %v1675_v26 = vadd.f32 %v1059_v35, %v800_v61 }
 0x178   : > { %v873_v27 = vmul.f32 0.01, %v1599_v36  ;;  %v874_v31 = vmul.f32 0.01, %v1601_v13  ;;  %v875_v30 = vmul.f32 0.01, %v1603_v50  ;;  %v1684_v38 = vadd.f32 %v1059_v35, %v801_v43 }
 0x179   : > { %vm856_vm15 = vcmp.ge.f32.partialorder %v1629_v0, 0.0  ;;  %vm857_vm10 = vcmp.ge.f32.partialorder %v1631_v1, 0.0  ;;  %v876_v41 = vmul.f32 0.01, %v1605_v54  ;;  %v877_v9 = vmul.f32 0.01, %v1607_v60 }
 0x17a   : > { %v878_v19 = vmul.f32 0.01, %v1609_v56  ;;  %vm862_vm14 = vcmp.ge.f32.partialorder %v1641_v8, 0.0  ;;  %v879_v21 = vmul.f32 0.01, %v1611_v44  ;;  %v905_v48 = vsel %vm841_vm0, %v1599_v36, %v873_v27 }
 0x17b   : > { %v880_v42 = vmul.f32 0.01, %v1613_v24  ;;  %v881_v58 = vmul.f32 0.01, %v1615_v11  ;;  %vm863_vm11 = vcmp.ge.f32.partialorder %v1643_v10, 0.0  ;;  %v906_v45 = vsel %vm842_vm1, %v1601_v13, %v874_v31  ;;  %937 = vst [vmem:[%s1673_s25] sm:$0xff] %v905_v48 }
 0x17c   : > { %v882_v63 = vmul.f32 0.01, %v1617_v47  ;;  %v883_v40 = vmul.f32 0.01, %v1619_v57  ;;  %v884_v46 = vmul.f32 0.01, %v1621_v14  ;;  %v907_v28 = vsel %vm843_vm2, %v1603_v50, %v875_v30 }
 0x17d   : > { %vm867_vm0 = vcmp.ge.f32.partialorder %v1651_v20, 0.0  ;;  %vm869_vm12 = vcmp.ge.f32.partialorder %v1656_v22, 0.0  ;;  %vm870_vm9 = vcmp.ge.f32.partialorder %v1658_v23, 0.0  ;;  %v885_v55 = vmul.f32 0.01, %v1623_v62  ;;  %938 = vst [vmem:[%s1673_s25 + $0x8] sm:$0xff] %v906_v45 }
 0x17e   : > { %v886_v3 = vmul.f32 0.01, %v1625_v52  ;;  %v887_v6 = vmul.f32 0.01, %v1627_v18  ;;  %vm871_vm1 = vcmp.ge.f32.partialorder %v1675_v26, 0.0  ;;  %vm872_vm13 = vcmp.ge.f32.partialorder %v1684_v38, 0.0 }
 0x17f   : > { %v888_v15 = vmul.f32 0.01, %v1629_v0  ;;  %v889_v25 = vmul.f32 0.01, %v1631_v1  ;;  %v890_v39 = vmul.f32 0.01, %v1633_v33  ;;  %v908_v32 = vsel %vm844_vm3, %v1605_v54, %v876_v41 }
 0x180   : > { %939 = vst [vmem:[%s1673_s25 + $0x10] sm:$0xff] %v907_v28  ;;  %v891_v29 = vmul.f32 0.01, %v1635_v2  ;;  %v892_v35 = vmul.f32 0.01, %v1637_v5  ;;  %v909_v51 = vsel %vm845_vm4, %v1607_v60, %v877_v9  ;;  %940 = vst [vmem:[%s1673_s25 + $0x18] sm:$0xff] %v908_v32  ;;  %v910_v53 = vsel %vm846_vm5, %v1609_v56, %v878_v19 }
 0x181   : > { %v893_v34 = vmul.f32 0.01, %v1639_v7  ;;  %v894_v37 = vmul.f32 0.01, %v1641_v8  ;;  %v895_v49 = vmul.f32 0.01, %v1643_v10  ;;  %v911_v13 = vsel %vm847_vm6, %v1611_v44, %v879_v21 }
 0x182   : > { %v896_v59 = vmul.f32 0.01, %v1645_v16  ;;  %941 = vst [vmem:[%s1673_s25 + $0x20] sm:$0xff] %v909_v51  ;;  %v897_v61 = vmul.f32 0.01, %v1647_v4  ;;  %942 = vst [vmem:[%s1673_s25 + $0x28] sm:$0xff] %v910_v53  ;;  %v912_v56 = vsel %vm848_vm7, %v1613_v24, %v880_v42  ;;  %v913_v31 = vsel %vm849_vm8, %v1615_v11, %v881_v58 }
 0x183   : > { %v898_v43 = vmul.f32 0.01, %v1649_v17  ;;  %v899_v36 = vmul.f32 0.01, %v1651_v20  ;;  %v900_v50 = vmul.f32 0.01, %v1653_v12 }
 0x184   : > { %v901_v54 = vmul.f32 0.01, %v1656_v22  ;;  %v902_v60 = vmul.f32 0.01, %v1658_v23  ;;  %943 = vst [vmem:[%s1673_s25 + $0x30] sm:$0xff] %v911_v13  ;;  %vm1870_vm2 = vcmp.ge.f32.partialorder %v1617_v47, 0.0 }
 0x185   : > { %v903_v27 = vmul.f32 0.01, %v1675_v26  ;;  %v904_v44 = vmul.f32 0.01, %v1684_v38  ;;  %v914_v30 = vsel %vm1870_vm2, %v1617_v47, %v882_v63  ;;  %944 = vst [vmem:[%s1673_s25 + $0x38] sm:$0xff] %v912_v56  ;;  %vm1871_vm3 = vcmp.ge.f32.partialorder %v1619_v57, 0.0 }
 0x186   : > { %v915_v24 = vsel %vm1871_vm3, %v1619_v57, %v883_v40  ;;  %vm1872_vm4 = vcmp.ge.f32.partialorder %v1621_v14, 0.0  ;;  %vm1873_vm5 = vcmp.ge.f32.partialorder %v1623_v62, 0.0  ;;  %vm1874_vm6 = vcmp.ge.f32.partialorder %v1625_v52, 0.0  ;;  %945 = vst [vmem:[%s1673_s25 + $0x40] sm:$0xff] %v913_v31  ;;  %946 = vst [vmem:[%s1673_s25 + $0x48] sm:$0xff] %v914_v30 }
 0x187   : > { %v916_v41 = vsel %vm1872_vm4, %v1621_v14, %v884_v46  ;;  %v917_v9 = vsel %vm1873_vm5, %v1623_v62, %v885_v55  ;;  %v918_v11 = vsel %vm1874_vm6, %v1625_v52, %v886_v3  ;;  %vm1875_vm7 = vcmp.ge.f32.partialorder %v1627_v18, 0.0  ;;  %947 = vst [vmem:[%s1673_s25 + $0x50] sm:$0xff] %v915_v24 }
 0x188   : > { %v919_v47 = vsel %vm1875_vm7, %v1627_v18, %v887_v6  ;;  %v920_v57 = vsel %vm856_vm15, %v1629_v0, %v888_v15  ;;  %v921_v14 = vsel %vm857_vm10, %v1631_v1, %v889_v25  ;;  %vm1876_vm8 = vcmp.ge.f32.partialorder %v1633_v33, 0.0  ;;  %948 = vst [vmem:[%s1673_s25 + $0x58] sm:$0xff] %v916_v41  ;;  %949 = vst [vmem:[%s1673_s25 + $0x60] sm:$0xff] %v917_v9 }
 0x189   : > { %v922_v62 = vsel %vm1876_vm8, %v1633_v33, %v890_v39  ;;  %950 = vst [vmem:[%s1673_s25 + $0x68] sm:$0xff] %v918_v11  ;;  %vm1877_vm2 = vcmp.ge.f32.partialorder %v1635_v2, 0.0  ;;  %vm1878_vm15 = vcmp.ge.f32.partialorder %v1637_v5, 0.0  ;;  %vm1879_vm10 = vcmp.ge.f32.partialorder %v1639_v7, 0.0  ;;  %951 = vst [vmem:[%s1673_s25 + $0x70] sm:$0xff] %v919_v47 }
 0x18a   : > { %v923_v52 = vsel %vm1877_vm2, %v1635_v2, %v891_v29  ;;  %v924_v18 = vsel %vm1878_vm15, %v1637_v5, %v892_v35  ;;  %v925_v0 = vsel %vm1879_vm10, %v1639_v7, %v893_v34  ;;  %v926_v1 = vsel %vm862_vm14, %v1641_v8, %v894_v37  ;;  %952 = vst [vmem:[%s1673_s25 + $0x78] sm:$0xff] %v920_v57 }
 0x18b   : > { %953 = vst [vmem:[%s1673_s25 + $0x80] sm:$0xff] %v921_v14  ;;  %954 = vst [vmem:[%s1673_s25 + $0x88] sm:$0xff] %v922_v62  ;;  %v927_v33 = vsel %vm863_vm11, %v1643_v10, %v895_v49  ;;  %vm1880_vm3 = vcmp.ge.f32.partialorder %v1645_v16, 0.0  ;;  %vm1881_vm4 = vcmp.ge.f32.partialorder %v1647_v4, 0.0  ;;  %vm1882_vm14 = vcmp.ge.f32.partialorder %v1649_v17, 0.0 }
 0x18c   : > { %v928_v2 = vsel %vm1880_vm3, %v1645_v16, %v896_v59  ;;  %v929_v5 = vsel %vm1881_vm4, %v1647_v4, %v897_v61  ;;  %v930_v7 = vsel %vm1882_vm14, %v1649_v17, %v898_v43  ;;  %955 = vst [vmem:[%s1673_s25 + $0x90] sm:$0xff] %v923_v52  ;;  %956 = vst [vmem:[%s1673_s25 + $0x98] sm:$0xff] %v924_v18  ;;  %vm1883_vm11 = vcmp.ge.f32.partialorder %v1653_v12, 0.0 }
 0x18d   : > { %957 = vst [vmem:[%s1673_s25 + $0xa0] sm:$0xff] %v925_v0  ;;  %958 = vst [vmem:[%s1673_s25 + $0xa8] sm:$0xff] %v926_v1  ;;  %v931_v8 = vsel %vm867_vm0, %v1651_v20, %v899_v36  ;;  %v932_v10 = vsel %vm1883_vm11, %v1653_v12, %v900_v50  ;;  %v933_v16 = vsel %vm869_vm12, %v1656_v22, %v901_v54 }
 0x18e   : > { %v934_v4 = vsel %vm870_vm9, %v1658_v23, %v902_v60  ;;  %959 = vst [vmem:[%s1673_s25 + $0xb0] sm:$0xff] %v927_v33  ;;  %960 = vst [vmem:[%s1673_s25 + $0xb8] sm:$0xff] %v928_v2  ;;  %v935_v17 = vsel %vm871_vm1, %v1675_v26, %v903_v27  ;;  %v936_v20 = vsel %vm872_vm13, %v1684_v38, %v904_v44 }
 0x18f   : > { %961 = vst [vmem:[%s1673_s25 + $0xc0] sm:$0xff] %v929_v5  ;;  %962 = vst [vmem:[%s1673_s25 + $0xc8] sm:$0xff] %v930_v7 }
 0x190   : > { %963 = vst [vmem:[%s1673_s25 + $0xd0] sm:$0xff] %v931_v8  ;;  %964 = vst [vmem:[%s1673_s25 + $0xd8] sm:$0xff] %v932_v10 }
 0x191   : > { %965 = vst [vmem:[%s1673_s25 + $0xe0] sm:$0xff] %v933_v16  ;;  %966 = vst [vmem:[%s1673_s25 + $0xe8] sm:$0xff] %v934_v4 }
 0x192   : > { %967 = vst [vmem:[%s1673_s25 + $0xf0] sm:$0xff] %v935_v17  ;;  %968 = vst [vmem:[%s1673_s25 + $0xf8] sm:$0xff] %v936_v20 }
 0x193 PF: > { %s15_s18 = sadd.s32 1, %s1192_s18  }
 0x194   : > { %p12_p4 = scmp.ge.s32.totalorder %s15_s18, 4  }
 0x196   :  { %14 = sbr.rel (!%p12_p4) target bundleno = 1 (0x1), region = 70 }

// kernel: residual_encoder_unet_forward.16
= control target key start
LH: loop header
LB: loop body
LE: loop exit
PB: predicated region body
PF: predicated region fallthrough
CT: control target
= control target key end

     0   :  { %s1355_s21 = smov 0   ;;  %s2036_s0 = inlined_call_operand.vmem [shape: bf16[2,256,128], index: 0, kind: input, shape index: {}]   ;;  %s2037_s1 = inlined_call_operand.vmem [shape: bf16[128,128], index: 1, kind: input, shape index: {}]   ;;  %s2038_s2 = inlined_call_operand.vmem [shape: f32[1,128], index: 2, kind: input, shape index: {}]   ;;  %s2039_s3 = inlined_call_operand.vmem [shape: f32[1,128], index: 3, kind: input, shape index: {}]   ;;  %s2040_s4 = inlined_call_operand.vmem [shape: f32[1,128], index: 4, kind: input, shape index: {}]   ;;  %s2041_s5 = inlined_call_operand.vmem [shape: f32[2,256,128], index: 5, kind: input, shape index: {}]   ;;  %s2042_s6 = inlined_call_operand.vmem [shape: f32[2,256,128], index: 6, kind: output, shape index: {}]  }
   0x1 LB: > { %s1147_s22 = sadd.s32 4294967295, %s1318_s21   ;;  %p1151_p0 = scmp.ge.s32.totalorder %s1318_s21, 1  ;;  %s1318_s21 = sphi %s1355_s21, %s16_s21  }
   0x2   : > { %p222_p1 = scmp.lt.s32.totalorder %s1318_s21, 3 }
   0x4   : > { %p223_p2 = pnand %p1151_p0, %p222_p1 }
   0x5   : > { %v1286_v0 = vld [vmem:[%s2037_s1] sm:$0xff] (!%p223_p2)   ;;  %p257_p3 = scmp.lt.s32.totalorder (!%p223_p2), %s1147_s22, 1  ;;  %v1287_v1 = vld [vmem:[%s2037_s1 + $0x8] sm:$0xff] (!%p223_p2)   ;;  %v1288_v2 = vld [vmem:[%s2037_s1 + $0x10] sm:$0xff] (!%p223_p2)  }
   0x6   : > { %226 = sbr.rel (%p223_p2) target bundleno = 411 (0x19b), region = 44  ;;  %1214 = vmatprep.subr.bf16.mxu0 (!%p223_p2), %v1286_v0  ;;  %1262 = vmatprep.subr.bf16.mxu1 (!%p223_p2), %v1286_v0  ;;  %v1289_v3 = vld [vmem:[%s2037_s1 + $0x18] sm:$0xff] (!%p223_p2)   ;;  %v1290_v5 = vld [vmem:[%s2037_s1 + $0x20] sm:$0xff] (!%p223_p2)   ;;  %v1291_v6 = vld [vmem:[%s2037_s1 + $0x28] sm:$0xff] (!%p223_p2)  }
   0x7   : > { %1215 = vmatpush3.bf16.msra.mxu0 (!%p223_p2), %v1286_v0  ;;  %1270 = vmatpush3.bf16.msra.mxu1 (!%p223_p2), %v1286_v0  ;;  %v1292_v7 = vld [vmem:[%s2037_s1 + $0x30] sm:$0xff] (!%p223_p2)   ;;  %v1293_v8 = vld [vmem:[%s2037_s1 + $0x38] sm:$0xff] (!%p223_p2)   ;;  %v1414_v24 = vld [vmem:[%s2038_s2] ss:$0 sm:$0xff] (!%p223_p2) }
   0x8   : > { %1216 = vmatprep.subr.bf16.mxu0 (!%p223_p2), %v1287_v1  ;;  %1263 = vmatprep.subr.bf16.mxu1 (!%p223_p2), %v1287_v1 }
   0xb   : > { %1217 = vmatpush3.bf16.msra.mxu0 (!%p223_p2), %v1287_v1  ;;  %1271 = vmatpush3.bf16.msra.mxu1 (!%p223_p2), %v1287_v1 }
   0xc   : > { %1218 = vmatprep.subr.bf16.mxu0 (!%p223_p2), %v1288_v2  ;;  %1264 = vmatprep.subr.bf16.mxu1 (!%p223_p2), %v1288_v2 }
   0xd   : > { %s2058_s22 = smov (!%p257_p3, %s1147_s22), 1 }
   0xe   : > { %s1187_s29 = sshll.u32 %s2058_s22, 7  ;;  %s1188_s25 = sshll.u32 %s2058_s22, 8 }
   0xf   : > { %s1378_s8 = scalar_lea.vmem %s2036_s0, %s1187_s29  ;;  %1219 = vmatpush3.bf16.msra.mxu0 %v1288_v2  ;;  %1272 = vmatpush3.bf16.msra.mxu1 %v1288_v2  ;;  %s1736_s30 = scalar_lea.vmem %s2041_s5, %s1188_s25 }
  0x10   : > { %v1294_v4 = vld [vmem:[%s1378_s8] sm:$0xff]   ;;  %1220 = vmatprep.subr.bf16.mxu0 %v1289_v3  ;;  %1265 = vmatprep.subr.bf16.mxu1 %v1289_v3  ;;  %v1295_v10 = vld [vmem:[%s1378_s8 + $0x8] sm:$0xff]   ;;  %v1296_v11 = vld [vmem:[%s1378_s8 + $0x10] sm:$0xff]   ;;  %s1849_s9 = scalar_lea.vmem %s2042_s6, %s1188_s25 }
  0x11   : > { %1230 = vmatprep.mubr.bf16.mxu0 %v1294_v4  ;;  %v1302_v9 = vld [vmem:[%s1378_s8 + $0x40] sm:$0xff]   ;;  %v1303_v12 = vld [vmem:[%s1378_s8 + $0x48] sm:$0xff]   ;;  %v1304_v13 = vld [vmem:[%s1378_s8 + $0x50] sm:$0xff]  }
  0x12   : > { %1246 = vmatprep.mubr.bf16.mxu1 %v1302_v9  ;;  %v1297_v14 = vld [vmem:[%s1378_s8 + $0x18] sm:$0xff]   ;;  %v1298_v16 = vld [vmem:[%s1378_s8 + $0x20] sm:$0xff]   ;;  %v1299_v18 = vld [vmem:[%s1378_s8 + $0x28] sm:$0xff]  }
  0x13   : > { %1221 = vmatpush3.bf16.msra.mxu0 %v1289_v3  ;;  %1273 = vmatpush3.bf16.msra.mxu1 %v1289_v3  ;;  %v1305_v15 = vld [vmem:[%s1378_s8 + $0x58] sm:$0xff]   ;;  %v1306_v17 = vld [vmem:[%s1378_s8 + $0x60] sm:$0xff]   ;;  %v1307_v19 = vld [vmem:[%s1378_s8 + $0x68] sm:$0xff]  }
  0x14   : > { %1222 = vmatprep.subr.bf16.mxu0 %v1290_v5  ;;  %1266 = vmatprep.subr.bf16.mxu1 %v1290_v5  ;;  %v1300_v20 = vld [vmem:[%s1378_s8 + $0x30] sm:$0xff]   ;;  %v1301_v22 = vld [vmem:[%s1378_s8 + $0x38] sm:$0xff]  }
  0x15   : > { %v1308_v21 = vld [vmem:[%s1378_s8 + $0x70] sm:$0xff]   ;;  %v1309_v23 = vld [vmem:[%s1378_s8 + $0x78] sm:$0xff]  }
  0x17   : > { %1223 = vmatpush3.bf16.msra.mxu0 %v1290_v5  ;;  %1274 = vmatpush3.bf16.msra.mxu1 %v1290_v5 }
  0x18   : > { %1224 = vmatprep.subr.bf16.mxu0 %v1291_v6  ;;  %1267 = vmatprep.subr.bf16.mxu1 %v1291_v6 }
  0x1b   : > { %1225 = vmatpush3.bf16.msra.mxu0 %v1291_v6  ;;  %1275 = vmatpush3.bf16.msra.mxu1 %v1291_v6 }
  0x1c   : > { %1226 = vmatprep.subr.bf16.mxu0 %v1292_v7  ;;  %1268 = vmatprep.subr.bf16.mxu1 %v1292_v7 }
  0x1f   : > { %1227 = vmatpush3.bf16.msra.mxu0 %v1292_v7  ;;  %1276 = vmatpush3.bf16.msra.mxu1 %v1292_v7 }
  0x20   : > { %1228 = vmatprep.subr.bf16.mxu0 %v1293_v8  ;;  %1269 = vmatprep.subr.bf16.mxu1 %v1293_v8 }
  0x23   : > { %1229 = vmatpush3.bf16.msra.mxu0 %v1293_v8  ;;  %1277 = vmatpush3.bf16.msra.mxu1 %v1293_v8 }
  0x26   : > { %1231 = vmatmul.mubr.bf16.vlgmr.msra.gmra.mrb[0].mxu0 %v1295_v10  ;;  %1247 = vmatmul.mubr.bf16.vlgmr.msra.gmra.mrb[0].mxu1 %v1303_v12 }
  0x27   : > { %1234 = vmatprep.mubr.bf16.mxu0 %v1296_v11  ;;  %1250 = vmatprep.mubr.bf16.mxu1 %v1304_v13 }
  0x2e   : > { %1235 = vmatmul.mubr.bf16.gmra.mrb[4].mxu0 %v1297_v14  ;;  %1251 = vmatmul.mubr.bf16.gmra.mrb[4].mxu1 %v1305_v15 }
  0x2f   : > { %1238 = vmatprep.mubr.bf16.mxu0 %v1298_v16  ;;  %1254 = vmatprep.mubr.bf16.mxu1 %v1306_v17 }
  0x36   : > { %1239 = vmatmul.mubr.bf16.gmra.mrb[8].mxu0 %v1299_v18  ;;  %1255 = vmatmul.mubr.bf16.gmra.mrb[8].mxu1 %v1307_v19 }
  0x37   : > { %1242 = vmatprep.mubr.bf16.mxu0 %v1300_v20  ;;  %1258 = vmatprep.mubr.bf16.mxu1 %v1308_v21 }
  0x3e   : > { %1243 = vmatmul.mubr.bf16.gmra.mrb[12].mxu0 %v1301_v22  ;;  %1259 = vmatmul.mubr.bf16.gmra.mrb[12].mxu1 %v1309_v23 }
  0xf9   : > { %v1232_v25 = vpop.f32.mrb[0].mxu0  ;;  %v1416_v26 = vpop.f32.mrb[0].mxu1 }
  0xfa   : > { %v506_v27 = vpop.f32.mrb[1].mxu0  ;;  %v1418_v28 = vpop.f32.mrb[1].mxu1  ;;  %v1428_v34 = vadd.f32 %v1232_v25, %v1414_v24 }
  0xfb   : > { %v1421_v29 = vadd.f32 %v1414_v24, %v506_v27  ;;  %v1233_v30 = vpop.f32.mrb[2].mxu0  ;;  %v1423_v31 = vpop.f32.mrb[2].mxu1 }
  0xfc   : > { %v509_v32 = vpop.f32.mrb[3].mxu0  ;;  %v1425_v33 = vpop.f32.mrb[3].mxu1  ;;  %v1436_v37 = vadd.f32 %v1233_v30, %v1414_v24  ;;  %v672_v40 = vmul.f32 %v1428_v34, %v1428_v34 }
  0xfd   : > { %v1431_v35 = vadd.f32 %v1414_v24, %v509_v32  ;;  %v670_v36 = vmul.f32 %v1421_v29, %v1421_v29 }
  0xfe   : > { %v673_v47 = vmul.f32 %v1436_v37, %v1436_v37 }
  0xff   : > { %v633_v38 = vadd.f32 %v1431_v35, %v1421_v29  ;;  %v671_v39 = vmul.f32 %v1431_v35, %v1431_v35 }
 0x101   : > { %v634_v41 = vadd.f32 %v633_v38, %v1428_v34  ;;  %v702_v42 = vadd.f32 %v671_v39, %v670_v36  ;;  %v1236_v43 = vpop.f32.mrb[4].mxu0  ;;  %v1445_v44 = vpop.f32.mrb[4].mxu1 }
 0x102   : > { %v522_v45 = vpop.f32.mrb[5].mxu0  ;;  %v1447_v46 = vpop.f32.mrb[5].mxu1  ;;  %v1458_v53 = vadd.f32 %v1236_v43, %v1414_v24 }
 0x103   : > { %v703_v48 = vadd.f32 %v702_v42, %v672_v40  ;;  %v1452_v49 = vadd.f32 %v1414_v24, %v522_v45  ;;  %v635_v50 = vadd.f32 %v634_v41, %v1436_v37  ;;  %v1237_v51 = vpop.f32.mrb[6].mxu0  ;;  %v1455_v52 = vpop.f32.mrb[6].mxu1 }
 0x104   : > { %v525_v54 = vpop.f32.mrb[7].mxu0  ;;  %v1460_v55 = vpop.f32.mrb[7].mxu1  ;;  %v1469_v61 = vadd.f32 %v1237_v51, %v1414_v24  ;;  %v676_v0 = vmul.f32 %v1458_v53, %v1458_v53 }
 0x105   : > { %v636_v56 = vadd.f32 %v635_v50, %v1452_v49  ;;  %v674_v57 = vmul.f32 %v1452_v49, %v1452_v49  ;;  %v704_v58 = vadd.f32 %v703_v48, %v673_v47  ;;  %v1466_v59 = vadd.f32 %v1414_v24, %v525_v54 }
 0x106   : > { %v677_v7 = vmul.f32 %v1469_v61, %v1469_v61 }
 0x107   : > { %v705_v60 = vadd.f32 %v704_v58, %v674_v57  ;;  %v637_v62 = vadd.f32 %v636_v56, %v1466_v59  ;;  %v675_v63 = vmul.f32 %v1466_v59, %v1466_v59 }
 0x109   : > { %v638_v1 = vadd.f32 %v637_v62, %v1458_v53  ;;  %v706_v2 = vadd.f32 %v705_v60, %v675_v63  ;;  %v1240_v3 = vpop.f32.mrb[8].mxu0  ;;  %v1477_v4 = vpop.f32.mrb[8].mxu1  ;;  %v1534_v60 = vadd.f32 %v1414_v24, %v1418_v28 }
 0x10a   : > { %v538_v5 = vpop.f32.mrb[9].mxu0  ;;  %v1479_v6 = vpop.f32.mrb[9].mxu1  ;;  %v1490_v13 = vadd.f32 %v1240_v3, %v1414_v24 }
 0x10b   : > { %v707_v8 = vadd.f32 %v706_v2, %v676_v0  ;;  %v1484_v9 = vadd.f32 %v1414_v24, %v538_v5  ;;  %v639_v10 = vadd.f32 %v638_v1, %v1469_v61  ;;  %v1241_v11 = vpop.f32.mrb[10].mxu0  ;;  %v1487_v12 = vpop.f32.mrb[10].mxu1 }
 0x10c   : > { %v541_v14 = vpop.f32.mrb[11].mxu0  ;;  %v1492_v15 = vpop.f32.mrb[11].mxu1  ;;  %v1501_v21 = vadd.f32 %v1241_v11, %v1414_v24  ;;  %v680_v25 = vmul.f32 %v1490_v13, %v1490_v13  ;;  %v1552_v11 = vadd.f32 %v1414_v24, %v1425_v33  ;;  %v1568_v33 = vadd.f32 %v1414_v24, %v1447_v46 }
 0x10d   : > { %v640_v16 = vadd.f32 %v639_v10, %v1484_v9  ;;  %v678_v17 = vmul.f32 %v1484_v9, %v1484_v9  ;;  %v708_v18 = vadd.f32 %v707_v8, %v677_v7  ;;  %v1498_v19 = vadd.f32 %v1414_v24, %v541_v14 }
 0x10e   : > { %v681_v40 = vmul.f32 %v1501_v21, %v1501_v21  ;;  %v686_v7 = vmul.f32 %v1534_v60, %v1534_v60  ;;  %v1556_v14 = vadd.f32 %v1416_v26, %v1414_v24  ;;  %v1584_v46 = vadd.f32 %v1445_v44, %v1414_v24 }
 0x10f   : > { %v709_v20 = vadd.f32 %v708_v18, %v678_v17  ;;  %v641_v22 = vadd.f32 %v640_v16, %v1498_v19  ;;  %v679_v23 = vmul.f32 %v1498_v19, %v1498_v19  ;;  %v1561_v18 = vadd.f32 %v1423_v31, %v1414_v24 }
 0x110   : > { %v688_v26 = vmul.f32 %v1556_v14, %v1556_v14  ;;  %v692_v44 = vmul.f32 %v1584_v46, %v1584_v46 }
 0x111   : > { %v642_v27 = vadd.f32 %v641_v22, %v1490_v13  ;;  %v710_v30 = vadd.f32 %v709_v20, %v679_v23  ;;  %v1244_v32 = vpop.f32.mrb[12].mxu0  ;;  %v1509_v36 = vpop.f32.mrb[12].mxu1  ;;  %v687_v23 = vmul.f32 %v1552_v11, %v1552_v11  ;;  %v689_v31 = vmul.f32 %v1561_v18, %v1561_v18 }
 0x112   : > { %v554_v38 = vpop.f32.mrb[13].mxu0  ;;  %v1511_v39 = vpop.f32.mrb[13].mxu1  ;;  %v1522_v48 = vadd.f32 %v1244_v32, %v1414_v24 }
 0x113   : > { %v711_v41 = vadd.f32 %v710_v30, %v680_v25  ;;  %v1516_v42 = vadd.f32 %v1414_v24, %v554_v38  ;;  %v643_v43 = vadd.f32 %v642_v27, %v1501_v21  ;;  %v1245_v45 = vpop.f32.mrb[14].mxu0  ;;  %v1519_v47 = vpop.f32.mrb[14].mxu1  ;;  %v690_v38 = vmul.f32 %v1568_v33, %v1568_v33 }
 0x114   : > { %v557_v50 = vpop.f32.mrb[15].mxu0  ;;  %v1524_v51 = vpop.f32.mrb[15].mxu1  ;;  %v1537_v63 = vadd.f32 %v1245_v45, %v1414_v24  ;;  %v684_v2 = vmul.f32 %v1522_v48, %v1522_v48  ;;  %v1589_v45 = vadd.f32 %v1455_v52, %v1414_v24 }
 0x115   : > { %v644_v54 = vadd.f32 %v643_v43, %v1516_v42  ;;  %v682_v56 = vmul.f32 %v1516_v42, %v1516_v42  ;;  %v712_v57 = vadd.f32 %v711_v41, %v681_v40  ;;  %v1530_v58 = vadd.f32 %v1414_v24, %v557_v50 }
 0x116   : > { %v685_v28 = vmul.f32 %v1537_v63, %v1537_v63  ;;  %v1580_v40 = vadd.f32 %v1414_v24, %v1460_v55  ;;  %v1596_v55 = vadd.f32 %v1414_v24, %v1479_v6  ;;  %v693_v52 = vmul.f32 %v1589_v45, %v1589_v45 }
 0x117   : > { %v713_v62 = vadd.f32 %v712_v57, %v682_v56  ;;  %v645_v0 = vadd.f32 %v644_v54, %v1530_v58  ;;  %v683_v1 = vmul.f32 %v1530_v58, %v1530_v58  ;;  %v1612_v6 = vadd.f32 %v1477_v4, %v1414_v24 }
 0x118   : > { %v691_v56 = vmul.f32 %v1580_v40, %v1580_v40 }
 0x119   : > { %v646_v3 = vadd.f32 %v645_v0, %v1522_v48  ;;  %v714_v5 = vadd.f32 %v713_v62, %v683_v1  ;;  %v696_v4 = vmul.f32 %v1612_v6, %v1612_v6 }
 0x11b   : > { %v715_v8 = vadd.f32 %v714_v5, %v684_v2  ;;  %v647_v10 = vadd.f32 %v646_v3, %v1537_v63  ;;  %v694_v2 = vmul.f32 %v1596_v55, %v1596_v55  ;;  %v1608_v3 = vadd.f32 %v1414_v24, %v1492_v15 }
 0x11c   : > { %v1624_v15 = vadd.f32 %v1414_v24, %v1511_v39  ;;  %v1640_v39 = vadd.f32 %v1509_v36, %v1414_v24 }
 0x11d   : > { %v648_v16 = vadd.f32 %v647_v10, %v1534_v60  ;;  %v716_v17 = vadd.f32 %v715_v8, %v685_v28  ;;  %v1617_v28 = vadd.f32 %v1487_v12, %v1414_v24 }
 0x11f   : > { %v717_v20 = vadd.f32 %v716_v17, %v686_v7  ;;  %v649_v22 = vadd.f32 %v648_v16, %v1552_v11  ;;  %v695_v16 = vmul.f32 %v1608_v3, %v1608_v3  ;;  %v697_v12 = vmul.f32 %v1617_v28, %v1617_v28 }
 0x121   : > { %v650_v25 = vadd.f32 %v649_v22, %v1556_v14  ;;  %v718_v27 = vadd.f32 %v717_v20, %v687_v23 }
 0x123   : > { %v719_v30 = vadd.f32 %v718_v27, %v688_v26  ;;  %v651_v32 = vadd.f32 %v650_v25, %v1561_v18  ;;  %v698_v26 = vmul.f32 %v1624_v15, %v1624_v15  ;;  %v1636_v25 = vadd.f32 %v1414_v24, %v1524_v51 }
 0x124   : > { %v700_v51 = vmul.f32 %v1640_v39, %v1640_v39 }
 0x125   : > { %v652_v41 = vadd.f32 %v651_v32, %v1568_v33  ;;  %v720_v43 = vadd.f32 %v719_v30, %v689_v31  ;;  %v1645_v32 = vadd.f32 %v1519_v47, %v1414_v24 }
 0x127   : > { %v721_v50 = vadd.f32 %v720_v43, %v690_v38  ;;  %v653_v54 = vadd.f32 %v652_v41, %v1580_v40  ;;  %v699_v41 = vmul.f32 %v1636_v25, %v1636_v25 }
 0x129   : > { %v654_v57 = vadd.f32 %v653_v54, %v1584_v46  ;;  %v722_v62 = vadd.f32 %v721_v50, %v691_v56  ;;  %v701_v50 = vmul.f32 %v1645_v32, %v1645_v32 }
 0x12b   : > { %v723_v0 = vadd.f32 %v722_v62, %v692_v44  ;;  %v655_v1 = vadd.f32 %v654_v57, %v1589_v45 }
 0x12d   : > { %v656_v5 = vadd.f32 %v655_v1, %v1596_v55  ;;  %v724_v7 = vadd.f32 %v723_v0, %v693_v52 }
 0x12f   : > { %v725_v8 = vadd.f32 %v724_v7, %v694_v2  ;;  %v657_v10 = vadd.f32 %v656_v5, %v1608_v3 }
 0x131   : > { %v658_v17 = vadd.f32 %v657_v10, %v1612_v6  ;;  %v726_v20 = vadd.f32 %v725_v8, %v695_v16 }
 0x133   : > { %v727_v22 = vadd.f32 %v726_v20, %v696_v4  ;;  %v659_v23 = vadd.f32 %v658_v17, %v1617_v28 }
 0x135   : > { %v660_v27 = vadd.f32 %v659_v23, %v1624_v15  ;;  %v728_v31 = vadd.f32 %v727_v22, %v697_v12 }
 0x137   : > { %v729_v30 = vadd.f32 %v728_v31, %v698_v26  ;;  %v661_v38 = vadd.f32 %v660_v27, %v1636_v25 }
 0x139   : > { %v662_v43 = vadd.f32 %v661_v38, %v1640_v39  ;;  %v730_v36 = vadd.f32 %v729_v30, %v699_v41 }
 0x13b   : > { %v663_v54 = vadd.f32 %v662_v43, %v1645_v32  ;;  %v731_v56 = vadd.f32 %v730_v36, %v700_v51 }
 0x13d   : > { %v664_v44 = vrot.slane %v663_v54, 4  ;;  %v732_v24 = vadd.f32 %v731_v56, %v701_v50 }
 0x13f   : > { %v665_v47 = vadd.f32 %v664_v44, %v663_v54  ;;  %v733_v57 = vrot.slane %v732_v24, 4 }
 0x141   : > { %v666_v62 = vrot.slane %v665_v47, 2  ;;  %v734_v52 = vadd.f32 %v733_v57, %v732_v24 }
 0x143   : > { %v667_v0 = vadd.f32 %v666_v62, %v665_v47  ;;  %v735_v1 = vrot.slane %v734_v52, 2 }
 0x145   : > { %v668_v2 = vrot.slane %v667_v0, 1  ;;  %v736_v5 = vadd.f32 %v735_v1, %v734_v52 }
 0x147   : > { %v669_v7 = vadd.f32 %v668_v2, %v667_v0  ;;  %v737_v8 = vrot.slane %v736_v5, 1 }
 0x149   : > { %v738_v10 = vadd.f32 %v737_v8, %v736_v5  ;;  %v1656_v16 = vmul.f32 0.00390625, %v669_v7 }
 0x14b   : > { %v740_v4 = vmul.f32 0.00390625, %v738_v10  ;;  %v741_v17 = vmul.f32 %v1656_v16, %v1656_v16  ;;  %v752_v12 = vsub.f32 %v1484_v9, %v1656_v16  ;;  %v753_v22 = vsub.f32 %v1498_v19, %v1656_v16  ;;  %v1183_v10 = vld [vmem:[%s2039_s3] ss:$0 sm:$0xff] }
 0x14c   : > { %v755_v23 = vsub.f32 %v1501_v21, %v1656_v16  ;;  %v756_v26 = vsub.f32 %v1516_v42, %v1656_v16  ;;  %v757_v27 = vsub.f32 %v1530_v58, %v1656_v16  ;;  %v758_v31 = vsub.f32 %v1522_v48, %v1656_v16 }
 0x14d   : > { %v742_v20 = vsub.f32 %v740_v4, %v741_v17  ;;  %v759_v30 = vsub.f32 %v1537_v63, %v1656_v16  ;;  %v765_v9 = vsub.f32 %v1580_v40, %v1656_v16  ;;  %v766_v19 = vsub.f32 %v1584_v46, %v1656_v16 }
 0x14e   : > { %v767_v21 = vsub.f32 %v1589_v45, %v1656_v16  ;;  %v768_v42 = vsub.f32 %v1596_v55, %v1656_v16  ;;  %v769_v58 = vsub.f32 %v1608_v3, %v1656_v16  ;;  %v770_v48 = vsub.f32 %v1612_v6, %v1656_v16 }
 0x14f   : > { %v743_v38 = vmax.f32 %v742_v20, 0.0  ;;  %v771_v63 = vsub.f32 %v1617_v28, %v1656_v16  ;;  %v772_v40 = vsub.f32 %v1624_v15, %v1656_v16  ;;  %v773_v46 = vsub.f32 %v1636_v25, %v1656_v16 }
 0x150   : > { %v774_v45 = vsub.f32 %v1640_v39, %v1656_v16  ;;  %v775_v55 = vsub.f32 %v1645_v32, %v1656_v16  ;;  %v744_v3 = vsub.f32 %v1421_v29, %v1656_v16  ;;  %v745_v6 = vsub.f32 %v1431_v35, %v1656_v16 }
 0x151   : > { %v776_v41 = vadd.f32 1e-05, %v743_v38  ;;  %v746_v28 = vsub.f32 %v1428_v34, %v1656_v16  ;;  %v747_v15 = vsub.f32 %v1436_v37, %v1656_v16  ;;  %v748_v25 = vsub.f32 %v1452_v49, %v1656_v16 }
 0x152   : > { %v749_v39 = vsub.f32 %v1466_v59, %v1656_v16  ;;  %v750_v32 = vsub.f32 %v1458_v53, %v1656_v16  ;;  %v751_v29 = vsub.f32 %v1469_v61, %v1656_v16  ;;  %v754_v35 = vsub.f32 %v1490_v13, %v1656_v16 }
 0x153   : > { %1310 = vrsqrt.f32 %v776_v41  ;;  %v760_v34 = vsub.f32 %v1534_v60, %v1656_v16  ;;  %v761_v37 = vsub.f32 %v1552_v11, %v1656_v16  ;;  %v762_v49 = vsub.f32 %v1556_v14, %v1656_v16 }
 0x154   : > { %v763_v59 = vsub.f32 %v1561_v18, %v1656_v16  ;;  %v764_v53 = vsub.f32 %v1568_v33, %v1656_v16 }
 0x15d   : > { %v1311_v51 = vpop.eup %1310 }
 0x15e   : > { %v778_v61 = vmul.f32 %v1311_v51, %v744_v3  ;;  %v779_v43 = vmul.f32 %v1311_v51, %v745_v6  ;;  %v780_v36 = vmul.f32 %v1311_v51, %v746_v28  ;;  %v781_v13 = vmul.f32 %v1311_v51, %v747_v15 }
 0x15f   : > { %v782_v50 = vmul.f32 %v1311_v51, %v748_v25  ;;  %v783_v54 = vmul.f32 %v1311_v51, %v749_v39  ;;  %v784_v60 = vmul.f32 %v1311_v51, %v750_v32  ;;  %v785_v56 = vmul.f32 %v1311_v51, %v751_v29 }
 0x160   : > { %v786_v44 = vmul.f32 %v1311_v51, %v752_v12  ;;  %v787_v24 = vmul.f32 %v1311_v51, %v753_v22  ;;  %v788_v11 = vmul.f32 %v1311_v51, %v754_v35  ;;  %v789_v47 = vmul.f32 %v1311_v51, %v755_v23  ;;  %v1184_v35 = vld [vmem:[%s2040_s4] ss:$0 sm:$0xff] }
 0x161   : > { %v790_v57 = vmul.f32 %v1311_v51, %v756_v26  ;;  %v791_v14 = vmul.f32 %v1311_v51, %v757_v27  ;;  %v792_v62 = vmul.f32 %v1311_v51, %v758_v31  ;;  %v793_v52 = vmul.f32 %v1311_v51, %v759_v30 }
 0x162   : > { %v794_v18 = vmul.f32 %v1311_v51, %v760_v34  ;;  %v795_v0 = vmul.f32 %v1311_v51, %v761_v37  ;;  %v796_v1 = vmul.f32 %v1311_v51, %v762_v49  ;;  %v797_v33 = vmul.f32 %v1311_v51, %v763_v59 }
 0x163   : > { %v798_v2 = vmul.f32 %v1311_v51, %v764_v53  ;;  %v799_v5 = vmul.f32 %v1311_v51, %v765_v9  ;;  %v800_v7 = vmul.f32 %v1311_v51, %v766_v19  ;;  %v801_v8 = vmul.f32 %v1311_v51, %v767_v21 }
 0x164   : > { %v802_v16 = vmul.f32 %v1311_v51, %v768_v42  ;;  %v803_v4 = vmul.f32 %v1311_v51, %v769_v58  ;;  %v804_v17 = vmul.f32 %v1311_v51, %v770_v48  ;;  %v805_v20 = vmul.f32 %v1311_v51, %v771_v63 }
 0x165   : > { %v806_v12 = vmul.f32 %v1311_v51, %v772_v40  ;;  %v807_v22 = vmul.f32 %v1311_v51, %v773_v46  ;;  %v808_v23 = vmul.f32 %v1311_v51, %v774_v45  ;;  %v809_v26 = vmul.f32 %v1311_v51, %v775_v55 }
 0x166   : > { %v817_v27 = vmul.f32 %v1183_v10, %v778_v61  ;;  %v818_v31 = vmul.f32 %v1183_v10, %v779_v43  ;;  %v819_v30 = vmul.f32 %v1183_v10, %v780_v36  ;;  %v820_v38 = vmul.f32 %v1183_v10, %v781_v13 }
 0x167   : > { %v821_v41 = vmul.f32 %v1183_v10, %v782_v50  ;;  %v822_v9 = vmul.f32 %v1183_v10, %v783_v54  ;;  %v823_v19 = vmul.f32 %v1183_v10, %v784_v60  ;;  %v824_v21 = vmul.f32 %v1183_v10, %v785_v56 }
 0x168   : > { %v825_v3 = vmul.f32 %v1183_v10, %v786_v44  ;;  %v826_v6 = vmul.f32 %v1183_v10, %v787_v24  ;;  %v827_v28 = vmul.f32 %v1183_v10, %v788_v11  ;;  %v828_v42 = vmul.f32 %v1183_v10, %v789_v47 }
 0x169   : > { %v829_v58 = vmul.f32 %v1183_v10, %v790_v57  ;;  %v830_v48 = vmul.f32 %v1183_v10, %v791_v14  ;;  %v831_v63 = vmul.f32 %v1183_v10, %v792_v62  ;;  %v832_v40 = vmul.f32 %v1183_v10, %v793_v52  ;;  %v888_v62 = vld [vmem:[%s1736_s30] sm:$0xff]  ;;  %v889_v52 = vld [vmem:[%s1736_s30 + $0x8] sm:$0xff] }
 0x16a   : > { %v833_v46 = vmul.f32 %v1183_v10, %v794_v18  ;;  %v834_v45 = vmul.f32 %v1183_v10, %v795_v0  ;;  %v835_v55 = vmul.f32 %v1183_v10, %v796_v1  ;;  %v836_v15 = vmul.f32 %v1183_v10, %v797_v33  ;;  %v890_v18 = vld [vmem:[%s1736_s30 + $0x10] sm:$0xff]  ;;  %v891_v0 = vld [vmem:[%s1736_s30 + $0x18] sm:$0xff] }
 0x16b   : > { %v837_v25 = vmul.f32 %v1183_v10, %v798_v2  ;;  %v838_v39 = vmul.f32 %v1183_v10, %v799_v5  ;;  %v839_v32 = vmul.f32 %v1183_v10, %v800_v7  ;;  %v840_v29 = vmul.f32 %v1183_v10, %v801_v8  ;;  %v892_v7 = vld [vmem:[%s1736_s30 + $0x20] sm:$0xff]  ;;  %v893_v8 = vld [vmem:[%s1736_s30 + $0x28] sm:$0xff] }
 0x16c   : > { %v841_v34 = vmul.f32 %v1183_v10, %v802_v16  ;;  %v842_v51 = vmul.f32 %v1183_v10, %v803_v4  ;;  %v843_v37 = vmul.f32 %v1183_v10, %v804_v17  ;;  %v844_v49 = vmul.f32 %v1183_v10, %v805_v20  ;;  %v895_v16 = vld [vmem:[%s1736_s30 + $0x38] sm:$0xff] }
 0x16d   : > { %v845_v59 = vmul.f32 %v1183_v10, %v806_v12  ;;  %v846_v53 = vmul.f32 %v1183_v10, %v807_v22  ;;  %v847_v61 = vmul.f32 %v1183_v10, %v808_v23  ;;  %v848_v43 = vmul.f32 %v1183_v10, %v809_v26  ;;  %v894_v10 = vld [vmem:[%s1736_s30 + $0x30] sm:$0xff]  ;;  %v896_v22 = vld [vmem:[%s1736_s30 + $0x40] sm:$0xff]  ;;  %v897_v23 = vld [vmem:[%s1736_s30 + $0x48] sm:$0xff] }
 0x16e   : > { %v856_v36 = vadd.f32 %v1184_v35, %v817_v27  ;;  %v857_v13 = vadd.f32 %v1184_v35, %v818_v31  ;;  %v858_v50 = vadd.f32 %v1184_v35, %v819_v30  ;;  %v859_v54 = vadd.f32 %v1184_v35, %v820_v38  ;;  %v898_v26 = vld [vmem:[%s1736_s30 + $0x50] sm:$0xff] }
 0x16f   : > { %v860_v60 = vadd.f32 %v1184_v35, %v821_v41  ;;  %v861_v56 = vadd.f32 %v1184_v35, %v822_v9  ;;  %v862_v44 = vadd.f32 %v1184_v35, %v823_v19  ;;  %v863_v24 = vadd.f32 %v1184_v35, %v824_v21  ;;  %v899_v41 = vld [vmem:[%s1736_s30 + $0x58] sm:$0xff]  ;;  %v900_v9 = vld [vmem:[%s1736_s30 + $0x60] sm:$0xff]  ;;  %v901_v19 = vld [vmem:[%s1736_s30 + $0x68] sm:$0xff] }
 0x170   : > { %v864_v11 = vadd.f32 %v1184_v35, %v825_v3  ;;  %v865_v47 = vadd.f32 %v1184_v35, %v826_v6  ;;  %v866_v57 = vadd.f32 %v1184_v35, %v827_v28  ;;  %v867_v14 = vadd.f32 %v1184_v35, %v828_v42  ;;  %v902_v42 = vld [vmem:[%s1736_s30 + $0x70] sm:$0xff] }
 0x171   : > { %v868_v1 = vadd.f32 %v1184_v35, %v829_v58  ;;  %v869_v33 = vadd.f32 %v1184_v35, %v830_v48  ;;  %v870_v2 = vadd.f32 %v1184_v35, %v831_v63  ;;  %v871_v5 = vadd.f32 %v1184_v35, %v832_v40  ;;  %v903_v58 = vld [vmem:[%s1736_s30 + $0x78] sm:$0xff]  ;;  %v904_v48 = vld [vmem:[%s1736_s30 + $0x80] sm:$0xff] }
 0x172   : > { %v872_v4 = vadd.f32 %v1184_v35, %v833_v46  ;;  %v873_v17 = vadd.f32 %v1184_v35, %v834_v45  ;;  %v874_v20 = vadd.f32 %v1184_v35, %v835_v55  ;;  %v875_v12 = vadd.f32 %v1184_v35, %v836_v15  ;;  %v905_v55 = vld [vmem:[%s1736_s30 + $0x88] sm:$0xff]  ;;  %v906_v15 = vld [vmem:[%s1736_s30 + $0x90] sm:$0xff] }
 0x173   : > { %v876_v27 = vadd.f32 %v1184_v35, %v837_v25  ;;  %v877_v31 = vadd.f32 %v1184_v35, %v838_v39  ;;  %v878_v30 = vadd.f32 %v1184_v35, %v839_v32  ;;  %v879_v38 = vadd.f32 %v1184_v35, %v840_v29  ;;  %v907_v25 = vld [vmem:[%s1736_s30 + $0x98] sm:$0xff] }
 0x174   : > { %v880_v21 = vadd.f32 %v1184_v35, %v841_v34  ;;  %v881_v3 = vadd.f32 %v1184_v35, %v842_v51  ;;  %v882_v6 = vadd.f32 %v1184_v35, %v843_v37  ;;  %v883_v28 = vadd.f32 %v1184_v35, %v844_v49  ;;  %v908_v51 = vld [vmem:[%s1736_s30 + $0xa0] sm:$0xff]  ;;  %v909_v37 = vld [vmem:[%s1736_s30 + $0xa8] sm:$0xff]  ;;  %v910_v49 = vld [vmem:[%s1736_s30 + $0xb0] sm:$0xff] }
 0x175   : > { %v884_v63 = vadd.f32 %v1184_v35, %v845_v59  ;;  %v885_v40 = vadd.f32 %v1184_v35, %v846_v53  ;;  %v886_v46 = vadd.f32 %v1184_v35, %v847_v61  ;;  %v887_v45 = vadd.f32 %v1184_v35, %v848_v43  ;;  %v911_v43 = vld [vmem:[%s1736_s30 + $0xb8] sm:$0xff] }
 0x176   : > { %v1758_v39 = vadd.f32 %v888_v62, %v856_v36  ;;  %v1760_v32 = vadd.f32 %v889_v52, %v857_v13  ;;  %v1762_v29 = vadd.f32 %v890_v18, %v858_v50  ;;  %v1764_v34 = vadd.f32 %v891_v0, %v859_v54  ;;  %v912_v36 = vld [vmem:[%s1736_s30 + $0xc0] sm:$0xff]  ;;  %v913_v13 = vld [vmem:[%s1736_s30 + $0xc8] sm:$0xff]  ;;  %v915_v52 = vld [vmem:[%s1736_s30 + $0xd8] sm:$0xff] }
 0x177   : > { %v1769_v35 = vadd.f32 %v892_v7, %v860_v60  ;;  %v1771_v59 = vadd.f32 %v893_v8, %v861_v56  ;;  %v1773_v53 = vadd.f32 %v894_v10, %v862_v44  ;;  %v1775_v61 = vadd.f32 %v895_v16, %v863_v24  ;;  %v914_v56 = vld [vmem:[%s1736_s30 + $0xd0] sm:$0xff]  ;;  %v916_v44 = vld [vmem:[%s1736_s30 + $0xe0] sm:$0xff]  ;;  %v917_v10 = vld [vmem:[%s1736_s30 + $0xe8] sm:$0xff] }
 0x178   : > { %v1780_v50 = vadd.f32 %v896_v22, %v864_v11  ;;  %v1782_v54 = vadd.f32 %v897_v23, %v865_v47  ;;  %v1784_v62 = vadd.f32 %v898_v26, %v866_v57  ;;  %v1786_v60 = vadd.f32 %v899_v41, %v867_v14  ;;  %v918_v8 = vld [vmem:[%s1736_s30 + $0xf0] sm:$0xff]  ;;  %v919_v11 = vld [vmem:[%s1736_s30 + $0xf8] sm:$0xff] }
 0x179   : > { %v1791_v18 = vadd.f32 %v900_v9, %v868_v1  ;;  %v1793_v24 = vadd.f32 %v901_v19, %v869_v33  ;;  %v1795_v0 = vadd.f32 %v902_v42, %v870_v2  ;;  %v1797_v7 = vadd.f32 %v903_v58, %v871_v5 }
 0x17a   : > { %v1802_v47 = vadd.f32 %v904_v48, %v872_v4  ;;  %v1804_v57 = vadd.f32 %v905_v55, %v873_v17  ;;  %v1806_v14 = vadd.f32 %v906_v15, %v874_v20  ;;  %v1808_v16 = vadd.f32 %v907_v25, %v875_v12 }
 0x17b   : > { %v1810_v22 = vadd.f32 %v908_v51, %v876_v27  ;;  %v1812_v1 = vadd.f32 %v909_v37, %v877_v31  ;;  %v1814_v33 = vadd.f32 %v910_v49, %v878_v30  ;;  %v1816_v2 = vadd.f32 %v911_v43, %v879_v38 }
 0x17c   : > { %v1818_v5 = vadd.f32 %v912_v36, %v880_v21  ;;  %v1820_v23 = vadd.f32 %v913_v13, %v881_v3  ;;  %v1822_v4 = vadd.f32 %v914_v56, %v882_v6  ;;  %v1824_v17 = vadd.f32 %v915_v52, %v883_v28 }
 0x17d   : > { %v1826_v20 = vadd.f32 %v916_v44, %v884_v63  ;;  %v1828_v12 = vadd.f32 %v917_v10, %v885_v40  ;;  %v1830_v26 = vadd.f32 %v918_v8, %v886_v46  ;;  %v1832_v27 = vadd.f32 %v919_v11, %v887_v45 }
 0x17e   : > { %vm952_vm0 = vcmp.ge.f32.partialorder %v1758_v39, 0.0  ;;  %vm953_vm1 = vcmp.ge.f32.partialorder %v1760_v32, 0.0  ;;  %vm954_vm2 = vcmp.ge.f32.partialorder %v1762_v29, 0.0  ;;  %vm955_vm3 = vcmp.ge.f32.partialorder %v1764_v34, 0.0 }
 0x17f   : > { %vm956_vm4 = vcmp.ge.f32.partialorder %v1769_v35, 0.0  ;;  %vm957_vm5 = vcmp.ge.f32.partialorder %v1771_v59, 0.0  ;;  %vm958_vm6 = vcmp.ge.f32.partialorder %v1773_v53, 0.0  ;;  %vm959_vm7 = vcmp.ge.f32.partialorder %v1775_v61, 0.0 }
 0x180   : > { %vm960_vm8 = vcmp.ge.f32.partialorder %v1780_v50, 0.0  ;;  %v984_v31 = vmul.f32 0.01, %v1758_v39  ;;  %v985_v30 = vmul.f32 0.01, %v1760_v32  ;;  %vm967_vm15 = vcmp.ge.f32.partialorder %v1797_v7, 0.0 }
 0x181   : > { %v986_v38 = vmul.f32 0.01, %v1762_v29  ;;  %vm968_vm9 = vcmp.ge.f32.partialorder %v1802_v47, 0.0  ;;  %v987_v41 = vmul.f32 0.01, %v1764_v34  ;;  %vm973_vm14 = vcmp.ge.f32.partialorder %v1812_v1, 0.0 }
 0x182   : > { %v988_v9 = vmul.f32 0.01, %v1769_v35  ;;  %v989_v19 = vmul.f32 0.01, %v1771_v59  ;;  %v990_v21 = vmul.f32 0.01, %v1773_v53  ;;  %v1016_v28 = vsel %vm952_vm0, %v1758_v39, %v984_v31 }
 0x183   : > { %v991_v3 = vmul.f32 0.01, %v1775_v61  ;;  %v992_v6 = vmul.f32 0.01, %v1780_v50  ;;  %vm974_vm10 = vcmp.ge.f32.partialorder %v1814_v33, 0.0  ;;  %v1017_v63 = vsel %vm953_vm1, %v1760_v32, %v985_v30  ;;  %1048 = vst [vmem:[%s1849_s9] sm:$0xff] %v1016_v28 }
 0x184   : > { %v993_v42 = vmul.f32 0.01, %v1782_v54  ;;  %v994_v58 = vmul.f32 0.01, %v1784_v62  ;;  %v995_v48 = vmul.f32 0.01, %v1786_v60  ;;  %v1018_v55 = vsel %vm954_vm2, %v1762_v29, %v986_v38 }
 0x185   : > { %vm978_vm0 = vcmp.ge.f32.partialorder %v1822_v4, 0.0  ;;  %vm980_vm12 = vcmp.ge.f32.partialorder %v1826_v20, 0.0  ;;  %vm981_vm11 = vcmp.ge.f32.partialorder %v1828_v12, 0.0  ;;  %v996_v40 = vmul.f32 0.01, %v1791_v18  ;;  %1049 = vst [vmem:[%s1849_s9 + $0x8] sm:$0xff] %v1017_v63 }
 0x186   : > { %v997_v46 = vmul.f32 0.01, %v1793_v24  ;;  %v998_v45 = vmul.f32 0.01, %v1795_v0  ;;  %vm982_vm1 = vcmp.ge.f32.partialorder %v1830_v26, 0.0  ;;  %vm983_vm13 = vcmp.ge.f32.partialorder %v1832_v27, 0.0 }
 0x187   : > { %v999_v15 = vmul.f32 0.01, %v1797_v7  ;;  %v1000_v25 = vmul.f32 0.01, %v1802_v47  ;;  %v1001_v39 = vmul.f32 0.01, %v1804_v57  ;;  %v1019_v32 = vsel %vm955_vm3, %v1764_v34, %v987_v41 }
 0x188   : > { %1050 = vst [vmem:[%s1849_s9 + $0x10] sm:$0xff] %v1018_v55  ;;  %v1002_v29 = vmul.f32 0.01, %v1806_v14  ;;  %v1003_v51 = vmul.f32 0.01, %v1808_v16  ;;  %v1020_v49 = vsel %vm956_vm4, %v1769_v35, %v988_v9  ;;  %1051 = vst [vmem:[%s1849_s9 + $0x18] sm:$0xff] %v1019_v32  ;;  %v1021_v13 = vsel %vm957_vm5, %v1771_v59, %v989_v19 }
 0x189   : > { %v1004_v37 = vmul.f32 0.01, %v1810_v22  ;;  %v1005_v43 = vmul.f32 0.01, %v1812_v1  ;;  %v1006_v36 = vmul.f32 0.01, %v1814_v33  ;;  %v1022_v44 = vsel %vm958_vm6, %v1773_v53, %v990_v21 }
 0x18a   : > { %v1007_v34 = vmul.f32 0.01, %v1816_v2  ;;  %1052 = vst [vmem:[%s1849_s9 + $0x20] sm:$0xff] %v1020_v49  ;;  %v1008_v56 = vmul.f32 0.01, %v1818_v5  ;;  %1053 = vst [vmem:[%s1849_s9 + $0x28] sm:$0xff] %v1021_v13  ;;  %v1023_v10 = vsel %vm959_vm7, %v1775_v61, %v991_v3  ;;  %v1024_v30 = vsel %vm960_vm8, %v1780_v50, %v992_v6 }
 0x18b   : > { %v1009_v52 = vmul.f32 0.01, %v1820_v23  ;;  %v1010_v35 = vmul.f32 0.01, %v1822_v4  ;;  %v1011_v8 = vmul.f32 0.01, %v1824_v17 }
 0x18c   : > { %v1012_v11 = vmul.f32 0.01, %v1826_v20  ;;  %v1013_v59 = vmul.f32 0.01, %v1828_v12  ;;  %1054 = vst [vmem:[%s1849_s9 + $0x30] sm:$0xff] %v1022_v44  ;;  %vm2043_vm2 = vcmp.ge.f32.partialorder %v1782_v54, 0.0 }
 0x18d   : > { %v1014_v31 = vmul.f32 0.01, %v1830_v26  ;;  %v1015_v53 = vmul.f32 0.01, %v1832_v27  ;;  %v1025_v38 = vsel %vm2043_vm2, %v1782_v54, %v993_v42  ;;  %1055 = vst [vmem:[%s1849_s9 + $0x38] sm:$0xff] %v1023_v10  ;;  %vm2044_vm3 = vcmp.ge.f32.partialorder %v1784_v62, 0.0 }
 0x18e   : > { %v1026_v61 = vsel %vm2044_vm3, %v1784_v62, %v994_v58  ;;  %vm2045_vm4 = vcmp.ge.f32.partialorder %v1786_v60, 0.0  ;;  %vm2046_vm5 = vcmp.ge.f32.partialorder %v1791_v18, 0.0  ;;  %vm2047_vm6 = vcmp.ge.f32.partialorder %v1793_v24, 0.0  ;;  %1056 = vst [vmem:[%s1849_s9 + $0x40] sm:$0xff] %v1024_v30  ;;  %1057 = vst [vmem:[%s1849_s9 + $0x48] sm:$0xff] %v1025_v38 }
 0x18f   : > { %v1027_v41 = vsel %vm2045_vm4, %v1786_v60, %v995_v48  ;;  %v1028_v9 = vsel %vm2046_vm5, %v1791_v18, %v996_v40  ;;  %v1029_v50 = vsel %vm2047_vm6, %v1793_v24, %v997_v46  ;;  %vm2048_vm7 = vcmp.ge.f32.partialorder %v1795_v0, 0.0  ;;  %1058 = vst [vmem:[%s1849_s9 + $0x50] sm:$0xff] %v1026_v61 }
 0x190   : > { %v1030_v54 = vsel %vm2048_vm7, %v1795_v0, %v998_v45  ;;  %v1031_v62 = vsel %vm967_vm15, %v1797_v7, %v999_v15  ;;  %v1032_v60 = vsel %vm968_vm9, %v1802_v47, %v1000_v25  ;;  %vm2049_vm8 = vcmp.ge.f32.partialorder %v1804_v57, 0.0  ;;  %1059 = vst [vmem:[%s1849_s9 + $0x58] sm:$0xff] %v1027_v41  ;;  %1060 = vst [vmem:[%s1849_s9 + $0x60] sm:$0xff] %v1028_v9 }
 0x191   : > { %v1033_v18 = vsel %vm2049_vm8, %v1804_v57, %v1001_v39  ;;  %1061 = vst [vmem:[%s1849_s9 + $0x68] sm:$0xff] %v1029_v50  ;;  %vm2050_vm2 = vcmp.ge.f32.partialorder %v1806_v14, 0.0  ;;  %vm2051_vm15 = vcmp.ge.f32.partialorder %v1808_v16, 0.0  ;;  %vm2052_vm9 = vcmp.ge.f32.partialorder %v1810_v22, 0.0  ;;  %1062 = vst [vmem:[%s1849_s9 + $0x70] sm:$0xff] %v1030_v54 }
 0x192   : > { %v1034_v24 = vsel %vm2050_vm2, %v1806_v14, %v1002_v29  ;;  %v1035_v0 = vsel %vm2051_vm15, %v1808_v16, %v1003_v51  ;;  %v1036_v7 = vsel %vm2052_vm9, %v1810_v22, %v1004_v37  ;;  %v1037_v47 = vsel %vm973_vm14, %v1812_v1, %v1005_v43  ;;  %1063 = vst [vmem:[%s1849_s9 + $0x78] sm:$0xff] %v1031_v62 }
 0x193   : > { %1064 = vst [vmem:[%s1849_s9 + $0x80] sm:$0xff] %v1032_v60  ;;  %1065 = vst [vmem:[%s1849_s9 + $0x88] sm:$0xff] %v1033_v18  ;;  %v1038_v57 = vsel %vm974_vm10, %v1814_v33, %v1006_v36  ;;  %vm2053_vm3 = vcmp.ge.f32.partialorder %v1816_v2, 0.0  ;;  %vm2054_vm4 = vcmp.ge.f32.partialorder %v1818_v5, 0.0  ;;  %vm2055_vm14 = vcmp.ge.f32.partialorder %v1820_v23, 0.0 }
 0x194   : > { %v1039_v14 = vsel %vm2053_vm3, %v1816_v2, %v1007_v34  ;;  %v1040_v16 = vsel %vm2054_vm4, %v1818_v5, %v1008_v56  ;;  %v1041_v22 = vsel %vm2055_vm14, %v1820_v23, %v1009_v52  ;;  %1066 = vst [vmem:[%s1849_s9 + $0x90] sm:$0xff] %v1034_v24  ;;  %1067 = vst [vmem:[%s1849_s9 + $0x98] sm:$0xff] %v1035_v0  ;;  %vm2056_vm10 = vcmp.ge.f32.partialorder %v1824_v17, 0.0 }
 0x195   : > { %1068 = vst [vmem:[%s1849_s9 + $0xa0] sm:$0xff] %v1036_v7  ;;  %1069 = vst [vmem:[%s1849_s9 + $0xa8] sm:$0xff] %v1037_v47  ;;  %v1042_v1 = vsel %vm978_vm0, %v1822_v4, %v1010_v35  ;;  %v1043_v33 = vsel %vm2056_vm10, %v1824_v17, %v1011_v8  ;;  %v1044_v2 = vsel %vm980_vm12, %v1826_v20, %v1012_v11 }
 0x196   : > { %v1045_v5 = vsel %vm981_vm11, %v1828_v12, %v1013_v59  ;;  %1070 = vst [vmem:[%s1849_s9 + $0xb0] sm:$0xff] %v1038_v57  ;;  %1071 = vst [vmem:[%s1849_s9 + $0xb8] sm:$0xff] %v1039_v14  ;;  %v1046_v23 = vsel %vm982_vm1, %v1830_v26, %v1014_v31  ;;  %v1047_v4 = vsel %vm983_vm13, %v1832_v27, %v1015_v53 }
 0x197   : > { %1072 = vst [vmem:[%s1849_s9 + $0xc0] sm:$0xff] %v1040_v16  ;;  %1073 = vst [vmem:[%s1849_s9 + $0xc8] sm:$0xff] %v1041_v22 }
 0x198   : > { %1074 = vst [vmem:[%s1849_s9 + $0xd0] sm:$0xff] %v1042_v1  ;;  %1075 = vst [vmem:[%s1849_s9 + $0xd8] sm:$0xff] %v1043_v33 }
 0x199   : > { %1076 = vst [vmem:[%s1849_s9 + $0xe0] sm:$0xff] %v1044_v2  ;;  %1077 = vst [vmem:[%s1849_s9 + $0xe8] sm:$0xff] %v1045_v5 }
 0x19a   : > { %1078 = vst [vmem:[%s1849_s9 + $0xf0] sm:$0xff] %v1046_v23  ;;  %1079 = vst [vmem:[%s1849_s9 + $0xf8] sm:$0xff] %v1047_v4 }
 0x19b PF: > { %s16_s21 = sadd.s32 1, %s1318_s21  }
 0x19c   : > { %p13_p4 = scmp.ge.s32.totalorder %s16_s21, 4  }
 0x19e   :  { %15 = sbr.rel (!%p13_p4) target bundleno = 1 (0x1), region = 77 }

// kernel: residual_encoder_unet_forward.18
= control target key start
LH: loop header
LB: loop body
LE: loop exit
PB: predicated region body
PF: predicated region fallthrough
CT: control target
= control target key end

     0   :  { %s684_s18 = smov 0   ;;  %s750_s0 = inlined_call_operand.vmem [shape: bf16[2,64,128], index: 0, kind: input, shape index: {}]   ;;  %s751_s1 = inlined_call_operand.vmem [shape: bf16[128,128], index: 1, kind: input, shape index: {}]   ;;  %s752_s2 = inlined_call_operand.vmem [shape: f32[1,128], index: 2, kind: input, shape index: {}]   ;;  %s753_s3 = inlined_call_operand.vmem [shape: f32[1,128], index: 3, kind: input, shape index: {}]   ;;  %s754_s4 = inlined_call_operand.vmem [shape: f32[1,128], index: 4, kind: input, shape index: {}]   ;;  %s755_s5 = inlined_call_operand.vmem [shape: f32[2,64,128], index: 5, kind: output, shape index: {}]  }
   0x1 LB: > { %s544_s19 = sadd.s32 4294967295, %s652_s18   ;;  %p548_p0 = scmp.ge.s32.totalorder %s652_s18, 1  ;;  %s652_s18 = sphi %s684_s18, %s15_s18  }
   0x2   : > { %p187_p1 = scmp.lt.s32.totalorder %s652_s18, 3 }
   0x4   : > { %p188_p2 = pnand %p548_p0, %p187_p1 }
   0x5   : > { %v632_v0 = vld [vmem:[%s751_s1] sm:$0xff] (!%p188_p2)   ;;  %p215_p3 = scmp.lt.s32.totalorder (!%p188_p2), %s544_s19, 1  ;;  %v633_v1 = vld [vmem:[%s751_s1 + $0x8] sm:$0xff] (!%p188_p2)   ;;  %v634_v2 = vld [vmem:[%s751_s1 + $0x10] sm:$0xff] (!%p188_p2)  }
   0x6   : > { %191 = sbr.rel (%p188_p2) target bundleno = 312 (0x138), region = 40  ;;  %584 = vmatprep.subr.bf16.mxu0 (!%p188_p2), %v632_v0  ;;  %608 = vmatprep.subr.bf16.mxu1 (!%p188_p2), %v632_v0  ;;  %v635_v3 = vld [vmem:[%s751_s1 + $0x18] sm:$0xff] (!%p188_p2)   ;;  %v636_v6 = vld [vmem:[%s751_s1 + $0x20] sm:$0xff] (!%p188_p2)   ;;  %v637_v7 = vld [vmem:[%s751_s1 + $0x28] sm:$0xff] (!%p188_p2)  }
   0x7   : > { %585 = vmatpush3.bf16.msra.mxu0 (!%p188_p2), %v632_v0  ;;  %616 = vmatpush3.bf16.msra.mxu1 (!%p188_p2), %v632_v0  ;;  %v638_v8 = vld [vmem:[%s751_s1 + $0x30] sm:$0xff] (!%p188_p2)   ;;  %v639_v9 = vld [vmem:[%s751_s1 + $0x38] sm:$0xff] (!%p188_p2)   ;;  %v553_v12 = vld [vmem:[%s752_s2] ss:$0 sm:$0xff] (!%p188_p2) }
   0x8   : > { %586 = vmatprep.subr.bf16.mxu0 (!%p188_p2), %v633_v1  ;;  %609 = vmatprep.subr.bf16.mxu1 (!%p188_p2), %v633_v1 }
   0xb   : > { %587 = vmatpush3.bf16.msra.mxu0 (!%p188_p2), %v633_v1  ;;  %617 = vmatpush3.bf16.msra.mxu1 (!%p188_p2), %v633_v1 }
   0xc   : > { %588 = vmatprep.subr.bf16.mxu0 (!%p188_p2), %v634_v2  ;;  %610 = vmatprep.subr.bf16.mxu1 (!%p188_p2), %v634_v2 }
   0xd   : > { %s757_s19 = smov (!%p215_p3, %s544_s19), 1 }
   0xe   : > { %s570_s26 = sshll.u32 %s757_s19, 5  ;;  %s571_s21 = sshll.u32 %s757_s19, 6 }
   0xf   : > { %s707_s29 = scalar_lea.vmem %s750_s0, %s570_s26  ;;  %589 = vmatpush3.bf16.msra.mxu0 %v634_v2  ;;  %618 = vmatpush3.bf16.msra.mxu1 %v634_v2  ;;  %s224_s19 = scalar_lea.vmem %s755_s5, %s571_s21 }
  0x10   : > { %v640_v4 = vld [vmem:[%s707_s29] sm:$0xff]   ;;  %v642_v5 = vld [vmem:[%s707_s29 + $0x10] sm:$0xff]   ;;  %590 = vmatprep.subr.bf16.mxu0 %v635_v3  ;;  %611 = vmatprep.subr.bf16.mxu1 %v635_v3  ;;  %v641_v10 = vld [vmem:[%s707_s29 + $0x8] sm:$0xff]  }
  0x11   : > { %600 = vmatprep.mubr.bf16.mxu0 %v640_v4  ;;  %604 = vmatprep.mubr.bf16.mxu1 %v642_v5  ;;  %v643_v11 = vld [vmem:[%s707_s29 + $0x18] sm:$0xff]  }
  0x13   : > { %591 = vmatpush3.bf16.msra.mxu0 %v635_v3  ;;  %619 = vmatpush3.bf16.msra.mxu1 %v635_v3 }
  0x14   : > { %592 = vmatprep.subr.bf16.mxu0 %v636_v6  ;;  %612 = vmatprep.subr.bf16.mxu1 %v636_v6 }
  0x17   : > { %593 = vmatpush3.bf16.msra.mxu0 %v636_v6  ;;  %620 = vmatpush3.bf16.msra.mxu1 %v636_v6 }
  0x18   : > { %594 = vmatprep.subr.bf16.mxu0 %v637_v7  ;;  %613 = vmatprep.subr.bf16.mxu1 %v637_v7 }
  0x1b   : > { %595 = vmatpush3.bf16.msra.mxu0 %v637_v7  ;;  %621 = vmatpush3.bf16.msra.mxu1 %v637_v7 }
  0x1c   : > { %596 = vmatprep.subr.bf16.mxu0 %v638_v8  ;;  %614 = vmatprep.subr.bf16.mxu1 %v638_v8 }
  0x1f   : > { %597 = vmatpush3.bf16.msra.mxu0 %v638_v8  ;;  %622 = vmatpush3.bf16.msra.mxu1 %v638_v8 }
  0x20   : > { %598 = vmatprep.subr.bf16.mxu0 %v639_v9  ;;  %615 = vmatprep.subr.bf16.mxu1 %v639_v9 }
  0x23   : > { %599 = vmatpush3.bf16.msra.mxu0 %v639_v9  ;;  %623 = vmatpush3.bf16.msra.mxu1 %v639_v9 }
  0x26   : > { %601 = vmatmul.mubr.bf16.vlgmr.msra.gmra.mrb[0].mxu0 %v641_v10  ;;  %605 = vmatmul.mubr.bf16.vlgmr.msra.gmra.mrb[0].mxu1 %v643_v11 }
  0xf9   : > { %v602_v13 = vpop.f32.mrb[0].mxu0  ;;  %v606_v14 = vpop.f32.mrb[0].mxu1 }
  0xfa   : > { %v363_v15 = vpop.f32.mrb[1].mxu0  ;;  %v379_v16 = vpop.f32.mrb[1].mxu1  ;;  %v372_v22 = vadd.f32 %v602_v13, %v553_v12  ;;  %v388_v37 = vadd.f32 %v606_v14, %v553_v12  ;;  %v566_v14 = vld [vmem:[%s753_s3] ss:$0 sm:$0xff] }
  0xfb   : > { %v731_v17 = vadd.f32 %v553_v12, %v363_v15  ;;  %v603_v18 = vpop.f32.mrb[2].mxu0  ;;  %v607_v19 = vpop.f32.mrb[2].mxu1  ;;  %v380_v24 = vadd.f32 %v553_v12, %v379_v16 }
  0xfc   : > { %v366_v20 = vpop.f32.mrb[3].mxu0  ;;  %v382_v21 = vpop.f32.mrb[3].mxu1  ;;  %v375_v26 = vadd.f32 %v603_v18, %v553_v12  ;;  %v409_v29 = vmul.f32 %v372_v22, %v372_v22  ;;  %v391_v41 = vadd.f32 %v607_v19, %v553_v12  ;;  %v413_v44 = vmul.f32 %v388_v37, %v388_v37 }
  0xfd   : > { %v367_v23 = vadd.f32 %v553_v12, %v366_v20  ;;  %v407_v25 = vmul.f32 %v731_v17, %v731_v17  ;;  %v411_v32 = vmul.f32 %v380_v24, %v380_v24  ;;  %v383_v36 = vadd.f32 %v553_v12, %v382_v21 }
  0xfe   : > { %v410_v33 = vmul.f32 %v375_v26, %v375_v26  ;;  %v414_v47 = vmul.f32 %v391_v41, %v391_v41 }
  0xff   : > { %v394_v27 = vadd.f32 %v367_v23, %v731_v17  ;;  %v408_v28 = vmul.f32 %v367_v23, %v367_v23  ;;  %v412_v43 = vmul.f32 %v383_v36, %v383_v36 }
 0x101   : > { %v395_v30 = vadd.f32 %v394_v27, %v372_v22  ;;  %v415_v31 = vadd.f32 %v408_v28, %v407_v25 }
 0x103   : > { %v416_v34 = vadd.f32 %v415_v31, %v409_v29  ;;  %v396_v35 = vadd.f32 %v395_v30, %v375_v26 }
 0x105   : > { %v397_v38 = vadd.f32 %v396_v35, %v380_v24  ;;  %v417_v39 = vadd.f32 %v416_v34, %v410_v33 }
 0x107   : > { %v418_v40 = vadd.f32 %v417_v39, %v411_v32  ;;  %v398_v42 = vadd.f32 %v397_v38, %v383_v36 }
 0x109   : > { %v399_v45 = vadd.f32 %v398_v42, %v388_v37  ;;  %v419_v46 = vadd.f32 %v418_v40, %v412_v43 }
 0x10b   : > { %v400_v48 = vadd.f32 %v399_v45, %v391_v41  ;;  %v420_v49 = vadd.f32 %v419_v46, %v413_v44 }
 0x10d   : > { %v401_v50 = vrot.slane %v400_v48, 4  ;;  %v421_v51 = vadd.f32 %v420_v49, %v414_v47 }
 0x10f   : > { %v402_v52 = vadd.f32 %v401_v50, %v400_v48  ;;  %v422_v53 = vrot.slane %v421_v51, 4 }
 0x111   : > { %v403_v54 = vrot.slane %v402_v52, 2  ;;  %v423_v55 = vadd.f32 %v422_v53, %v421_v51 }
 0x113   : > { %v404_v56 = vadd.f32 %v403_v54, %v402_v52  ;;  %v424_v57 = vrot.slane %v423_v55, 2 }
 0x115   : > { %v405_v58 = vrot.slane %v404_v56, 1  ;;  %v425_v59 = vadd.f32 %v424_v57, %v423_v55 }
 0x117   : > { %v406_v60 = vadd.f32 %v405_v58, %v404_v56  ;;  %v426_v61 = vrot.slane %v425_v59, 1 }
 0x119   : > { %v427_v62 = vadd.f32 %v426_v61, %v425_v59  ;;  %v428_v63 = vmul.f32 0.015625, %v406_v60 }
 0x11b   : > { %v429_v0 = vmul.f32 0.015625, %v427_v62  ;;  %v430_v1 = vmul.f32 %v428_v63, %v428_v63  ;;  %v433_v2 = vsub.f32 %v731_v17, %v428_v63  ;;  %v434_v3 = vsub.f32 %v367_v23, %v428_v63  ;;  %v567_v23 = vld [vmem:[%s754_s4] ss:$0 sm:$0xff] }
 0x11c   : > { %v435_v4 = vsub.f32 %v372_v22, %v428_v63  ;;  %v436_v5 = vsub.f32 %v375_v26, %v428_v63  ;;  %v437_v6 = vsub.f32 %v380_v24, %v428_v63  ;;  %v438_v7 = vsub.f32 %v383_v36, %v428_v63 }
 0x11d   : > { %v431_v8 = vsub.f32 %v429_v0, %v430_v1  ;;  %v439_v9 = vsub.f32 %v388_v37, %v428_v63  ;;  %v440_v10 = vsub.f32 %v391_v41, %v428_v63 }
 0x11f   : > { %v432_v11 = vmax.f32 %v431_v8, 0.0 }
 0x121   : > { %v441_v12 = vadd.f32 1e-05, %v432_v11 }
 0x123   : > { %644 = vrsqrt.f32 %v441_v12 }
 0x12d   : > { %v645_v13 = vpop.eup %644 }
 0x12e   : > { %v443_v15 = vmul.f32 %v645_v13, %v433_v2  ;;  %v444_v16 = vmul.f32 %v645_v13, %v434_v3  ;;  %v445_v17 = vmul.f32 %v645_v13, %v435_v4  ;;  %v446_v18 = vmul.f32 %v645_v13, %v436_v5 }
 0x12f   : > { %v447_v19 = vmul.f32 %v645_v13, %v437_v6  ;;  %v448_v20 = vmul.f32 %v645_v13, %v438_v7  ;;  %v449_v21 = vmul.f32 %v645_v13, %v439_v9  ;;  %v450_v22 = vmul.f32 %v645_v13, %v440_v10 }
 0x130   : > { %v458_v24 = vmul.f32 %v566_v14, %v443_v15  ;;  %v459_v25 = vmul.f32 %v566_v14, %v444_v16  ;;  %v460_v26 = vmul.f32 %v566_v14, %v445_v17  ;;  %v461_v27 = vmul.f32 %v566_v14, %v446_v18 }
 0x131   : > { %v462_v28 = vmul.f32 %v566_v14, %v447_v19  ;;  %v463_v29 = vmul.f32 %v566_v14, %v448_v20  ;;  %v464_v30 = vmul.f32 %v566_v14, %v449_v21  ;;  %v465_v31 = vmul.f32 %v566_v14, %v450_v22 }
 0x132   : > { %v473_v32 = vadd.f32 %v567_v23, %v458_v24  ;;  %v474_v33 = vadd.f32 %v567_v23, %v459_v25  ;;  %v475_v34 = vadd.f32 %v567_v23, %v460_v26  ;;  %v476_v35 = vadd.f32 %v567_v23, %v461_v27 }
 0x133   : > { %v477_v36 = vadd.f32 %v567_v23, %v462_v28  ;;  %v478_v37 = vadd.f32 %v567_v23, %v463_v29  ;;  %v479_v38 = vadd.f32 %v567_v23, %v464_v30  ;;  %v480_v39 = vadd.f32 %v567_v23, %v465_v31 }
 0x134   : > { %481 = vst [vmem:[%s224_s19] sm:$0xff] %v473_v32  ;;  %482 = vst [vmem:[%s224_s19 + $0x8] sm:$0xff] %v474_v33 }
 0x135   : > { %483 = vst [vmem:[%s224_s19 + $0x10] sm:$0xff] %v475_v34  ;;  %484 = vst [vmem:[%s224_s19 + $0x18] sm:$0xff] %v476_v35 }
 0x136   : > { %485 = vst [vmem:[%s224_s19 + $0x20] sm:$0xff] %v477_v36  ;;  %486 = vst [vmem:[%s224_s19 + $0x28] sm:$0xff] %v478_v37 }
 0x137   : > { %487 = vst [vmem:[%s224_s19 + $0x30] sm:$0xff] %v479_v38  ;;  %488 = vst [vmem:[%s224_s19 + $0x38] sm:$0xff] %v480_v39 }
 0x138 PF: > { %s15_s18 = sadd.s32 1, %s652_s18  }
 0x139   : > { %p12_p4 = scmp.ge.s32.totalorder %s15_s18, 4  }
 0x13b   :  { %14 = sbr.rel (!%p12_p4) target bundleno = 1 (0x1), region = 70 }

// kernel: residual_encoder_unet_forward.17
= control target key start
LH: loop header
LB: loop body
LE: loop exit
PB: predicated region body
PF: predicated region fallthrough
CT: control target
= control target key end

     0   :  { %s708_s18 = smov 0   ;;  %s782_s0 = inlined_call_operand.vmem [shape: bf16[2,64,128], index: 0, kind: input, shape index: {}]   ;;  %s783_s1 = inlined_call_operand.vmem [shape: bf16[128,128], index: 1, kind: input, shape index: {}]   ;;  %s784_s2 = inlined_call_operand.vmem [shape: f32[1,128], index: 2, kind: input, shape index: {}]   ;;  %s785_s3 = inlined_call_operand.vmem [shape: f32[1,128], index: 3, kind: input, shape index: {}]   ;;  %s786_s4 = inlined_call_operand.vmem [shape: f32[1,128], index: 4, kind: input, shape index: {}]   ;;  %s787_s5 = inlined_call_operand.vmem [shape: f32[2,64,128], index: 5, kind: output, shape index: {}]  }
   0x1 LB: > { %s568_s19 = sadd.s32 4294967295, %s676_s18   ;;  %p572_p0 = scmp.ge.s32.totalorder %s676_s18, 1  ;;  %s676_s18 = sphi %s708_s18, %s15_s18  }
   0x2   : > { %p187_p1 = scmp.lt.s32.totalorder %s676_s18, 3 }
   0x4   : > { %p188_p2 = pnand %p572_p0, %p187_p1 }
   0x5   : > { %v656_v0 = vld [vmem:[%s783_s1] sm:$0xff] (!%p188_p2)   ;;  %p215_p3 = scmp.lt.s32.totalorder (!%p188_p2), %s568_s19, 1  ;;  %v657_v1 = vld [vmem:[%s783_s1 + $0x8] sm:$0xff] (!%p188_p2)   ;;  %v658_v2 = vld [vmem:[%s783_s1 + $0x10] sm:$0xff] (!%p188_p2)  }
   0x6   : > { %191 = sbr.rel (%p188_p2) target bundleno = 318 (0x13e), region = 40  ;;  %608 = vmatprep.subr.bf16.mxu0 (!%p188_p2), %v656_v0  ;;  %632 = vmatprep.subr.bf16.mxu1 (!%p188_p2), %v656_v0  ;;  %v659_v3 = vld [vmem:[%s783_s1 + $0x18] sm:$0xff] (!%p188_p2)   ;;  %v660_v6 = vld [vmem:[%s783_s1 + $0x20] sm:$0xff] (!%p188_p2)   ;;  %v661_v7 = vld [vmem:[%s783_s1 + $0x28] sm:$0xff] (!%p188_p2)  }
   0x7   : > { %609 = vmatpush3.bf16.msra.mxu0 (!%p188_p2), %v656_v0  ;;  %640 = vmatpush3.bf16.msra.mxu1 (!%p188_p2), %v656_v0  ;;  %v662_v8 = vld [vmem:[%s783_s1 + $0x30] sm:$0xff] (!%p188_p2)   ;;  %v663_v9 = vld [vmem:[%s783_s1 + $0x38] sm:$0xff] (!%p188_p2)   ;;  %v577_v12 = vld [vmem:[%s784_s2] ss:$0 sm:$0xff] (!%p188_p2) }
   0x8   : > { %610 = vmatprep.subr.bf16.mxu0 (!%p188_p2), %v657_v1  ;;  %633 = vmatprep.subr.bf16.mxu1 (!%p188_p2), %v657_v1 }
   0xb   : > { %611 = vmatpush3.bf16.msra.mxu0 (!%p188_p2), %v657_v1  ;;  %641 = vmatpush3.bf16.msra.mxu1 (!%p188_p2), %v657_v1 }
   0xc   : > { %612 = vmatprep.subr.bf16.mxu0 (!%p188_p2), %v658_v2  ;;  %634 = vmatprep.subr.bf16.mxu1 (!%p188_p2), %v658_v2 }
   0xd   : > { %s789_s19 = smov (!%p215_p3, %s568_s19), 1 }
   0xe   : > { %s594_s26 = sshll.u32 %s789_s19, 5  ;;  %s595_s23 = sshll.u32 %s789_s19, 6 }
   0xf   : > { %s731_s29 = scalar_lea.vmem %s782_s0, %s594_s26  ;;  %613 = vmatpush3.bf16.msra.mxu0 %v658_v2  ;;  %642 = vmatpush3.bf16.msra.mxu1 %v658_v2  ;;  %s224_s26 = scalar_lea.vmem %s787_s5, %s595_s23 }
  0x10   : > { %v664_v4 = vld [vmem:[%s731_s29] sm:$0xff]   ;;  %v666_v5 = vld [vmem:[%s731_s29 + $0x10] sm:$0xff]   ;;  %614 = vmatprep.subr.bf16.mxu0 %v659_v3  ;;  %635 = vmatprep.subr.bf16.mxu1 %v659_v3  ;;  %v665_v10 = vld [vmem:[%s731_s29 + $0x8] sm:$0xff]  }
  0x11   : > { %624 = vmatprep.mubr.bf16.mxu0 %v664_v4  ;;  %628 = vmatprep.mubr.bf16.mxu1 %v666_v5  ;;  %v667_v11 = vld [vmem:[%s731_s29 + $0x18] sm:$0xff]  }
  0x13   : > { %615 = vmatpush3.bf16.msra.mxu0 %v659_v3  ;;  %643 = vmatpush3.bf16.msra.mxu1 %v659_v3 }
  0x14   : > { %616 = vmatprep.subr.bf16.mxu0 %v660_v6  ;;  %636 = vmatprep.subr.bf16.mxu1 %v660_v6 }
  0x17   : > { %617 = vmatpush3.bf16.msra.mxu0 %v660_v6  ;;  %644 = vmatpush3.bf16.msra.mxu1 %v660_v6 }
  0x18   : > { %618 = vmatprep.subr.bf16.mxu0 %v661_v7  ;;  %637 = vmatprep.subr.bf16.mxu1 %v661_v7 }
  0x1b   : > { %619 = vmatpush3.bf16.msra.mxu0 %v661_v7  ;;  %645 = vmatpush3.bf16.msra.mxu1 %v661_v7 }
  0x1c   : > { %620 = vmatprep.subr.bf16.mxu0 %v662_v8  ;;  %638 = vmatprep.subr.bf16.mxu1 %v662_v8 }
  0x1f   : > { %621 = vmatpush3.bf16.msra.mxu0 %v662_v8  ;;  %646 = vmatpush3.bf16.msra.mxu1 %v662_v8 }
  0x20   : > { %622 = vmatprep.subr.bf16.mxu0 %v663_v9  ;;  %639 = vmatprep.subr.bf16.mxu1 %v663_v9 }
  0x23   : > { %623 = vmatpush3.bf16.msra.mxu0 %v663_v9  ;;  %647 = vmatpush3.bf16.msra.mxu1 %v663_v9 }
  0x26   : > { %625 = vmatmul.mubr.bf16.vlgmr.msra.gmra.mrb[0].mxu0 %v665_v10  ;;  %629 = vmatmul.mubr.bf16.vlgmr.msra.gmra.mrb[0].mxu1 %v667_v11 }
  0xf9   : > { %v626_v13 = vpop.f32.mrb[0].mxu0  ;;  %v630_v14 = vpop.f32.mrb[0].mxu1 }
  0xfa   : > { %v363_v15 = vpop.f32.mrb[1].mxu0  ;;  %v379_v16 = vpop.f32.mrb[1].mxu1  ;;  %v372_v22 = vadd.f32 %v626_v13, %v577_v12  ;;  %v388_v37 = vadd.f32 %v630_v14, %v577_v12  ;;  %v590_v14 = vld [vmem:[%s785_s3] ss:$0 sm:$0xff] }
  0xfb   : > { %v755_v17 = vadd.f32 %v577_v12, %v363_v15  ;;  %v627_v18 = vpop.f32.mrb[2].mxu0  ;;  %v631_v19 = vpop.f32.mrb[2].mxu1  ;;  %v380_v24 = vadd.f32 %v577_v12, %v379_v16 }
  0xfc   : > { %v366_v20 = vpop.f32.mrb[3].mxu0  ;;  %v382_v21 = vpop.f32.mrb[3].mxu1  ;;  %v375_v26 = vadd.f32 %v627_v18, %v577_v12  ;;  %v409_v29 = vmul.f32 %v372_v22, %v372_v22  ;;  %v391_v41 = vadd.f32 %v631_v19, %v577_v12  ;;  %v413_v44 = vmul.f32 %v388_v37, %v388_v37 }
  0xfd   : > { %v367_v23 = vadd.f32 %v577_v12, %v366_v20  ;;  %v407_v25 = vmul.f32 %v755_v17, %v755_v17  ;;  %v411_v32 = vmul.f32 %v380_v24, %v380_v24  ;;  %v383_v36 = vadd.f32 %v577_v12, %v382_v21 }
  0xfe   : > { %v410_v33 = vmul.f32 %v375_v26, %v375_v26  ;;  %v414_v47 = vmul.f32 %v391_v41, %v391_v41 }
  0xff   : > { %v394_v27 = vadd.f32 %v367_v23, %v755_v17  ;;  %v408_v28 = vmul.f32 %v367_v23, %v367_v23  ;;  %v412_v43 = vmul.f32 %v383_v36, %v383_v36 }
 0x101   : > { %v395_v30 = vadd.f32 %v394_v27, %v372_v22  ;;  %v415_v31 = vadd.f32 %v408_v28, %v407_v25 }
 0x103   : > { %v416_v34 = vadd.f32 %v415_v31, %v409_v29  ;;  %v396_v35 = vadd.f32 %v395_v30, %v375_v26 }
 0x105   : > { %v397_v38 = vadd.f32 %v396_v35, %v380_v24  ;;  %v417_v39 = vadd.f32 %v416_v34, %v410_v33 }
 0x107   : > { %v418_v40 = vadd.f32 %v417_v39, %v411_v32  ;;  %v398_v42 = vadd.f32 %v397_v38, %v383_v36 }
 0x109   : > { %v399_v45 = vadd.f32 %v398_v42, %v388_v37  ;;  %v419_v46 = vadd.f32 %v418_v40, %v412_v43 }
 0x10b   : > { %v400_v48 = vadd.f32 %v399_v45, %v391_v41  ;;  %v420_v49 = vadd.f32 %v419_v46, %v413_v44 }
 0x10d   : > { %v401_v50 = vrot.slane %v400_v48, 4  ;;  %v421_v51 = vadd.f32 %v420_v49, %v414_v47 }
 0x10f   : > { %v402_v52 = vadd.f32 %v401_v50, %v400_v48  ;;  %v422_v53 = vrot.slane %v421_v51, 4 }
 0x111   : > { %v403_v54 = vrot.slane %v402_v52, 2  ;;  %v423_v55 = vadd.f32 %v422_v53, %v421_v51 }
 0x113   : > { %v404_v56 = vadd.f32 %v403_v54, %v402_v52  ;;  %v424_v57 = vrot.slane %v423_v55, 2 }
 0x115   : > { %v405_v58 = vrot.slane %v404_v56, 1  ;;  %v425_v59 = vadd.f32 %v424_v57, %v423_v55 }
 0x117   : > { %v406_v60 = vadd.f32 %v405_v58, %v404_v56  ;;  %v426_v61 = vrot.slane %v425_v59, 1 }
 0x119   : > { %v427_v62 = vadd.f32 %v426_v61, %v425_v59  ;;  %v428_v63 = vmul.f32 0.015625, %v406_v60 }
 0x11b   : > { %v429_v0 = vmul.f32 0.015625, %v427_v62  ;;  %v430_v1 = vmul.f32 %v428_v63, %v428_v63  ;;  %v433_v2 = vsub.f32 %v755_v17, %v428_v63  ;;  %v434_v3 = vsub.f32 %v367_v23, %v428_v63  ;;  %v591_v23 = vld [vmem:[%s786_s4] ss:$0 sm:$0xff] }
 0x11c   : > { %v435_v4 = vsub.f32 %v372_v22, %v428_v63  ;;  %v436_v5 = vsub.f32 %v375_v26, %v428_v63  ;;  %v437_v6 = vsub.f32 %v380_v24, %v428_v63  ;;  %v438_v7 = vsub.f32 %v383_v36, %v428_v63 }
 0x11d   : > { %v431_v8 = vsub.f32 %v429_v0, %v430_v1  ;;  %v439_v9 = vsub.f32 %v388_v37, %v428_v63  ;;  %v440_v10 = vsub.f32 %v391_v41, %v428_v63 }
 0x11f   : > { %v432_v11 = vmax.f32 %v431_v8, 0.0 }
 0x121   : > { %v441_v12 = vadd.f32 1e-05, %v432_v11 }
 0x123   : > { %668 = vrsqrt.f32 %v441_v12 }
 0x12d   : > { %v669_v13 = vpop.eup %668 }
 0x12e   : > { %v443_v15 = vmul.f32 %v669_v13, %v433_v2  ;;  %v444_v16 = vmul.f32 %v669_v13, %v434_v3  ;;  %v445_v18 = vmul.f32 %v669_v13, %v435_v4  ;;  %v446_v17 = vmul.f32 %v669_v13, %v436_v5 }
 0x12f   : > { %v447_v19 = vmul.f32 %v669_v13, %v437_v6  ;;  %v448_v20 = vmul.f32 %v669_v13, %v438_v7  ;;  %v449_v21 = vmul.f32 %v669_v13, %v439_v9  ;;  %v450_v22 = vmul.f32 %v669_v13, %v440_v10 }
 0x130   : > { %v458_v24 = vmul.f32 %v590_v14, %v443_v15  ;;  %v459_v25 = vmul.f32 %v590_v14, %v444_v16  ;;  %v460_v26 = vmul.f32 %v590_v14, %v445_v18  ;;  %v461_v27 = vmul.f32 %v590_v14, %v446_v17 }
 0x131   : > { %v462_v28 = vmul.f32 %v590_v14, %v447_v19  ;;  %v463_v29 = vmul.f32 %v590_v14, %v448_v20  ;;  %v464_v30 = vmul.f32 %v590_v14, %v449_v21  ;;  %v465_v31 = vmul.f32 %v590_v14, %v450_v22 }
 0x132   : > { %v473_v32 = vadd.f32 %v591_v23, %v458_v24  ;;  %v474_v33 = vadd.f32 %v591_v23, %v459_v25  ;;  %v475_v34 = vadd.f32 %v591_v23, %v460_v26  ;;  %v476_v35 = vadd.f32 %v591_v23, %v461_v27 }
 0x133   : > { %v477_v36 = vadd.f32 %v591_v23, %v462_v28  ;;  %v478_v37 = vadd.f32 %v591_v23, %v463_v29  ;;  %v479_v38 = vadd.f32 %v591_v23, %v464_v30  ;;  %v480_v39 = vadd.f32 %v591_v23, %v465_v31 }
 0x134   : > { %vm481_vm0 = vcmp.ge.f32.partialorder %v473_v32, 0.0  ;;  %vm482_vm1 = vcmp.ge.f32.partialorder %v474_v33, 0.0  ;;  %vm483_vm2 = vcmp.ge.f32.partialorder %v475_v34, 0.0  ;;  %vm484_vm3 = vcmp.ge.f32.partialorder %v476_v35, 0.0 }
 0x135   : > { %vm485_vm4 = vcmp.ge.f32.partialorder %v477_v36, 0.0  ;;  %vm486_vm5 = vcmp.ge.f32.partialorder %v478_v37, 0.0  ;;  %vm487_vm6 = vcmp.ge.f32.partialorder %v479_v38, 0.0  ;;  %vm488_vm7 = vcmp.ge.f32.partialorder %v480_v39, 0.0 }
 0x136   : > { %v489_v40 = vmul.f32 0.01, %v473_v32  ;;  %v490_v41 = vmul.f32 0.01, %v474_v33  ;;  %v491_v42 = vmul.f32 0.01, %v475_v34 }
 0x137   : > { %v492_v43 = vmul.f32 0.01, %v476_v35  ;;  %v493_v44 = vmul.f32 0.01, %v477_v36  ;;  %v494_v45 = vmul.f32 0.01, %v478_v37 }
 0x138   : > { %v495_v46 = vmul.f32 0.01, %v479_v38  ;;  %v496_v47 = vmul.f32 0.01, %v480_v39  ;;  %v497_v48 = vsel %vm481_vm0, %v473_v32, %v489_v40  ;;  %v498_v49 = vsel %vm482_vm1, %v474_v33, %v490_v41 }
 0x139   : > { %v499_v50 = vsel %vm483_vm2, %v475_v34, %v491_v42  ;;  %v500_v51 = vsel %vm484_vm3, %v476_v35, %v492_v43  ;;  %v501_v52 = vsel %vm485_vm4, %v477_v36, %v493_v44  ;;  %v502_v53 = vsel %vm486_vm5, %v478_v37, %v494_v45  ;;  %505 = vst [vmem:[%s224_s26] sm:$0xff] %v497_v48 }
 0x13a   : > { %506 = vst [vmem:[%s224_s26 + $0x8] sm:$0xff] %v498_v49  ;;  %v503_v54 = vsel %vm487_vm6, %v479_v38, %v495_v46  ;;  %v504_v55 = vsel %vm488_vm7, %v480_v39, %v496_v47  ;;  %507 = vst [vmem:[%s224_s26 + $0x10] sm:$0xff] %v499_v50 }
 0x13b   : > { %508 = vst [vmem:[%s224_s26 + $0x18] sm:$0xff] %v500_v51  ;;  %509 = vst [vmem:[%s224_s26 + $0x20] sm:$0xff] %v501_v52 }
 0x13c   : > { %510 = vst [vmem:[%s224_s26 + $0x28] sm:$0xff] %v502_v53  ;;  %511 = vst [vmem:[%s224_s26 + $0x30] sm:$0xff] %v503_v54 }
 0x13d   : > { %512 = vst [vmem:[%s224_s26 + $0x38] sm:$0xff] %v504_v55 }
 0x13e PF: > { %s15_s18 = sadd.s32 1, %s676_s18  }
 0x13f   : > { %p12_p4 = scmp.ge.s32.totalorder %s15_s18, 4  }
 0x141   :  { %14 = sbr.rel (!%p12_p4) target bundleno = 1 (0x1), region = 70 }

// kernel: residual_encoder_unet_forward.19
= control target key start
LH: loop header
LB: loop body
LE: loop exit
PB: predicated region body
PF: predicated region fallthrough
CT: control target
= control target key end

     0   :  { %s903_s21 = smov 0   ;;  %s1015_s0 = inlined_call_operand.vmem [shape: bf16[2,64,256], index: 0, kind: input, shape index: {}]   ;;  %s1016_s1 = inlined_call_operand.vmem [shape: bf16[256,128], index: 1, kind: input, shape index: {}]   ;;  %s1017_s2 = inlined_call_operand.vmem [shape: f32[1,128], index: 2, kind: input, shape index: {}]   ;;  %s1018_s3 = inlined_call_operand.vmem [shape: f32[1,128], index: 3, kind: input, shape index: {}]   ;;  %s1019_s4 = inlined_call_operand.vmem [shape: f32[1,128], index: 4, kind: input, shape index: {}]   ;;  %s1020_s5 = inlined_call_operand.vmem [shape: f32[2,64,128], index: 5, kind: input, shape index: {}]   ;;  %s1021_s6 = inlined_call_operand.vmem [shape: f32[2,64,128], index: 6, kind: output, shape index: {}]  }
   0x1 LB: > { %s723_s22 = sadd.s32 4294967295, %s866_s21   ;;  %p727_p0 = scmp.ge.s32.totalorder %s866_s21, 1  ;;  %s866_s21 = sphi %s903_s21, %s16_s21  }
   0x2   : > { %p222_p1 = scmp.lt.s32.totalorder %s866_s21, 3 }
   0x4   : > { %p223_p2 = pnand %p727_p0, %p222_p1 }
   0x5   : > { %v830_v0 = vld [vmem:[%s1016_s1 + $0x40] sm:$0xff] (!%p223_p2)   ;;  %v832_v2 = vld [vmem:[%s1016_s1 + $0x48] sm:$0xff] (!%p223_p2)   ;;  %p257_p3 = scmp.lt.s32.totalorder (!%p223_p2), %s723_s22, 1  ;;  %v834_v4 = vld [vmem:[%s1016_s1 + $0x50] sm:$0xff] (!%p223_p2)  }
   0x6   : > { %226 = sbr.rel (%p223_p2) target bundleno = 326 (0x146), region = 44  ;;  %v831_v1 = vld [vmem:[%s1016_s1] sm:$0xff] (!%p223_p2)   ;;  %766 = vmatprep.subr.bf16.mxu0 (!%p223_p2), %v830_v0  ;;  %806 = vmatprep.subr.bf16.mxu1 (!%p223_p2), %v830_v0  ;;  %v833_v3 = vld [vmem:[%s1016_s1 + $0x8] sm:$0xff] (!%p223_p2)   ;;  %v835_v5 = vld [vmem:[%s1016_s1 + $0x10] sm:$0xff] (!%p223_p2)  }
   0x7   : > { %767 = vmatpush3.bf16.msra.mxu0 (!%p223_p2), %v831_v1  ;;  %814 = vmatpush3.bf16.msra.mxu1 (!%p223_p2), %v831_v1  ;;  %v836_v6 = vld [vmem:[%s1016_s1 + $0x58] sm:$0xff] (!%p223_p2)   ;;  %v838_v8 = vld [vmem:[%s1016_s1 + $0x60] sm:$0xff] (!%p223_p2)   ;;  %v840_v10 = vld [vmem:[%s1016_s1 + $0x68] sm:$0xff] (!%p223_p2)  }
   0x8   : > { %768 = vmatprep.subr.bf16.mxu0 (!%p223_p2), %v832_v2  ;;  %807 = vmatprep.subr.bf16.mxu1 (!%p223_p2), %v832_v2  ;;  %v837_v7 = vld [vmem:[%s1016_s1 + $0x18] sm:$0xff] (!%p223_p2)   ;;  %v839_v9 = vld [vmem:[%s1016_s1 + $0x20] sm:$0xff] (!%p223_p2)   ;;  %v841_v12 = vld [vmem:[%s1016_s1 + $0x28] sm:$0xff] (!%p223_p2)  }
   0x9   : > { %v842_v13 = vld [vmem:[%s1016_s1 + $0x70] sm:$0xff] (!%p223_p2)   ;;  %v844_v16 = vld [vmem:[%s1016_s1 + $0x78] sm:$0xff] (!%p223_p2)   ;;  %v734_v26 = vld [vmem:[%s1017_s2] ss:$0 sm:$0xff] (!%p223_p2) }
   0xa   : > { %v843_v15 = vld [vmem:[%s1016_s1 + $0x30] sm:$0xff] (!%p223_p2)   ;;  %v845_v17 = vld [vmem:[%s1016_s1 + $0x38] sm:$0xff] (!%p223_p2)  }
   0xb   : > { %769 = vmatpush3.bf16.msra.mxu0 (!%p223_p2), %v833_v3  ;;  %815 = vmatpush3.bf16.msra.mxu1 (!%p223_p2), %v833_v3 }
   0xc   : > { %770 = vmatprep.subr.bf16.mxu0 (!%p223_p2), %v834_v4  ;;  %808 = vmatprep.subr.bf16.mxu1 (!%p223_p2), %v834_v4 }
   0xd   : > { %s1023_s22 = smov (!%p257_p3, %s723_s22), 1 }
   0xe   : > { %s935_s15 = sshll.u32 %s1023_s22, 6 }
   0xf   : > { %771 = vmatpush3.bf16.msra.mxu0 %v835_v5  ;;  %816 = vmatpush3.bf16.msra.mxu1 %v835_v5  ;;  %s944_s20 = scalar_lea.vmem %s1015_s0, %s935_s15  ;;  %s266_s17 = scalar_lea.vmem %s1020_s5, %s935_s15 }
  0x10   : > { %772 = vmatprep.subr.bf16.mxu0 %v836_v6  ;;  %809 = vmatprep.subr.bf16.mxu1 %v836_v6  ;;  %v848_v11 = vld [vmem:[%s944_s20 + $0x4] ss:$8 sps:$4 sm:$0xff]   ;;  %v846_v18 = vld [vmem:[%s944_s20] ss:$8 sps:$4 sm:$0xff]   ;;  %v852_v20 = vld [vmem:[%s944_s20 + $0x14] ss:$8 sps:$4 sm:$0xff]   ;;  %s271_s25 = scalar_lea.vmem %s1021_s6, %s935_s15 }
  0x11   : > { %v851_v14 = vld [vmem:[%s944_s20 + $0x24] ss:$8 sps:$4 sm:$0xff]   ;;  %488 = vmatprep.mubr.bf16.mxu0 %v848_v11  ;;  %v849_v19 = vld [vmem:[%s944_s20 + $0x20] ss:$8 sps:$4 sm:$0xff]   ;;  %v855_v21 = vld [vmem:[%s944_s20 + $0x34] ss:$8 sps:$4 sm:$0xff]  }
  0x12   : > { %504 = vmatprep.mubr.bf16.mxu1 %v851_v14  ;;  %v854_v22 = vld [vmem:[%s944_s20 + $0x10] ss:$8 sps:$4 sm:$0xff]  }
  0x13   : > { %773 = vmatpush3.bf16.msra.mxu0 %v837_v7  ;;  %817 = vmatpush3.bf16.msra.mxu1 %v837_v7  ;;  %v857_v23 = vld [vmem:[%s944_s20 + $0x30] ss:$8 sps:$4 sm:$0xff]  }
  0x14   : > { %774 = vmatprep.subr.bf16.mxu0 %v838_v8  ;;  %810 = vmatprep.subr.bf16.mxu1 %v838_v8 }
  0x17   : > { %775 = vmatpush3.bf16.msra.mxu0 %v839_v9  ;;  %818 = vmatpush3.bf16.msra.mxu1 %v839_v9 }
  0x18   : > { %776 = vmatprep.subr.bf16.mxu0 %v840_v10  ;;  %811 = vmatprep.subr.bf16.mxu1 %v840_v10 }
  0x1b   : > { %777 = vmatpush3.bf16.msra.mxu0 %v841_v12  ;;  %819 = vmatpush3.bf16.msra.mxu1 %v841_v12 }
  0x1c   : > { %778 = vmatprep.subr.bf16.mxu0 %v842_v13  ;;  %812 = vmatprep.subr.bf16.mxu1 %v842_v13 }
  0x1f   : > { %779 = vmatpush3.bf16.msra.mxu0 %v843_v15  ;;  %820 = vmatpush3.bf16.msra.mxu1 %v843_v15 }
  0x20   : > { %780 = vmatprep.subr.bf16.mxu0 %v844_v16  ;;  %813 = vmatprep.subr.bf16.mxu1 %v844_v16 }
  0x23   : > { %781 = vmatpush3.bf16.msra.mxu0 %v845_v17  ;;  %821 = vmatpush3.bf16.msra.mxu1 %v845_v17 }
  0x26   : > { %489 = vmatmul.mubr.bf16.vlgmr.msra.gmra.mrb[0].mxu0 %v846_v18  ;;  %505 = vmatmul.mubr.bf16.vlgmr.msra.gmra.mrb[0].mxu1 %v849_v19 }
  0x27   : > { %496 = vmatprep.mubr.bf16.mxu0 %v852_v20  ;;  %512 = vmatprep.mubr.bf16.mxu1 %v855_v21 }
  0x2e   : > { %497 = vmatmul.mubr.bf16.gmra.mrb[4].mxu0 %v854_v22  ;;  %513 = vmatmul.mubr.bf16.gmra.mrb[4].mxu1 %v857_v23 }
  0xf9   : > { %v782_v24 = vpop.f32.mrb[0].mxu0  ;;  %v794_v25 = vpop.f32.mrb[0].mxu1 }
  0xfa   : > { %v783_v27 = vpop.f32.mrb[1].mxu0  ;;  %v795_v28 = vpop.f32.mrb[1].mxu1 }
  0xfb   : > { %v784_v29 = vadd.f32 %v783_v27, %v782_v24  ;;  %v785_v30 = vpop.f32.mrb[2].mxu0  ;;  %v796_v31 = vadd.f32 %v795_v28, %v794_v25  ;;  %v797_v32 = vpop.f32.mrb[2].mxu1 }
  0xfc   : > { %v786_v33 = vpop.f32.mrb[3].mxu0  ;;  %v798_v34 = vpop.f32.mrb[3].mxu1 }
  0xfd   : > { %v978_v35 = vadd.f32 %v784_v29, %v734_v26  ;;  %v787_v36 = vadd.f32 %v786_v33, %v785_v30  ;;  %v799_v37 = vadd.f32 %v798_v34, %v797_v32  ;;  %v507_v56 = vadd.f32 %v796_v31, %v734_v26 }
  0xff   : > { %v980_v38 = vadd.f32 %v787_v36, %v734_v26  ;;  %v534_v39 = vmul.f32 %v978_v35, %v978_v35  ;;  %v510_v60 = vadd.f32 %v799_v37, %v734_v26  ;;  %v538_v1 = vmul.f32 %v507_v56, %v507_v56 }
 0x101   : > { %v521_v40 = vadd.f32 %v980_v38, %v978_v35  ;;  %v535_v41 = vmul.f32 %v980_v38, %v980_v38  ;;  %v788_v42 = vpop.f32.mrb[4].mxu0  ;;  %v800_v43 = vpop.f32.mrb[4].mxu1  ;;  %v539_v4 = vmul.f32 %v510_v60, %v510_v60 }
 0x102   : > { %v789_v44 = vpop.f32.mrb[5].mxu0  ;;  %v801_v45 = vpop.f32.mrb[5].mxu1 }
 0x103   : > { %v542_v46 = vadd.f32 %v535_v41, %v534_v39  ;;  %v790_v47 = vadd.f32 %v789_v44, %v788_v42  ;;  %v791_v48 = vpop.f32.mrb[6].mxu0  ;;  %v802_v49 = vadd.f32 %v801_v45, %v800_v43  ;;  %v803_v50 = vpop.f32.mrb[6].mxu1 }
 0x104   : > { %v792_v51 = vpop.f32.mrb[7].mxu0  ;;  %v804_v52 = vpop.f32.mrb[7].mxu1 }
 0x105   : > { %v499_v53 = vadd.f32 %v790_v47, %v734_v26  ;;  %v793_v54 = vadd.f32 %v792_v51, %v791_v48  ;;  %v805_v55 = vadd.f32 %v804_v52, %v803_v50  ;;  %v515_v0 = vadd.f32 %v802_v49, %v734_v26  ;;  %v760_v51 = vld [vmem:[%s1019_s4] ss:$0 sm:$0xff] }
 0x106   : > { %v608_v52 = vld [vmem:[%s266_s17] sm:$0xff] }
 0x107   : > { %v522_v57 = vadd.f32 %v521_v40, %v499_v53  ;;  %v536_v58 = vmul.f32 %v499_v53, %v499_v53  ;;  %v502_v59 = vadd.f32 %v793_v54, %v734_v26  ;;  %v540_v7 = vmul.f32 %v515_v0, %v515_v0 }
 0x108   : > { %v518_v8 = vadd.f32 %v805_v55, %v734_v26 }
 0x109   : > { %v543_v61 = vadd.f32 %v542_v46, %v536_v58  ;;  %v523_v62 = vadd.f32 %v522_v57, %v502_v59  ;;  %v537_v63 = vmul.f32 %v502_v59, %v502_v59  ;;  %v610_v58 = vld [vmem:[%s266_s17 + $0x10] sm:$0xff] }
 0x10a   : > { %v541_v13 = vmul.f32 %v518_v8, %v518_v8 }
 0x10b   : > { %v524_v2 = vadd.f32 %v523_v62, %v507_v56  ;;  %v544_v3 = vadd.f32 %v543_v61, %v537_v63 }
 0x10d   : > { %v545_v5 = vadd.f32 %v544_v3, %v538_v1  ;;  %v525_v6 = vadd.f32 %v524_v2, %v510_v60  ;;  %v613_v1 = vld [vmem:[%s266_s17 + $0x28] sm:$0xff]  ;;  %v614_v2 = vld [vmem:[%s266_s17 + $0x30] sm:$0xff] }
 0x10f   : > { %v526_v9 = vadd.f32 %v525_v6, %v515_v0  ;;  %v546_v10 = vadd.f32 %v545_v5, %v539_v4 }
 0x111   : > { %v547_v11 = vadd.f32 %v546_v10, %v540_v7  ;;  %v527_v12 = vadd.f32 %v526_v9, %v518_v8  ;;  %v615_v7 = vld [vmem:[%s266_s17 + $0x38] sm:$0xff] }
 0x113   : > { %v528_v14 = vrot.slane %v527_v12, 4  ;;  %v548_v15 = vadd.f32 %v547_v11, %v541_v13 }
 0x115   : > { %v529_v16 = vadd.f32 %v528_v14, %v527_v12  ;;  %v549_v17 = vrot.slane %v548_v15, 4 }
 0x117   : > { %v530_v18 = vrot.slane %v529_v16, 2  ;;  %v550_v19 = vadd.f32 %v549_v17, %v548_v15 }
 0x119   : > { %v531_v20 = vadd.f32 %v530_v18, %v529_v16  ;;  %v551_v21 = vrot.slane %v550_v19, 2 }
 0x11b   : > { %v532_v22 = vrot.slane %v531_v20, 1  ;;  %v552_v23 = vadd.f32 %v551_v21, %v550_v19 }
 0x11d   : > { %v533_v24 = vadd.f32 %v532_v22, %v531_v20  ;;  %v553_v25 = vrot.slane %v552_v23, 1 }
 0x11f   : > { %v554_v27 = vadd.f32 %v553_v25, %v552_v23  ;;  %v555_v28 = vmul.f32 0.015625, %v533_v24 }
 0x121   : > { %v556_v26 = vmul.f32 0.015625, %v554_v27  ;;  %v557_v29 = vmul.f32 %v555_v28, %v555_v28  ;;  %v560_v30 = vsub.f32 %v978_v35, %v555_v28  ;;  %v561_v31 = vsub.f32 %v980_v38, %v555_v28  ;;  %v759_v35 = vld [vmem:[%s1018_s3] ss:$0 sm:$0xff] }
 0x122   : > { %v562_v32 = vsub.f32 %v499_v53, %v555_v28  ;;  %v563_v33 = vsub.f32 %v502_v59, %v555_v28  ;;  %v564_v34 = vsub.f32 %v507_v56, %v555_v28  ;;  %v565_v36 = vsub.f32 %v510_v60, %v555_v28  ;;  %v609_v53 = vld [vmem:[%s266_s17 + $0x8] sm:$0xff]  ;;  %v611_v59 = vld [vmem:[%s266_s17 + $0x18] sm:$0xff]  ;;  %v612_v60 = vld [vmem:[%s266_s17 + $0x20] sm:$0xff] }
 0x123   : > { %v558_v37 = vsub.f32 %v556_v26, %v557_v29  ;;  %v566_v39 = vsub.f32 %v515_v0, %v555_v28  ;;  %v567_v40 = vsub.f32 %v518_v8, %v555_v28 }
 0x125   : > { %v559_v41 = vmax.f32 %v558_v37, 0.0 }
 0x127   : > { %v568_v42 = vadd.f32 1e-05, %v559_v41 }
 0x129   : > { %858 = vrsqrt.f32 %v568_v42 }
 0x133   : > { %v859_v43 = vpop.eup %858 }
 0x134   : > { %v570_v38 = vmul.f32 %v859_v43, %v560_v30  ;;  %v571_v44 = vmul.f32 %v859_v43, %v561_v31  ;;  %v572_v45 = vmul.f32 %v859_v43, %v562_v32  ;;  %v573_v46 = vmul.f32 %v859_v43, %v563_v33 }
 0x135   : > { %v574_v47 = vmul.f32 %v859_v43, %v564_v34  ;;  %v575_v48 = vmul.f32 %v859_v43, %v565_v36  ;;  %v576_v49 = vmul.f32 %v859_v43, %v566_v39  ;;  %v577_v50 = vmul.f32 %v859_v43, %v567_v40 }
 0x136   : > { %v585_v54 = vmul.f32 %v759_v35, %v570_v38  ;;  %v586_v55 = vmul.f32 %v759_v35, %v571_v44  ;;  %v587_v56 = vmul.f32 %v759_v35, %v572_v45  ;;  %v588_v57 = vmul.f32 %v759_v35, %v573_v46 }
 0x137   : > { %v589_v61 = vmul.f32 %v759_v35, %v574_v47  ;;  %v590_v62 = vmul.f32 %v759_v35, %v575_v48  ;;  %v591_v63 = vmul.f32 %v759_v35, %v576_v49  ;;  %v592_v0 = vmul.f32 %v759_v35, %v577_v50 }
 0x138   : > { %v600_v3 = vadd.f32 %v760_v51, %v585_v54  ;;  %v601_v4 = vadd.f32 %v760_v51, %v586_v55  ;;  %v602_v5 = vadd.f32 %v760_v51, %v587_v56  ;;  %v603_v6 = vadd.f32 %v760_v51, %v588_v57 }
 0x139   : > { %v604_v8 = vadd.f32 %v760_v51, %v589_v61  ;;  %v605_v9 = vadd.f32 %v760_v51, %v590_v62  ;;  %v606_v10 = vadd.f32 %v760_v51, %v591_v63  ;;  %v607_v11 = vadd.f32 %v760_v51, %v592_v0 }
 0x13a   : > { %v616_v12 = vadd.f32 %v608_v52, %v600_v3  ;;  %v617_v13 = vadd.f32 %v609_v53, %v601_v4  ;;  %v618_v14 = vadd.f32 %v610_v58, %v602_v5  ;;  %v619_v15 = vadd.f32 %v611_v59, %v603_v6 }
 0x13b   : > { %v620_v16 = vadd.f32 %v612_v60, %v604_v8  ;;  %v621_v17 = vadd.f32 %v613_v1, %v605_v9  ;;  %v622_v18 = vadd.f32 %v614_v2, %v606_v10  ;;  %v623_v19 = vadd.f32 %v615_v7, %v607_v11 }
 0x13c   : > { %vm624_vm0 = vcmp.ge.f32.partialorder %v616_v12, 0.0  ;;  %vm625_vm1 = vcmp.ge.f32.partialorder %v617_v13, 0.0  ;;  %vm626_vm2 = vcmp.ge.f32.partialorder %v618_v14, 0.0  ;;  %vm627_vm3 = vcmp.ge.f32.partialorder %v619_v15, 0.0 }
 0x13d   : > { %vm628_vm4 = vcmp.ge.f32.partialorder %v620_v16, 0.0  ;;  %vm629_vm5 = vcmp.ge.f32.partialorder %v621_v17, 0.0  ;;  %vm630_vm6 = vcmp.ge.f32.partialorder %v622_v18, 0.0  ;;  %vm631_vm7 = vcmp.ge.f32.partialorder %v623_v19, 0.0 }
 0x13e   : > { %v632_v20 = vmul.f32 0.01, %v616_v12  ;;  %v633_v21 = vmul.f32 0.01, %v617_v13  ;;  %v634_v22 = vmul.f32 0.01, %v618_v14 }
 0x13f   : > { %v635_v23 = vmul.f32 0.01, %v619_v15  ;;  %v636_v24 = vmul.f32 0.01, %v620_v16  ;;  %v637_v25 = vmul.f32 0.01, %v621_v17 }
 0x140   : > { %v638_v27 = vmul.f32 0.01, %v622_v18  ;;  %v639_v28 = vmul.f32 0.01, %v623_v19  ;;  %v640_v26 = vsel %vm624_vm0, %v616_v12, %v632_v20  ;;  %v641_v29 = vsel %vm625_vm1, %v617_v13, %v633_v21 }
 0x141   : > { %v642_v30 = vsel %vm626_vm2, %v618_v14, %v634_v22  ;;  %v643_v31 = vsel %vm627_vm3, %v619_v15, %v635_v23  ;;  %v644_v32 = vsel %vm628_vm4, %v620_v16, %v636_v24  ;;  %v645_v33 = vsel %vm629_vm5, %v621_v17, %v637_v25  ;;  %648 = vst [vmem:[%s271_s25] sm:$0xff] %v640_v26 }
 0x142   : > { %649 = vst [vmem:[%s271_s25 + $0x8] sm:$0xff] %v641_v29  ;;  %v646_v34 = vsel %vm630_vm6, %v622_v18, %v638_v27  ;;  %v647_v36 = vsel %vm631_vm7, %v623_v19, %v639_v28  ;;  %650 = vst [vmem:[%s271_s25 + $0x10] sm:$0xff] %v642_v30 }
 0x143   : > { %651 = vst [vmem:[%s271_s25 + $0x18] sm:$0xff] %v643_v31  ;;  %652 = vst [vmem:[%s271_s25 + $0x20] sm:$0xff] %v644_v32 }
 0x144   : > { %653 = vst [vmem:[%s271_s25 + $0x28] sm:$0xff] %v645_v33  ;;  %654 = vst [vmem:[%s271_s25 + $0x30] sm:$0xff] %v646_v34 }
 0x145   : > { %655 = vst [vmem:[%s271_s25 + $0x38] sm:$0xff] %v647_v36 }
 0x146 PF: > { %s16_s21 = sadd.s32 1, %s866_s21  }
 0x147   : > { %p13_p4 = scmp.ge.s32.totalorder %s16_s21, 4  }
 0x149   :  { %15 = sbr.rel (!%p13_p4) target bundleno = 1 (0x1), region = 77 }

// kernel: residual_encoder_unet_forward.21
= control target key start
LH: loop header
LB: loop body
LE: loop exit
PB: predicated region body
PF: predicated region fallthrough
CT: control target
= control target key end

     0   :  { %s563_s18 = smov 0   ;;  %s617_s0 = inlined_call_operand.vmem [shape: bf16[2,16,128], index: 0, kind: input, shape index: {}]   ;;  %s618_s1 = inlined_call_operand.vmem [shape: bf16[128,128], index: 1, kind: input, shape index: {}]   ;;  %s619_s2 = inlined_call_operand.vmem [shape: f32[1,128], index: 2, kind: input, shape index: {}]   ;;  %s620_s3 = inlined_call_operand.vmem [shape: f32[1,128], index: 3, kind: input, shape index: {}]   ;;  %s621_s4 = inlined_call_operand.vmem [shape: f32[1,128], index: 4, kind: input, shape index: {}]   ;;  %s622_s5 = inlined_call_operand.vmem [shape: f32[2,16,128], index: 5, kind: output, shape index: {}]  }
   0x1 LB: > { %s448_s19 = sadd.s32 4294967295, %s529_s18   ;;  %p452_p0 = scmp.ge.s32.totalorder %s529_s18, 1  ;;  %s529_s18 = sphi %s563_s18, %s15_s18  }
   0x2   : > { %p187_p1 = scmp.lt.s32.totalorder %s529_s18, 3 }
   0x4   : > { %p188_p2 = pnand %p452_p0, %p187_p1 }
   0x5   : > { %v512_v0 = vld [vmem:[%s618_s1] sm:$0xff] (!%p188_p2)   ;;  %v531_v1 = vmov (!%p188_p2), 0.0   ;;  %v513_v2 = vld [vmem:[%s618_s1 + $0x8] sm:$0xff] (!%p188_p2)   ;;  %vm532_vm0 = vmmov (!%p188_p2), 0   ;;  %p215_p3 = scmp.lt.s32.totalorder (!%p188_p2), %s448_s19, 1  ;;  %v514_v3 = vld [vmem:[%s618_s1 + $0x10] sm:$0xff] (!%p188_p2)  }
   0x6   : > { %191 = sbr.rel (%p188_p2) target bundleno = 296 (0x128), region = 40  ;;  %482 = vmatprep.subr.bf16.mxu0 (!%p188_p2), %v531_v1  ;;  %498 = vmatprep.mubr.msk.bf16.mxu0 (!%p188_p2), %vm532_vm0, %v531_v1  ;;  %v515_v4 = vld [vmem:[%s618_s1 + $0x18] sm:$0xff] (!%p188_p2)   ;;  %v516_v5 = vld [vmem:[%s618_s1 + $0x20] sm:$0xff] (!%p188_p2)   ;;  %v517_v6 = vld [vmem:[%s618_s1 + $0x28] sm:$0xff] (!%p188_p2)  }
   0x7   : > { %483 = vmatpush3.bf16.msra.mxu0 (!%p188_p2), %v512_v0  ;;  %v518_v7 = vld [vmem:[%s618_s1 + $0x30] sm:$0xff] (!%p188_p2)   ;;  %v519_v8 = vld [vmem:[%s618_s1 + $0x38] sm:$0xff] (!%p188_p2)   ;;  %v457_v10 = vld [vmem:[%s619_s2] ss:$0 sm:$0xff] (!%p188_p2) }
   0x8   : > { %484 = vmatprep.subr.bf16.mxu0 (!%p188_p2), %v531_v1  ;;  %v467_v42 = vld [vmem:[%s620_s3] ss:$0 sm:$0xff] (!%p188_p2) }
   0x9   : > { %v468_v45 = vld [vmem:[%s621_s4] ss:$0 sm:$0xff] (!%p188_p2) }
   0xb   : > { %485 = vmatpush3.bf16.msra.mxu0 (!%p188_p2), %v513_v2 }
   0xc   : > { %486 = vmatprep.subr.bf16.mxu0 (!%p188_p2), %v531_v1 }
   0xd   : > { %s624_s19 = smov (!%p215_p3, %s448_s19), 1 }
   0xe   : > { %s471_s26 = sshll.u32 %s624_s19, 3  ;;  %s472_s21 = sshll.u32 %s624_s19, 4 }
   0xf   : > { %s219_s29 = scalar_lea.vmem %s617_s0, %s471_s26  ;;  %487 = vmatpush3.bf16.msra.mxu0 %v514_v3  ;;  %s224_s26 = scalar_lea.vmem %s622_s5, %s472_s21 }
  0x10   : > { %488 = vmatprep.subr.bf16.mxu0 %v531_v1  ;;  %v520_v9 = vld [vmem:[%s219_s29] sm:$0xff]  }
  0x13   : > { %489 = vmatpush3.bf16.msra.mxu0 %v515_v4 }
  0x14   : > { %490 = vmatprep.subr.bf16.mxu0 %v531_v1 }
  0x17   : > { %491 = vmatpush3.bf16.msra.mxu0 %v516_v5 }
  0x18   : > { %492 = vmatprep.subr.bf16.mxu0 %v531_v1 }
  0x1b   : > { %493 = vmatpush3.bf16.msra.mxu0 %v517_v6 }
  0x1c   : > { %494 = vmatprep.subr.bf16.mxu0 %v531_v1 }
  0x1f   : > { %495 = vmatpush3.bf16.msra.mxu0 %v518_v7 }
  0x20   : > { %496 = vmatprep.subr.bf16.mxu0 %v531_v1 }
  0x23   : > { %497 = vmatpush3.bf16.msra.mxu0 %v519_v8 }
  0x26   : > { %499 = vmatmul.mubr.bf16.vlgmr.msra.gmra.mrb[0].mxu0 %v520_v9 }
  0xf9   : > { %v339_v11 = vpop.f32.mrb[0].mxu0 }
  0xfa   : > { %v340_v12 = vadd.f32 %v457_v10, %v339_v11  ;;  %v500_v13 = vpop.f32.mrb[1].mxu0 }
  0xfb   : > { %v342_v14 = vpop.f32.mrb[2].mxu0 }
  0xfc   : > { %v343_v15 = vadd.f32 %v457_v10, %v342_v14  ;;  %v501_v16 = vpop.f32.mrb[3].mxu0  ;;  %v353_v17 = vmul.f32 %v340_v12, %v340_v12 }
  0xfe   : > { %v346_v18 = vadd.f32 %v343_v15, %v340_v12  ;;  %v354_v19 = vmul.f32 %v343_v15, %v343_v15 }
 0x100   : > { %v347_v20 = vrot.slane %v346_v18, 4  ;;  %v355_v21 = vadd.f32 %v354_v19, %v353_v17 }
 0x102   : > { %v348_v22 = vadd.f32 %v347_v20, %v346_v18  ;;  %v356_v23 = vrot.slane %v355_v21, 4 }
 0x104   : > { %v349_v24 = vrot.slane %v348_v22, 2  ;;  %v357_v25 = vadd.f32 %v356_v23, %v355_v21 }
 0x106   : > { %v350_v26 = vadd.f32 %v349_v24, %v348_v22  ;;  %v358_v27 = vrot.slane %v357_v25, 2 }
 0x108   : > { %v351_v28 = vrot.slane %v350_v26, 1  ;;  %v359_v29 = vadd.f32 %v358_v27, %v357_v25 }
 0x10a   : > { %v352_v30 = vadd.f32 %v351_v28, %v350_v26  ;;  %v360_v31 = vrot.slane %v359_v29, 1 }
 0x10c   : > { %v361_v32 = vadd.f32 %v360_v31, %v359_v29  ;;  %v362_v33 = vmul.f32 0.0625, %v352_v30 }
 0x10e   : > { %v363_v34 = vmul.f32 0.0625, %v361_v32  ;;  %v364_v35 = vmul.f32 %v362_v33, %v362_v33  ;;  %v367_v36 = vsub.f32 %v340_v12, %v362_v33  ;;  %v368_v37 = vsub.f32 %v343_v15, %v362_v33 }
 0x110   : > { %v365_v38 = vsub.f32 %v363_v34, %v364_v35 }
 0x112   : > { %v366_v39 = vmax.f32 %v365_v38, 0.0 }
 0x114   : > { %v369_v40 = vadd.f32 1e-05, %v366_v39 }
 0x116   : > { %521 = vrsqrt.f32 %v369_v40 }
 0x120   : > { %v522_v41 = vpop.eup %521 }
 0x121   : > { %v371_v43 = vmul.f32 %v522_v41, %v367_v36  ;;  %v372_v44 = vmul.f32 %v522_v41, %v368_v37 }
 0x123   : > { %v380_v46 = vmul.f32 %v467_v42, %v371_v43  ;;  %v381_v47 = vmul.f32 %v467_v42, %v372_v44 }
 0x125   : > { %v389_v48 = vadd.f32 %v468_v45, %v380_v46  ;;  %v390_v49 = vadd.f32 %v468_v45, %v381_v47 }
 0x127   : > { %391 = vst [vmem:[%s224_s26] sm:$0xff] %v389_v48  ;;  %392 = vst [vmem:[%s224_s26 + $0x8] sm:$0xff] %v390_v49 }
 0x128 PF: > { %s15_s18 = sadd.s32 1, %s529_s18  }
 0x129   : > { %p12_p4 = scmp.ge.s32.totalorder %s15_s18, 4  }
 0x12b   :  { %14 = sbr.rel (!%p12_p4) target bundleno = 1 (0x1), region = 70 }

// kernel: residual_encoder_unet_forward.20
= control target key start
LH: loop header
LB: loop body
LE: loop exit
PB: predicated region body
PF: predicated region fallthrough
CT: control target
= control target key end

     0   :  { %s645_s18 = smov 0   ;;  %s726_s0 = inlined_call_operand.vmem [shape: bf16[2,16,256], index: 0, kind: input, shape index: {}]   ;;  %s727_s1 = inlined_call_operand.vmem [shape: bf16[256,128], index: 1, kind: input, shape index: {}]   ;;  %s728_s2 = inlined_call_operand.vmem [shape: f32[1,128], index: 2, kind: input, shape index: {}]   ;;  %s729_s3 = inlined_call_operand.vmem [shape: f32[1,128], index: 3, kind: input, shape index: {}]   ;;  %s730_s4 = inlined_call_operand.vmem [shape: f32[1,128], index: 4, kind: input, shape index: {}]   ;;  %s731_s5 = inlined_call_operand.vmem [shape: f32[2,16,128], index: 5, kind: output, shape index: {}]  }
   0x1 LB: > { %s522_s19 = sadd.s32 4294967295, %s613_s18   ;;  %p526_p0 = scmp.ge.s32.totalorder %s613_s18, 1  ;;  %s613_s18 = sphi %s645_s18, %s15_s18  }
   0x2   : > { %p187_p1 = scmp.lt.s32.totalorder %s613_s18, 3 }
   0x4   : > { %p188_p2 = pnand %p526_p0, %p187_p1 }
   0x5   : > { %v586_v0 = vld [vmem:[%s727_s1 + $0x40] sm:$0xff] (!%p188_p2)   ;;  %v588_v2 = vld [vmem:[%s727_s1 + $0x48] sm:$0xff] (!%p188_p2)   ;;  %p215_p3 = scmp.lt.s32.totalorder (!%p188_p2), %s522_s19, 1  ;;  %v590_v4 = vld [vmem:[%s727_s1 + $0x50] sm:$0xff] (!%p188_p2)  }
   0x6   : > { %191 = sbr.rel (%p188_p2) target bundleno = 302 (0x12e), region = 40  ;;  %v587_v1 = vld [vmem:[%s727_s1] sm:$0xff] (!%p188_p2)   ;;  %556 = vmatprep.subr.bf16.mxu0 (!%p188_p2), %v586_v0  ;;  %v589_v3 = vld [vmem:[%s727_s1 + $0x8] sm:$0xff] (!%p188_p2)   ;;  %v591_v5 = vld [vmem:[%s727_s1 + $0x10] sm:$0xff] (!%p188_p2)  }
   0x7   : > { %557 = vmatpush3.bf16.msra.mxu0 (!%p188_p2), %v587_v1  ;;  %v592_v6 = vld [vmem:[%s727_s1 + $0x58] sm:$0xff] (!%p188_p2)   ;;  %v594_v8 = vld [vmem:[%s727_s1 + $0x60] sm:$0xff] (!%p188_p2)   ;;  %v596_v10 = vld [vmem:[%s727_s1 + $0x68] sm:$0xff] (!%p188_p2)  }
   0x8   : > { %558 = vmatprep.subr.bf16.mxu0 (!%p188_p2), %v588_v2  ;;  %v593_v7 = vld [vmem:[%s727_s1 + $0x18] sm:$0xff] (!%p188_p2)   ;;  %v595_v9 = vld [vmem:[%s727_s1 + $0x20] sm:$0xff] (!%p188_p2)   ;;  %v597_v12 = vld [vmem:[%s727_s1 + $0x28] sm:$0xff] (!%p188_p2)  }
   0x9   : > { %v598_v13 = vld [vmem:[%s727_s1 + $0x70] sm:$0xff] (!%p188_p2)   ;;  %v600_v15 = vld [vmem:[%s727_s1 + $0x78] sm:$0xff] (!%p188_p2)   ;;  %v531_v19 = vld [vmem:[%s728_s2] ss:$0 sm:$0xff] (!%p188_p2) }
   0xa   : > { %v599_v14 = vld [vmem:[%s727_s1 + $0x30] sm:$0xff] (!%p188_p2)   ;;  %v601_v16 = vld [vmem:[%s727_s1 + $0x38] sm:$0xff] (!%p188_p2)   ;;  %v550_v52 = vld [vmem:[%s729_s3] ss:$0 sm:$0xff] (!%p188_p2) }
   0xb   : > { %559 = vmatpush3.bf16.msra.mxu0 (!%p188_p2), %v589_v3  ;;  %v551_v55 = vld [vmem:[%s730_s4] ss:$0 sm:$0xff] (!%p188_p2) }
   0xc   : > { %560 = vmatprep.subr.bf16.mxu0 (!%p188_p2), %v590_v4 }
   0xd   : > { %s733_s19 = smov (!%p215_p3, %s522_s19), 1 }
   0xe   : > { %s554_s11 = sshll.u32 %s733_s19, 4 }
   0xf   : > { %561 = vmatpush3.bf16.msra.mxu0 %v591_v5  ;;  %s219_s16 = scalar_lea.vmem %s726_s0, %s554_s11  ;;  %s224_s17 = scalar_lea.vmem %s731_s5, %s554_s11 }
  0x10   : > { %562 = vmatprep.subr.bf16.mxu0 %v592_v6  ;;  %v604_v11 = vld [vmem:[%s219_s16 + $0x4] ss:$8 sps:$4 sm:$0xff]   ;;  %v602_v17 = vld [vmem:[%s219_s16] ss:$8 sps:$4 sm:$0xff]  }
  0x11   : > { %405 = vmatprep.mubr.bf16.mxu0 %v604_v11 }
  0x13   : > { %563 = vmatpush3.bf16.msra.mxu0 %v593_v7 }
  0x14   : > { %564 = vmatprep.subr.bf16.mxu0 %v594_v8 }
  0x17   : > { %565 = vmatpush3.bf16.msra.mxu0 %v595_v9 }
  0x18   : > { %566 = vmatprep.subr.bf16.mxu0 %v596_v10 }
  0x1b   : > { %567 = vmatpush3.bf16.msra.mxu0 %v597_v12 }
  0x1c   : > { %568 = vmatprep.subr.bf16.mxu0 %v598_v13 }
  0x1f   : > { %569 = vmatpush3.bf16.msra.mxu0 %v599_v14 }
  0x20   : > { %570 = vmatprep.subr.bf16.mxu0 %v600_v15 }
  0x23   : > { %571 = vmatpush3.bf16.msra.mxu0 %v601_v16 }
  0x26   : > { %406 = vmatmul.mubr.bf16.vlgmr.msra.gmra.mrb[0].mxu0 %v602_v17 }
  0xf9   : > { %v572_v18 = vpop.f32.mrb[0].mxu0 }
  0xfa   : > { %v573_v20 = vpop.f32.mrb[1].mxu0 }
  0xfb   : > { %v574_v21 = vadd.f32 %v573_v20, %v572_v18  ;;  %v575_v22 = vpop.f32.mrb[2].mxu0 }
  0xfc   : > { %v576_v23 = vpop.f32.mrb[3].mxu0 }
  0xfd   : > { %v408_v24 = vadd.f32 %v574_v21, %v531_v19  ;;  %v577_v25 = vadd.f32 %v576_v23, %v575_v22 }
  0xff   : > { %v411_v26 = vadd.f32 %v577_v25, %v531_v19  ;;  %v421_v27 = vmul.f32 %v408_v24, %v408_v24 }
 0x101   : > { %v414_v28 = vadd.f32 %v411_v26, %v408_v24  ;;  %v422_v29 = vmul.f32 %v411_v26, %v411_v26 }
 0x103   : > { %v415_v30 = vrot.slane %v414_v28, 4  ;;  %v423_v31 = vadd.f32 %v422_v29, %v421_v27 }
 0x105   : > { %v416_v32 = vadd.f32 %v415_v30, %v414_v28  ;;  %v424_v33 = vrot.slane %v423_v31, 4 }
 0x107   : > { %v417_v34 = vrot.slane %v416_v32, 2  ;;  %v425_v35 = vadd.f32 %v424_v33, %v423_v31 }
 0x109   : > { %v418_v36 = vadd.f32 %v417_v34, %v416_v32  ;;  %v426_v37 = vrot.slane %v425_v35, 2 }
 0x10b   : > { %v419_v38 = vrot.slane %v418_v36, 1  ;;  %v427_v39 = vadd.f32 %v426_v37, %v425_v35 }
 0x10d   : > { %v420_v40 = vadd.f32 %v419_v38, %v418_v36  ;;  %v428_v41 = vrot.slane %v427_v39, 1 }
 0x10f   : > { %v429_v42 = vadd.f32 %v428_v41, %v427_v39  ;;  %v430_v43 = vmul.f32 0.0625, %v420_v40 }
 0x111   : > { %v431_v44 = vmul.f32 0.0625, %v429_v42  ;;  %v432_v45 = vmul.f32 %v430_v43, %v430_v43  ;;  %v435_v46 = vsub.f32 %v408_v24, %v430_v43  ;;  %v436_v47 = vsub.f32 %v411_v26, %v430_v43 }
 0x113   : > { %v433_v48 = vsub.f32 %v431_v44, %v432_v45 }
 0x115   : > { %v434_v49 = vmax.f32 %v433_v48, 0.0 }
 0x117   : > { %v437_v50 = vadd.f32 1e-05, %v434_v49 }
 0x119   : > { %605 = vrsqrt.f32 %v437_v50 }
 0x123   : > { %v606_v51 = vpop.eup %605 }
 0x124   : > { %v439_v53 = vmul.f32 %v606_v51, %v435_v46  ;;  %v440_v54 = vmul.f32 %v606_v51, %v436_v47 }
 0x126   : > { %v448_v56 = vmul.f32 %v550_v52, %v439_v53  ;;  %v449_v57 = vmul.f32 %v550_v52, %v440_v54 }
 0x128   : > { %v457_v58 = vadd.f32 %v551_v55, %v448_v56  ;;  %v458_v59 = vadd.f32 %v551_v55, %v449_v57 }
 0x12a   : > { %vm459_vm0 = vcmp.ge.f32.partialorder %v457_v58, 0.0  ;;  %vm460_vm1 = vcmp.ge.f32.partialorder %v458_v59, 0.0  ;;  %v461_v60 = vmul.f32 0.01, %v457_v58  ;;  %v462_v61 = vmul.f32 0.01, %v458_v59 }
 0x12c   : > { %v463_v62 = vsel %vm459_vm0, %v457_v58, %v461_v60  ;;  %v464_v63 = vsel %vm460_vm1, %v458_v59, %v462_v61 }
 0x12d   : > { %465 = vst [vmem:[%s224_s17] sm:$0xff] %v463_v62  ;;  %466 = vst [vmem:[%s224_s17 + $0x8] sm:$0xff] %v464_v63 }
 0x12e PF: > { %s15_s18 = sadd.s32 1, %s613_s18  }
 0x12f   : > { %p12_p4 = scmp.ge.s32.totalorder %s15_s18, 4  }
 0x131   :  { %14 = sbr.rel (!%p12_p4) target bundleno = 1 (0x1), region = 70 }

// kernel: residual_encoder_unet_forward.22
= control target key start
LH: loop header
LB: loop body
LE: loop exit
PB: predicated region body
PF: predicated region fallthrough
CT: control target
= control target key end

     0   :  { %s879_s21 = smov 0   ;;  %s988_s0 = inlined_call_operand.vmem [shape: bf16[2,16,384], index: 0, kind: input, shape index: {}]   ;;  %s989_s1 = inlined_call_operand.vmem [shape: bf16[384,128], index: 1, kind: input, shape index: {}]   ;;  %s990_s2 = inlined_call_operand.vmem [shape: f32[1,128], index: 2, kind: input, shape index: {}]   ;;  %s991_s3 = inlined_call_operand.vmem [shape: f32[1,128], index: 3, kind: input, shape index: {}]   ;;  %s992_s4 = inlined_call_operand.vmem [shape: f32[1,128], index: 4, kind: input, shape index: {}]   ;;  %s993_s5 = inlined_call_operand.vmem [shape: f32[2,16,128], index: 5, kind: input, shape index: {}]   ;;  %s994_s6 = inlined_call_operand.vmem [shape: f32[2,16,128], index: 6, kind: output, shape index: {}]  }
   0x1 LB: > { %s698_s22 = sadd.s32 4294967295, %s840_s21   ;;  %p702_p0 = scmp.ge.s32.totalorder %s840_s21, 1  ;;  %s840_s21 = sphi %s879_s21, %s16_s21  }
   0x2   : > { %p222_p1 = scmp.lt.s32.totalorder %s840_s21, 3 }
   0x4   : > { %p223_p2 = pnand %p702_p0, %p222_p1 }
   0x5   : > { %v804_v0 = vld [vmem:[%s989_s1 + $0x40] sm:$0xff] (!%p223_p2)   ;;  %v842_v2 = vmov (!%p223_p2), 0.0   ;;  %v807_v4 = vld [vmem:[%s989_s1 + $0x48] sm:$0xff] (!%p223_p2)   ;;  %vm843_vm0 = vmmov (!%p223_p2), 0   ;;  %v810_v7 = vld [vmem:[%s989_s1 + $0x50] sm:$0xff] (!%p223_p2)   ;;  %p257_p3 = scmp.lt.s32.totalorder (!%p223_p2), %s698_s22, 1 }
   0x6   : > { %226 = sbr.rel (%p223_p2) target bundleno = 306 (0x132), region = 44  ;;  %v805_v1 = vld [vmem:[%s989_s1] sm:$0xff] (!%p223_p2)   ;;  %773 = vmatprep.subr.bf16.mxu1 (!%p223_p2), %v842_v2  ;;  %742 = vmatprep.subr.bf16.mxu0 (!%p223_p2), %v804_v0  ;;  %v808_v5 = vld [vmem:[%s989_s1 + $0x8] sm:$0xff] (!%p223_p2)   ;;  %v811_v8 = vld [vmem:[%s989_s1 + $0x10] sm:$0xff] (!%p223_p2)  }
   0x7   : > { %v806_v3 = vld [vmem:[%s989_s1 + $0x80] sm:$0xff] (!%p223_p2)   ;;  %743 = vmatpush3.bf16.msra.mxu0 (!%p223_p2), %v805_v1  ;;  %789 = vmatprep.mubr.msk.bf16.mxu1 (!%p223_p2), %vm843_vm0, %v842_v2  ;;  %v809_v6 = vld [vmem:[%s989_s1 + $0x88] sm:$0xff] (!%p223_p2)   ;;  %v812_v9 = vld [vmem:[%s989_s1 + $0x90] sm:$0xff] (!%p223_p2)  }
   0x8   : > { %774 = vmatpush3.bf16.msra.mxu1 (!%p223_p2), %v806_v3  ;;  %744 = vmatprep.subr.bf16.mxu0 (!%p223_p2), %v807_v4  ;;  %v813_v10 = vld [vmem:[%s989_s1 + $0x58] sm:$0xff] (!%p223_p2)   ;;  %v816_v13 = vld [vmem:[%s989_s1 + $0x60] sm:$0xff] (!%p223_p2)   ;;  %v819_v16 = vld [vmem:[%s989_s1 + $0x68] sm:$0xff] (!%p223_p2)  }
   0x9   : > { %775 = vmatprep.subr.bf16.mxu1 (!%p223_p2), %v842_v2  ;;  %v814_v11 = vld [vmem:[%s989_s1 + $0x18] sm:$0xff] (!%p223_p2)   ;;  %v817_v14 = vld [vmem:[%s989_s1 + $0x20] sm:$0xff] (!%p223_p2)   ;;  %v820_v17 = vld [vmem:[%s989_s1 + $0x28] sm:$0xff] (!%p223_p2)  }
   0xa   : > { %v815_v12 = vld [vmem:[%s989_s1 + $0x98] sm:$0xff] (!%p223_p2)   ;;  %v818_v15 = vld [vmem:[%s989_s1 + $0xa0] sm:$0xff] (!%p223_p2)   ;;  %v821_v18 = vld [vmem:[%s989_s1 + $0xa8] sm:$0xff] (!%p223_p2)  }
   0xb   : > { %745 = vmatpush3.bf16.msra.mxu0 (!%p223_p2), %v808_v5  ;;  %v822_v19 = vld [vmem:[%s989_s1 + $0x70] sm:$0xff] (!%p223_p2)   ;;  %v825_v22 = vld [vmem:[%s989_s1 + $0x78] sm:$0xff] (!%p223_p2)   ;;  %v708_v30 = vld [vmem:[%s990_s2] ss:$0 sm:$0xff] (!%p223_p2) }
   0xc   : > { %776 = vmatpush3.bf16.msra.mxu1 (!%p223_p2), %v809_v6  ;;  %746 = vmatprep.subr.bf16.mxu0 (!%p223_p2), %v810_v7  ;;  %v823_v20 = vld [vmem:[%s989_s1 + $0x30] sm:$0xff] (!%p223_p2)   ;;  %v826_v24 = vld [vmem:[%s989_s1 + $0x38] sm:$0xff] (!%p223_p2)   ;;  %v736_v4 = vld [vmem:[%s991_s3] ss:$0 sm:$0xff] (!%p223_p2) }
   0xd   : > { %777 = vmatprep.subr.bf16.mxu1 %v842_v2  ;;  %s996_s22 = smov (!%p257_p3, %s698_s22), 1  ;;  %v824_v21 = vld [vmem:[%s989_s1 + $0xb0] sm:$0xff]   ;;  %v830_v25 = vld [vmem:[%s989_s1 + $0xb8] sm:$0xff]   ;;  %v737_v7 = vld [vmem:[%s992_s4] ss:$0 sm:$0xff] }
   0xe   : > { %s793_s9 = smul.u32 24, %s996_s22 }
   0xf   : > { %747 = vmatpush3.bf16.msra.mxu0 %v811_v8 }
  0x10   : > { %778 = vmatpush3.bf16.msra.mxu1 %v812_v9  ;;  %748 = vmatprep.subr.bf16.mxu0 %v813_v10  ;;  %s261_s18 = scalar_lea.vmem %s988_s0, %s793_s9  ;;  %s740_s9 = sshll.u32 %s996_s22, 4 }
  0x11   : > { %779 = vmatprep.subr.bf16.mxu1 %v842_v2  ;;  %v829_v23 = vld [vmem:[%s261_s18 + $0x4] ss:$12 sps:$4 sm:$0xff]   ;;  %v827_v26 = vld [vmem:[%s261_s18] ss:$12 sps:$4 sm:$0xff]   ;;  %v831_v27 = vld [vmem:[%s261_s18 + $0x8] ss:$12 sps:$4 sm:$0xff]   ;;  %s266_s14 = scalar_lea.vmem %s993_s5, %s740_s9  ;;  %s271_s18 = scalar_lea.vmem %s994_s6, %s740_s9 }
  0x12   : > { %524 = vmatprep.mubr.bf16.mxu0 %v829_v23  ;;  %v619_v10 = vld [vmem:[%s266_s14] sm:$0xff] }
  0x13   : > { %749 = vmatpush3.bf16.msra.mxu0 %v814_v11  ;;  %v620_v11 = vld [vmem:[%s266_s14 + $0x8] sm:$0xff] }
  0x14   : > { %780 = vmatpush3.bf16.msra.mxu1 %v815_v12  ;;  %750 = vmatprep.subr.bf16.mxu0 %v816_v13 }
  0x15   : > { %781 = vmatprep.subr.bf16.mxu1 %v842_v2 }
  0x17   : > { %751 = vmatpush3.bf16.msra.mxu0 %v817_v14 }
  0x18   : > { %782 = vmatpush3.bf16.msra.mxu1 %v818_v15  ;;  %752 = vmatprep.subr.bf16.mxu0 %v819_v16 }
  0x19   : > { %783 = vmatprep.subr.bf16.mxu1 %v842_v2 }
  0x1b   : > { %753 = vmatpush3.bf16.msra.mxu0 %v820_v17 }
  0x1c   : > { %784 = vmatpush3.bf16.msra.mxu1 %v821_v18  ;;  %754 = vmatprep.subr.bf16.mxu0 %v822_v19 }
  0x1d   : > { %785 = vmatprep.subr.bf16.mxu1 %v842_v2 }
  0x1f   : > { %755 = vmatpush3.bf16.msra.mxu0 %v823_v20 }
  0x20   : > { %786 = vmatpush3.bf16.msra.mxu1 %v824_v21  ;;  %756 = vmatprep.subr.bf16.mxu0 %v825_v22 }
  0x21   : > { %787 = vmatprep.subr.bf16.mxu1 %v842_v2 }
  0x23   : > { %757 = vmatpush3.bf16.msra.mxu0 %v826_v24 }
  0x24   : > { %788 = vmatpush3.bf16.msra.mxu1 %v830_v25 }
  0x26   : > { %525 = vmatmul.mubr.bf16.vlgmr.msra.gmra.mrb[0].mxu0 %v827_v26 }
  0x27   : > { %790 = vmatmul.mubr.bf16.vlgmr.msra.gmra.mrb[0].mxu1 %v831_v27 }
  0xf9   : > { %v758_v28 = vpop.f32.mrb[0].mxu0 }
  0xfa   : > { %v759_v29 = vpop.f32.mrb[1].mxu0  ;;  %v567_v31 = vpop.f32.mrb[0].mxu1 }
  0xfb   : > { %v760_v32 = vadd.f32 %v759_v29, %v758_v28  ;;  %v761_v33 = vpop.f32.mrb[2].mxu0  ;;  %v791_v34 = vpop.f32.mrb[1].mxu1 }
  0xfc   : > { %v762_v35 = vpop.f32.mrb[3].mxu0  ;;  %v570_v36 = vpop.f32.mrb[2].mxu1 }
  0xfd   : > { %v527_v37 = vadd.f32 %v760_v32, %v708_v30  ;;  %v763_v38 = vadd.f32 %v762_v35, %v761_v33  ;;  %v792_v39 = vpop.f32.mrb[3].mxu1 }
  0xff   : > { %v568_v40 = vadd.f32 %v567_v31, %v527_v37  ;;  %v530_v41 = vadd.f32 %v763_v38, %v708_v30 }
 0x101   : > { %v571_v42 = vadd.f32 %v570_v36, %v530_v41  ;;  %v581_v43 = vmul.f32 %v568_v40, %v568_v40 }
 0x103   : > { %v574_v44 = vadd.f32 %v571_v42, %v568_v40  ;;  %v582_v45 = vmul.f32 %v571_v42, %v571_v42 }
 0x105   : > { %v575_v46 = vrot.slane %v574_v44, 4  ;;  %v583_v47 = vadd.f32 %v582_v45, %v581_v43 }
 0x107   : > { %v576_v48 = vadd.f32 %v575_v46, %v574_v44  ;;  %v584_v49 = vrot.slane %v583_v47, 4 }
 0x109   : > { %v577_v50 = vrot.slane %v576_v48, 2  ;;  %v585_v51 = vadd.f32 %v584_v49, %v583_v47 }
 0x10b   : > { %v578_v52 = vadd.f32 %v577_v50, %v576_v48  ;;  %v586_v53 = vrot.slane %v585_v51, 2 }
 0x10d   : > { %v579_v54 = vrot.slane %v578_v52, 1  ;;  %v587_v55 = vadd.f32 %v586_v53, %v585_v51 }
 0x10f   : > { %v580_v56 = vadd.f32 %v579_v54, %v578_v52  ;;  %v588_v57 = vrot.slane %v587_v55, 1 }
 0x111   : > { %v589_v58 = vadd.f32 %v588_v57, %v587_v55  ;;  %v590_v59 = vmul.f32 0.0625, %v580_v56 }
 0x113   : > { %v591_v60 = vmul.f32 0.0625, %v589_v58  ;;  %v592_v61 = vmul.f32 %v590_v59, %v590_v59  ;;  %v595_v62 = vsub.f32 %v568_v40, %v590_v59  ;;  %v596_v63 = vsub.f32 %v571_v42, %v590_v59 }
 0x115   : > { %v593_v0 = vsub.f32 %v591_v60, %v592_v61 }
 0x117   : > { %v594_v1 = vmax.f32 %v593_v0, 0.0 }
 0x119   : > { %v597_v2 = vadd.f32 1e-05, %v594_v1 }
 0x11b   : > { %832 = vrsqrt.f32 %v597_v2 }
 0x125   : > { %v833_v3 = vpop.eup %832 }
 0x126   : > { %v599_v5 = vmul.f32 %v833_v3, %v595_v62  ;;  %v600_v6 = vmul.f32 %v833_v3, %v596_v63 }
 0x128   : > { %v608_v8 = vmul.f32 %v736_v4, %v599_v5  ;;  %v609_v9 = vmul.f32 %v736_v4, %v600_v6 }
 0x12a   : > { %v617_v12 = vadd.f32 %v737_v7, %v608_v8  ;;  %v618_v13 = vadd.f32 %v737_v7, %v609_v9 }
 0x12c   : > { %v621_v14 = vadd.f32 %v619_v10, %v617_v12  ;;  %v622_v15 = vadd.f32 %v620_v11, %v618_v13 }
 0x12e   : > { %vm623_vm1 = vcmp.ge.f32.partialorder %v621_v14, 0.0  ;;  %vm624_vm2 = vcmp.ge.f32.partialorder %v622_v15, 0.0  ;;  %v625_v16 = vmul.f32 0.01, %v621_v14  ;;  %v626_v17 = vmul.f32 0.01, %v622_v15 }
 0x130   : > { %v627_v18 = vsel %vm623_vm1, %v621_v14, %v625_v16  ;;  %v628_v19 = vsel %vm624_vm2, %v622_v15, %v626_v17 }
 0x131   : > { %629 = vst [vmem:[%s271_s18] sm:$0xff] %v627_v18  ;;  %630 = vst [vmem:[%s271_s18 + $0x8] sm:$0xff] %v628_v19 }
 0x132 PF: > { %s16_s21 = sadd.s32 1, %s840_s21  }
 0x133   : > { %p13_p4 = scmp.ge.s32.totalorder %s16_s21, 4  }
 0x135   :  { %15 = sbr.rel (!%p13_p4) target bundleno = 1 (0x1), region = 77 }

// kernel: residual_encoder_unet_forward.23
= control target key start
LH: loop header
LB: loop body
LE: loop exit
PB: predicated region body
PF: predicated region fallthrough
CT: control target
= control target key end

     0   :  { %s275_s1 = inlined_call_operand.vmem [shape: bf16[128,128], index: 1, kind: input, shape index: {}]   ;;  %s276_s0 = inlined_call_operand.vmem [shape: bf16[32,128], index: 0, kind: input, shape index: {}]   ;;  %s277_s2 = inlined_call_operand.vmem [shape: f32[1,128], index: 2, kind: input, shape index: {}]   ;;  %s278_s3 = inlined_call_operand.vmem [shape: f32[32,128], index: 3, kind: output, shape index: {}]  }
   0x1   :  { %v200_v0 = vld [vmem:[%s275_s1] sm:$0xff]   ;;  %v201_v1 = vld [vmem:[%s275_s1 + $0x8] sm:$0xff]   ;;  %v202_v2 = vld [vmem:[%s275_s1 + $0x10] sm:$0xff]  }
   0x2   :  { %180 = vmatprep.subr.bf16.mxu0 %v200_v0  ;;  %v203_v3 = vld [vmem:[%s275_s1 + $0x18] sm:$0xff]   ;;  %v208_v4 = vld [vmem:[%s276_s0] sm:$0xff]   ;;  %v205_v6 = vld [vmem:[%s275_s1 + $0x28] sm:$0xff]  }
   0x3   :  { %181 = vmatpush3.bf16.msra.mxu0 %v200_v0  ;;  %196 = vmatprep.mubr.bf16.mxu0 %v208_v4  ;;  %v204_v5 = vld [vmem:[%s275_s1 + $0x20] sm:$0xff]   ;;  %v206_v7 = vld [vmem:[%s275_s1 + $0x30] sm:$0xff]   ;;  %v207_v8 = vld [vmem:[%s275_s1 + $0x38] sm:$0xff]  }
   0x4   :  { %182 = vmatprep.subr.bf16.mxu0 %v201_v1  ;;  %v209_v9 = vld [vmem:[%s276_s0 + $0x8] sm:$0xff]   ;;  %v159_v10 = vld [vmem:[%s277_s2] ss:$0 sm:$0xff] }
   0x7   :  { %183 = vmatpush3.bf16.msra.mxu0 %v201_v1 }
   0x8   :  { %184 = vmatprep.subr.bf16.mxu0 %v202_v2 }
   0xb   :  { %185 = vmatpush3.bf16.msra.mxu0 %v202_v2 }
   0xc   :  { %186 = vmatprep.subr.bf16.mxu0 %v203_v3 }
   0xf   :  { %187 = vmatpush3.bf16.msra.mxu0 %v203_v3 }
  0x10   :  { %188 = vmatprep.subr.bf16.mxu0 %v204_v5 }
  0x13   :  { %189 = vmatpush3.bf16.msra.mxu0 %v204_v5 }
  0x14   :  { %190 = vmatprep.subr.bf16.mxu0 %v205_v6 }
  0x17   :  { %191 = vmatpush3.bf16.msra.mxu0 %v205_v6 }
  0x18   :  { %192 = vmatprep.subr.bf16.mxu0 %v206_v7 }
  0x1b   :  { %193 = vmatpush3.bf16.msra.mxu0 %v206_v7 }
  0x1c   :  { %194 = vmatprep.subr.bf16.mxu0 %v207_v8 }
  0x1f   :  { %195 = vmatpush3.bf16.msra.mxu0 %v207_v8 }
  0x22   :  { %197 = vmatmul.mubr.bf16.vlgmr.msra.gmra.mrb[0].mxu0 %v209_v9 }
  0xf5   :  { %v198_v11 = vpop.f32.mrb[0].mxu0 }
  0xf6   :  { %v145_v12 = vadd.f32 %v198_v11, %v159_v10  ;;  %v136_v13 = vpop.f32.mrb[1].mxu0 }
  0xf7   :  { %v137_v14 = vadd.f32 %v159_v10, %v136_v13  ;;  %v199_v15 = vpop.f32.mrb[2].mxu0 }
  0xf8   :  { %153 = vst [vmem:[%s278_s3 + $0x10] sm:$0xff] %v145_v12  ;;  %v148_v16 = vadd.f32 %v199_v15, %v159_v10  ;;  %v139_v17 = vpop.f32.mrb[3].mxu0 }
  0xf9   :  { %151 = vst [vmem:[%s278_s3] sm:$0xff] %v137_v14  ;;  %v140_v18 = vadd.f32 %v159_v10, %v139_v17 }
  0xfa   :  { %154 = vst [vmem:[%s278_s3 + $0x18] sm:$0xff] %v148_v16 }
  0xfb   :  { %152 = vst [vmem:[%s278_s3 + $0x8] sm:$0xff] %v140_v18 }

// kernel: residual_encoder_unet_forward.24
= control target key start
LH: loop header
LB: loop body
LE: loop exit
PB: predicated region body
PF: predicated region fallthrough
CT: control target
= control target key end

     0   :  { %s1244_s24 = smov 0   ;;  %s1446_s0 = inlined_call_operand.vmem [shape: bf16[2,64,256], index: 0, kind: input, shape index: {}]   ;;  %s1447_s1 = inlined_call_operand.vmem [shape: bf16[256,128], index: 1, kind: input, shape index: {}]   ;;  %s1448_s2 = inlined_call_operand.vmem [shape: bf16[2,64,256], index: 2, kind: input, shape index: {}]   ;;  %s1449_s3 = inlined_call_operand.vmem [shape: bf16[256,128], index: 3, kind: input, shape index: {}]   ;;  %s1450_s4 = inlined_call_operand.vmem [shape: f32[1,128], index: 4, kind: input, shape index: {}]   ;;  %s1451_s5 = inlined_call_operand.vmem [shape: f32[1,128], index: 5, kind: input, shape index: {}]   ;;  %s1452_s6 = inlined_call_operand.vmem [shape: f32[1,128], index: 6, kind: input, shape index: {}]   ;;  %s1453_s7 = inlined_call_operand.vmem [shape: f32[2,64,128], index: 7, kind: output, shape index: {}]  }
   0x1 LB: > { %s983_s25 = sadd.s32 4294967295, %s1202_s24   ;;  %p987_p0 = scmp.ge.s32.totalorder %s1202_s24, 1  ;;  %s1202_s24 = sphi %s1244_s24, %s17_s24  }
   0x2   : > { %p247_p1 = scmp.lt.s32.totalorder %s1202_s24, 3 }
   0x4   : > { %p248_p2 = pnand %p987_p0, %p247_p1 }
   0x5   : > { %v1138_v0 = vld [vmem:[%s1449_s3 + $0x40] sm:$0xff] (!%p248_p2)   ;;  %v1142_v4 = vld [vmem:[%s1449_s3 + $0x48] sm:$0xff] (!%p248_p2)   ;;  %v1146_v8 = vld [vmem:[%s1449_s3 + $0x50] sm:$0xff] (!%p248_p2)   ;;  %p284_p3 = scmp.lt.s32.totalorder (!%p248_p2), %s983_s25, 1 }
   0x6   : > { %251 = sbr.rel (%p248_p2) target bundleno = 336 (0x150), region = 48  ;;  %v1139_v1 = vld [vmem:[%s1447_s1 + $0x40] sm:$0xff] (!%p248_p2)   ;;  %1050 = vmatprep.subr.bf16.mxu0 (!%p248_p2), %v1138_v0  ;;  %v1143_v5 = vld [vmem:[%s1447_s1 + $0x48] sm:$0xff] (!%p248_p2)   ;;  %v1147_v9 = vld [vmem:[%s1447_s1 + $0x50] sm:$0xff] (!%p248_p2)  }
   0x7   : > { %v1140_v2 = vld [vmem:[%s1449_s3] sm:$0xff] (!%p248_p2)   ;;  %1090 = vmatprep.subr.bf16.mxu1 (!%p248_p2), %v1139_v1  ;;  %v1144_v6 = vld [vmem:[%s1449_s3 + $0x8] sm:$0xff] (!%p248_p2)   ;;  %v1148_v10 = vld [vmem:[%s1449_s3 + $0x10] sm:$0xff] (!%p248_p2)  }
   0x8   : > { %v1141_v3 = vld [vmem:[%s1447_s1] sm:$0xff] (!%p248_p2)   ;;  %1051 = vmatpush3.bf16.msra.mxu0 (!%p248_p2), %v1140_v2  ;;  %v1145_v7 = vld [vmem:[%s1447_s1 + $0x8] sm:$0xff] (!%p248_p2)   ;;  %v1149_v11 = vld [vmem:[%s1447_s1 + $0x10] sm:$0xff] (!%p248_p2)  }
   0x9   : > { %1091 = vmatpush3.bf16.msra.mxu1 (!%p248_p2), %v1141_v3  ;;  %1052 = vmatprep.subr.bf16.mxu0 (!%p248_p2), %v1142_v4  ;;  %v1150_v12 = vld [vmem:[%s1449_s3 + $0x58] sm:$0xff] (!%p248_p2)   ;;  %v1154_v16 = vld [vmem:[%s1449_s3 + $0x60] sm:$0xff] (!%p248_p2)   ;;  %v1158_v20 = vld [vmem:[%s1449_s3 + $0x68] sm:$0xff] (!%p248_p2)  }
   0xa   : > { %1092 = vmatprep.subr.bf16.mxu1 (!%p248_p2), %v1143_v5  ;;  %v1151_v13 = vld [vmem:[%s1447_s1 + $0x58] sm:$0xff] (!%p248_p2)   ;;  %v1155_v17 = vld [vmem:[%s1447_s1 + $0x60] sm:$0xff] (!%p248_p2)   ;;  %v1159_v21 = vld [vmem:[%s1447_s1 + $0x68] sm:$0xff] (!%p248_p2)  }
   0xb   : > { %v1152_v14 = vld [vmem:[%s1449_s3 + $0x18] sm:$0xff] (!%p248_p2)   ;;  %v1156_v18 = vld [vmem:[%s1449_s3 + $0x20] sm:$0xff] (!%p248_p2)   ;;  %v1160_v22 = vld [vmem:[%s1449_s3 + $0x28] sm:$0xff] (!%p248_p2)  }
   0xc   : > { %1053 = vmatpush3.bf16.msra.mxu0 (!%p248_p2), %v1144_v6  ;;  %v1153_v15 = vld [vmem:[%s1447_s1 + $0x18] sm:$0xff] (!%p248_p2)   ;;  %v1157_v19 = vld [vmem:[%s1447_s1 + $0x20] sm:$0xff] (!%p248_p2)   ;;  %v1161_v23 = vld [vmem:[%s1447_s1 + $0x28] sm:$0xff] (!%p248_p2)  }
   0xd   : > { %1093 = vmatpush3.bf16.msra.mxu1 %v1145_v7  ;;  %1054 = vmatprep.subr.bf16.mxu0 %v1146_v8  ;;  %s1455_s25 = smov (!%p284_p3, %s983_s25), 1  ;;  %v1162_v24 = vld [vmem:[%s1449_s3 + $0x70] sm:$0xff]   ;;  %v1166_v28 = vld [vmem:[%s1449_s3 + $0x78] sm:$0xff]   ;;  %v1385_v57 = vld [vmem:[%s1450_s4] ss:$0 sm:$0xff] }
   0xe   : > { %1094 = vmatprep.subr.bf16.mxu1 %v1147_v9  ;;  %v1163_v25 = vld [vmem:[%s1447_s1 + $0x70] sm:$0xff]   ;;  %s1337_s15 = sshll.u32 %s1455_s25, 6  ;;  %v1167_v29 = vld [vmem:[%s1447_s1 + $0x78] sm:$0xff]  }
   0xf   : > { %v1164_v26 = vld [vmem:[%s1449_s3 + $0x30] sm:$0xff]   ;;  %s1352_s23 = scalar_lea.vmem %s1448_s2, %s1337_s15  ;;  %v1168_v30 = vld [vmem:[%s1449_s3 + $0x38] sm:$0xff]   ;;  %s1364_s9 = scalar_lea.vmem %s1446_s0, %s1337_s15 }
  0x10   : > { %1055 = vmatpush3.bf16.msra.mxu0 %v1148_v10  ;;  %v1165_v27 = vld [vmem:[%s1447_s1 + $0x30] sm:$0xff]   ;;  %v1169_v31 = vld [vmem:[%s1447_s1 + $0x38] sm:$0xff]   ;;  %v1170_v32 = vld [vmem:[%s1352_s23] ss:$8 sps:$4 sm:$0xff]   ;;  %s298_s19 = scalar_lea.vmem %s1453_s7, %s1337_s15 }
  0x11   : > { %1095 = vmatpush3.bf16.msra.mxu1 %v1149_v11  ;;  %1056 = vmatprep.subr.bf16.mxu0 %v1150_v12  ;;  %v1172_v33 = vld [vmem:[%s1352_s23 + $0x4] ss:$8 sps:$4 sm:$0xff]   ;;  %v1173_v34 = vld [vmem:[%s1364_s9] ss:$8 sps:$4 sm:$0xff]   ;;  %v1176_v36 = vld [vmem:[%s1352_s23 + $0x14] ss:$8 sps:$4 sm:$0xff]  }
  0x12   : > { %1096 = vmatprep.subr.bf16.mxu1 %v1151_v13  ;;  %v1175_v35 = vld [vmem:[%s1364_s9 + $0x4] ss:$8 sps:$4 sm:$0xff]   ;;  %548 = vmatprep.mubr.bf16.mxu0 %v1172_v33  ;;  %v1178_v37 = vld [vmem:[%s1364_s9 + $0x14] ss:$8 sps:$4 sm:$0xff]   ;;  %v1180_v38 = vld [vmem:[%s1352_s23 + $0x10] ss:$8 sps:$4 sm:$0xff]  }
  0x13   : > { %749 = vmatprep.mubr.bf16.mxu1 %v1175_v35  ;;  %v1181_v39 = vld [vmem:[%s1364_s9 + $0x10] ss:$8 sps:$4 sm:$0xff]   ;;  %v1182_v40 = vld [vmem:[%s1352_s23 + $0x24] ss:$8 sps:$4 sm:$0xff]   ;;  %v1186_v42 = vld [vmem:[%s1352_s23 + $0x20] ss:$8 sps:$4 sm:$0xff]  }
  0x14   : > { %1057 = vmatpush3.bf16.msra.mxu0 %v1152_v14  ;;  %v1184_v41 = vld [vmem:[%s1364_s9 + $0x24] ss:$8 sps:$4 sm:$0xff]   ;;  %v1187_v43 = vld [vmem:[%s1364_s9 + $0x20] ss:$8 sps:$4 sm:$0xff]   ;;  %v1188_v44 = vld [vmem:[%s1352_s23 + $0x34] ss:$8 sps:$4 sm:$0xff]  }
  0x15   : > { %1097 = vmatpush3.bf16.msra.mxu1 %v1153_v15  ;;  %1058 = vmatprep.subr.bf16.mxu0 %v1154_v16  ;;  %v1190_v45 = vld [vmem:[%s1364_s9 + $0x34] ss:$8 sps:$4 sm:$0xff]   ;;  %v1192_v46 = vld [vmem:[%s1352_s23 + $0x30] ss:$8 sps:$4 sm:$0xff]  }
  0x16   : > { %1098 = vmatprep.subr.bf16.mxu1 %v1155_v17  ;;  %v1193_v47 = vld [vmem:[%s1364_s9 + $0x30] ss:$8 sps:$4 sm:$0xff]  }
  0x18   : > { %1059 = vmatpush3.bf16.msra.mxu0 %v1156_v18 }
  0x19   : > { %1099 = vmatpush3.bf16.msra.mxu1 %v1157_v19  ;;  %1060 = vmatprep.subr.bf16.mxu0 %v1158_v20 }
  0x1a   : > { %1100 = vmatprep.subr.bf16.mxu1 %v1159_v21 }
  0x1c   : > { %1061 = vmatpush3.bf16.msra.mxu0 %v1160_v22 }
  0x1d   : > { %1101 = vmatpush3.bf16.msra.mxu1 %v1161_v23  ;;  %1062 = vmatprep.subr.bf16.mxu0 %v1162_v24 }
  0x1e   : > { %1102 = vmatprep.subr.bf16.mxu1 %v1163_v25 }
  0x20   : > { %1063 = vmatpush3.bf16.msra.mxu0 %v1164_v26 }
  0x21   : > { %1103 = vmatpush3.bf16.msra.mxu1 %v1165_v27  ;;  %1064 = vmatprep.subr.bf16.mxu0 %v1166_v28 }
  0x22   : > { %1104 = vmatprep.subr.bf16.mxu1 %v1167_v29 }
  0x24   : > { %1065 = vmatpush3.bf16.msra.mxu0 %v1168_v30 }
  0x25   : > { %1105 = vmatpush3.bf16.msra.mxu1 %v1169_v31 }
  0x27   : > { %549 = vmatmul.mubr.bf16.vlgmr.msra.gmra.mrb[0].mxu0 %v1170_v32 }
  0x28   : > { %750 = vmatmul.mubr.bf16.vlgmr.msra.gmra.mrb[0].mxu1 %v1173_v34  ;;  %556 = vmatprep.mubr.bf16.mxu0 %v1176_v36 }
  0x29   : > { %757 = vmatprep.mubr.bf16.mxu1 %v1178_v37 }
  0x2f   : > { %557 = vmatmul.mubr.bf16.gmra.mrb[4].mxu0 %v1180_v38 }
  0x30   : > { %758 = vmatmul.mubr.bf16.gmra.mrb[4].mxu1 %v1181_v39  ;;  %564 = vmatprep.mubr.bf16.mxu0 %v1182_v40 }
  0x31   : > { %765 = vmatprep.mubr.bf16.mxu1 %v1184_v41 }
  0x37   : > { %565 = vmatmul.mubr.bf16.gmra.mrb[8].mxu0 %v1186_v42 }
  0x38   : > { %766 = vmatmul.mubr.bf16.gmra.mrb[8].mxu1 %v1187_v43  ;;  %572 = vmatprep.mubr.bf16.mxu0 %v1188_v44 }
  0x39   : > { %773 = vmatprep.mubr.bf16.mxu1 %v1190_v45 }
  0x3f   : > { %573 = vmatmul.mubr.bf16.gmra.mrb[12].mxu0 %v1192_v46 }
  0x40   : > { %774 = vmatmul.mubr.bf16.gmra.mrb[12].mxu1 %v1193_v47 }
  0xfa   : > { %v1066_v48 = vpop.f32.mrb[0].mxu0 }
  0xfb   : > { %v1106_v49 = vpop.f32.mrb[0].mxu1  ;;  %v1067_v50 = vpop.f32.mrb[1].mxu0 }
  0xfc   : > { %v1068_v51 = vadd.f32 %v1067_v50, %v1066_v48  ;;  %v1107_v52 = vpop.f32.mrb[1].mxu1  ;;  %v1069_v53 = vpop.f32.mrb[2].mxu0 }
  0xfd   : > { %v1108_v54 = vadd.f32 %v1107_v52, %v1106_v49  ;;  %v1109_v55 = vpop.f32.mrb[2].mxu1  ;;  %v1070_v56 = vpop.f32.mrb[3].mxu0 }
  0xfe   : > { %v1071_v58 = vadd.f32 %v1070_v56, %v1069_v53  ;;  %v1110_v59 = vpop.f32.mrb[3].mxu1 }
  0xff   : > { %v752_v60 = vadd.f32 %v1108_v54, %v1068_v51  ;;  %v1111_v61 = vadd.f32 %v1110_v59, %v1109_v55 }
 0x101   : > { %v1388_v62 = vadd.f32 %v1385_v57, %v752_v60  ;;  %v755_v63 = vadd.f32 %v1111_v61, %v1071_v58 }
 0x102   : > { %v1072_v0 = vpop.f32.mrb[4].mxu0 }
 0x103   : > { %v1391_v1 = vadd.f32 %v1385_v57, %v755_v63  ;;  %v1112_v2 = vpop.f32.mrb[4].mxu1  ;;  %v1073_v3 = vpop.f32.mrb[5].mxu0  ;;  %v810_v7 = vmul.f32 %v1388_v62, %v1388_v62 }
 0x104   : > { %v1074_v4 = vadd.f32 %v1073_v3, %v1072_v0  ;;  %v1113_v5 = vpop.f32.mrb[5].mxu1  ;;  %v1075_v6 = vpop.f32.mrb[6].mxu0 }
 0x105   : > { %v797_v8 = vadd.f32 %v1391_v1, %v1388_v62  ;;  %v811_v9 = vmul.f32 %v1391_v1, %v1391_v1  ;;  %v1114_v10 = vadd.f32 %v1113_v5, %v1112_v2  ;;  %v1115_v11 = vpop.f32.mrb[6].mxu1  ;;  %v1076_v12 = vpop.f32.mrb[7].mxu0 }
 0x106   : > { %v1077_v13 = vadd.f32 %v1076_v12, %v1075_v6  ;;  %v1116_v14 = vpop.f32.mrb[7].mxu1 }
 0x107   : > { %v818_v15 = vadd.f32 %v811_v9, %v810_v7  ;;  %v760_v16 = vadd.f32 %v1114_v10, %v1074_v4  ;;  %v1117_v17 = vadd.f32 %v1116_v14, %v1115_v11 }
 0x109   : > { %v1400_v18 = vadd.f32 %v1385_v57, %v760_v16  ;;  %v763_v19 = vadd.f32 %v1117_v17, %v1077_v13 }
 0x10a   : > { %v1078_v20 = vpop.f32.mrb[8].mxu0 }
 0x10b   : > { %v798_v21 = vadd.f32 %v797_v8, %v1400_v18  ;;  %v812_v22 = vmul.f32 %v1400_v18, %v1400_v18  ;;  %v1406_v23 = vadd.f32 %v1385_v57, %v763_v19  ;;  %v1118_v24 = vpop.f32.mrb[8].mxu1  ;;  %v1079_v25 = vpop.f32.mrb[9].mxu0 }
 0x10c   : > { %v1080_v26 = vadd.f32 %v1079_v25, %v1078_v20  ;;  %v1119_v27 = vpop.f32.mrb[9].mxu1  ;;  %v1081_v28 = vpop.f32.mrb[10].mxu0 }
 0x10d   : > { %v819_v29 = vadd.f32 %v818_v15, %v812_v22  ;;  %v799_v30 = vadd.f32 %v798_v21, %v1406_v23  ;;  %v813_v31 = vmul.f32 %v1406_v23, %v1406_v23  ;;  %v1120_v32 = vadd.f32 %v1119_v27, %v1118_v24  ;;  %v1121_v33 = vpop.f32.mrb[10].mxu1  ;;  %v1082_v34 = vpop.f32.mrb[11].mxu0 }
 0x10e   : > { %v1083_v35 = vadd.f32 %v1082_v34, %v1081_v28  ;;  %v1122_v36 = vpop.f32.mrb[11].mxu1 }
 0x10f   : > { %v820_v37 = vadd.f32 %v819_v29, %v813_v31  ;;  %v768_v38 = vadd.f32 %v1120_v32, %v1080_v26  ;;  %v1123_v39 = vadd.f32 %v1122_v36, %v1121_v33 }
 0x111   : > { %v1412_v40 = vadd.f32 %v1385_v57, %v768_v38  ;;  %v771_v41 = vadd.f32 %v1123_v39, %v1083_v35 }
 0x112   : > { %v1084_v42 = vpop.f32.mrb[12].mxu0 }
 0x113   : > { %v800_v43 = vadd.f32 %v799_v30, %v1412_v40  ;;  %v814_v44 = vmul.f32 %v1412_v40, %v1412_v40  ;;  %v794_v45 = vadd.f32 %v1385_v57, %v771_v41  ;;  %v1124_v46 = vpop.f32.mrb[12].mxu1  ;;  %v1085_v47 = vpop.f32.mrb[13].mxu0 }
 0x114   : > { %v1086_v48 = vadd.f32 %v1085_v47, %v1084_v42  ;;  %v1125_v49 = vpop.f32.mrb[13].mxu1  ;;  %v1087_v50 = vpop.f32.mrb[14].mxu0 }
 0x115   : > { %v821_v51 = vadd.f32 %v820_v37, %v814_v44  ;;  %v801_v52 = vadd.f32 %v800_v43, %v794_v45  ;;  %v815_v53 = vmul.f32 %v794_v45, %v794_v45  ;;  %v1126_v54 = vadd.f32 %v1125_v49, %v1124_v46  ;;  %v1127_v55 = vpop.f32.mrb[14].mxu1  ;;  %v1088_v56 = vpop.f32.mrb[15].mxu0  ;;  %v1044_v43 = vld [vmem:[%s1452_s6] ss:$0 sm:$0xff] }
 0x116   : > { %v1089_v58 = vadd.f32 %v1088_v56, %v1087_v50  ;;  %v1128_v59 = vpop.f32.mrb[15].mxu1 }
 0x117   : > { %v822_v60 = vadd.f32 %v821_v51, %v815_v53  ;;  %v776_v61 = vadd.f32 %v1126_v54, %v1086_v48  ;;  %v1129_v63 = vadd.f32 %v1128_v59, %v1127_v55 }
 0x119   : > { %v795_v0 = vadd.f32 %v1385_v57, %v776_v61  ;;  %v779_v2 = vadd.f32 %v1129_v63, %v1089_v58 }
 0x11b   : > { %v802_v3 = vadd.f32 %v801_v52, %v795_v0  ;;  %v816_v4 = vmul.f32 %v795_v0, %v795_v0  ;;  %v796_v5 = vadd.f32 %v1385_v57, %v779_v2 }
 0x11d   : > { %v823_v6 = vadd.f32 %v822_v60, %v816_v4  ;;  %v803_v7 = vadd.f32 %v802_v3, %v796_v5  ;;  %v817_v8 = vmul.f32 %v796_v5, %v796_v5 }
 0x11f   : > { %v804_v9 = vrot.slane %v803_v7, 4  ;;  %v824_v10 = vadd.f32 %v823_v6, %v817_v8 }
 0x121   : > { %v805_v11 = vadd.f32 %v804_v9, %v803_v7  ;;  %v825_v12 = vrot.slane %v824_v10, 4 }
 0x123   : > { %v806_v13 = vrot.slane %v805_v11, 2  ;;  %v826_v14 = vadd.f32 %v825_v12, %v824_v10 }
 0x125   : > { %v807_v15 = vadd.f32 %v806_v13, %v805_v11  ;;  %v827_v16 = vrot.slane %v826_v14, 2 }
 0x127   : > { %v808_v17 = vrot.slane %v807_v15, 1  ;;  %v828_v19 = vadd.f32 %v827_v16, %v826_v14 }
 0x129   : > { %v809_v20 = vadd.f32 %v808_v17, %v807_v15  ;;  %v829_v21 = vrot.slane %v828_v19, 1 }
 0x12b   : > { %v830_v22 = vadd.f32 %v829_v21, %v828_v19  ;;  %v831_v24 = vmul.f32 0.015625, %v809_v20 }
 0x12d   : > { %v832_v25 = vmul.f32 0.015625, %v830_v22  ;;  %v833_v26 = vmul.f32 %v831_v24, %v831_v24  ;;  %v836_v57 = vsub.f32 %v1388_v62, %v831_v24  ;;  %v837_v27 = vsub.f32 %v1391_v1, %v831_v24  ;;  %v1043_v62 = vld [vmem:[%s1451_s5] ss:$0 sm:$0xff] }
 0x12e   : > { %v838_v28 = vsub.f32 %v1400_v18, %v831_v24  ;;  %v839_v29 = vsub.f32 %v1406_v23, %v831_v24  ;;  %v840_v30 = vsub.f32 %v1412_v40, %v831_v24  ;;  %v841_v31 = vsub.f32 %v794_v45, %v831_v24 }
 0x12f   : > { %v834_v32 = vsub.f32 %v832_v25, %v833_v26  ;;  %v842_v33 = vsub.f32 %v795_v0, %v831_v24  ;;  %v843_v34 = vsub.f32 %v796_v5, %v831_v24 }
 0x131   : > { %v835_v35 = vmax.f32 %v834_v32, 0.0 }
 0x133   : > { %v844_v36 = vadd.f32 1e-05, %v835_v35 }
 0x135   : > { %1194 = vrsqrt.f32 %v844_v36 }
 0x13f   : > { %v1195_v37 = vpop.eup %1194 }
 0x140   : > { %v846_v38 = vmul.f32 %v1195_v37, %v836_v57  ;;  %v847_v1 = vmul.f32 %v1195_v37, %v837_v27  ;;  %v848_v39 = vmul.f32 %v1195_v37, %v838_v28  ;;  %v849_v18 = vmul.f32 %v1195_v37, %v839_v29 }
 0x141   : > { %v850_v41 = vmul.f32 %v1195_v37, %v840_v30  ;;  %v851_v23 = vmul.f32 %v1195_v37, %v841_v31  ;;  %v852_v42 = vmul.f32 %v1195_v37, %v842_v33  ;;  %v853_v40 = vmul.f32 %v1195_v37, %v843_v34 }
 0x142   : > { %v861_v44 = vmul.f32 %v1043_v62, %v846_v38  ;;  %v862_v45 = vmul.f32 %v1043_v62, %v847_v1  ;;  %v863_v46 = vmul.f32 %v1043_v62, %v848_v39  ;;  %v864_v47 = vmul.f32 %v1043_v62, %v849_v18 }
 0x143   : > { %v865_v48 = vmul.f32 %v1043_v62, %v850_v41  ;;  %v866_v49 = vmul.f32 %v1043_v62, %v851_v23  ;;  %v867_v50 = vmul.f32 %v1043_v62, %v852_v42  ;;  %v868_v51 = vmul.f32 %v1043_v62, %v853_v40 }
 0x144   : > { %v876_v52 = vadd.f32 %v1044_v43, %v861_v44  ;;  %v877_v53 = vadd.f32 %v1044_v43, %v862_v45  ;;  %v878_v54 = vadd.f32 %v1044_v43, %v863_v46  ;;  %v879_v55 = vadd.f32 %v1044_v43, %v864_v47 }
 0x145   : > { %v880_v56 = vadd.f32 %v1044_v43, %v865_v48  ;;  %v881_v58 = vadd.f32 %v1044_v43, %v866_v49  ;;  %v882_v59 = vadd.f32 %v1044_v43, %v867_v50  ;;  %v883_v60 = vadd.f32 %v1044_v43, %v868_v51 }
 0x146   : > { %vm884_vm0 = vcmp.ge.f32.partialorder %v876_v52, 0.0  ;;  %vm885_vm1 = vcmp.ge.f32.partialorder %v877_v53, 0.0  ;;  %vm886_vm2 = vcmp.ge.f32.partialorder %v878_v54, 0.0  ;;  %vm887_vm3 = vcmp.ge.f32.partialorder %v879_v55, 0.0 }
 0x147   : > { %vm888_vm4 = vcmp.ge.f32.partialorder %v880_v56, 0.0  ;;  %vm889_vm5 = vcmp.ge.f32.partialorder %v881_v58, 0.0  ;;  %vm890_vm6 = vcmp.ge.f32.partialorder %v882_v59, 0.0  ;;  %vm891_vm7 = vcmp.ge.f32.partialorder %v883_v60, 0.0 }
 0x148   : > { %v892_v61 = vmul.f32 0.01, %v876_v52  ;;  %v893_v63 = vmul.f32 0.01, %v877_v53  ;;  %v894_v0 = vmul.f32 0.01, %v878_v54 }
 0x149   : > { %v895_v2 = vmul.f32 0.01, %v879_v55  ;;  %v896_v3 = vmul.f32 0.01, %v880_v56  ;;  %v897_v4 = vmul.f32 0.01, %v881_v58 }
 0x14a   : > { %v898_v5 = vmul.f32 0.01, %v882_v59  ;;  %v899_v6 = vmul.f32 0.01, %v883_v60  ;;  %v900_v7 = vsel %vm884_vm0, %v876_v52, %v892_v61  ;;  %v901_v8 = vsel %vm885_vm1, %v877_v53, %v893_v63 }
 0x14b   : > { %v902_v9 = vsel %vm886_vm2, %v878_v54, %v894_v0  ;;  %v903_v10 = vsel %vm887_vm3, %v879_v55, %v895_v2  ;;  %v904_v11 = vsel %vm888_vm4, %v880_v56, %v896_v3  ;;  %v905_v12 = vsel %vm889_vm5, %v881_v58, %v897_v4  ;;  %908 = vst [vmem:[%s298_s19] sm:$0xff] %v900_v7 }
 0x14c   : > { %909 = vst [vmem:[%s298_s19 + $0x8] sm:$0xff] %v901_v8  ;;  %v906_v13 = vsel %vm890_vm6, %v882_v59, %v898_v5  ;;  %v907_v14 = vsel %vm891_vm7, %v883_v60, %v899_v6  ;;  %910 = vst [vmem:[%s298_s19 + $0x10] sm:$0xff] %v902_v9 }
 0x14d   : > { %911 = vst [vmem:[%s298_s19 + $0x18] sm:$0xff] %v903_v10  ;;  %912 = vst [vmem:[%s298_s19 + $0x20] sm:$0xff] %v904_v11 }
 0x14e   : > { %913 = vst [vmem:[%s298_s19 + $0x28] sm:$0xff] %v905_v12  ;;  %914 = vst [vmem:[%s298_s19 + $0x30] sm:$0xff] %v906_v13 }
 0x14f   : > { %915 = vst [vmem:[%s298_s19 + $0x38] sm:$0xff] %v907_v14 }
 0x150 PF: > { %s17_s24 = sadd.s32 1, %s1202_s24  }
 0x151   : > { %p14_p4 = scmp.ge.s32.totalorder %s17_s24, 4  }
 0x153   :  { %16 = sbr.rel (!%p14_p4) target bundleno = 1 (0x1), region = 81 }

// kernel: residual_encoder_unet_forward.25
= control target key start
LH: loop header
LB: loop body
LE: loop exit
PB: predicated region body
PF: predicated region fallthrough
CT: control target
= control target key end

     0   :  { %s483_s1 = inlined_call_operand.vmem [shape: bf16[128,128], index: 1, kind: input, shape index: {}]   ;;  %s484_s0 = inlined_call_operand.vmem [shape: bf16[128,128], index: 0, kind: input, shape index: {}]   ;;  %s485_s2 = inlined_call_operand.vmem [shape: f32[1,128], index: 2, kind: input, shape index: {}]   ;;  %s486_s3 = inlined_call_operand.vmem [shape: f32[128,128], index: 3, kind: output, shape index: {}]  }
   0x1   :  { %v348_v0 = vld [vmem:[%s483_s1] sm:$0xff]   ;;  %v349_v1 = vld [vmem:[%s483_s1 + $0x8] sm:$0xff]   ;;  %v350_v2 = vld [vmem:[%s483_s1 + $0x10] sm:$0xff]  }
   0x2   :  { %300 = vmatprep.subr.bf16.mxu0 %v348_v0  ;;  %332 = vmatprep.subr.bf16.mxu1 %v348_v0  ;;  %v351_v3 = vld [vmem:[%s483_s1 + $0x18] sm:$0xff]   ;;  %v356_v4 = vld [vmem:[%s484_s0] sm:$0xff]   ;;  %v353_v7 = vld [vmem:[%s483_s1 + $0x28] sm:$0xff]  }
   0x3   :  { %301 = vmatpush3.bf16.msra.mxu0 %v348_v0  ;;  %340 = vmatpush3.bf16.msra.mxu1 %v348_v0  ;;  %v357_v5 = vld [vmem:[%s484_s0 + $0x20] sm:$0xff]   ;;  %v354_v8 = vld [vmem:[%s483_s1 + $0x30] sm:$0xff]   ;;  %v355_v9 = vld [vmem:[%s483_s1 + $0x38] sm:$0xff]  }
   0x4   :  { %302 = vmatprep.subr.bf16.mxu0 %v349_v1  ;;  %333 = vmatprep.subr.bf16.mxu1 %v349_v1  ;;  %v352_v6 = vld [vmem:[%s483_s1 + $0x20] sm:$0xff]   ;;  %v358_v10 = vld [vmem:[%s484_s0 + $0x8] sm:$0xff]   ;;  %v360_v12 = vld [vmem:[%s484_s0 + $0x10] sm:$0xff]  }
   0x5   :  { %316 = vmatprep.mubr.bf16.mxu0 %v356_v4  ;;  %324 = vmatprep.mubr.bf16.mxu1 %v357_v5  ;;  %v359_v11 = vld [vmem:[%s484_s0 + $0x28] sm:$0xff]   ;;  %v361_v13 = vld [vmem:[%s484_s0 + $0x30] sm:$0xff]   ;;  %v362_v14 = vld [vmem:[%s484_s0 + $0x18] sm:$0xff]  }
   0x6   :  { %v363_v15 = vld [vmem:[%s484_s0 + $0x38] sm:$0xff]   ;;  %v267_v16 = vld [vmem:[%s485_s2] ss:$0 sm:$0xff] }
   0x7   :  { %303 = vmatpush3.bf16.msra.mxu0 %v349_v1  ;;  %341 = vmatpush3.bf16.msra.mxu1 %v349_v1 }
   0x8   :  { %304 = vmatprep.subr.bf16.mxu0 %v350_v2  ;;  %334 = vmatprep.subr.bf16.mxu1 %v350_v2 }
   0xb   :  { %305 = vmatpush3.bf16.msra.mxu0 %v350_v2  ;;  %342 = vmatpush3.bf16.msra.mxu1 %v350_v2 }
   0xc   :  { %306 = vmatprep.subr.bf16.mxu0 %v351_v3  ;;  %335 = vmatprep.subr.bf16.mxu1 %v351_v3 }
   0xf   :  { %307 = vmatpush3.bf16.msra.mxu0 %v351_v3  ;;  %343 = vmatpush3.bf16.msra.mxu1 %v351_v3 }
  0x10   :  { %308 = vmatprep.subr.bf16.mxu0 %v352_v6  ;;  %336 = vmatprep.subr.bf16.mxu1 %v352_v6 }
  0x13   :  { %309 = vmatpush3.bf16.msra.mxu0 %v352_v6  ;;  %344 = vmatpush3.bf16.msra.mxu1 %v352_v6 }
  0x14   :  { %310 = vmatprep.subr.bf16.mxu0 %v353_v7  ;;  %337 = vmatprep.subr.bf16.mxu1 %v353_v7 }
  0x17   :  { %311 = vmatpush3.bf16.msra.mxu0 %v353_v7  ;;  %345 = vmatpush3.bf16.msra.mxu1 %v353_v7 }
  0x18   :  { %312 = vmatprep.subr.bf16.mxu0 %v354_v8  ;;  %338 = vmatprep.subr.bf16.mxu1 %v354_v8 }
  0x1b   :  { %313 = vmatpush3.bf16.msra.mxu0 %v354_v8  ;;  %346 = vmatpush3.bf16.msra.mxu1 %v354_v8 }
  0x1c   :  { %314 = vmatprep.subr.bf16.mxu0 %v355_v9  ;;  %339 = vmatprep.subr.bf16.mxu1 %v355_v9 }
  0x1f   :  { %315 = vmatpush3.bf16.msra.mxu0 %v355_v9  ;;  %347 = vmatpush3.bf16.msra.mxu1 %v355_v9 }
  0x22   :  { %317 = vmatmul.mubr.bf16.vlgmr.msra.gmra.mrb[0].mxu0 %v358_v10  ;;  %325 = vmatmul.mubr.bf16.vlgmr.msra.gmra.mrb[0].mxu1 %v359_v11 }
  0x23   :  { %320 = vmatprep.mubr.bf16.mxu0 %v360_v12  ;;  %328 = vmatprep.mubr.bf16.mxu1 %v361_v13 }
  0x2a   :  { %321 = vmatmul.mubr.bf16.gmra.mrb[4].mxu0 %v362_v14  ;;  %329 = vmatmul.mubr.bf16.gmra.mrb[4].mxu1 %v363_v15 }
  0xf5   :  { %v318_v17 = vpop.f32.mrb[0].mxu0  ;;  %v326_v18 = vpop.f32.mrb[0].mxu1 }
  0xf6   :  { %v193_v19 = vadd.f32 %v318_v17, %v267_v16  ;;  %v225_v20 = vadd.f32 %v326_v18, %v267_v16  ;;  %v184_v21 = vpop.f32.mrb[1].mxu0  ;;  %v216_v22 = vpop.f32.mrb[1].mxu1 }
  0xf7   :  { %v185_v23 = vadd.f32 %v267_v16, %v184_v21  ;;  %v217_v24 = vadd.f32 %v267_v16, %v216_v22  ;;  %v319_v25 = vpop.f32.mrb[2].mxu0  ;;  %v327_v26 = vpop.f32.mrb[2].mxu1 }
  0xf8   :  { %249 = vst [vmem:[%s486_s3 + $0x10] sm:$0xff] %v193_v19  ;;  %257 = vst [vmem:[%s486_s3 + $0x50] sm:$0xff] %v225_v20  ;;  %v196_v27 = vadd.f32 %v319_v25, %v267_v16  ;;  %v228_v28 = vadd.f32 %v327_v26, %v267_v16  ;;  %v187_v29 = vpop.f32.mrb[3].mxu0  ;;  %v219_v30 = vpop.f32.mrb[3].mxu1 }
  0xf9   :  { %247 = vst [vmem:[%s486_s3] sm:$0xff] %v185_v23  ;;  %255 = vst [vmem:[%s486_s3 + $0x40] sm:$0xff] %v217_v24  ;;  %v188_v31 = vadd.f32 %v267_v16, %v187_v29  ;;  %v220_v32 = vadd.f32 %v267_v16, %v219_v30 }
  0xfa   :  { %250 = vst [vmem:[%s486_s3 + $0x18] sm:$0xff] %v196_v27  ;;  %258 = vst [vmem:[%s486_s3 + $0x58] sm:$0xff] %v228_v28 }
  0xfb   :  { %248 = vst [vmem:[%s486_s3 + $0x8] sm:$0xff] %v188_v31  ;;  %256 = vst [vmem:[%s486_s3 + $0x48] sm:$0xff] %v220_v32 }
  0xfd   :  { %v322_v33 = vpop.f32.mrb[4].mxu0  ;;  %v330_v34 = vpop.f32.mrb[4].mxu1 }
  0xfe   :  { %v209_v35 = vadd.f32 %v322_v33, %v267_v16  ;;  %v241_v36 = vadd.f32 %v330_v34, %v267_v16  ;;  %v200_v37 = vpop.f32.mrb[5].mxu0  ;;  %v232_v38 = vpop.f32.mrb[5].mxu1 }
  0xff   :  { %v201_v39 = vadd.f32 %v267_v16, %v200_v37  ;;  %v233_v40 = vadd.f32 %v267_v16, %v232_v38  ;;  %v323_v41 = vpop.f32.mrb[6].mxu0  ;;  %v331_v42 = vpop.f32.mrb[6].mxu1 }
 0x100   :  { %253 = vst [vmem:[%s486_s3 + $0x30] sm:$0xff] %v209_v35  ;;  %261 = vst [vmem:[%s486_s3 + $0x70] sm:$0xff] %v241_v36  ;;  %v212_v43 = vadd.f32 %v323_v41, %v267_v16  ;;  %v244_v44 = vadd.f32 %v331_v42, %v267_v16  ;;  %v203_v45 = vpop.f32.mrb[7].mxu0  ;;  %v235_v46 = vpop.f32.mrb[7].mxu1 }
 0x101   :  { %251 = vst [vmem:[%s486_s3 + $0x20] sm:$0xff] %v201_v39  ;;  %259 = vst [vmem:[%s486_s3 + $0x60] sm:$0xff] %v233_v40  ;;  %v204_v47 = vadd.f32 %v267_v16, %v203_v45  ;;  %v236_v48 = vadd.f32 %v267_v16, %v235_v46 }
 0x102   :  { %254 = vst [vmem:[%s486_s3 + $0x38] sm:$0xff] %v212_v43  ;;  %262 = vst [vmem:[%s486_s3 + $0x78] sm:$0xff] %v244_v44 }
 0x103   :  { %252 = vst [vmem:[%s486_s3 + $0x28] sm:$0xff] %v204_v47  ;;  %260 = vst [vmem:[%s486_s3 + $0x68] sm:$0xff] %v236_v48 }

// kernel: residual_encoder_unet_forward.27
= control target key start
LH: loop header
LB: loop body
LE: loop exit
PB: predicated region body
PF: predicated region fallthrough
CT: control target
= control target key end

     0   :  { %s807_s12 = smov 0   ;;  %s941_s0 = inlined_call_operand.vmem [shape: bf16[512,128], index: 0, kind: input, shape index: {}]   ;;  %s942_s1 = inlined_call_operand.vmem [shape: bf16[128,128], index: 1, kind: input, shape index: {}]   ;;  %s943_s2 = inlined_call_operand.vmem [shape: f32[1,128], index: 2, kind: input, shape index: {}]   ;;  %s944_s3 = inlined_call_operand.vmem [shape: f32[512,128], index: 3, kind: output, shape index: {}]  }
   0x1 LB: > { %s623_s13 = sadd.s32 4294967295, %s785_s12   ;;  %p627_p0 = scmp.ge.s32.totalorder %s785_s12, 1  ;;  %s785_s12 = sphi %s807_s12, %s13_s12  }
   0x2   : > { %p138_p1 = scmp.lt.s32.totalorder %s785_s12, 3 }
   0x4   : > { %p139_p2 = pnand %p627_p0, %p138_p1 }
   0x5   : > { %v755_v0 = vld [vmem:[%s942_s1] sm:$0xff] (!%p139_p2)   ;;  %s628_s16 = sshll.u32 (!%p139_p2), %s623_s13, 5  ;;  %v756_v1 = vld [vmem:[%s942_s1 + $0x8] sm:$0xff] (!%p139_p2)   ;;  %v757_v2 = vld [vmem:[%s942_s1 + $0x10] sm:$0xff] (!%p139_p2)  }
   0x6   : > { %142 = sbr.rel (%p139_p2) target bundleno = 280 (0x118), region = 32  ;;  %p163_p3 = scmp.lt.s32.totalorder (!%p139_p2), %s628_s16, 63  ;;  %683 = vmatprep.subr.bf16.mxu0 (!%p139_p2), %v755_v0  ;;  %731 = vmatprep.subr.bf16.mxu1 (!%p139_p2), %v755_v0  ;;  %v758_v3 = vld [vmem:[%s942_s1 + $0x18] sm:$0xff] (!%p139_p2)   ;;  %v759_v6 = vld [vmem:[%s942_s1 + $0x20] sm:$0xff] (!%p139_p2)   ;;  %v760_v7 = vld [vmem:[%s942_s1 + $0x28] sm:$0xff] (!%p139_p2)  }
   0x7   : > { %684 = vmatpush3.bf16.msra.mxu0 (!%p139_p2), %v755_v0  ;;  %739 = vmatpush3.bf16.msra.mxu1 (!%p139_p2), %v755_v0  ;;  %v761_v8 = vld [vmem:[%s942_s1 + $0x30] sm:$0xff] (!%p139_p2)   ;;  %v762_v9 = vld [vmem:[%s942_s1 + $0x38] sm:$0xff] (!%p139_p2)   ;;  %v867_v24 = vld [vmem:[%s943_s2] ss:$0 sm:$0xff] (!%p139_p2) }
   0x8   : > { %685 = vmatprep.subr.bf16.mxu0 (!%p139_p2), %v756_v1  ;;  %732 = vmatprep.subr.bf16.mxu1 (!%p139_p2), %v756_v1 }
   0xb   : > { %686 = vmatpush3.bf16.msra.mxu0 (!%p139_p2), %v756_v1  ;;  %740 = vmatpush3.bf16.msra.mxu1 (!%p139_p2), %v756_v1 }
   0xc   : > { %687 = vmatprep.subr.bf16.mxu0 (!%p139_p2), %v757_v2  ;;  %733 = vmatprep.subr.bf16.mxu1 (!%p139_p2), %v757_v2 }
   0xd   : > { %s946_s16 = smov (!%p163_p3, %s628_s16), 63 }
   0xe   : > { %s629_s21 = sshll.u32 %s946_s16, 2  ;;  %s631_s8 = sshll.u32 %s946_s16, 3 }
   0xf   : > { %s830_s24 = scalar_lea.vmem %s941_s0, %s629_s21  ;;  %688 = vmatpush3.bf16.msra.mxu0 %v757_v2  ;;  %741 = vmatpush3.bf16.msra.mxu1 %v757_v2  ;;  %s872_s14 = scalar_lea.vmem %s944_s3, %s631_s8 }
  0x10   : > { %v763_v4 = vld [vmem:[%s830_s24] sm:$0xff]   ;;  %689 = vmatprep.subr.bf16.mxu0 %v758_v3  ;;  %734 = vmatprep.subr.bf16.mxu1 %v758_v3  ;;  %v765_v10 = vld [vmem:[%s830_s24 + $0x8] sm:$0xff]   ;;  %v767_v12 = vld [vmem:[%s830_s24 + $0x10] sm:$0xff]  }
  0x11   : > { %v764_v5 = vld [vmem:[%s830_s24 + $0x40] sm:$0xff]   ;;  %699 = vmatprep.mubr.bf16.mxu0 %v763_v4  ;;  %v766_v11 = vld [vmem:[%s830_s24 + $0x48] sm:$0xff]   ;;  %v768_v13 = vld [vmem:[%s830_s24 + $0x50] sm:$0xff]  }
  0x12   : > { %715 = vmatprep.mubr.bf16.mxu1 %v764_v5  ;;  %v769_v14 = vld [vmem:[%s830_s24 + $0x18] sm:$0xff]   ;;  %v771_v16 = vld [vmem:[%s830_s24 + $0x20] sm:$0xff]   ;;  %v773_v18 = vld [vmem:[%s830_s24 + $0x28] sm:$0xff]  }
  0x13   : > { %690 = vmatpush3.bf16.msra.mxu0 %v758_v3  ;;  %742 = vmatpush3.bf16.msra.mxu1 %v758_v3  ;;  %v770_v15 = vld [vmem:[%s830_s24 + $0x58] sm:$0xff]   ;;  %v772_v17 = vld [vmem:[%s830_s24 + $0x60] sm:$0xff]   ;;  %v774_v19 = vld [vmem:[%s830_s24 + $0x68] sm:$0xff]  }
  0x14   : > { %691 = vmatprep.subr.bf16.mxu0 %v759_v6  ;;  %735 = vmatprep.subr.bf16.mxu1 %v759_v6  ;;  %v775_v20 = vld [vmem:[%s830_s24 + $0x30] sm:$0xff]   ;;  %v777_v22 = vld [vmem:[%s830_s24 + $0x38] sm:$0xff]  }
  0x15   : > { %v776_v21 = vld [vmem:[%s830_s24 + $0x70] sm:$0xff]   ;;  %v778_v23 = vld [vmem:[%s830_s24 + $0x78] sm:$0xff]  }
  0x17   : > { %692 = vmatpush3.bf16.msra.mxu0 %v759_v6  ;;  %743 = vmatpush3.bf16.msra.mxu1 %v759_v6 }
  0x18   : > { %693 = vmatprep.subr.bf16.mxu0 %v760_v7  ;;  %736 = vmatprep.subr.bf16.mxu1 %v760_v7 }
  0x1b   : > { %694 = vmatpush3.bf16.msra.mxu0 %v760_v7  ;;  %744 = vmatpush3.bf16.msra.mxu1 %v760_v7 }
  0x1c   : > { %695 = vmatprep.subr.bf16.mxu0 %v761_v8  ;;  %737 = vmatprep.subr.bf16.mxu1 %v761_v8 }
  0x1f   : > { %696 = vmatpush3.bf16.msra.mxu0 %v761_v8  ;;  %745 = vmatpush3.bf16.msra.mxu1 %v761_v8 }
  0x20   : > { %697 = vmatprep.subr.bf16.mxu0 %v762_v9  ;;  %738 = vmatprep.subr.bf16.mxu1 %v762_v9 }
  0x23   : > { %698 = vmatpush3.bf16.msra.mxu0 %v762_v9  ;;  %746 = vmatpush3.bf16.msra.mxu1 %v762_v9 }
  0x26   : > { %700 = vmatmul.mubr.bf16.vlgmr.msra.gmra.mrb[0].mxu0 %v765_v10  ;;  %716 = vmatmul.mubr.bf16.vlgmr.msra.gmra.mrb[0].mxu1 %v766_v11 }
  0x27   : > { %703 = vmatprep.mubr.bf16.mxu0 %v767_v12  ;;  %719 = vmatprep.mubr.bf16.mxu1 %v768_v13 }
  0x2e   : > { %704 = vmatmul.mubr.bf16.gmra.mrb[4].mxu0 %v769_v14  ;;  %720 = vmatmul.mubr.bf16.gmra.mrb[4].mxu1 %v770_v15 }
  0x2f   : > { %707 = vmatprep.mubr.bf16.mxu0 %v771_v16  ;;  %723 = vmatprep.mubr.bf16.mxu1 %v772_v17 }
  0x36   : > { %708 = vmatmul.mubr.bf16.gmra.mrb[8].mxu0 %v773_v18  ;;  %724 = vmatmul.mubr.bf16.gmra.mrb[8].mxu1 %v774_v19 }
  0x37   : > { %711 = vmatprep.mubr.bf16.mxu0 %v775_v20  ;;  %727 = vmatprep.mubr.bf16.mxu1 %v776_v21 }
  0x3e   : > { %712 = vmatmul.mubr.bf16.gmra.mrb[12].mxu0 %v777_v22  ;;  %728 = vmatmul.mubr.bf16.gmra.mrb[12].mxu1 %v778_v23 }
  0xf9   : > { %v701_v25 = vpop.f32.mrb[0].mxu0  ;;  %v717_v26 = vpop.f32.mrb[0].mxu1 }
  0xfa   : > { %v417_v27 = vadd.f32 %v701_v25, %v867_v24  ;;  %v481_v28 = vadd.f32 %v717_v26, %v867_v24  ;;  %v408_v29 = vpop.f32.mrb[1].mxu0  ;;  %v472_v30 = vpop.f32.mrb[1].mxu1 }
  0xfb   : > { %v409_v31 = vadd.f32 %v867_v24, %v408_v29  ;;  %v473_v32 = vadd.f32 %v867_v24, %v472_v30  ;;  %v702_v33 = vpop.f32.mrb[2].mxu0  ;;  %v718_v34 = vpop.f32.mrb[2].mxu1 }
  0xfc   : > { %537 = vst [vmem:[%s872_s14 + $0x10] sm:$0xff] %v417_v27  ;;  %553 = vst [vmem:[%s872_s14 + $0x90] sm:$0xff] %v481_v28  ;;  %v420_v35 = vadd.f32 %v702_v33, %v867_v24  ;;  %v484_v36 = vadd.f32 %v718_v34, %v867_v24  ;;  %v411_v37 = vpop.f32.mrb[3].mxu0  ;;  %v475_v38 = vpop.f32.mrb[3].mxu1 }
  0xfd   : > { %535 = vst [vmem:[%s872_s14] sm:$0xff] %v409_v31  ;;  %551 = vst [vmem:[%s872_s14 + $0x80] sm:$0xff] %v473_v32  ;;  %v412_v39 = vadd.f32 %v867_v24, %v411_v37  ;;  %v476_v40 = vadd.f32 %v867_v24, %v475_v38 }
  0xfe   : > { %538 = vst [vmem:[%s872_s14 + $0x18] sm:$0xff] %v420_v35  ;;  %554 = vst [vmem:[%s872_s14 + $0x98] sm:$0xff] %v484_v36 }
  0xff   : > { %536 = vst [vmem:[%s872_s14 + $0x8] sm:$0xff] %v412_v39  ;;  %552 = vst [vmem:[%s872_s14 + $0x88] sm:$0xff] %v476_v40 }
 0x101   : > { %v705_v41 = vpop.f32.mrb[4].mxu0  ;;  %v721_v42 = vpop.f32.mrb[4].mxu1 }
 0x102   : > { %v433_v43 = vadd.f32 %v705_v41, %v867_v24  ;;  %v497_v44 = vadd.f32 %v721_v42, %v867_v24  ;;  %v424_v45 = vpop.f32.mrb[5].mxu0  ;;  %v488_v46 = vpop.f32.mrb[5].mxu1 }
 0x103   : > { %v425_v47 = vadd.f32 %v867_v24, %v424_v45  ;;  %v489_v48 = vadd.f32 %v867_v24, %v488_v46  ;;  %v706_v49 = vpop.f32.mrb[6].mxu0  ;;  %v722_v50 = vpop.f32.mrb[6].mxu1 }
 0x104   : > { %541 = vst [vmem:[%s872_s14 + $0x30] sm:$0xff] %v433_v43  ;;  %557 = vst [vmem:[%s872_s14 + $0xb0] sm:$0xff] %v497_v44  ;;  %v436_v51 = vadd.f32 %v706_v49, %v867_v24  ;;  %v500_v52 = vadd.f32 %v722_v50, %v867_v24  ;;  %v427_v53 = vpop.f32.mrb[7].mxu0  ;;  %v491_v54 = vpop.f32.mrb[7].mxu1 }
 0x105   : > { %539 = vst [vmem:[%s872_s14 + $0x20] sm:$0xff] %v425_v47  ;;  %555 = vst [vmem:[%s872_s14 + $0xa0] sm:$0xff] %v489_v48  ;;  %v428_v55 = vadd.f32 %v867_v24, %v427_v53  ;;  %v492_v56 = vadd.f32 %v867_v24, %v491_v54 }
 0x106   : > { %542 = vst [vmem:[%s872_s14 + $0x38] sm:$0xff] %v436_v51  ;;  %558 = vst [vmem:[%s872_s14 + $0xb8] sm:$0xff] %v500_v52 }
 0x107   : > { %540 = vst [vmem:[%s872_s14 + $0x28] sm:$0xff] %v428_v55  ;;  %556 = vst [vmem:[%s872_s14 + $0xa8] sm:$0xff] %v492_v56 }
 0x109   : > { %v709_v57 = vpop.f32.mrb[8].mxu0  ;;  %v725_v58 = vpop.f32.mrb[8].mxu1 }
 0x10a   : > { %v449_v59 = vadd.f32 %v709_v57, %v867_v24  ;;  %v513_v60 = vadd.f32 %v725_v58, %v867_v24  ;;  %v440_v61 = vpop.f32.mrb[9].mxu0  ;;  %v504_v62 = vpop.f32.mrb[9].mxu1 }
 0x10b   : > { %v441_v63 = vadd.f32 %v867_v24, %v440_v61  ;;  %v505_v0 = vadd.f32 %v867_v24, %v504_v62  ;;  %v710_v1 = vpop.f32.mrb[10].mxu0  ;;  %v726_v2 = vpop.f32.mrb[10].mxu1 }
 0x10c   : > { %545 = vst [vmem:[%s872_s14 + $0x50] sm:$0xff] %v449_v59  ;;  %561 = vst [vmem:[%s872_s14 + $0xd0] sm:$0xff] %v513_v60  ;;  %v452_v3 = vadd.f32 %v710_v1, %v867_v24  ;;  %v516_v4 = vadd.f32 %v726_v2, %v867_v24  ;;  %v443_v5 = vpop.f32.mrb[11].mxu0  ;;  %v507_v6 = vpop.f32.mrb[11].mxu1 }
 0x10d   : > { %543 = vst [vmem:[%s872_s14 + $0x40] sm:$0xff] %v441_v63  ;;  %559 = vst [vmem:[%s872_s14 + $0xc0] sm:$0xff] %v505_v0  ;;  %v444_v7 = vadd.f32 %v867_v24, %v443_v5  ;;  %v508_v8 = vadd.f32 %v867_v24, %v507_v6 }
 0x10e   : > { %546 = vst [vmem:[%s872_s14 + $0x58] sm:$0xff] %v452_v3  ;;  %562 = vst [vmem:[%s872_s14 + $0xd8] sm:$0xff] %v516_v4 }
 0x10f   : > { %544 = vst [vmem:[%s872_s14 + $0x48] sm:$0xff] %v444_v7  ;;  %560 = vst [vmem:[%s872_s14 + $0xc8] sm:$0xff] %v508_v8 }
 0x111   : > { %v713_v9 = vpop.f32.mrb[12].mxu0  ;;  %v729_v10 = vpop.f32.mrb[12].mxu1 }
 0x112   : > { %v465_v11 = vadd.f32 %v713_v9, %v867_v24  ;;  %v529_v12 = vadd.f32 %v729_v10, %v867_v24  ;;  %v456_v13 = vpop.f32.mrb[13].mxu0  ;;  %v520_v14 = vpop.f32.mrb[13].mxu1 }
 0x113   : > { %v457_v15 = vadd.f32 %v867_v24, %v456_v13  ;;  %v521_v16 = vadd.f32 %v867_v24, %v520_v14  ;;  %v714_v17 = vpop.f32.mrb[14].mxu0  ;;  %v730_v18 = vpop.f32.mrb[14].mxu1 }
 0x114   : > { %549 = vst [vmem:[%s872_s14 + $0x70] sm:$0xff] %v465_v11  ;;  %565 = vst [vmem:[%s872_s14 + $0xf0] sm:$0xff] %v529_v12  ;;  %v468_v19 = vadd.f32 %v714_v17, %v867_v24  ;;  %v532_v20 = vadd.f32 %v730_v18, %v867_v24  ;;  %v459_v21 = vpop.f32.mrb[15].mxu0  ;;  %v523_v22 = vpop.f32.mrb[15].mxu1 }
 0x115   : > { %547 = vst [vmem:[%s872_s14 + $0x60] sm:$0xff] %v457_v15  ;;  %563 = vst [vmem:[%s872_s14 + $0xe0] sm:$0xff] %v521_v16  ;;  %v460_v23 = vadd.f32 %v867_v24, %v459_v21  ;;  %v524_v25 = vadd.f32 %v867_v24, %v523_v22 }
 0x116   : > { %550 = vst [vmem:[%s872_s14 + $0x78] sm:$0xff] %v468_v19  ;;  %566 = vst [vmem:[%s872_s14 + $0xf8] sm:$0xff] %v532_v20 }
 0x117   : > { %548 = vst [vmem:[%s872_s14 + $0x68] sm:$0xff] %v460_v23  ;;  %564 = vst [vmem:[%s872_s14 + $0xe8] sm:$0xff] %v524_v25 }
 0x118 PF: > { %s13_s12 = sadd.s32 1, %s785_s12  }
 0x119   : > { %p10_p4 = scmp.ge.s32.totalorder %s13_s12, 4  }
 0x11b   :  { %12 = sbr.rel (!%p10_p4) target bundleno = 1 (0x1), region = 62 }

// kernel: residual_encoder_unet_forward.26
= control target key start
LH: loop header
LB: loop body
LE: loop exit
PB: predicated region body
PF: predicated region fallthrough
CT: control target
= control target key end

     0   :  { %s1844_s24 = smov 0   ;;  %s2481_s0 = inlined_call_operand.vmem [shape: bf16[2,256,128], index: 0, kind: input, shape index: {}]   ;;  %s2482_s1 = inlined_call_operand.vmem [shape: bf16[128,128], index: 1, kind: input, shape index: {}]   ;;  %s2483_s2 = inlined_call_operand.vmem [shape: bf16[2,256,128], index: 2, kind: input, shape index: {}]   ;;  %s2484_s3 = inlined_call_operand.vmem [shape: bf16[128,128], index: 3, kind: input, shape index: {}]   ;;  %s2485_s4 = inlined_call_operand.vmem [shape: f32[1,128], index: 4, kind: input, shape index: {}]   ;;  %s2486_s5 = inlined_call_operand.vmem [shape: f32[1,128], index: 5, kind: input, shape index: {}]   ;;  %s2487_s6 = inlined_call_operand.vmem [shape: f32[1,128], index: 6, kind: input, shape index: {}]   ;;  %s2488_s7 = inlined_call_operand.vmem [shape: f32[2,256,128], index: 7, kind: output, shape index: {}]  }
   0x1 LB: > { %s1495_s25 = sadd.s32 4294967295, %s1802_s24   ;;  %p1499_p0 = scmp.ge.s32.totalorder %s1802_s24, 1  ;;  %s1802_s24 = sphi %s1844_s24, %s17_s24  }
   0x2   : > { %p247_p1 = scmp.lt.s32.totalorder %s1802_s24, 3 }
   0x4   : > { %p248_p2 = pnand %p1499_p0, %p247_p1 }
   0x5   : > { %v1746_v0 = vld [vmem:[%s2484_s3] sm:$0xff] (!%p248_p2)   ;;  %v1748_v2 = vld [vmem:[%s2484_s3 + $0x8] sm:$0xff] (!%p248_p2)   ;;  %p284_p3 = scmp.lt.s32.totalorder (!%p248_p2), %s1495_s25, 1  ;;  %v1750_v4 = vld [vmem:[%s2484_s3 + $0x10] sm:$0xff] (!%p248_p2)  }
   0x6   : > { %251 = sbr.rel (%p248_p2) target bundleno = 406 (0x196), region = 48  ;;  %v1747_v1 = vld [vmem:[%s2482_s1] sm:$0xff] (!%p248_p2)   ;;  %1610 = vmatprep.subr.bf16.mxu1 (!%p248_p2), %v1746_v0  ;;  %v1749_v3 = vld [vmem:[%s2482_s1 + $0x8] sm:$0xff] (!%p248_p2)   ;;  %v1751_v5 = vld [vmem:[%s2482_s1 + $0x10] sm:$0xff] (!%p248_p2)  }
   0x7   : > { %1658 = vmatprep.subr.bf16.mxu0 (!%p248_p2), %v1747_v1  ;;  %1611 = vmatpush3.bf16.msra.mxu1 (!%p248_p2), %v1746_v0  ;;  %v1752_v6 = vld [vmem:[%s2484_s3 + $0x18] sm:$0xff] (!%p248_p2)   ;;  %v1754_v8 = vld [vmem:[%s2484_s3 + $0x20] sm:$0xff] (!%p248_p2)   ;;  %v1756_v10 = vld [vmem:[%s2484_s3 + $0x28] sm:$0xff] (!%p248_p2)  }
   0x8   : > { %1659 = vmatpush3.bf16.msra.mxu0 (!%p248_p2), %v1747_v1  ;;  %1612 = vmatprep.subr.bf16.mxu1 (!%p248_p2), %v1748_v2  ;;  %v1753_v7 = vld [vmem:[%s2482_s1 + $0x18] sm:$0xff] (!%p248_p2)   ;;  %v1755_v9 = vld [vmem:[%s2482_s1 + $0x20] sm:$0xff] (!%p248_p2)   ;;  %v1757_v11 = vld [vmem:[%s2482_s1 + $0x28] sm:$0xff] (!%p248_p2)  }
   0x9   : > { %1660 = vmatprep.subr.bf16.mxu0 (!%p248_p2), %v1749_v3  ;;  %v1758_v14 = vld [vmem:[%s2484_s3 + $0x30] sm:$0xff] (!%p248_p2)   ;;  %v1760_v16 = vld [vmem:[%s2484_s3 + $0x38] sm:$0xff] (!%p248_p2)   ;;  %v1948_v52 = vld [vmem:[%s2485_s4] ss:$0 sm:$0xff] (!%p248_p2) }
   0xa   : > { %v1759_v15 = vld [vmem:[%s2482_s1 + $0x30] sm:$0xff] (!%p248_p2)   ;;  %v1761_v17 = vld [vmem:[%s2482_s1 + $0x38] sm:$0xff] (!%p248_p2)  }
   0xb   : > { %1613 = vmatpush3.bf16.msra.mxu1 (!%p248_p2), %v1748_v2 }
   0xc   : > { %1661 = vmatpush3.bf16.msra.mxu0 (!%p248_p2), %v1749_v3  ;;  %1614 = vmatprep.subr.bf16.mxu1 (!%p248_p2), %v1750_v4 }
   0xd   : > { %s2504_s25 = smov (!%p284_p3, %s1495_s25), 1  ;;  %1662 = vmatprep.subr.bf16.mxu0 %v1751_v5 }
   0xe   : > { %s1559_s19 = sshll.u32 %s2504_s25, 7  ;;  %s1561_s29 = sshll.u32 %s2504_s25, 8 }
   0xf   : > { %1615 = vmatpush3.bf16.msra.mxu1 %v1750_v4  ;;  %s1888_s28 = scalar_lea.vmem %s2483_s2, %s1559_s19  ;;  %s1896_s10 = scalar_lea.vmem %s2481_s0, %s1559_s19 }
  0x10   : > { %1663 = vmatpush3.bf16.msra.mxu0 %v1751_v5  ;;  %1616 = vmatprep.subr.bf16.mxu1 %v1752_v6  ;;  %v1762_v12 = vld [vmem:[%s1888_s28] sm:$0xff]   ;;  %v1764_v18 = vld [vmem:[%s1888_s28 + $0x8] sm:$0xff]   ;;  %v1766_v20 = vld [vmem:[%s1888_s28 + $0x10] sm:$0xff]   ;;  %s2290_s8 = scalar_lea.vmem %s2488_s7, %s1561_s29 }
  0x11   : > { %1664 = vmatprep.subr.bf16.mxu0 %v1753_v7  ;;  %v1763_v13 = vld [vmem:[%s1896_s10] sm:$0xff]   ;;  %1626 = vmatprep.mubr.bf16.mxu1 %v1762_v12  ;;  %v1765_v19 = vld [vmem:[%s1896_s10 + $0x8] sm:$0xff]   ;;  %v1767_v21 = vld [vmem:[%s1896_s10 + $0x10] sm:$0xff]  }
  0x12   : > { %1674 = vmatprep.mubr.bf16.mxu0 %v1763_v13  ;;  %v1768_v22 = vld [vmem:[%s1888_s28 + $0x18] sm:$0xff]   ;;  %v1770_v24 = vld [vmem:[%s1888_s28 + $0x20] sm:$0xff]   ;;  %v1772_v26 = vld [vmem:[%s1888_s28 + $0x28] sm:$0xff]  }
  0x13   : > { %1617 = vmatpush3.bf16.msra.mxu1 %v1752_v6  ;;  %v1769_v23 = vld [vmem:[%s1896_s10 + $0x18] sm:$0xff]   ;;  %v1771_v25 = vld [vmem:[%s1896_s10 + $0x20] sm:$0xff]   ;;  %v1773_v27 = vld [vmem:[%s1896_s10 + $0x28] sm:$0xff]  }
  0x14   : > { %1665 = vmatpush3.bf16.msra.mxu0 %v1753_v7  ;;  %1618 = vmatprep.subr.bf16.mxu1 %v1754_v8  ;;  %v1774_v28 = vld [vmem:[%s1888_s28 + $0x30] sm:$0xff]   ;;  %v1776_v30 = vld [vmem:[%s1888_s28 + $0x38] sm:$0xff]   ;;  %v1778_v32 = vld [vmem:[%s1888_s28 + $0x40] sm:$0xff]  }
  0x15   : > { %1666 = vmatprep.subr.bf16.mxu0 %v1755_v9  ;;  %v1775_v29 = vld [vmem:[%s1896_s10 + $0x30] sm:$0xff]   ;;  %v1777_v31 = vld [vmem:[%s1896_s10 + $0x38] sm:$0xff]   ;;  %v1779_v33 = vld [vmem:[%s1896_s10 + $0x40] sm:$0xff]  }
  0x16   : > { %v1780_v34 = vld [vmem:[%s1888_s28 + $0x48] sm:$0xff]   ;;  %v1782_v36 = vld [vmem:[%s1888_s28 + $0x50] sm:$0xff]   ;;  %v1784_v38 = vld [vmem:[%s1888_s28 + $0x58] sm:$0xff]  }
  0x17   : > { %1619 = vmatpush3.bf16.msra.mxu1 %v1754_v8  ;;  %v1781_v35 = vld [vmem:[%s1896_s10 + $0x48] sm:$0xff]   ;;  %v1783_v37 = vld [vmem:[%s1896_s10 + $0x50] sm:$0xff]   ;;  %v1785_v39 = vld [vmem:[%s1896_s10 + $0x58] sm:$0xff]  }
  0x18   : > { %1667 = vmatpush3.bf16.msra.mxu0 %v1755_v9  ;;  %1620 = vmatprep.subr.bf16.mxu1 %v1756_v10  ;;  %v1786_v40 = vld [vmem:[%s1888_s28 + $0x60] sm:$0xff]   ;;  %v1788_v42 = vld [vmem:[%s1888_s28 + $0x68] sm:$0xff]   ;;  %v1790_v44 = vld [vmem:[%s1888_s28 + $0x70] sm:$0xff]  }
  0x19   : > { %1668 = vmatprep.subr.bf16.mxu0 %v1757_v11  ;;  %v1787_v41 = vld [vmem:[%s1896_s10 + $0x60] sm:$0xff]   ;;  %v1789_v43 = vld [vmem:[%s1896_s10 + $0x68] sm:$0xff]   ;;  %v1791_v45 = vld [vmem:[%s1896_s10 + $0x70] sm:$0xff]  }
  0x1a   : > { %v1792_v46 = vld [vmem:[%s1888_s28 + $0x78] sm:$0xff]  }
  0x1b   : > { %1621 = vmatpush3.bf16.msra.mxu1 %v1756_v10  ;;  %v1793_v47 = vld [vmem:[%s1896_s10 + $0x78] sm:$0xff]  }
  0x1c   : > { %1669 = vmatpush3.bf16.msra.mxu0 %v1757_v11  ;;  %1622 = vmatprep.subr.bf16.mxu1 %v1758_v14 }
  0x1d   : > { %1670 = vmatprep.subr.bf16.mxu0 %v1759_v15 }
  0x1f   : > { %1623 = vmatpush3.bf16.msra.mxu1 %v1758_v14 }
  0x20   : > { %1671 = vmatpush3.bf16.msra.mxu0 %v1759_v15  ;;  %1624 = vmatprep.subr.bf16.mxu1 %v1760_v16 }
  0x21   : > { %1672 = vmatprep.subr.bf16.mxu0 %v1761_v17 }
  0x23   : > { %1625 = vmatpush3.bf16.msra.mxu1 %v1760_v16 }
  0x24   : > { %1673 = vmatpush3.bf16.msra.mxu0 %v1761_v17 }
  0x26   : > { %1627 = vmatmul.mubr.bf16.vlgmr.msra.gmra.mrb[0].mxu1 %v1764_v18 }
  0x27   : > { %1675 = vmatmul.mubr.bf16.vlgmr.msra.gmra.mrb[0].mxu0 %v1765_v19  ;;  %1630 = vmatprep.mubr.bf16.mxu1 %v1766_v20 }
  0x28   : > { %1678 = vmatprep.mubr.bf16.mxu0 %v1767_v21 }
  0x2e   : > { %1631 = vmatmul.mubr.bf16.gmra.mrb[4].mxu1 %v1768_v22 }
  0x2f   : > { %1679 = vmatmul.mubr.bf16.gmra.mrb[4].mxu0 %v1769_v23  ;;  %1634 = vmatprep.mubr.bf16.mxu1 %v1770_v24 }
  0x30   : > { %1682 = vmatprep.mubr.bf16.mxu0 %v1771_v25 }
  0x36   : > { %1635 = vmatmul.mubr.bf16.gmra.mrb[8].mxu1 %v1772_v26 }
  0x37   : > { %1683 = vmatmul.mubr.bf16.gmra.mrb[8].mxu0 %v1773_v27  ;;  %1638 = vmatprep.mubr.bf16.mxu1 %v1774_v28 }
  0x38   : > { %1686 = vmatprep.mubr.bf16.mxu0 %v1775_v29 }
  0x3e   : > { %1639 = vmatmul.mubr.bf16.gmra.mrb[12].mxu1 %v1776_v30 }
  0x3f   : > { %1687 = vmatmul.mubr.bf16.gmra.mrb[12].mxu0 %v1777_v31  ;;  %1642 = vmatprep.mubr.bf16.mxu1 %v1778_v32 }
  0x40   : > { %1690 = vmatprep.mubr.bf16.mxu0 %v1779_v33 }
  0x46   : > { %1643 = vmatmul.mubr.bf16.gmra.mrb[16].mxu1 %v1780_v34 }
  0x47   : > { %1691 = vmatmul.mubr.bf16.gmra.mrb[16].mxu0 %v1781_v35  ;;  %1646 = vmatprep.mubr.bf16.mxu1 %v1782_v36 }
  0x48   : > { %1694 = vmatprep.mubr.bf16.mxu0 %v1783_v37 }
  0x4e   : > { %1647 = vmatmul.mubr.bf16.gmra.mrb[20].mxu1 %v1784_v38 }
  0x4f   : > { %1695 = vmatmul.mubr.bf16.gmra.mrb[20].mxu0 %v1785_v39  ;;  %1650 = vmatprep.mubr.bf16.mxu1 %v1786_v40 }
  0x50   : > { %1698 = vmatprep.mubr.bf16.mxu0 %v1787_v41 }
  0x56   : > { %1651 = vmatmul.mubr.bf16.gmra.mrb[24].mxu1 %v1788_v42 }
  0x57   : > { %1699 = vmatmul.mubr.bf16.gmra.mrb[24].mxu0 %v1789_v43  ;;  %1654 = vmatprep.mubr.bf16.mxu1 %v1790_v44 }
  0x58   : > { %1702 = vmatprep.mubr.bf16.mxu0 %v1791_v45 }
  0x5e   : > { %1655 = vmatmul.mubr.bf16.gmra.mrb[28].mxu1 %v1792_v46 }
  0x5f   : > { %1703 = vmatmul.mubr.bf16.gmra.mrb[28].mxu0 %v1793_v47 }
  0xf9   : > { %v1628_v48 = vpop.f32.mrb[0].mxu1 }
  0xfa   : > { %v1676_v49 = vpop.f32.mrb[0].mxu0  ;;  %v574_v50 = vpop.f32.mrb[1].mxu1 }
  0xfb   : > { %v888_v51 = vadd.f32 %v1676_v49, %v1628_v48  ;;  %v879_v53 = vpop.f32.mrb[1].mxu0  ;;  %v1629_v54 = vpop.f32.mrb[2].mxu1 }
  0xfc   : > { %v880_v55 = vadd.f32 %v879_v53, %v574_v50  ;;  %v1677_v56 = vpop.f32.mrb[2].mxu0  ;;  %v577_v57 = vpop.f32.mrb[3].mxu1 }
  0xfd   : > { %v891_v58 = vadd.f32 %v1677_v56, %v1629_v54  ;;  %v882_v59 = vpop.f32.mrb[3].mxu0  ;;  %v1954_v62 = vadd.f32 %v1948_v52, %v888_v51 }
  0xfe   : > { %v1951_v60 = vadd.f32 %v1948_v52, %v880_v55  ;;  %v883_v61 = vadd.f32 %v882_v59, %v577_v57 }
  0xff   : > { %v1960_v0 = vadd.f32 %v1948_v52, %v891_v58  ;;  %v1084_v10 = vmul.f32 %v1954_v62, %v1954_v62 }
 0x100   : > { %v1957_v63 = vadd.f32 %v1948_v52, %v883_v61  ;;  %v1082_v2 = vmul.f32 %v1951_v60, %v1951_v60 }
 0x101   : > { %v1632_v1 = vpop.f32.mrb[4].mxu1  ;;  %v1085_v16 = vmul.f32 %v1960_v0, %v1960_v0 }
 0x102   : > { %v1045_v3 = vadd.f32 %v1957_v63, %v1951_v60  ;;  %v1083_v4 = vmul.f32 %v1957_v63, %v1957_v63  ;;  %v1680_v5 = vpop.f32.mrb[4].mxu0  ;;  %v590_v6 = vpop.f32.mrb[5].mxu1 }
 0x103   : > { %v904_v7 = vadd.f32 %v1680_v5, %v1632_v1  ;;  %v895_v8 = vpop.f32.mrb[5].mxu0  ;;  %v1633_v9 = vpop.f32.mrb[6].mxu1 }
 0x104   : > { %v1046_v11 = vadd.f32 %v1045_v3, %v1954_v62  ;;  %v1114_v12 = vadd.f32 %v1083_v4, %v1082_v2  ;;  %v896_v13 = vadd.f32 %v895_v8, %v590_v6  ;;  %v1681_v14 = vpop.f32.mrb[6].mxu0  ;;  %v593_v15 = vpop.f32.mrb[7].mxu1 }
 0x105   : > { %v907_v17 = vadd.f32 %v1681_v14, %v1633_v9  ;;  %v898_v18 = vpop.f32.mrb[7].mxu0  ;;  %v1978_v23 = vadd.f32 %v1948_v52, %v904_v7 }
 0x106   : > { %v1115_v19 = vadd.f32 %v1114_v12, %v1084_v10  ;;  %v1974_v20 = vadd.f32 %v1948_v52, %v896_v13  ;;  %v1047_v21 = vadd.f32 %v1046_v11, %v1960_v0  ;;  %v899_v22 = vadd.f32 %v898_v18, %v593_v15 }
 0x107   : > { %v1987_v28 = vadd.f32 %v1948_v52, %v907_v17  ;;  %v1088_v38 = vmul.f32 %v1978_v23, %v1978_v23 }
 0x108   : > { %v1048_v24 = vadd.f32 %v1047_v21, %v1974_v20  ;;  %v1086_v25 = vmul.f32 %v1974_v20, %v1974_v20  ;;  %v1116_v26 = vadd.f32 %v1115_v19, %v1085_v16  ;;  %v1984_v27 = vadd.f32 %v1948_v52, %v899_v22 }
 0x109   : > { %v1636_v29 = vpop.f32.mrb[8].mxu1  ;;  %v1089_v44 = vmul.f32 %v1987_v28, %v1987_v28 }
 0x10a   : > { %v1117_v30 = vadd.f32 %v1116_v26, %v1086_v25  ;;  %v1049_v31 = vadd.f32 %v1048_v24, %v1984_v27  ;;  %v1087_v32 = vmul.f32 %v1984_v27, %v1984_v27  ;;  %v1684_v33 = vpop.f32.mrb[8].mxu0  ;;  %v606_v34 = vpop.f32.mrb[9].mxu1 }
 0x10b   : > { %v920_v35 = vadd.f32 %v1684_v33, %v1636_v29  ;;  %v911_v36 = vpop.f32.mrb[9].mxu0  ;;  %v1637_v37 = vpop.f32.mrb[10].mxu1 }
 0x10c   : > { %v1050_v39 = vadd.f32 %v1049_v31, %v1978_v23  ;;  %v1118_v40 = vadd.f32 %v1117_v30, %v1087_v32  ;;  %v912_v41 = vadd.f32 %v911_v36, %v606_v34  ;;  %v1685_v42 = vpop.f32.mrb[10].mxu0  ;;  %v609_v43 = vpop.f32.mrb[11].mxu1 }
 0x10d   : > { %v923_v45 = vadd.f32 %v1685_v42, %v1637_v37  ;;  %v914_v46 = vpop.f32.mrb[11].mxu0  ;;  %v2002_v51 = vadd.f32 %v1948_v52, %v920_v35 }
 0x10e   : > { %v1119_v47 = vadd.f32 %v1118_v40, %v1088_v38  ;;  %v1998_v48 = vadd.f32 %v1948_v52, %v912_v41  ;;  %v1051_v49 = vadd.f32 %v1050_v39, %v1987_v28  ;;  %v915_v50 = vadd.f32 %v914_v46, %v609_v43 }
 0x10f   : > { %v2011_v57 = vadd.f32 %v1948_v52, %v923_v45  ;;  %v1092_v7 = vmul.f32 %v2002_v51, %v2002_v51 }
 0x110   : > { %v1052_v53 = vadd.f32 %v1051_v49, %v1998_v48  ;;  %v1090_v54 = vmul.f32 %v1998_v48, %v1998_v48  ;;  %v1120_v55 = vadd.f32 %v1119_v47, %v1089_v44  ;;  %v2008_v56 = vadd.f32 %v1948_v52, %v915_v50 }
 0x111   : > { %v1640_v58 = vpop.f32.mrb[12].mxu1  ;;  %v1093_v13 = vmul.f32 %v2011_v57, %v2011_v57 }
 0x112   : > { %v1121_v59 = vadd.f32 %v1120_v55, %v1090_v54  ;;  %v1053_v61 = vadd.f32 %v1052_v53, %v2008_v56  ;;  %v1091_v1 = vmul.f32 %v2008_v56, %v2008_v56  ;;  %v1688_v2 = vpop.f32.mrb[12].mxu0  ;;  %v622_v3 = vpop.f32.mrb[13].mxu1 }
 0x113   : > { %v936_v4 = vadd.f32 %v1688_v2, %v1640_v58  ;;  %v927_v5 = vpop.f32.mrb[13].mxu0  ;;  %v1641_v6 = vpop.f32.mrb[14].mxu1 }
 0x114   : > { %v1054_v8 = vadd.f32 %v1053_v61, %v2002_v51  ;;  %v1122_v9 = vadd.f32 %v1121_v59, %v1091_v1  ;;  %v928_v10 = vadd.f32 %v927_v5, %v622_v3  ;;  %v1689_v11 = vpop.f32.mrb[14].mxu0  ;;  %v625_v12 = vpop.f32.mrb[15].mxu1 }
 0x115   : > { %v939_v14 = vadd.f32 %v1689_v11, %v1641_v6  ;;  %v930_v15 = vpop.f32.mrb[15].mxu0  ;;  %v2026_v21 = vadd.f32 %v1948_v52, %v936_v4 }
 0x116   : > { %v1123_v16 = vadd.f32 %v1122_v9, %v1092_v7  ;;  %v2022_v17 = vadd.f32 %v1948_v52, %v928_v10  ;;  %v1055_v18 = vadd.f32 %v1054_v8, %v2011_v57  ;;  %v931_v19 = vadd.f32 %v930_v15, %v625_v12 }
 0x117   : > { %v2035_v29 = vadd.f32 %v1948_v52, %v939_v14  ;;  %v1096_v39 = vmul.f32 %v2026_v21, %v2026_v21 }
 0x118   : > { %v1056_v22 = vadd.f32 %v1055_v18, %v2022_v17  ;;  %v1094_v24 = vmul.f32 %v2022_v17, %v2022_v17  ;;  %v1124_v25 = vadd.f32 %v1123_v16, %v1093_v13  ;;  %v2032_v26 = vadd.f32 %v1948_v52, %v931_v19 }
 0x119   : > { %v1644_v30 = vpop.f32.mrb[16].mxu1  ;;  %v1097_v45 = vmul.f32 %v2035_v29, %v2035_v29 }
 0x11a   : > { %v1125_v31 = vadd.f32 %v1124_v25, %v1094_v24  ;;  %v1057_v32 = vadd.f32 %v1056_v22, %v2032_v26  ;;  %v1095_v33 = vmul.f32 %v2032_v26, %v2032_v26  ;;  %v1692_v34 = vpop.f32.mrb[16].mxu0  ;;  %v638_v35 = vpop.f32.mrb[17].mxu1 }
 0x11b   : > { %v952_v36 = vadd.f32 %v1692_v34, %v1644_v30  ;;  %v943_v37 = vpop.f32.mrb[17].mxu0  ;;  %v1645_v38 = vpop.f32.mrb[18].mxu1 }
 0x11c   : > { %v1058_v40 = vadd.f32 %v1057_v32, %v2026_v21  ;;  %v1126_v41 = vadd.f32 %v1125_v31, %v1095_v33  ;;  %v944_v42 = vadd.f32 %v943_v37, %v638_v35  ;;  %v1693_v43 = vpop.f32.mrb[18].mxu0  ;;  %v641_v44 = vpop.f32.mrb[19].mxu1 }
 0x11d   : > { %v955_v46 = vadd.f32 %v1693_v43, %v1645_v38  ;;  %v946_v47 = vpop.f32.mrb[19].mxu0  ;;  %v2050_v55 = vadd.f32 %v1948_v52, %v952_v36 }
 0x11e   : > { %v1127_v49 = vadd.f32 %v1126_v41, %v1096_v39  ;;  %v2046_v50 = vadd.f32 %v1948_v52, %v944_v42  ;;  %v1059_v53 = vadd.f32 %v1058_v40, %v2035_v29  ;;  %v947_v54 = vadd.f32 %v946_v47, %v641_v44 }
 0x11f   : > { %v2059_v2 = vadd.f32 %v1948_v52, %v955_v46  ;;  %v1100_v12 = vmul.f32 %v2050_v55, %v2050_v55 }
 0x120   : > { %v1060_v58 = vadd.f32 %v1059_v53, %v2046_v50  ;;  %v1098_v59 = vmul.f32 %v2046_v50, %v2046_v50  ;;  %v1128_v61 = vadd.f32 %v1127_v49, %v1097_v45  ;;  %v2056_v1 = vadd.f32 %v1948_v52, %v947_v54 }
 0x121   : > { %v1648_v3 = vpop.f32.mrb[20].mxu1  ;;  %v1101_v19 = vmul.f32 %v2059_v2, %v2059_v2 }
 0x122   : > { %v1129_v4 = vadd.f32 %v1128_v61, %v1098_v59  ;;  %v1061_v5 = vadd.f32 %v1060_v58, %v2056_v1  ;;  %v1099_v6 = vmul.f32 %v2056_v1, %v2056_v1  ;;  %v1696_v7 = vpop.f32.mrb[20].mxu0  ;;  %v654_v8 = vpop.f32.mrb[21].mxu1 }
 0x123   : > { %v968_v9 = vadd.f32 %v1696_v7, %v1648_v3  ;;  %v959_v10 = vpop.f32.mrb[21].mxu0  ;;  %v1649_v11 = vpop.f32.mrb[22].mxu1 }
 0x124   : > { %v1062_v13 = vadd.f32 %v1061_v5, %v2050_v55  ;;  %v1130_v14 = vadd.f32 %v1129_v4, %v1099_v6  ;;  %v960_v15 = vadd.f32 %v959_v10, %v654_v8  ;;  %v1697_v16 = vpop.f32.mrb[22].mxu0  ;;  %v657_v18 = vpop.f32.mrb[23].mxu1 }
 0x125   : > { %v971_v22 = vadd.f32 %v1697_v16, %v1649_v11  ;;  %v962_v24 = vpop.f32.mrb[23].mxu0  ;;  %v2074_v33 = vadd.f32 %v1948_v52, %v968_v9 }
 0x126   : > { %v1131_v25 = vadd.f32 %v1130_v14, %v1100_v12  ;;  %v2070_v30 = vadd.f32 %v1948_v52, %v960_v15  ;;  %v1063_v31 = vadd.f32 %v1062_v13, %v2059_v2  ;;  %v963_v32 = vadd.f32 %v962_v24, %v657_v18 }
 0x127   : > { %v2083_v38 = vadd.f32 %v1948_v52, %v971_v22  ;;  %v1104_v49 = vmul.f32 %v2074_v33, %v2074_v33 }
 0x128   : > { %v1064_v34 = vadd.f32 %v1063_v31, %v2070_v30  ;;  %v1102_v35 = vmul.f32 %v2070_v30, %v2070_v30  ;;  %v1132_v36 = vadd.f32 %v1131_v25, %v1101_v19  ;;  %v2080_v37 = vadd.f32 %v1948_v52, %v963_v32 }
 0x129   : > { %v1652_v39 = vpop.f32.mrb[24].mxu1  ;;  %v1105_v3 = vmul.f32 %v2083_v38, %v2083_v38 }
 0x12a   : > { %v1133_v40 = vadd.f32 %v1132_v36, %v1102_v35  ;;  %v1065_v41 = vadd.f32 %v1064_v34, %v2080_v37  ;;  %v1103_v42 = vmul.f32 %v2080_v37, %v2080_v37  ;;  %v1700_v43 = vpop.f32.mrb[24].mxu0  ;;  %v670_v44 = vpop.f32.mrb[25].mxu1 }
 0x12b   : > { %v984_v45 = vadd.f32 %v1700_v43, %v1652_v39  ;;  %v975_v46 = vpop.f32.mrb[25].mxu0  ;;  %v1653_v47 = vpop.f32.mrb[26].mxu1 }
 0x12c   : > { %v1066_v53 = vadd.f32 %v1065_v41, %v2074_v33  ;;  %v1134_v54 = vadd.f32 %v1133_v40, %v1103_v42  ;;  %v976_v58 = vadd.f32 %v975_v46, %v670_v44  ;;  %v1701_v59 = vpop.f32.mrb[26].mxu0  ;;  %v673_v61 = vpop.f32.mrb[27].mxu1 }
 0x12d   : > { %v987_v4 = vadd.f32 %v1701_v59, %v1653_v47  ;;  %v978_v5 = vpop.f32.mrb[27].mxu0  ;;  %v2098_v10 = vadd.f32 %v1948_v52, %v984_v45 }
 0x12e   : > { %v1135_v6 = vadd.f32 %v1134_v54, %v1104_v49  ;;  %v2094_v7 = vadd.f32 %v1948_v52, %v976_v58  ;;  %v1067_v8 = vadd.f32 %v1066_v53, %v2083_v38  ;;  %v979_v9 = vadd.f32 %v978_v5, %v673_v61 }
 0x12f   : > { %v2107_v15 = vadd.f32 %v1948_v52, %v987_v4  ;;  %v1108_v35 = vmul.f32 %v2098_v10, %v2098_v10 }
 0x130   : > { %v1068_v11 = vadd.f32 %v1067_v8, %v2094_v7  ;;  %v1106_v12 = vmul.f32 %v2094_v7, %v2094_v7  ;;  %v1136_v13 = vadd.f32 %v1135_v6, %v1105_v3  ;;  %v2104_v14 = vadd.f32 %v1948_v52, %v979_v9 }
 0x131   : > { %v1656_v16 = vpop.f32.mrb[28].mxu1  ;;  %v1109_v43 = vmul.f32 %v2107_v15, %v2107_v15 }
 0x132   : > { %v1137_v18 = vadd.f32 %v1136_v13, %v1106_v12  ;;  %v1069_v19 = vadd.f32 %v1068_v11, %v2104_v14  ;;  %v1107_v22 = vmul.f32 %v2104_v14, %v2104_v14  ;;  %v1704_v24 = vpop.f32.mrb[28].mxu0  ;;  %v686_v25 = vpop.f32.mrb[29].mxu1 }
 0x133   : > { %v1000_v31 = vadd.f32 %v1704_v24, %v1656_v16  ;;  %v991_v32 = vpop.f32.mrb[29].mxu0  ;;  %v1657_v34 = vpop.f32.mrb[30].mxu1 }
 0x134   : > { %v1070_v36 = vadd.f32 %v1069_v19, %v2098_v10  ;;  %v1138_v39 = vadd.f32 %v1137_v18, %v1107_v22  ;;  %v992_v40 = vadd.f32 %v991_v32, %v686_v25  ;;  %v1705_v41 = vpop.f32.mrb[30].mxu0  ;;  %v689_v42 = vpop.f32.mrb[31].mxu1 }
 0x135   : > { %v1003_v44 = vadd.f32 %v1705_v41, %v1657_v34  ;;  %v994_v45 = vpop.f32.mrb[31].mxu0  ;;  %v2122_v54 = vadd.f32 %v1948_v52, %v1000_v31 }
 0x136   : > { %v1139_v46 = vadd.f32 %v1138_v39, %v1108_v35  ;;  %v2118_v47 = vadd.f32 %v1948_v52, %v992_v40  ;;  %v1071_v49 = vadd.f32 %v1070_v36, %v2107_v15  ;;  %v995_v53 = vadd.f32 %v994_v45, %v689_v42 }
 0x137   : > { %v2131_v5 = vadd.f32 %v1948_v52, %v1003_v44  ;;  %v1112_v9 = vmul.f32 %v2122_v54, %v2122_v54 }
 0x138   : > { %v1072_v58 = vadd.f32 %v1071_v49, %v2118_v47  ;;  %v1110_v59 = vmul.f32 %v2118_v47, %v2118_v47  ;;  %v1140_v61 = vadd.f32 %v1139_v46, %v1109_v43  ;;  %v2128_v3 = vadd.f32 %v1948_v52, %v995_v53 }
 0x139   : > { %v1113_v13 = vmul.f32 %v2131_v5, %v2131_v5 }
 0x13a   : > { %v1141_v4 = vadd.f32 %v1140_v61, %v1110_v59  ;;  %v1073_v6 = vadd.f32 %v1072_v58, %v2128_v3  ;;  %v1111_v8 = vmul.f32 %v2128_v3, %v2128_v3 }
 0x13c   : > { %v1074_v11 = vadd.f32 %v1073_v6, %v2122_v54  ;;  %v1142_v12 = vadd.f32 %v1141_v4, %v1111_v8 }
 0x13e   : > { %v1075_v16 = vadd.f32 %v1074_v11, %v2131_v5  ;;  %v1143_v18 = vadd.f32 %v1142_v12, %v1112_v9 }
 0x140   : > { %v1076_v19 = vrot.slane %v1075_v16, 4  ;;  %v1144_v52 = vadd.f32 %v1143_v18, %v1113_v13 }
 0x142   : > { %v1077_v22 = vadd.f32 %v1076_v19, %v1075_v16  ;;  %v1145_v24 = vrot.slane %v1144_v52, 4 }
 0x144   : > { %v1078_v25 = vrot.slane %v1077_v22, 2  ;;  %v1146_v31 = vadd.f32 %v1145_v24, %v1144_v52 }
 0x146   : > { %v1079_v32 = vadd.f32 %v1078_v25, %v1077_v22  ;;  %v1147_v34 = vrot.slane %v1146_v31, 2 }
 0x148   : > { %v1080_v35 = vrot.slane %v1079_v32, 1  ;;  %v1148_v36 = vadd.f32 %v1147_v34, %v1146_v31 }
 0x14a   : > { %v1081_v39 = vadd.f32 %v1080_v35, %v1079_v32  ;;  %v1149_v40 = vrot.slane %v1148_v36, 1 }
 0x14c   : > { %v1150_v41 = vadd.f32 %v1149_v40, %v1148_v36  ;;  %v2142_v42 = vmul.f32 0.00390625, %v1081_v39 }
 0x14e   : > { %v1152_v43 = vmul.f32 0.00390625, %v1150_v41  ;;  %v1153_v44 = vmul.f32 %v2142_v42, %v2142_v42  ;;  %v1164_v46 = vsub.f32 %v1998_v48, %v2142_v42  ;;  %v1165_v49 = vsub.f32 %v2008_v56, %v2142_v42 }
 0x14f   : > { %v1167_v53 = vsub.f32 %v2011_v57, %v2142_v42  ;;  %v1168_v58 = vsub.f32 %v2022_v17, %v2142_v42  ;;  %v1169_v61 = vsub.f32 %v2032_v26, %v2142_v42  ;;  %v1170_v4 = vsub.f32 %v2026_v21, %v2142_v42 }
 0x150   : > { %v1154_v45 = vsub.f32 %v1152_v43, %v1153_v44  ;;  %v1171_v6 = vsub.f32 %v2035_v29, %v2142_v42  ;;  %v1172_v48 = vsub.f32 %v2046_v50, %v2142_v42  ;;  %v1173_v56 = vsub.f32 %v2056_v1, %v2142_v42 }
 0x151   : > { %v1174_v57 = vsub.f32 %v2050_v55, %v2142_v42  ;;  %v1175_v17 = vsub.f32 %v2059_v2, %v2142_v42  ;;  %v1176_v26 = vsub.f32 %v2070_v30, %v2142_v42  ;;  %v1177_v21 = vsub.f32 %v2080_v37, %v2142_v42 }
 0x152   : > { %v1155_v59 = vmax.f32 %v1154_v45, 0.0  ;;  %v1178_v29 = vsub.f32 %v2074_v33, %v2142_v42  ;;  %v1179_v50 = vsub.f32 %v2083_v38, %v2142_v42  ;;  %v1180_v1 = vsub.f32 %v2094_v7, %v2142_v42 }
 0x153   : > { %v1181_v55 = vsub.f32 %v2104_v14, %v2142_v42  ;;  %v1182_v2 = vsub.f32 %v2098_v10, %v2142_v42  ;;  %v1183_v30 = vsub.f32 %v2107_v15, %v2142_v42  ;;  %v1184_v37 = vsub.f32 %v2118_v47, %v2142_v42 }
 0x154   : > { %v1185_v33 = vsub.f32 %v2128_v3, %v2142_v42  ;;  %v1186_v38 = vsub.f32 %v2122_v54, %v2142_v42  ;;  %v1187_v7 = vsub.f32 %v2131_v5, %v2142_v42  ;;  %v1188_v8 = vadd.f32 1e-05, %v1155_v59 }
 0x155   : > { %v1156_v10 = vsub.f32 %v1951_v60, %v2142_v42  ;;  %v1157_v14 = vsub.f32 %v1957_v63, %v2142_v42  ;;  %v1158_v15 = vsub.f32 %v1954_v62, %v2142_v42  ;;  %v1159_v47 = vsub.f32 %v1960_v0, %v2142_v42 }
 0x156   : > { %1794 = vrsqrt.f32 %v1188_v8  ;;  %v1160_v54 = vsub.f32 %v1974_v20, %v2142_v42  ;;  %v1161_v5 = vsub.f32 %v1984_v27, %v2142_v42  ;;  %v1162_v9 = vsub.f32 %v1978_v23, %v2142_v42 }
 0x157   : > { %v1163_v60 = vsub.f32 %v1987_v28, %v2142_v42  ;;  %v1166_v63 = vsub.f32 %v2002_v51, %v2142_v42 }
 0x160   : > { %v1795_v3 = vpop.eup %1794 }
 0x161   : > { %v1190_v62 = vmul.f32 %v1795_v3, %v1156_v10  ;;  %v1191_v11 = vmul.f32 %v1795_v3, %v1157_v14  ;;  %v1192_v12 = vmul.f32 %v1795_v3, %v1158_v15  ;;  %v1193_v0 = vmul.f32 %v1795_v3, %v1159_v47  ;;  %v1556_v47 = vld [vmem:[%s2487_s6] ss:$0 sm:$0xff] }
 0x162   : > { %v1194_v13 = vmul.f32 %v1795_v3, %v1160_v54  ;;  %v1195_v16 = vmul.f32 %v1795_v3, %v1161_v5  ;;  %v1196_v20 = vmul.f32 %v1795_v3, %v1162_v9  ;;  %v1197_v18 = vmul.f32 %v1795_v3, %v1163_v60 }
 0x163   : > { %v1198_v19 = vmul.f32 %v1795_v3, %v1164_v46  ;;  %v1199_v52 = vmul.f32 %v1795_v3, %v1165_v49  ;;  %v1200_v27 = vmul.f32 %v1795_v3, %v1166_v63  ;;  %v1201_v22 = vmul.f32 %v1795_v3, %v1167_v53 }
 0x164   : > { %v1202_v24 = vmul.f32 %v1795_v3, %v1168_v58  ;;  %v1203_v23 = vmul.f32 %v1795_v3, %v1169_v61  ;;  %v1204_v25 = vmul.f32 %v1795_v3, %v1170_v4  ;;  %v1205_v31 = vmul.f32 %v1795_v3, %v1171_v6  ;;  %v1555_v58 = vld [vmem:[%s2486_s5] ss:$0 sm:$0xff] }
 0x165   : > { %v1206_v28 = vmul.f32 %v1795_v3, %v1172_v48  ;;  %v1207_v32 = vmul.f32 %v1795_v3, %v1173_v56  ;;  %v1208_v34 = vmul.f32 %v1795_v3, %v1174_v57  ;;  %v1209_v51 = vmul.f32 %v1795_v3, %v1175_v17 }
 0x166   : > { %v1210_v35 = vmul.f32 %v1795_v3, %v1176_v26  ;;  %v1211_v36 = vmul.f32 %v1795_v3, %v1177_v21  ;;  %v1212_v39 = vmul.f32 %v1795_v3, %v1178_v29  ;;  %v1213_v40 = vmul.f32 %v1795_v3, %v1179_v50 }
 0x167   : > { %v1214_v41 = vmul.f32 %v1795_v3, %v1180_v1  ;;  %v1215_v42 = vmul.f32 %v1795_v3, %v1181_v55  ;;  %v1216_v43 = vmul.f32 %v1795_v3, %v1182_v2  ;;  %v1217_v44 = vmul.f32 %v1795_v3, %v1183_v30 }
 0x168   : > { %v1218_v45 = vmul.f32 %v1795_v3, %v1184_v37  ;;  %v1219_v46 = vmul.f32 %v1795_v3, %v1185_v33  ;;  %v1220_v49 = vmul.f32 %v1795_v3, %v1186_v38  ;;  %v1221_v53 = vmul.f32 %v1795_v3, %v1187_v7 }
 0x169   : > { %v1229_v59 = vmul.f32 %v1555_v58, %v1190_v62  ;;  %v1230_v61 = vmul.f32 %v1555_v58, %v1191_v11  ;;  %v1231_v4 = vmul.f32 %v1555_v58, %v1192_v12  ;;  %v1232_v6 = vmul.f32 %v1555_v58, %v1193_v0 }
 0x16a   : > { %v1233_v48 = vmul.f32 %v1555_v58, %v1194_v13  ;;  %v1234_v56 = vmul.f32 %v1555_v58, %v1195_v16  ;;  %v1235_v57 = vmul.f32 %v1555_v58, %v1196_v20  ;;  %v1236_v17 = vmul.f32 %v1555_v58, %v1197_v18 }
 0x16b   : > { %v1237_v26 = vmul.f32 %v1555_v58, %v1198_v19  ;;  %v1238_v21 = vmul.f32 %v1555_v58, %v1199_v52  ;;  %v1239_v29 = vmul.f32 %v1555_v58, %v1200_v27  ;;  %v1240_v50 = vmul.f32 %v1555_v58, %v1201_v22 }
 0x16c   : > { %v1241_v1 = vmul.f32 %v1555_v58, %v1202_v24  ;;  %v1242_v55 = vmul.f32 %v1555_v58, %v1203_v23  ;;  %v1243_v2 = vmul.f32 %v1555_v58, %v1204_v25  ;;  %v1244_v30 = vmul.f32 %v1555_v58, %v1205_v31 }
 0x16d   : > { %v1245_v37 = vmul.f32 %v1555_v58, %v1206_v28  ;;  %v1246_v33 = vmul.f32 %v1555_v58, %v1207_v32  ;;  %v1247_v38 = vmul.f32 %v1555_v58, %v1208_v34  ;;  %v1248_v7 = vmul.f32 %v1555_v58, %v1209_v51 }
 0x16e   : > { %v1249_v8 = vmul.f32 %v1555_v58, %v1210_v35  ;;  %v1250_v10 = vmul.f32 %v1555_v58, %v1211_v36  ;;  %v1251_v14 = vmul.f32 %v1555_v58, %v1212_v39  ;;  %v1252_v15 = vmul.f32 %v1555_v58, %v1213_v40 }
 0x16f   : > { %v1253_v54 = vmul.f32 %v1555_v58, %v1214_v41  ;;  %v1254_v3 = vmul.f32 %v1555_v58, %v1215_v42  ;;  %v1255_v5 = vmul.f32 %v1555_v58, %v1216_v43  ;;  %v1256_v9 = vmul.f32 %v1555_v58, %v1217_v44 }
 0x170   : > { %v1257_v60 = vmul.f32 %v1555_v58, %v1218_v45  ;;  %v1258_v63 = vmul.f32 %v1555_v58, %v1219_v46  ;;  %v1259_v62 = vmul.f32 %v1555_v58, %v1220_v49  ;;  %v1260_v11 = vmul.f32 %v1555_v58, %v1221_v53 }
 0x171   : > { %v2216_v12 = vadd.f32 %v1556_v47, %v1229_v59  ;;  %v2218_v0 = vadd.f32 %v1556_v47, %v1230_v61  ;;  %v2220_v13 = vadd.f32 %v1556_v47, %v1231_v4  ;;  %v2222_v16 = vadd.f32 %v1556_v47, %v1232_v6 }
 0x172   : > { %v2224_v20 = vadd.f32 %v1556_v47, %v1233_v48  ;;  %v2226_v18 = vadd.f32 %v1556_v47, %v1234_v56  ;;  %v2228_v19 = vadd.f32 %v1556_v47, %v1235_v57  ;;  %v2230_v52 = vadd.f32 %v1556_v47, %v1236_v17 }
 0x173   : > { %v2232_v27 = vadd.f32 %v1556_v47, %v1237_v26  ;;  %v2234_v22 = vadd.f32 %v1556_v47, %v1238_v21  ;;  %v2236_v24 = vadd.f32 %v1556_v47, %v1239_v29  ;;  %v2238_v23 = vadd.f32 %v1556_v47, %v1240_v50 }
 0x174   : > { %v2240_v25 = vadd.f32 %v1556_v47, %v1241_v1  ;;  %v2242_v31 = vadd.f32 %v1556_v47, %v1242_v55  ;;  %v2244_v28 = vadd.f32 %v1556_v47, %v1243_v2  ;;  %v2246_v32 = vadd.f32 %v1556_v47, %v1244_v30 }
 0x175   : > { %v2248_v34 = vadd.f32 %v1556_v47, %v1245_v37  ;;  %v2250_v51 = vadd.f32 %v1556_v47, %v1246_v33  ;;  %v2252_v35 = vadd.f32 %v1556_v47, %v1247_v38  ;;  %v2254_v36 = vadd.f32 %v1556_v47, %v1248_v7 }
 0x176   : > { %v2256_v39 = vadd.f32 %v1556_v47, %v1249_v8  ;;  %v2258_v40 = vadd.f32 %v1556_v47, %v1250_v10  ;;  %v2260_v41 = vadd.f32 %v1556_v47, %v1251_v14  ;;  %v2262_v42 = vadd.f32 %v1556_v47, %v1252_v15 }
 0x177   : > { %v2264_v43 = vadd.f32 %v1556_v47, %v1253_v54  ;;  %v2266_v44 = vadd.f32 %v1556_v47, %v1254_v3  ;;  %v2268_v45 = vadd.f32 %v1556_v47, %v1255_v5  ;;  %v2270_v46 = vadd.f32 %v1556_v47, %v1256_v9 }
 0x178   : > { %v2273_v49 = vadd.f32 %v1556_v47, %v1257_v60  ;;  %v2275_v53 = vadd.f32 %v1556_v47, %v1258_v63  ;;  %vm1300_vm0 = vcmp.ge.f32.partialorder %v2216_v12, 0.0  ;;  %vm1301_vm1 = vcmp.ge.f32.partialorder %v2218_v0, 0.0 }
 0x179   : > { %vm1302_vm2 = vcmp.ge.f32.partialorder %v2220_v13, 0.0  ;;  %vm1303_vm3 = vcmp.ge.f32.partialorder %v2222_v16, 0.0  ;;  %vm1304_vm4 = vcmp.ge.f32.partialorder %v2224_v20, 0.0  ;;  %vm1305_vm5 = vcmp.ge.f32.partialorder %v2226_v18, 0.0 }
 0x17a   : > { %vm1306_vm6 = vcmp.ge.f32.partialorder %v2228_v19, 0.0  ;;  %vm1307_vm7 = vcmp.ge.f32.partialorder %v2230_v52, 0.0  ;;  %vm1308_vm8 = vcmp.ge.f32.partialorder %v2232_v27, 0.0  ;;  %v2292_v58 = vadd.f32 %v1556_v47, %v1259_v62 }
 0x17b   : > { %v1332_v59 = vmul.f32 0.01, %v2216_v12  ;;  %v1333_v61 = vmul.f32 0.01, %v2218_v0  ;;  %v1334_v4 = vmul.f32 0.01, %v2220_v13  ;;  %v2301_v6 = vadd.f32 %v1556_v47, %v1260_v11 }
 0x17c   : > { %vm1315_vm15 = vcmp.ge.f32.partialorder %v2246_v32, 0.0  ;;  %vm1316_vm10 = vcmp.ge.f32.partialorder %v2248_v34, 0.0  ;;  %v1335_v48 = vmul.f32 0.01, %v2222_v16  ;;  %v1336_v56 = vmul.f32 0.01, %v2224_v20 }
 0x17d   : > { %v1337_v57 = vmul.f32 0.01, %v2226_v18  ;;  %vm1321_vm14 = vcmp.ge.f32.partialorder %v2258_v40, 0.0  ;;  %v1338_v17 = vmul.f32 0.01, %v2228_v19  ;;  %v1364_v29 = vsel %vm1300_vm0, %v2216_v12, %v1332_v59 }
 0x17e   : > { %v1339_v26 = vmul.f32 0.01, %v2230_v52  ;;  %v1340_v21 = vmul.f32 0.01, %v2232_v27  ;;  %vm1322_vm11 = vcmp.ge.f32.partialorder %v2260_v41, 0.0  ;;  %v1365_v2 = vsel %vm1301_vm1, %v2218_v0, %v1333_v61  ;;  %1396 = vst [vmem:[%s2290_s8] sm:$0xff] %v1364_v29 }
 0x17f   : > { %v1341_v50 = vmul.f32 0.01, %v2234_v22  ;;  %v1342_v1 = vmul.f32 0.01, %v2236_v24  ;;  %v1343_v55 = vmul.f32 0.01, %v2238_v23  ;;  %v1366_v38 = vsel %vm1302_vm2, %v2220_v13, %v1334_v4 }
 0x180   : > { %vm1326_vm0 = vcmp.ge.f32.partialorder %v2268_v45, 0.0  ;;  %vm1328_vm12 = vcmp.ge.f32.partialorder %v2273_v49, 0.0  ;;  %vm1329_vm9 = vcmp.ge.f32.partialorder %v2275_v53, 0.0  ;;  %v1344_v30 = vmul.f32 0.01, %v2240_v25  ;;  %1397 = vst [vmem:[%s2290_s8 + $0x8] sm:$0xff] %v1365_v2 }
 0x181   : > { %v1345_v37 = vmul.f32 0.01, %v2242_v31  ;;  %v1346_v33 = vmul.f32 0.01, %v2244_v28  ;;  %vm1330_vm1 = vcmp.ge.f32.partialorder %v2292_v58, 0.0  ;;  %vm1331_vm13 = vcmp.ge.f32.partialorder %v2301_v6, 0.0 }
 0x182   : > { %v1347_v7 = vmul.f32 0.01, %v2246_v32  ;;  %v1348_v8 = vmul.f32 0.01, %v2248_v34  ;;  %v1349_v10 = vmul.f32 0.01, %v2250_v51  ;;  %v1367_v14 = vsel %vm1303_vm3, %v2222_v16, %v1335_v48 }
 0x183   : > { %1398 = vst [vmem:[%s2290_s8 + $0x10] sm:$0xff] %v1366_v38  ;;  %v1350_v15 = vmul.f32 0.01, %v2252_v35  ;;  %v1351_v47 = vmul.f32 0.01, %v2254_v36  ;;  %v1368_v3 = vsel %vm1304_vm4, %v2224_v20, %v1336_v56  ;;  %1399 = vst [vmem:[%s2290_s8 + $0x18] sm:$0xff] %v1367_v14  ;;  %v1369_v63 = vsel %vm1305_vm5, %v2226_v18, %v1337_v57 }
 0x184   : > { %v1352_v54 = vmul.f32 0.01, %v2256_v39  ;;  %v1353_v5 = vmul.f32 0.01, %v2258_v40  ;;  %v1354_v9 = vmul.f32 0.01, %v2260_v41  ;;  %v1370_v0 = vsel %vm1306_vm6, %v2228_v19, %v1338_v17 }
 0x185   : > { %v1355_v60 = vmul.f32 0.01, %v2262_v42  ;;  %1400 = vst [vmem:[%s2290_s8 + $0x20] sm:$0xff] %v1368_v3  ;;  %v1356_v62 = vmul.f32 0.01, %v2264_v43  ;;  %1401 = vst [vmem:[%s2290_s8 + $0x28] sm:$0xff] %v1369_v63  ;;  %v1371_v18 = vsel %vm1307_vm7, %v2230_v52, %v1339_v26  ;;  %v1372_v61 = vsel %vm1308_vm8, %v2232_v27, %v1340_v21 }
 0x186   : > { %v1357_v11 = vmul.f32 0.01, %v2266_v44  ;;  %v1358_v12 = vmul.f32 0.01, %v2268_v45  ;;  %v1359_v13 = vmul.f32 0.01, %v2270_v46 }
 0x187   : > { %v1360_v16 = vmul.f32 0.01, %v2273_v49  ;;  %v1361_v20 = vmul.f32 0.01, %v2275_v53  ;;  %1402 = vst [vmem:[%s2290_s8 + $0x30] sm:$0xff] %v1370_v0  ;;  %vm2489_vm2 = vcmp.ge.f32.partialorder %v2234_v22, 0.0 }
 0x188   : > { %v1362_v59 = vmul.f32 0.01, %v2292_v58  ;;  %v1363_v19 = vmul.f32 0.01, %v2301_v6  ;;  %v1373_v4 = vsel %vm2489_vm2, %v2234_v22, %v1341_v50  ;;  %1403 = vst [vmem:[%s2290_s8 + $0x38] sm:$0xff] %v1371_v18  ;;  %vm2490_vm3 = vcmp.ge.f32.partialorder %v2236_v24, 0.0 }
 0x189   : > { %v1374_v52 = vsel %vm2490_vm3, %v2236_v24, %v1342_v1  ;;  %vm2491_vm4 = vcmp.ge.f32.partialorder %v2238_v23, 0.0  ;;  %vm2492_vm5 = vcmp.ge.f32.partialorder %v2240_v25, 0.0  ;;  %vm2493_vm6 = vcmp.ge.f32.partialorder %v2242_v31, 0.0  ;;  %1404 = vst [vmem:[%s2290_s8 + $0x40] sm:$0xff] %v1372_v61  ;;  %1405 = vst [vmem:[%s2290_s8 + $0x48] sm:$0xff] %v1373_v4 }
 0x18a   : > { %v1375_v48 = vsel %vm2491_vm4, %v2238_v23, %v1343_v55  ;;  %v1376_v56 = vsel %vm2492_vm5, %v2240_v25, %v1344_v30  ;;  %v1377_v27 = vsel %vm2493_vm6, %v2242_v31, %v1345_v37  ;;  %vm2494_vm7 = vcmp.ge.f32.partialorder %v2244_v28, 0.0  ;;  %1406 = vst [vmem:[%s2290_s8 + $0x50] sm:$0xff] %v1374_v52 }
 0x18b   : > { %v1378_v22 = vsel %vm2494_vm7, %v2244_v28, %v1346_v33  ;;  %v1379_v24 = vsel %vm1315_vm15, %v2246_v32, %v1347_v7  ;;  %v1380_v23 = vsel %vm1316_vm10, %v2248_v34, %v1348_v8  ;;  %vm2495_vm8 = vcmp.ge.f32.partialorder %v2250_v51, 0.0  ;;  %1407 = vst [vmem:[%s2290_s8 + $0x58] sm:$0xff] %v1375_v48  ;;  %1408 = vst [vmem:[%s2290_s8 + $0x60] sm:$0xff] %v1376_v56 }
 0x18c   : > { %v1381_v25 = vsel %vm2495_vm8, %v2250_v51, %v1349_v10  ;;  %1409 = vst [vmem:[%s2290_s8 + $0x68] sm:$0xff] %v1377_v27  ;;  %vm2496_vm2 = vcmp.ge.f32.partialorder %v2252_v35, 0.0  ;;  %vm2497_vm15 = vcmp.ge.f32.partialorder %v2254_v36, 0.0  ;;  %vm2498_vm10 = vcmp.ge.f32.partialorder %v2256_v39, 0.0  ;;  %1410 = vst [vmem:[%s2290_s8 + $0x70] sm:$0xff] %v1378_v22 }
 0x18d   : > { %v1382_v31 = vsel %vm2496_vm2, %v2252_v35, %v1350_v15  ;;  %v1383_v28 = vsel %vm2497_vm15, %v2254_v36, %v1351_v47  ;;  %v1384_v32 = vsel %vm2498_vm10, %v2256_v39, %v1352_v54  ;;  %v1385_v34 = vsel %vm1321_vm14, %v2258_v40, %v1353_v5  ;;  %1411 = vst [vmem:[%s2290_s8 + $0x78] sm:$0xff] %v1379_v24 }
 0x18e   : > { %1412 = vst [vmem:[%s2290_s8 + $0x80] sm:$0xff] %v1380_v23  ;;  %1413 = vst [vmem:[%s2290_s8 + $0x88] sm:$0xff] %v1381_v25  ;;  %v1386_v51 = vsel %vm1322_vm11, %v2260_v41, %v1354_v9  ;;  %vm2499_vm3 = vcmp.ge.f32.partialorder %v2262_v42, 0.0  ;;  %vm2500_vm4 = vcmp.ge.f32.partialorder %v2264_v43, 0.0  ;;  %vm2501_vm14 = vcmp.ge.f32.partialorder %v2266_v44, 0.0 }
 0x18f   : > { %v1387_v35 = vsel %vm2499_vm3, %v2262_v42, %v1355_v60  ;;  %v1388_v36 = vsel %vm2500_vm4, %v2264_v43, %v1356_v62  ;;  %v1389_v39 = vsel %vm2501_vm14, %v2266_v44, %v1357_v11  ;;  %1414 = vst [vmem:[%s2290_s8 + $0x90] sm:$0xff] %v1382_v31  ;;  %1415 = vst [vmem:[%s2290_s8 + $0x98] sm:$0xff] %v1383_v28  ;;  %vm2502_vm11 = vcmp.ge.f32.partialorder %v2270_v46, 0.0 }
 0x190   : > { %1416 = vst [vmem:[%s2290_s8 + $0xa0] sm:$0xff] %v1384_v32  ;;  %1417 = vst [vmem:[%s2290_s8 + $0xa8] sm:$0xff] %v1385_v34  ;;  %v1390_v40 = vsel %vm1326_vm0, %v2268_v45, %v1358_v12  ;;  %v1391_v41 = vsel %vm2502_vm11, %v2270_v46, %v1359_v13  ;;  %v1392_v42 = vsel %vm1328_vm12, %v2273_v49, %v1360_v16 }
 0x191   : > { %v1393_v43 = vsel %vm1329_vm9, %v2275_v53, %v1361_v20  ;;  %1418 = vst [vmem:[%s2290_s8 + $0xb0] sm:$0xff] %v1386_v51  ;;  %1419 = vst [vmem:[%s2290_s8 + $0xb8] sm:$0xff] %v1387_v35  ;;  %v1394_v44 = vsel %vm1330_vm1, %v2292_v58, %v1362_v59  ;;  %v1395_v45 = vsel %vm1331_vm13, %v2301_v6, %v1363_v19 }
 0x192   : > { %1420 = vst [vmem:[%s2290_s8 + $0xc0] sm:$0xff] %v1388_v36  ;;  %1421 = vst [vmem:[%s2290_s8 + $0xc8] sm:$0xff] %v1389_v39 }
 0x193   : > { %1422 = vst [vmem:[%s2290_s8 + $0xd0] sm:$0xff] %v1390_v40  ;;  %1423 = vst [vmem:[%s2290_s8 + $0xd8] sm:$0xff] %v1391_v41 }
 0x194   : > { %1424 = vst [vmem:[%s2290_s8 + $0xe0] sm:$0xff] %v1392_v42  ;;  %1425 = vst [vmem:[%s2290_s8 + $0xe8] sm:$0xff] %v1393_v43 }
 0x195   : > { %1426 = vst [vmem:[%s2290_s8 + $0xf0] sm:$0xff] %v1394_v44  ;;  %1427 = vst [vmem:[%s2290_s8 + $0xf8] sm:$0xff] %v1395_v45 }
 0x196 PF: > { %s17_s24 = sadd.s32 1, %s1802_s24  }
 0x197   : > { %p14_p4 = scmp.ge.s32.totalorder %s17_s24, 4  }
 0x199   :  { %16 = sbr.rel (!%p14_p4) target bundleno = 1 (0x1), region = 81 }

</bundles_post_ra>
